<compile_context>
chip_gen: v7x
topology: tpu7x:2x2x1
jax: 0.10.0
libtpu: 0.0.40
codegen_flags: <defaults>
</compile_context>

<pallas_src>
import functools
import math

import jax
import jax.numpy as jnp
from jax import lax
from jax.experimental import pallas as pl
from jax.experimental.pallas import tpu as pltpu

d_model = 768
d_ff = 768 * 4


def _round_up(n, m):
    return ((n + m - 1) // m) * m


def _ffn_kernel(x_ref, w1_ref, b1_ref, w2_ref, b2_ref, o_ref, *, approx_gelu):
    # In-kernel activation cast: x tile arrives as f32 (single HBM read), the
    # bf16 cast for the MXU happens here in VMEM.
    x_bf16 = x_ref[...].astype(jnp.bfloat16)

    # h = gelu(x @ W1 + b1) -- bf16 MXU matmul, f32 accumulation, f32 VPU ops.
    h = jnp.dot(x_bf16, w1_ref[...], preferred_element_type=jnp.float32)
    h = h + b1_ref[...]                       # (1, d_ff) broadcasts over rows

    if approx_gelu:
        # tanh-approx GELU: transcendental goes to the otherwise-idle EUP slot
        # (v6e/v7x). NOT bit-identical to F.gelu's default exact-erf GELU.
        c = jnp.float32(math.sqrt(2.0 / math.pi))
        h = 0.5 * h * (1.0 + jnp.tanh(c * (h + 0.044715 * (h * h * h))))
    else:
        # Exact-erf GELU (matches F.gelu's default).
        inv_sqrt2 = jnp.float32(0.7071067811865476)
        h = 0.5 * h * (1.0 + lax.erf(h * inv_sqrt2))

    # out = h @ W2 + b2 -- bf16 MXU matmul, f32 accumulation.
    out = jnp.dot(h.astype(w2_ref.dtype), w2_ref[...],
                  preferred_element_type=jnp.float32)
    o_ref[...] = (out + b2_ref[...]).astype(o_ref.dtype)


@functools.partial(jax.jit, static_argnames=("tm", "out_dtype", "approx_gelu"))
def poswise_ffn(x, w1, b1, w2, b2, *, tm=256, out_dtype=None, approx_gelu=False):
    """x: (B, S, d_model) -> (B, S, d_model).

    Pass w1 (d_model, d_ff) and w2 (d_ff, d_model) already cast to bf16 (done
    once at init); biases stay f32.
    """
    B, S, D = x.shape
    F = w1.shape[1]
    assert D == d_model and F == d_ff
    assert w2.shape == (F, D)

    if out_dtype is None:
        out_dtype = x.dtype

    M = B * S
    xm = x.reshape(M, D)                      # free: no data movement

    # Effective row tile / minimal padding.
    if M <= tm:
        tm_eff = _round_up(max(M, 8), 8)      # single grid step, sublane-aligned
    else:
        tm_eff = tm
    Mp = _round_up(M, tm_eff)
    if Mp != M:
        xm = jnp.pad(xm, ((0, Mp - M), (0, 0)))

    b1_2d = b1.reshape(1, F).astype(jnp.float32)
    b2_2d = b2.reshape(1, D).astype(jnp.float32)

    # Constant index map => the block never changes; one VMEM buffer suffices.
    resident = dict(pipeline_mode=pl.Buffered(1))

    out = pl.pallas_call(
        functools.partial(_ffn_kernel, approx_gelu=approx_gelu),
        out_shape=jax.ShapeDtypeStruct((Mp, D), out_dtype),
        grid_spec=pltpu.PrefetchScalarGridSpec(
            num_scalar_prefetch=0,
            grid=(Mp // tm_eff,),
            in_specs=[
                pl.BlockSpec((tm_eff, D), lambda i: (i, 0)),          # x row tile (f32)
                pl.BlockSpec((D, F), lambda i: (0, 0), **resident),   # W1 bf16 (resident)
                pl.BlockSpec((1, F), lambda i: (0, 0), **resident),   # b1 (resident)
                pl.BlockSpec((F, D), lambda i: (0, 0), **resident),   # W2 bf16 (resident)
                pl.BlockSpec((1, D), lambda i: (0, 0), **resident),   # b2 (resident)
            ],
            out_specs=pl.BlockSpec((tm_eff, D), lambda i: (i, 0)),
        ),
        compiler_params=pltpu.CompilerParams(
            dimension_semantics=("parallel",),     # megacore: v7x splits row tiles
            vmem_limit_bytes=48 * 1024 * 1024,     # headroom under v7x's 64 MiB
        ),
    )(xm, w1, b1_2d, w2, b2_2d)

    if Mp != M:
        out = out[:M]
    return out.reshape(B, S, D)


def _init_params(key):
    """Deterministic nn.Linear-style init (uniform(-1/sqrt(fan_in), +1/sqrt(fan_in))).

    Weights are stored already transposed relative to PyTorch
    (in_features, out_features) so the kernel computes x @ W directly.
    """
    k1, k2, k3, k4 = jax.random.split(key, 4)
    bound1 = 1.0 / math.sqrt(d_model)
    bound2 = 1.0 / math.sqrt(d_ff)
    w1 = jax.random.uniform(k1, (d_model, d_ff), jnp.float32, -bound1, bound1)
    b1 = jax.random.uniform(k2, (d_ff,), jnp.float32, -bound1, bound1)
    w2 = jax.random.uniform(k3, (d_ff, d_model), jnp.float32, -bound2, bound2)
    b2 = jax.random.uniform(k4, (d_model,), jnp.float32, -bound2, bound2)
    return w1, b1, w2, b2


if __name__ == "__main__":
    key = jax.random.PRNGKey(0)
    kx, kp = jax.random.split(key)

    B, S = 2, 8
    x = jax.random.normal(kx, (B, S, d_model), jnp.float32)
    w1, b1, w2, b2 = _init_params(kp)

    # One-time bf16 weight cast, OUTSIDE the jitted call path -- these are the
    # arrays you'd store / ship and reuse across calls.
    w1_bf16 = w1.astype(jnp.bfloat16)
    w2_bf16 = w2.astype(jnp.bfloat16)
    jax.block_until_ready((w1_bf16, w2_bf16))

    out = poswise_ffn(x, w1_bf16, b1, w2_bf16, b2)
    jax.block_until_ready(out)

    # Reference in plain f32 JAX (exact-erf gelu, matching F.gelu default).
    # Tolerance is relaxed vs. an all-f32 kernel because the matmul operands
    # are bf16 (f32 accumulation).
    h_ref = x @ w1 + b1
    h_ref = 0.5 * h_ref * (1.0 + lax.erf(h_ref / jnp.sqrt(2.0)))
    ref = h_ref @ w2 + b2
    assert out.shape == (B, S, d_model)
    max_err = float(jnp.max(jnp.abs(out - ref)))
    assert jnp.allclose(out, ref, atol=3e-2, rtol=3e-2), max_err

    print("KERNEL_OK")
</pallas_src>

<mosaic_0001>
module attributes {stable_mosaic.version = 11 : i64} {
  func.func @_ffn_kernel(%arg0: i32, %arg1: memref<16x768xf32, #tpu.memory_space<vmem>>, %arg2: memref<768x3072xbf16, #tpu.memory_space<vmem>>, %arg3: memref<1x3072xf32, #tpu.memory_space<vmem>>, %arg4: memref<3072x768xbf16, #tpu.memory_space<vmem>>, %arg5: memref<1x768xf32, #tpu.memory_space<vmem>>, %arg6: memref<16x768xf32, #tpu.memory_space<vmem>>) attributes {dimension_semantics = [#tpu.dimension_semantics<parallel>], iteration_bounds = array<i64: 1>, scalar_prefetch = 0 : i64, scratch_operands = 0 : i64, tpu.core_type = #tpu.core_type<tc>, window_params = [{transform_indices = @transform_0, window_bounds = array<i64: 16, 768>}, {pipeline_mode = #tpu.pipeline_mode<synchronous>, transform_indices = @transform_1, window_bounds = array<i64: 768, 3072>}, {pipeline_mode = #tpu.pipeline_mode<synchronous>, transform_indices = @transform_2, window_bounds = array<i64: 1, 3072>}, {pipeline_mode = #tpu.pipeline_mode<synchronous>, transform_indices = @transform_3, window_bounds = array<i64: 3072, 768>}, {pipeline_mode = #tpu.pipeline_mode<synchronous>, transform_indices = @transform_4, window_bounds = array<i64: 1, 768>}, {transform_indices = @transform_5, window_bounds = array<i64: 16, 768>}]} {
    %c0 = arith.constant 0 : index
    %c0_0 = arith.constant 0 : index
    %0 = vector.load %arg1[%c0, %c0_0] : memref<16x768xf32, #tpu.memory_space<vmem>>, vector<16x768xf32>
    %1 = arith.truncf %0 : vector<16x768xf32> to vector<16x768xbf16>
    %c0_1 = arith.constant 0 : index
    %c0_2 = arith.constant 0 : index
    %2 = vector.load %arg2[%c0_1, %c0_2] : memref<768x3072xbf16, #tpu.memory_space<vmem>>, vector<768x3072xbf16>
    %cst = arith.constant dense<0.000000e+00> : vector<16x3072xf32>
    %3 = tpu.matmul %1, %2, %cst {dimension_numbers = #tpu.dot_dimension_numbers<[1], [0], [0], [1], [0, 0, 1, 1], [], []>} : vector<16x768xbf16>, vector<768x3072xbf16>, vector<16x3072xf32> -> vector<16x3072xf32>
    %c0_3 = arith.constant 0 : index
    %c0_4 = arith.constant 0 : index
    %4 = vector.load %arg3[%c0_3, %c0_4] : memref<1x3072xf32, #tpu.memory_space<vmem>>, vector<1x3072xf32>
    %5 = vector.broadcast %4 : vector<1x3072xf32> to vector<16x3072xf32>
    %6 = arith.addf %3, %5 : vector<16x3072xf32>
    %cst_5 = arith.constant 5.000000e-01 : f32
    %7 = vector.broadcast %cst_5 : f32 to vector<16x3072xf32>
    %8 = arith.mulf %7, %6 : vector<16x3072xf32>
    %cst_6 = arith.constant 0.707106769 : f32
    %9 = vector.broadcast %cst_6 : f32 to vector<16x3072xf32>
    %10 = arith.mulf %6, %9 : vector<16x3072xf32>
    %11 = math.erf %10 : vector<16x3072xf32>
    %cst_7 = arith.constant 1.000000e+00 : f32
    %12 = vector.broadcast %cst_7 : f32 to vector<16x3072xf32>
    %13 = arith.addf %12, %11 : vector<16x3072xf32>
    %14 = arith.mulf %8, %13 : vector<16x3072xf32>
    %15 = arith.truncf %14 : vector<16x3072xf32> to vector<16x3072xbf16>
    %c0_8 = arith.constant 0 : index
    %c0_9 = arith.constant 0 : index
    %16 = vector.load %arg4[%c0_8, %c0_9] : memref<3072x768xbf16, #tpu.memory_space<vmem>>, vector<3072x768xbf16>
    %cst_10 = arith.constant dense<0.000000e+00> : vector<16x768xf32>
    %17 = tpu.matmul %15, %16, %cst_10 {dimension_numbers = #tpu.dot_dimension_numbers<[1], [0], [0], [1], [0, 0, 1, 1], [], []>} : vector<16x3072xbf16>, vector<3072x768xbf16>, vector<16x768xf32> -> vector<16x768xf32>
    %c0_11 = arith.constant 0 : index
    %c0_12 = arith.constant 0 : index
    %18 = vector.load %arg5[%c0_11, %c0_12] : memref<1x768xf32, #tpu.memory_space<vmem>>, vector<1x768xf32>
    %19 = vector.broadcast %18 : vector<1x768xf32> to vector<16x768xf32>
    %20 = arith.addf %17, %19 : vector<16x768xf32>
    %c0_13 = arith.constant 0 : index
    %c0_14 = arith.constant 0 : index
    %21 = vector.load %arg6[%c0_13, %c0_14] : memref<16x768xf32, #tpu.memory_space<vmem>>, vector<16x768xf32>
    tpu.vector_store %arg6[%c0_13, %c0_14], %20 {strides = array<i32>} : memref<16x768xf32, #tpu.memory_space<vmem>>, vector<16x768xf32>,
    return
  }
  func.func @transform_0(%arg0: i32) -> (i32, i32) {
    %c0_i32 = arith.constant 0 : i32
    %c0_i32_0 = arith.constant 0 : i32
    return %arg0, %c0_i32 : i32, i32
  }
  func.func @transform_1(%arg0: i32) -> (i32, i32) {
    %c0_i32 = arith.constant 0 : i32
    %c0_i32_0 = arith.constant 0 : i32
    %c0_i32_1 = arith.constant 0 : i32
    return %c0_i32, %c0_i32_0 : i32, i32
  }
  func.func @transform_2(%arg0: i32) -> (i32, i32) {
    %c0_i32 = arith.constant 0 : i32
    %c0_i32_0 = arith.constant 0 : i32
    %c0_i32_1 = arith.constant 0 : i32
    return %c0_i32, %c0_i32_0 : i32, i32
  }
  func.func @transform_3(%arg0: i32) -> (i32, i32) {
    %c0_i32 = arith.constant 0 : i32
    %c0_i32_0 = arith.constant 0 : i32
    %c0_i32_1 = arith.constant 0 : i32
    return %c0_i32, %c0_i32_0 : i32, i32
  }
  func.func @transform_4(%arg0: i32) -> (i32, i32) {
    %c0_i32 = arith.constant 0 : i32
    %c0_i32_0 = arith.constant 0 : i32
    %c0_i32_1 = arith.constant 0 : i32
    return %c0_i32, %c0_i32_0 : i32, i32
  }
  func.func @transform_5(%arg0: i32) -> (i32, i32) {
    %c0_i32 = arith.constant 0 : i32
    %c0_i32_0 = arith.constant 0 : i32
    return %arg0, %c0_i32 : i32, i32
  }
}

</mosaic_0001>

<bundles_post_ra>
// kernel: poswise_ffn.1
= control target key start
LH: loop header
LB: loop body
LE: loop exit
PB: predicated region body
PF: predicated region fallthrough
CT: control target
= control target key end

     0   :  { %10 = vsyncpa [#allocation3], 0  ;;  %s22574_s0 = inlined_call_operand.hbm [shape: f32[16,768], index: 0, kind: input, shape index: {}]   ;;  %s22575_s1 = inlined_call_operand.hbm [shape: bf16[768,3072], index: 1, kind: input, shape index: {}]   ;;  %s22576_s2 = inlined_call_operand.hbm [shape: f32[1,3072], index: 2, kind: input, shape index: {}]   ;;  %s22577_s3 = inlined_call_operand.hbm [shape: bf16[3072,768], index: 3, kind: input, shape index: {}]   ;;  %s22578_s4 = inlined_call_operand.vmem [shape: f32[1,768], index: 4, kind: input, shape index: {}]   ;;  %s22579_s5 = inlined_call_operand.hbm [shape: f32[16,768], index: 5, kind: output, shape index: {}]  }
   0x1   :  { %11 = vsyncpa [#allocation6], 0 }
   0x2   :  { %12 = vsyncpa [#allocation9], 0 }
   0x3   :  { %13 = vsyncpa [#allocation4], 0  ;;  %s22018_s18 = smov [#allocation5]   ;;  %s21900_s22 = scalar_lea.hbm %s22575_s1, 147456 }
   0x4   :  { %s31_s19 = sshll.u32 %s22018_s18, 4  ;;  %p21901_p0 = scmp.ne.s32.totalorder %s22575_s1, %s21900_s22  ;;  %s32_s19 = int_to_ptr.vmem [resolvable:$true] %s31_s19 }
   0x5   :  { %p21904_p1 = scmp.lt.u32.totalorder %s21900_s22, %s22575_s1 }
   0x7   :  { %p21906_p2 = pnand %p21904_p1, %p21901_p0 }
   0x9   :  { %21909 = shalt.err (!%p21906_p2)
}
   0xa   :  { %s21910_s27 = scalar_lea.vmem %s32_s19, 147456  ;;  %p21915_p4 = scmp.lt.s32.totalorder %s32_s19, %s32_s19 }
   0xb   :  { %p21911_p3 = scmp.ne.s32.totalorder %s32_s19, %s21910_s27  ;;  %p21916_p5 = scmp.lt.s32.totalorder %s21910_s27, %s21910_s27 }
   0xd   :  { %p21917_p6 = por %p21916_p5, %p21915_p4 }
   0xf   :  { %p21918_p7 = pnand %p21917_p6, %p21911_p3 }
  0x11   :  { %21921 = shalt.err (!%p21918_p7)
}
  0x12   :  { %s22019_s28 = smov 1536   ;;  %s22020_s29 = smov 96  }
  0x13   :  { %37 = dma.hbm_to_vmem [thread:$0]  %s22575_s1, 147456, %s32_s19, [#allocation6], %s22019_s28, %s22019_s28, %s22020_s29  }
  0x14   :  { %s22021_s7 = smov [#allocation2]   ;;  %s21922_s11 = scalar_lea.hbm %s22574_s0, 1536 }
  0x15   :  { %s19_s8 = sshll.u32 %s22021_s7, 4  ;;  %p21923_p8 = scmp.ne.s32.totalorder %s22574_s0, %s21922_s11  ;;  %s20_s8 = int_to_ptr.vmem [resolvable:$true] %s19_s8 }
  0x16   :  { %p21926_p9 = scmp.lt.u32.totalorder %s21922_s11, %s22574_s0 }
  0x18   :  { %p21928_p10 = pnand %p21926_p9, %p21923_p8 }
  0x1a   :  { %21931 = shalt.err (!%p21928_p10)
}
  0x1b   :  { %s21932_s16 = scalar_lea.vmem %s20_s8, 1536  ;;  %p21937_p12 = scmp.lt.s32.totalorder %s20_s8, %s20_s8 }
  0x1c   :  { %p21933_p11 = scmp.ne.s32.totalorder %s20_s8, %s21932_s16  ;;  %p21938_p13 = scmp.lt.s32.totalorder %s21932_s16, %s21932_s16 }
  0x1e   :  { %p21939_p0 = por %p21938_p13, %p21937_p12 }
  0x20   :  { %p21940_p1 = pnand %p21939_p0, %p21933_p11 }
  0x22   :  { %21943 = shalt.err (!%p21940_p1)
}
  0x23   :  { %s22022_s1 = smov 768   ;;  %s22023_s17 = smov 48  }
  0x24   :  { %25 = dma.hbm_to_vmem [thread:$0]  %s22574_s0, 1536, %s20_s8, [#allocation3], %s22022_s1, %s22022_s1, %s22023_s17  }
  0x25   :  { %s22024_s20 = smov [#allocation7]   ;;  %s22025_s22 = smov [#allocation8]  }
  0x26   :  { %s44_s21 = sshll.u32 %s22024_s20, 4  ;;  %s53_s23 = sshll.u32 %s22025_s22, 4  ;;  %s45_s21 = int_to_ptr.vmem [resolvable:$true] %s44_s21  ;;  %s22086_s23 = int_to_ptr.vmem [resolvable:$true] %s53_s23 }
  0x27   :  { %s21944_s26 = scalar_lea.hbm %s22576_s2, 384 }
  0x28   :  { %p21945_p2 = scmp.ne.s32.totalorder %s22576_s2, %s21944_s26  ;;  %p21948_p3 = scmp.lt.u32.totalorder %s21944_s26, %s22576_s2 }
  0x2a   :  { %p21950_p4 = pnand %p21948_p3, %p21945_p2 }
  0x2c   :  { %21953 = shalt.err (!%p21950_p4)
}
  0x2d   :  { %s21954_s0 = scalar_lea.vmem %s45_s21, 384  ;;  %p21959_p6 = scmp.lt.s32.totalorder %s45_s21, %s45_s21 }
  0x2e   :  { %p21955_p5 = scmp.ne.s32.totalorder %s45_s21, %s21954_s0  ;;  %p21960_p7 = scmp.lt.s32.totalorder %s21954_s0, %s21954_s0 }
  0x30   :  { %p21961_p8 = por %p21960_p7, %p21959_p6 }
  0x32   :  { %p21962_p9 = pnand %p21961_p8, %p21955_p5 }
  0x34   :  { %21965 = shalt.err (!%p21962_p9)
}
  0x35   :  { %47 = dma.hbm_to_vmem [thread:$0]  %s22576_s2, 384, %s45_s21, [#allocation6]  }
  0x36   :  { %s21966_s10 = scalar_lea.hbm %s22577_s3, 147456 }
  0x37   :  { %p21967_p10 = scmp.ne.s32.totalorder %s22577_s3, %s21966_s10  ;;  %p21970_p11 = scmp.lt.u32.totalorder %s21966_s10, %s22577_s3 }
  0x39   :  { %p21972_p12 = pnand %p21970_p11, %p21967_p10 }
  0x3b   :  { %21975 = shalt.err (!%p21972_p12)
}
  0x3c   :  { %s21976_s15 = scalar_lea.vmem %s22086_s23, 147456  ;;  %p21981_p0 = scmp.lt.s32.totalorder %s22086_s23, %s22086_s23 }
  0x3d   :  { %p21977_p13 = scmp.ne.s32.totalorder %s22086_s23, %s21976_s15  ;;  %p21982_p1 = scmp.lt.s32.totalorder %s21976_s15, %s21976_s15 }
  0x3f   :  { %p21983_p2 = por %p21982_p1, %p21981_p0 }
  0x41   :  { %p21984_p3 = pnand %p21983_p2, %p21977_p13 }
  0x43   :  { %21987 = shalt.err (!%p21984_p3)
}
  0x44   :  { %s22026_s2 = smov 384   ;;  %s22027_s16 = smov 24  }
  0x45   :  { %59 = dma.hbm_to_vmem [thread:$0]  %s22577_s3, 147456, %s22086_s23, [#allocation9], %s22026_s2, %s22026_s2, %s22027_s16  }
  0x46   :  { %22010 = dma.done.wait [#allocation3], 1536  }
  0x47   :  { %22011 = vsyncadd [#allocation3], 4294965760 }
  0x48   :  { %22012 = dma.done.wait [#allocation6], 147840  }
  0x49   :  { %22013 = vsyncadd [#allocation6], 4294819456 }
  0x4a   :  { %22014 = dma.done.wait [#allocation9], 147456  }
  0x4b   :  { %22015 = vsyncadd [#allocation9], 4294819840  ;;  %v92_v0 = vld [vmem:[#allocation5] sm:$0xff]  ;;  %v75_v53 = vld [vmem:[#allocation2 + $0x8] sm:$0xff] }
  0x4c   :  { %v104_v1 = vld [vmem:[#allocation5 + $0x60] sm:$0xff]  ;;  %v81_v54 = vld [vmem:[#allocation2 + $0x38] sm:$0xff] }
  0x4d   :  { %v96_v2 = vld [vmem:[#allocation5 + $0x20] sm:$0xff]  ;;  %v17466_v3 = vcombine.high %v92_v0, %v104_v1  ;;  %v17465_v5 = vcombine.low %v92_v0, %v104_v1  ;;  %v22117_v58 = vpack.c.bf16 %v81_v54, %v75_v53 }
  0x4e   :  { %v108_v4 = vld [vmem:[#allocation5 + $0x80] sm:$0xff] }
  0x4f   :  { %v116_v6 = vld [vmem:[#allocation5 + $0xc0] sm:$0xff]  ;;  %v17474_v8 = vcombine.high %v96_v2, %v108_v4  ;;  %v17473_v9 = vcombine.low %v96_v2, %v108_v4  ;;  %7130 = vmatprep.subr.bf16.mxu1 %v17466_v3  ;;  %7162 = vmatprep.mubr.bf16.mxu1 %v22117_v58 }
  0x50   :  { %v128_v7 = vld [vmem:[#allocation5 + $0x120] sm:$0xff]  ;;  %7131 = vmatpush1.bf16.msra.mxu1 %v17465_v5  ;;  %7678 = vmatprep.mubr.bf16.mxu0 %v22117_v58 }
  0x51   :  { %v17490_v10 = vcombine.high %v116_v6, %v128_v7  ;;  %v120_v11 = vld [vmem:[#allocation5 + $0xe0] sm:$0xff]  ;;  %7646 = vmatprep.subr.bf16.mxu0 %v17474_v8  ;;  %v17489_v18 = vcombine.low %v116_v6, %v128_v7 }
  0x52   :  { %v132_v12 = vld [vmem:[#allocation5 + $0x140] sm:$0xff]  ;;  %7647 = vmatpush1.bf16.msra.mxu0 %v17473_v9 }
  0x53   :  { %v140_v13 = vld [vmem:[#allocation5 + $0x180] sm:$0xff]  ;;  %v17498_v14 = vcombine.high %v120_v11, %v132_v12  ;;  %7132 = vmatprep.subr.bf16.mxu1 %v17490_v10  ;;  %v17497_v19 = vcombine.low %v120_v11, %v132_v12 }
  0x54   :  { %v152_v15 = vld [vmem:[#allocation5 + $0x1e0] sm:$0xff]  ;;  %7133 = vmatpush1.bf16.msra.mxu1 %v17489_v18 }
  0x55   :  { %v144_v16 = vld [vmem:[#allocation5 + $0x1a0] sm:$0xff]  ;;  %v17514_v20 = vcombine.high %v140_v13, %v152_v15  ;;  %7648 = vmatprep.subr.bf16.mxu0 %v17498_v14  ;;  %v17513_v26 = vcombine.low %v140_v13, %v152_v15 }
  0x56   :  { %v156_v17 = vld [vmem:[#allocation5 + $0x200] sm:$0xff]  ;;  %7649 = vmatpush1.bf16.msra.mxu0 %v17497_v19 }
  0x57   :  { %v17522_v21 = vcombine.high %v144_v16, %v156_v17  ;;  %v164_v22 = vld [vmem:[#allocation5 + $0x240] sm:$0xff]  ;;  %7134 = vmatprep.subr.bf16.mxu1 %v17514_v20  ;;  %v17521_v27 = vcombine.low %v144_v16, %v156_v17 }
  0x58   :  { %v176_v23 = vld [vmem:[#allocation5 + $0x2a0] sm:$0xff]  ;;  %7135 = vmatpush1.bf16.msra.mxu1 %v17513_v26 }
  0x59   :  { %v168_v24 = vld [vmem:[#allocation5 + $0x260] sm:$0xff]  ;;  %v17538_v28 = vcombine.high %v164_v22, %v176_v23  ;;  %7650 = vmatprep.subr.bf16.mxu0 %v17522_v21  ;;  %v17537_v34 = vcombine.low %v164_v22, %v176_v23 }
  0x5a   :  { %v180_v25 = vld [vmem:[#allocation5 + $0x2c0] sm:$0xff]  ;;  %7651 = vmatpush1.bf16.msra.mxu0 %v17521_v27 }
  0x5b   :  { %v17546_v29 = vcombine.high %v168_v24, %v180_v25  ;;  %v188_v30 = vld [vmem:[#allocation5 + $0x300] sm:$0xff]  ;;  %7136 = vmatprep.subr.bf16.mxu1 %v17538_v28  ;;  %v17545_v35 = vcombine.low %v168_v24, %v180_v25 }
  0x5c   :  { %v200_v31 = vld [vmem:[#allocation5 + $0x360] sm:$0xff]  ;;  %7137 = vmatpush1.bf16.msra.mxu1 %v17537_v34 }
  0x5d   :  { %v192_v32 = vld [vmem:[#allocation5 + $0x320] sm:$0xff]  ;;  %v17562_v36 = vcombine.high %v188_v30, %v200_v31  ;;  %7652 = vmatprep.subr.bf16.mxu0 %v17546_v29  ;;  %v17561_v42 = vcombine.low %v188_v30, %v200_v31 }
  0x5e   :  { %v204_v33 = vld [vmem:[#allocation5 + $0x380] sm:$0xff]  ;;  %7653 = vmatpush1.bf16.msra.mxu0 %v17545_v35 }
  0x5f   :  { %v17570_v37 = vcombine.high %v192_v32, %v204_v33  ;;  %v212_v38 = vld [vmem:[#allocation5 + $0x3c0] sm:$0xff]  ;;  %7138 = vmatprep.subr.bf16.mxu1 %v17562_v36  ;;  %v17569_v43 = vcombine.low %v192_v32, %v204_v33 }
  0x60   :  { %v224_v39 = vld [vmem:[#allocation5 + $0x420] sm:$0xff]  ;;  %7139 = vmatpush1.bf16.msra.mxu1 %v17561_v42 }
  0x61   :  { %v216_v40 = vld [vmem:[#allocation5 + $0x3e0] sm:$0xff]  ;;  %v17586_v44 = vcombine.high %v212_v38, %v224_v39  ;;  %7654 = vmatprep.subr.bf16.mxu0 %v17570_v37  ;;  %v17585_v50 = vcombine.low %v212_v38, %v224_v39 }
  0x62   :  { %v228_v41 = vld [vmem:[#allocation5 + $0x440] sm:$0xff]  ;;  %7655 = vmatpush1.bf16.msra.mxu0 %v17569_v43 }
  0x63   :  { %v17594_v45 = vcombine.high %v216_v40, %v228_v41  ;;  %v236_v46 = vld [vmem:[#allocation5 + $0x480] sm:$0xff]  ;;  %7140 = vmatprep.subr.bf16.mxu1 %v17586_v44  ;;  %v17593_v51 = vcombine.low %v216_v40, %v228_v41 }
  0x64   :  { %v248_v47 = vld [vmem:[#allocation5 + $0x4e0] sm:$0xff]  ;;  %7141 = vmatpush1.bf16.msra.mxu1 %v17585_v50 }
  0x65   :  { %v240_v48 = vld [vmem:[#allocation5 + $0x4a0] sm:$0xff]  ;;  %v17610_v52 = vcombine.high %v236_v46, %v248_v47  ;;  %7656 = vmatprep.subr.bf16.mxu0 %v17594_v45  ;;  %v17609_v61 = vcombine.low %v236_v46, %v248_v47 }
  0x66   :  { %v252_v49 = vld [vmem:[#allocation5 + $0x500] sm:$0xff]  ;;  %7657 = vmatpush1.bf16.msra.mxu0 %v17593_v51 }
  0x67   :  { %v17618_v55 = vcombine.high %v240_v48, %v252_v49  ;;  %v260_v56 = vld [vmem:[#allocation5 + $0x540] sm:$0xff]  ;;  %7142 = vmatprep.subr.bf16.mxu1 %v17610_v52  ;;  %v17617_v62 = vcombine.low %v240_v48, %v252_v49 }
  0x68   :  { %v272_v57 = vld [vmem:[#allocation5 + $0x5a0] sm:$0xff]  ;;  %7143 = vmatpush1.bf16.msra.mxu1 %v17609_v61 }
  0x69   :  { %v264_v59 = vld [vmem:[#allocation5 + $0x560] sm:$0xff]  ;;  %v17634_v63 = vcombine.high %v260_v56, %v272_v57  ;;  %7658 = vmatprep.subr.bf16.mxu0 %v17618_v55  ;;  %v17633_v5 = vcombine.low %v260_v56, %v272_v57 }
  0x6a   :  { %v276_v60 = vld [vmem:[#allocation5 + $0x5c0] sm:$0xff]  ;;  %7659 = vmatpush1.bf16.msra.mxu0 %v17617_v62 }
  0x6b   :  { %v17642_v0 = vcombine.high %v264_v59, %v276_v60  ;;  %v284_v1 = vld [vmem:[#allocation5 + $0x600] sm:$0xff]  ;;  %7144 = vmatprep.subr.bf16.mxu1 %v17634_v63  ;;  %v17641_v6 = vcombine.low %v264_v59, %v276_v60 }
  0x6c   :  { %v296_v2 = vld [vmem:[#allocation5 + $0x660] sm:$0xff]  ;;  %7145 = vmatpush1.bf16.msra.mxu1 %v17633_v5 }
  0x6d   :  { %v288_v3 = vld [vmem:[#allocation5 + $0x620] sm:$0xff]  ;;  %v17658_v7 = vcombine.high %v284_v1, %v296_v2  ;;  %7660 = vmatprep.subr.bf16.mxu0 %v17642_v0  ;;  %v17657_v13 = vcombine.low %v284_v1, %v296_v2 }
  0x6e   :  { %v300_v4 = vld [vmem:[#allocation5 + $0x680] sm:$0xff]  ;;  %7661 = vmatpush1.bf16.msra.mxu0 %v17641_v6 }
  0x6f   :  { %v17666_v8 = vcombine.high %v288_v3, %v300_v4  ;;  %v308_v9 = vld [vmem:[#allocation5 + $0x6c0] sm:$0xff]  ;;  %7146 = vmatprep.subr.bf16.mxu1 %v17658_v7  ;;  %v17665_v14 = vcombine.low %v288_v3, %v300_v4 }
  0x70   :  { %v320_v10 = vld [vmem:[#allocation5 + $0x720] sm:$0xff]  ;;  %7147 = vmatpush1.bf16.msra.mxu1 %v17657_v13 }
  0x71   :  { %v312_v11 = vld [vmem:[#allocation5 + $0x6e0] sm:$0xff]  ;;  %v17682_v15 = vcombine.high %v308_v9, %v320_v10  ;;  %7662 = vmatprep.subr.bf16.mxu0 %v17666_v8  ;;  %v17681_v21 = vcombine.low %v308_v9, %v320_v10  ;;  %v80_v8 = vld [vmem:[#allocation2 + $0x30] sm:$0xff] }
  0x72   :  { %v324_v12 = vld [vmem:[#allocation5 + $0x740] sm:$0xff]  ;;  %7663 = vmatpush1.bf16.msra.mxu0 %v17665_v14 }
  0x73   :  { %v17690_v16 = vcombine.high %v312_v11, %v324_v12  ;;  %v332_v17 = vld [vmem:[#allocation5 + $0x780] sm:$0xff]  ;;  %7148 = vmatprep.subr.bf16.mxu1 %v17682_v15  ;;  %v17689_v22 = vcombine.low %v312_v11, %v324_v12 }
  0x74   :  { %v344_v18 = vld [vmem:[#allocation5 + $0x7e0] sm:$0xff]  ;;  %7149 = vmatpush1.bf16.msra.mxu1 %v17681_v21 }
  0x75   :  { %v336_v19 = vld [vmem:[#allocation5 + $0x7a0] sm:$0xff]  ;;  %v17706_v23 = vcombine.high %v332_v17, %v344_v18  ;;  %7664 = vmatprep.subr.bf16.mxu0 %v17690_v16  ;;  %v17705_v29 = vcombine.low %v332_v17, %v344_v18  ;;  %v77_v17 = vld [vmem:[#allocation2 + $0x18] sm:$0xff]  ;;  %v83_v18 = vld [vmem:[#allocation2 + $0x48] sm:$0xff] }
  0x76   :  { %v348_v20 = vld [vmem:[#allocation5 + $0x800] sm:$0xff]  ;;  %7665 = vmatpush1.bf16.msra.mxu0 %v17689_v22 }
  0x77   :  { %v17714_v24 = vcombine.high %v336_v19, %v348_v20  ;;  %v356_v25 = vld [vmem:[#allocation5 + $0x840] sm:$0xff]  ;;  %7150 = vmatprep.subr.bf16.mxu1 %v17706_v23  ;;  %v17713_v30 = vcombine.low %v336_v19, %v348_v20 }
  0x78   :  { %v368_v26 = vld [vmem:[#allocation5 + $0x8a0] sm:$0xff]  ;;  %7151 = vmatpush1.bf16.msra.mxu1 %v17705_v29 }
  0x79   :  { %v360_v27 = vld [vmem:[#allocation5 + $0x860] sm:$0xff]  ;;  %v17730_v31 = vcombine.high %v356_v25, %v368_v26  ;;  %7666 = vmatprep.subr.bf16.mxu0 %v17714_v24  ;;  %v17729_v37 = vcombine.low %v356_v25, %v368_v26  ;;  %v22123_v25 = vpack.c.bf16 %v83_v18, %v77_v17 }
  0x7a   :  { %v372_v28 = vld [vmem:[#allocation5 + $0x8c0] sm:$0xff]  ;;  %7667 = vmatpush1.bf16.msra.mxu0 %v17713_v30 }
  0x7b   :  { %v17738_v32 = vcombine.high %v360_v27, %v372_v28  ;;  %v380_v33 = vld [vmem:[#allocation5 + $0x900] sm:$0xff]  ;;  %7152 = vmatprep.subr.bf16.mxu1 %v17730_v31  ;;  %v17737_v38 = vcombine.low %v360_v27, %v372_v28 }
  0x7c   :  { %v392_v34 = vld [vmem:[#allocation5 + $0x960] sm:$0xff]  ;;  %7153 = vmatpush1.bf16.msra.mxu1 %v17729_v37 }
  0x7d   :  { %v384_v35 = vld [vmem:[#allocation5 + $0x920] sm:$0xff]  ;;  %v17754_v39 = vcombine.high %v380_v33, %v392_v34  ;;  %7668 = vmatprep.subr.bf16.mxu0 %v17738_v32  ;;  %v17753_v45 = vcombine.low %v380_v33, %v392_v34 }
  0x7e   :  { %v396_v36 = vld [vmem:[#allocation5 + $0x980] sm:$0xff]  ;;  %7669 = vmatpush1.bf16.msra.mxu0 %v17737_v38 }
  0x7f   :  { %v17762_v40 = vcombine.high %v384_v35, %v396_v36  ;;  %v404_v41 = vld [vmem:[#allocation5 + $0x9c0] sm:$0xff]  ;;  %7154 = vmatprep.subr.bf16.mxu1 %v17754_v39  ;;  %v17761_v46 = vcombine.low %v384_v35, %v396_v36 }
  0x80   :  { %v416_v42 = vld [vmem:[#allocation5 + $0xa20] sm:$0xff]  ;;  %7155 = vmatpush1.bf16.msra.mxu1 %v17753_v45 }
  0x81   :  { %v408_v43 = vld [vmem:[#allocation5 + $0x9e0] sm:$0xff]  ;;  %v17778_v47 = vcombine.high %v404_v41, %v416_v42  ;;  %7670 = vmatprep.subr.bf16.mxu0 %v17762_v40  ;;  %v17777_v53 = vcombine.low %v404_v41, %v416_v42 }
  0x82   :  { %v420_v44 = vld [vmem:[#allocation5 + $0xa40] sm:$0xff]  ;;  %7671 = vmatpush1.bf16.msra.mxu0 %v17761_v46 }
  0x83   :  { %v17786_v48 = vcombine.high %v408_v43, %v420_v44  ;;  %v428_v49 = vld [vmem:[#allocation5 + $0xa80] sm:$0xff]  ;;  %7156 = vmatprep.subr.bf16.mxu1 %v17778_v47  ;;  %v17785_v54 = vcombine.low %v408_v43, %v420_v44 }
  0x84   :  { %v440_v50 = vld [vmem:[#allocation5 + $0xae0] sm:$0xff]  ;;  %7157 = vmatpush1.bf16.msra.mxu1 %v17777_v53 }
  0x85   :  { %v432_v51 = vld [vmem:[#allocation5 + $0xaa0] sm:$0xff]  ;;  %v17802_v55 = vcombine.high %v428_v49, %v440_v50  ;;  %7672 = vmatprep.subr.bf16.mxu0 %v17786_v48  ;;  %v17801_v62 = vcombine.low %v428_v49, %v440_v50 }
  0x86   :  { %v444_v52 = vld [vmem:[#allocation5 + $0xb00] sm:$0xff]  ;;  %7673 = vmatpush1.bf16.msra.mxu0 %v17785_v54 }
  0x87   :  { %v17810_v56 = vcombine.high %v432_v51, %v444_v52  ;;  %v452_v57 = vld [vmem:[#allocation5 + $0xb40] sm:$0xff]  ;;  %7158 = vmatprep.subr.bf16.mxu1 %v17802_v55  ;;  %v17809_v63 = vcombine.low %v432_v51, %v444_v52 }
  0x88   :  { %v464_v59 = vld [vmem:[#allocation5 + $0xba0] sm:$0xff]  ;;  %7159 = vmatpush1.bf16.msra.mxu1 %v17801_v62 }
  0x89   :  { %v456_v60 = vld [vmem:[#allocation5 + $0xb60] sm:$0xff]  ;;  %v17826_v0 = vcombine.high %v452_v57, %v464_v59  ;;  %7674 = vmatprep.subr.bf16.mxu0 %v17810_v56  ;;  %v17825_v6 = vcombine.low %v452_v57, %v464_v59 }
  0x8a   :  { %v468_v61 = vld [vmem:[#allocation5 + $0xbc0] sm:$0xff]  ;;  %7675 = vmatpush1.bf16.msra.mxu0 %v17809_v63 }
  0x8b   :  { %v17834_v1 = vcombine.high %v456_v60, %v468_v61  ;;  %v476_v2 = vld [vmem:[#allocation5 + $0xc00] sm:$0xff]  ;;  %7160 = vmatprep.subr.bf16.mxu1 %v17826_v0  ;;  %v17833_v9 = vcombine.low %v456_v60, %v468_v61 }
  0x8c   :  { %v488_v3 = vld [vmem:[#allocation5 + $0xc60] sm:$0xff]  ;;  %7161 = vmatpush1.bf16.msra.mxu1 %v17825_v6 }
  0x8d   :  { %v480_v4 = vld [vmem:[#allocation5 + $0xc20] sm:$0xff]  ;;  %v17850_v10 = vcombine.high %v476_v2, %v488_v3  ;;  %7676 = vmatprep.subr.bf16.mxu0 %v17834_v1  ;;  %v17849_v19 = vcombine.low %v476_v2, %v488_v3 }
  0x8e   :  { %v492_v5 = vld [vmem:[#allocation5 + $0xc80] sm:$0xff]  ;;  %7677 = vmatpush1.bf16.msra.mxu0 %v17833_v9 }
  0x8f   :  { %v74_v7 = vld [vmem:[#allocation2] sm:$0xff]  ;;  %v17858_v11 = vcombine.high %v480_v4, %v492_v5  ;;  %7173 = vmatprep.subr.bf16.mxu1 %v17850_v10  ;;  %v17857_v20 = vcombine.low %v480_v4, %v492_v5 }
  0x90   :  { %v500_v12 = vld [vmem:[#allocation5 + $0xcc0] sm:$0xff]  ;;  %v22121_v15 = vpack.c.bf16 %v80_v8, %v74_v7 }
  0x91   :  { %v512_v13 = vld [vmem:[#allocation5 + $0xd20] sm:$0xff]  ;;  %7689 = vmatprep.subr.bf16.mxu0 %v17858_v11 }
  0x92   :  { %v504_v14 = vld [vmem:[#allocation5 + $0xce0] sm:$0xff]  ;;  %v17874_v21 = vcombine.high %v500_v12, %v512_v13  ;;  %7163 = vmatmul.mubr.bf16.vlgmr.msra.gmra.mrb[0].mxu1 %v22121_v15  ;;  %7679 = vmatmul.mubr.bf16.vlgmr.msra.gmra.mrb[0].mxu0 %v22121_v15  ;;  %v17873_v28 = vcombine.low %v500_v12, %v512_v13 }
  0x93   :  { %v516_v16 = vld [vmem:[#allocation5 + $0xd40] sm:$0xff]  ;;  %7174 = vmatpush1.bf16.msra.mxu1 %v17849_v19  ;;  %7690 = vmatpush1.bf16.msra.mxu0 %v17857_v20 }
  0x94   :  { %v17882_v22 = vcombine.high %v504_v14, %v516_v16  ;;  %v524_v23 = vld [vmem:[#allocation5 + $0xd80] sm:$0xff]  ;;  %7175 = vmatprep.subr.bf16.mxu1 %v17874_v21  ;;  %v17881_v29 = vcombine.low %v504_v14, %v516_v16  ;;  %7205 = vmatprep.mubr.bf16.mxu1 %v22123_v25 }
  0x95   :  { %v536_v24 = vld [vmem:[#allocation5 + $0xde0] sm:$0xff]  ;;  %7721 = vmatprep.mubr.bf16.mxu0 %v22123_v25 }
  0x96   :  { %v528_v26 = vld [vmem:[#allocation5 + $0xda0] sm:$0xff]  ;;  %v17898_v30 = vcombine.high %v524_v23, %v536_v24  ;;  %7691 = vmatprep.subr.bf16.mxu0 %v17882_v22  ;;  %v17897_v36 = vcombine.low %v524_v23, %v536_v24 }
  0x97   :  { %v540_v27 = vld [vmem:[#allocation5 + $0xe00] sm:$0xff]  ;;  %7176 = vmatpush1.bf16.msra.mxu1 %v17873_v28  ;;  %7692 = vmatpush1.bf16.msra.mxu0 %v17881_v29 }
  0x98   :  { %v548_v31 = vld [vmem:[#allocation5 + $0xe40] sm:$0xff]  ;;  %v17906_v33 = vcombine.high %v528_v26, %v540_v27  ;;  %7177 = vmatprep.subr.bf16.mxu1 %v17898_v30  ;;  %v17905_v37 = vcombine.low %v528_v26, %v540_v27 }
  0x99   :  { %v560_v32 = vld [vmem:[#allocation5 + $0xea0] sm:$0xff] }
  0x9a   :  { %v552_v34 = vld [vmem:[#allocation5 + $0xe60] sm:$0xff]  ;;  %v17922_v38 = vcombine.high %v548_v31, %v560_v32  ;;  %7693 = vmatprep.subr.bf16.mxu0 %v17906_v33  ;;  %v17921_v44 = vcombine.low %v548_v31, %v560_v32 }
  0x9b   :  { %v564_v35 = vld [vmem:[#allocation5 + $0xec0] sm:$0xff]  ;;  %7178 = vmatpush1.bf16.msra.mxu1 %v17897_v36  ;;  %7694 = vmatpush1.bf16.msra.mxu0 %v17905_v37 }
  0x9c   :  { %v572_v39 = vld [vmem:[#allocation5 + $0xf00] sm:$0xff]  ;;  %v17930_v42 = vcombine.high %v552_v34, %v564_v35  ;;  %7179 = vmatprep.subr.bf16.mxu1 %v17922_v38  ;;  %v17929_v45 = vcombine.low %v552_v34, %v564_v35 }
  0x9d   :  { %v584_v40 = vld [vmem:[#allocation5 + $0xf60] sm:$0xff] }
  0x9e   :  { %v576_v41 = vld [vmem:[#allocation5 + $0xf20] sm:$0xff]  ;;  %v17946_v46 = vcombine.high %v572_v39, %v584_v40  ;;  %7695 = vmatprep.subr.bf16.mxu0 %v17930_v42  ;;  %v17945_v52 = vcombine.low %v572_v39, %v584_v40 }
  0x9f   :  { %v588_v43 = vld [vmem:[#allocation5 + $0xf80] sm:$0xff]  ;;  %7180 = vmatpush1.bf16.msra.mxu1 %v17921_v44  ;;  %7696 = vmatpush1.bf16.msra.mxu0 %v17929_v45 }
  0xa0   :  { %v596_v47 = vld [vmem:[#allocation5 + $0xfc0] sm:$0xff]  ;;  %v17954_v50 = vcombine.high %v576_v41, %v588_v43  ;;  %7181 = vmatprep.subr.bf16.mxu1 %v17946_v46  ;;  %v17953_v53 = vcombine.low %v576_v41, %v588_v43 }
  0xa1   :  { %v608_v48 = vld [vmem:[#allocation5 + $0x1020] sm:$0xff] }
  0xa2   :  { %v600_v49 = vld [vmem:[#allocation5 + $0xfe0] sm:$0xff]  ;;  %v17970_v54 = vcombine.high %v596_v47, %v608_v48  ;;  %7697 = vmatprep.subr.bf16.mxu0 %v17954_v50  ;;  %v17969_v61 = vcombine.low %v596_v47, %v608_v48 }
  0xa3   :  { %v612_v51 = vld [vmem:[#allocation5 + $0x1040] sm:$0xff]  ;;  %7182 = vmatpush1.bf16.msra.mxu1 %v17945_v52  ;;  %7698 = vmatpush1.bf16.msra.mxu0 %v17953_v53 }
  0xa4   :  { %v620_v55 = vld [vmem:[#allocation5 + $0x1080] sm:$0xff]  ;;  %v17978_v59 = vcombine.high %v600_v49, %v612_v51  ;;  %7183 = vmatprep.subr.bf16.mxu1 %v17970_v54  ;;  %v17977_v62 = vcombine.low %v600_v49, %v612_v51 }
  0xa5   :  { %v632_v56 = vld [vmem:[#allocation5 + $0x10e0] sm:$0xff] }
  0xa6   :  { %v624_v57 = vld [vmem:[#allocation5 + $0x10a0] sm:$0xff]  ;;  %v17994_v63 = vcombine.high %v620_v55, %v632_v56  ;;  %7699 = vmatprep.subr.bf16.mxu0 %v17978_v59  ;;  %v17993_v5 = vcombine.low %v620_v55, %v632_v56 }
  0xa7   :  { %v636_v60 = vld [vmem:[#allocation5 + $0x1100] sm:$0xff]  ;;  %7184 = vmatpush1.bf16.msra.mxu1 %v17969_v61  ;;  %7700 = vmatpush1.bf16.msra.mxu0 %v17977_v62 }
  0xa8   :  { %v644_v0 = vld [vmem:[#allocation5 + $0x1140] sm:$0xff]  ;;  %v18002_v3 = vcombine.high %v624_v57, %v636_v60  ;;  %7185 = vmatprep.subr.bf16.mxu1 %v17994_v63  ;;  %v18001_v6 = vcombine.low %v624_v57, %v636_v60 }
  0xa9   :  { %v656_v1 = vld [vmem:[#allocation5 + $0x11a0] sm:$0xff] }
  0xaa   :  { %v648_v2 = vld [vmem:[#allocation5 + $0x1160] sm:$0xff]  ;;  %v18018_v7 = vcombine.high %v644_v0, %v656_v1  ;;  %7701 = vmatprep.subr.bf16.mxu0 %v18002_v3  ;;  %v18017_v13 = vcombine.low %v644_v0, %v656_v1 }
  0xab   :  { %v660_v4 = vld [vmem:[#allocation5 + $0x11c0] sm:$0xff]  ;;  %7186 = vmatpush1.bf16.msra.mxu1 %v17993_v5  ;;  %7702 = vmatpush1.bf16.msra.mxu0 %v18001_v6 }
  0xac   :  { %v668_v8 = vld [vmem:[#allocation5 + $0x1200] sm:$0xff]  ;;  %v18026_v11 = vcombine.high %v648_v2, %v660_v4  ;;  %7187 = vmatprep.subr.bf16.mxu1 %v18018_v7  ;;  %v18025_v14 = vcombine.low %v648_v2, %v660_v4 }
  0xad   :  { %v680_v9 = vld [vmem:[#allocation5 + $0x1260] sm:$0xff] }
  0xae   :  { %v672_v10 = vld [vmem:[#allocation5 + $0x1220] sm:$0xff]  ;;  %v18042_v16 = vcombine.high %v668_v8, %v680_v9  ;;  %7703 = vmatprep.subr.bf16.mxu0 %v18026_v11  ;;  %v18041_v22 = vcombine.low %v668_v8, %v680_v9 }
  0xaf   :  { %v684_v12 = vld [vmem:[#allocation5 + $0x1280] sm:$0xff]  ;;  %7188 = vmatpush1.bf16.msra.mxu1 %v18017_v13  ;;  %7704 = vmatpush1.bf16.msra.mxu0 %v18025_v14 }
  0xb0   :  { %v692_v17 = vld [vmem:[#allocation5 + $0x12c0] sm:$0xff]  ;;  %v18050_v20 = vcombine.high %v672_v10, %v684_v12  ;;  %7189 = vmatprep.subr.bf16.mxu1 %v18042_v16  ;;  %v18049_v23 = vcombine.low %v672_v10, %v684_v12 }
  0xb1   :  { %v704_v18 = vld [vmem:[#allocation5 + $0x1320] sm:$0xff] }
  0xb2   :  { %v696_v19 = vld [vmem:[#allocation5 + $0x12e0] sm:$0xff]  ;;  %v18066_v24 = vcombine.high %v692_v17, %v704_v18  ;;  %7705 = vmatprep.subr.bf16.mxu0 %v18050_v20  ;;  %v18065_v31 = vcombine.low %v692_v17, %v704_v18  ;;  %v76_v17 = vld [vmem:[#allocation2 + $0x10] sm:$0xff] }
  0xb3   :  { %v708_v21 = vld [vmem:[#allocation5 + $0x1340] sm:$0xff]  ;;  %7190 = vmatpush1.bf16.msra.mxu1 %v18041_v22  ;;  %7706 = vmatpush1.bf16.msra.mxu0 %v18049_v23 }
  0xb4   :  { %v716_v26 = vld [vmem:[#allocation5 + $0x1380] sm:$0xff]  ;;  %v18074_v29 = vcombine.high %v696_v19, %v708_v21  ;;  %7191 = vmatprep.subr.bf16.mxu1 %v18066_v24  ;;  %v18073_v32 = vcombine.low %v696_v19, %v708_v21 }
  0xb5   :  { %v728_v27 = vld [vmem:[#allocation5 + $0x13e0] sm:$0xff] }
  0xb6   :  { %v720_v28 = vld [vmem:[#allocation5 + $0x13a0] sm:$0xff]  ;;  %v18090_v33 = vcombine.high %v716_v26, %v728_v27  ;;  %7707 = vmatprep.subr.bf16.mxu0 %v18074_v29  ;;  %v18089_v39 = vcombine.low %v716_v26, %v728_v27  ;;  %v79_v27 = vld [vmem:[#allocation2 + $0x28] sm:$0xff]  ;;  %v85_v29 = vld [vmem:[#allocation2 + $0x58] sm:$0xff] }
  0xb7   :  { %v732_v30 = vld [vmem:[#allocation5 + $0x1400] sm:$0xff]  ;;  %7192 = vmatpush1.bf16.msra.mxu1 %v18065_v31  ;;  %7708 = vmatpush1.bf16.msra.mxu0 %v18073_v32 }
  0xb8   :  { %v740_v34 = vld [vmem:[#allocation5 + $0x1440] sm:$0xff]  ;;  %v18098_v37 = vcombine.high %v720_v28, %v732_v30  ;;  %7193 = vmatprep.subr.bf16.mxu1 %v18090_v33  ;;  %v18097_v40 = vcombine.low %v720_v28, %v732_v30 }
  0xb9   :  { %v752_v35 = vld [vmem:[#allocation5 + $0x14a0] sm:$0xff] }
  0xba   :  { %v744_v36 = vld [vmem:[#allocation5 + $0x1460] sm:$0xff]  ;;  %v18114_v41 = vcombine.high %v740_v34, %v752_v35  ;;  %7709 = vmatprep.subr.bf16.mxu0 %v18098_v37  ;;  %v18113_v47 = vcombine.low %v740_v34, %v752_v35 }
  0xbb   :  { %v756_v38 = vld [vmem:[#allocation5 + $0x14c0] sm:$0xff]  ;;  %7194 = vmatpush1.bf16.msra.mxu1 %v18089_v39  ;;  %7710 = vmatpush1.bf16.msra.mxu0 %v18097_v40  ;;  %v22131_v39 = vpack.c.bf16 %v85_v29, %v79_v27 }
  0xbc   :  { %v764_v42 = vld [vmem:[#allocation5 + $0x1500] sm:$0xff]  ;;  %v18122_v45 = vcombine.high %v744_v36, %v756_v38  ;;  %7195 = vmatprep.subr.bf16.mxu1 %v18114_v41  ;;  %v18121_v48 = vcombine.low %v744_v36, %v756_v38 }
  0xbd   :  { %v776_v43 = vld [vmem:[#allocation5 + $0x1560] sm:$0xff] }
  0xbe   :  { %v768_v44 = vld [vmem:[#allocation5 + $0x1520] sm:$0xff]  ;;  %v18138_v49 = vcombine.high %v764_v42, %v776_v43  ;;  %7711 = vmatprep.subr.bf16.mxu0 %v18122_v45  ;;  %v18137_v55 = vcombine.low %v764_v42, %v776_v43 }
  0xbf   :  { %v780_v46 = vld [vmem:[#allocation5 + $0x1580] sm:$0xff]  ;;  %7196 = vmatpush1.bf16.msra.mxu1 %v18113_v47  ;;  %7712 = vmatpush1.bf16.msra.mxu0 %v18121_v48 }
  0xc0   :  { %v788_v50 = vld [vmem:[#allocation5 + $0x15c0] sm:$0xff]  ;;  %v18146_v53 = vcombine.high %v768_v44, %v780_v46  ;;  %7197 = vmatprep.subr.bf16.mxu1 %v18138_v49  ;;  %v18145_v56 = vcombine.low %v768_v44, %v780_v46 }
  0xc1   :  { %v800_v51 = vld [vmem:[#allocation5 + $0x1620] sm:$0xff] }
  0xc2   :  { %v792_v52 = vld [vmem:[#allocation5 + $0x15e0] sm:$0xff]  ;;  %v18162_v57 = vcombine.high %v788_v50, %v800_v51  ;;  %7713 = vmatprep.subr.bf16.mxu0 %v18146_v53  ;;  %v18161_v0 = vcombine.low %v788_v50, %v800_v51 }
  0xc3   :  { %v804_v54 = vld [vmem:[#allocation5 + $0x1640] sm:$0xff]  ;;  %7198 = vmatpush1.bf16.msra.mxu1 %v18137_v55  ;;  %7714 = vmatpush1.bf16.msra.mxu0 %v18145_v56 }
  0xc4   :  { %v812_v59 = vld [vmem:[#allocation5 + $0x1680] sm:$0xff]  ;;  %v18170_v62 = vcombine.high %v792_v52, %v804_v54  ;;  %7199 = vmatprep.subr.bf16.mxu1 %v18162_v57  ;;  %v18169_v1 = vcombine.low %v792_v52, %v804_v54 }
  0xc5   :  { %v824_v60 = vld [vmem:[#allocation5 + $0x16e0] sm:$0xff] }
  0xc6   :  { %v816_v61 = vld [vmem:[#allocation5 + $0x16a0] sm:$0xff]  ;;  %v18186_v2 = vcombine.high %v812_v59, %v824_v60  ;;  %7715 = vmatprep.subr.bf16.mxu0 %v18170_v62  ;;  %v18185_v8 = vcombine.low %v812_v59, %v824_v60 }
  0xc7   :  { %v828_v63 = vld [vmem:[#allocation5 + $0x1700] sm:$0xff]  ;;  %7200 = vmatpush1.bf16.msra.mxu1 %v18161_v0  ;;  %7716 = vmatpush1.bf16.msra.mxu0 %v18169_v1 }
  0xc8   :  { %v836_v3 = vld [vmem:[#allocation5 + $0x1740] sm:$0xff]  ;;  %v18194_v6 = vcombine.high %v816_v61, %v828_v63  ;;  %7201 = vmatprep.subr.bf16.mxu1 %v18186_v2  ;;  %v18193_v10 = vcombine.low %v816_v61, %v828_v63 }
  0xc9   :  { %v848_v4 = vld [vmem:[#allocation5 + $0x17a0] sm:$0xff] }
  0xca   :  { %v840_v5 = vld [vmem:[#allocation5 + $0x1760] sm:$0xff]  ;;  %v18210_v11 = vcombine.high %v836_v3, %v848_v4  ;;  %7717 = vmatprep.subr.bf16.mxu0 %v18194_v6  ;;  %v18209_v19 = vcombine.low %v836_v3, %v848_v4 }
  0xcb   :  { %v852_v7 = vld [vmem:[#allocation5 + $0x17c0] sm:$0xff]  ;;  %7202 = vmatpush1.bf16.msra.mxu1 %v18185_v8  ;;  %7718 = vmatpush1.bf16.msra.mxu0 %v18193_v10 }
  0xcc   :  { %v860_v9 = vld [vmem:[#allocation5 + $0x1800] sm:$0xff]  ;;  %v18218_v16 = vcombine.high %v840_v5, %v852_v7  ;;  %7203 = vmatprep.subr.bf16.mxu1 %v18210_v11  ;;  %v18217_v22 = vcombine.low %v840_v5, %v852_v7 }
  0xcd   :  { %v872_v12 = vld [vmem:[#allocation5 + $0x1860] sm:$0xff] }
  0xce   :  { %v864_v13 = vld [vmem:[#allocation5 + $0x1820] sm:$0xff]  ;;  %v18234_v23 = vcombine.high %v860_v9, %v872_v12  ;;  %7719 = vmatprep.subr.bf16.mxu0 %v18218_v16  ;;  %v18233_v31 = vcombine.low %v860_v9, %v872_v12 }
  0xcf   :  { %v876_v14 = vld [vmem:[#allocation5 + $0x1880] sm:$0xff]  ;;  %7204 = vmatpush1.bf16.msra.mxu1 %v18209_v19  ;;  %7720 = vmatpush1.bf16.msra.mxu0 %v18217_v22 }
  0xd0   :  { %v82_v18 = vld [vmem:[#allocation2 + $0x40] sm:$0xff]  ;;  %v18242_v28 = vcombine.high %v864_v13, %v876_v14  ;;  %7216 = vmatprep.subr.bf16.mxu1 %v18234_v23  ;;  %v18241_v32 = vcombine.low %v864_v13, %v876_v14 }
  0xd1   :  { %v884_v20 = vld [vmem:[#allocation5 + $0x18c0] sm:$0xff]  ;;  %v22129_v30 = vpack.c.bf16 %v82_v18, %v76_v17 }
  0xd2   :  { %v896_v21 = vld [vmem:[#allocation5 + $0x1920] sm:$0xff]  ;;  %7732 = vmatprep.subr.bf16.mxu0 %v18242_v28 }
  0xd3   :  { %v888_v24 = vld [vmem:[#allocation5 + $0x18e0] sm:$0xff]  ;;  %v18258_v33 = vcombine.high %v884_v20, %v896_v21  ;;  %7206 = vmatmul.mubr.bf16.vlgmr.msra.gmra.mrb[0].mxu1 %v22129_v30  ;;  %7722 = vmatmul.mubr.bf16.vlgmr.msra.gmra.mrb[0].mxu0 %v22129_v30  ;;  %v18257_v40 = vcombine.low %v884_v20, %v896_v21 }
  0xd4   :  { %v900_v26 = vld [vmem:[#allocation5 + $0x1940] sm:$0xff]  ;;  %7217 = vmatpush1.bf16.msra.mxu1 %v18233_v31  ;;  %7733 = vmatpush1.bf16.msra.mxu0 %v18241_v32 }
  0xd5   :  { %v908_v34 = vld [vmem:[#allocation5 + $0x1980] sm:$0xff]  ;;  %v18266_v37 = vcombine.high %v888_v24, %v900_v26  ;;  %7218 = vmatprep.subr.bf16.mxu1 %v18258_v33  ;;  %v18265_v41 = vcombine.low %v888_v24, %v900_v26  ;;  %7248 = vmatprep.mubr.bf16.mxu1 %v22131_v39 }
  0xd6   :  { %v920_v35 = vld [vmem:[#allocation5 + $0x19e0] sm:$0xff]  ;;  %7764 = vmatprep.mubr.bf16.mxu0 %v22131_v39 }
  0xd7   :  { %v912_v36 = vld [vmem:[#allocation5 + $0x19a0] sm:$0xff]  ;;  %v18282_v42 = vcombine.high %v908_v34, %v920_v35  ;;  %7734 = vmatprep.subr.bf16.mxu0 %v18266_v37  ;;  %v18281_v48 = vcombine.low %v908_v34, %v920_v35 }
  0xd8   :  { %v924_v38 = vld [vmem:[#allocation5 + $0x1a00] sm:$0xff]  ;;  %7219 = vmatpush1.bf16.msra.mxu1 %v18257_v40  ;;  %7735 = vmatpush1.bf16.msra.mxu0 %v18265_v41 }
  0xd9   :  { %v932_v43 = vld [vmem:[#allocation5 + $0x1a40] sm:$0xff]  ;;  %v18290_v46 = vcombine.high %v912_v36, %v924_v38  ;;  %7220 = vmatprep.subr.bf16.mxu1 %v18282_v42  ;;  %v18289_v49 = vcombine.low %v912_v36, %v924_v38 }
  0xda   :  { %v944_v44 = vld [vmem:[#allocation5 + $0x1aa0] sm:$0xff] }
  0xdb   :  { %v936_v45 = vld [vmem:[#allocation5 + $0x1a60] sm:$0xff]  ;;  %v18306_v50 = vcombine.high %v932_v43, %v944_v44  ;;  %7736 = vmatprep.subr.bf16.mxu0 %v18290_v46  ;;  %v18305_v56 = vcombine.low %v932_v43, %v944_v44 }
  0xdc   :  { %v948_v47 = vld [vmem:[#allocation5 + $0x1ac0] sm:$0xff]  ;;  %7221 = vmatpush1.bf16.msra.mxu1 %v18281_v48  ;;  %7737 = vmatpush1.bf16.msra.mxu0 %v18289_v49 }
  0xdd   :  { %v956_v51 = vld [vmem:[#allocation5 + $0x1b00] sm:$0xff]  ;;  %v18314_v54 = vcombine.high %v936_v45, %v948_v47  ;;  %7222 = vmatprep.subr.bf16.mxu1 %v18306_v50  ;;  %v18313_v57 = vcombine.low %v936_v45, %v948_v47 }
  0xde   :  { %v968_v52 = vld [vmem:[#allocation5 + $0x1b60] sm:$0xff] }
  0xdf   :  { %v960_v53 = vld [vmem:[#allocation5 + $0x1b20] sm:$0xff]  ;;  %v18330_v59 = vcombine.high %v956_v51, %v968_v52  ;;  %7738 = vmatprep.subr.bf16.mxu0 %v18314_v54  ;;  %v18329_v1 = vcombine.low %v956_v51, %v968_v52 }
  0xe0   :  { %v972_v55 = vld [vmem:[#allocation5 + $0x1b80] sm:$0xff]  ;;  %7223 = vmatpush1.bf16.msra.mxu1 %v18305_v56  ;;  %7739 = vmatpush1.bf16.msra.mxu0 %v18313_v57 }
  0xe1   :  { %v980_v60 = vld [vmem:[#allocation5 + $0x1bc0] sm:$0xff]  ;;  %v18338_v63 = vcombine.high %v960_v53, %v972_v55  ;;  %7224 = vmatprep.subr.bf16.mxu1 %v18330_v59  ;;  %v18337_v2 = vcombine.low %v960_v53, %v972_v55 }
  0xe2   :  { %v992_v61 = vld [vmem:[#allocation5 + $0x1c20] sm:$0xff] }
  0xe3   :  { %v984_v62 = vld [vmem:[#allocation5 + $0x1be0] sm:$0xff]  ;;  %v18354_v3 = vcombine.high %v980_v60, %v992_v61  ;;  %7740 = vmatprep.subr.bf16.mxu0 %v18338_v63  ;;  %v18353_v9 = vcombine.low %v980_v60, %v992_v61 }
  0xe4   :  { %v996_v0 = vld [vmem:[#allocation5 + $0x1c40] sm:$0xff]  ;;  %7225 = vmatpush1.bf16.msra.mxu1 %v18329_v1  ;;  %7741 = vmatpush1.bf16.msra.mxu0 %v18337_v2 }
  0xe5   :  { %v1004_v4 = vld [vmem:[#allocation5 + $0x1c80] sm:$0xff]  ;;  %v18362_v7 = vcombine.high %v984_v62, %v996_v0  ;;  %7226 = vmatprep.subr.bf16.mxu1 %v18354_v3  ;;  %v18361_v10 = vcombine.low %v984_v62, %v996_v0 }
  0xe6   :  { %v1016_v5 = vld [vmem:[#allocation5 + $0x1ce0] sm:$0xff] }
  0xe7   :  { %v1008_v6 = vld [vmem:[#allocation5 + $0x1ca0] sm:$0xff]  ;;  %v18378_v11 = vcombine.high %v1004_v4, %v1016_v5  ;;  %7742 = vmatprep.subr.bf16.mxu0 %v18362_v7  ;;  %v18377_v18 = vcombine.low %v1004_v4, %v1016_v5 }
  0xe8   :  { %v1020_v8 = vld [vmem:[#allocation5 + $0x1d00] sm:$0xff]  ;;  %7227 = vmatpush1.bf16.msra.mxu1 %v18353_v9  ;;  %7743 = vmatpush1.bf16.msra.mxu0 %v18361_v10 }
  0xe9   :  { %v1028_v12 = vld [vmem:[#allocation5 + $0x1d40] sm:$0xff]  ;;  %v18386_v16 = vcombine.high %v1008_v6, %v1020_v8  ;;  %7228 = vmatprep.subr.bf16.mxu1 %v18378_v11  ;;  %v18385_v19 = vcombine.low %v1008_v6, %v1020_v8 }
  0xea   :  { %v1040_v13 = vld [vmem:[#allocation5 + $0x1da0] sm:$0xff] }
  0xeb   :  { %v1032_v14 = vld [vmem:[#allocation5 + $0x1d60] sm:$0xff]  ;;  %v18402_v20 = vcombine.high %v1028_v12, %v1040_v13  ;;  %7744 = vmatprep.subr.bf16.mxu0 %v18386_v16  ;;  %v18401_v27 = vcombine.low %v1028_v12, %v1040_v13 }
  0xec   :  { %v1044_v17 = vld [vmem:[#allocation5 + $0x1dc0] sm:$0xff]  ;;  %7229 = vmatpush1.bf16.msra.mxu1 %v18377_v18  ;;  %7745 = vmatpush1.bf16.msra.mxu0 %v18385_v19 }
  0xed   :  { %v1052_v21 = vld [vmem:[#allocation5 + $0x1e00] sm:$0xff]  ;;  %v18410_v24 = vcombine.high %v1032_v14, %v1044_v17  ;;  %7230 = vmatprep.subr.bf16.mxu1 %v18402_v20  ;;  %v18409_v28 = vcombine.low %v1032_v14, %v1044_v17 }
  0xee   :  { %v1064_v22 = vld [vmem:[#allocation5 + $0x1e60] sm:$0xff] }
  0xef   :  { %v1056_v23 = vld [vmem:[#allocation5 + $0x1e20] sm:$0xff]  ;;  %v18426_v29 = vcombine.high %v1052_v21, %v1064_v22  ;;  %7746 = vmatprep.subr.bf16.mxu0 %v18410_v24  ;;  %v18425_v36 = vcombine.low %v1052_v21, %v1064_v22 }
  0xf0   :  { %v1068_v26 = vld [vmem:[#allocation5 + $0x1e80] sm:$0xff]  ;;  %7231 = vmatpush1.bf16.msra.mxu1 %v18401_v27  ;;  %7747 = vmatpush1.bf16.msra.mxu0 %v18409_v28  ;;  %v93_v27 = vld [vmem:[#allocation5 + $0x8] sm:$0xff] }
  0xf1   :  { %v1076_v31 = vld [vmem:[#allocation5 + $0x1ec0] sm:$0xff]  ;;  %v18434_v34 = vcombine.high %v1056_v23, %v1068_v26  ;;  %7232 = vmatprep.subr.bf16.mxu1 %v18426_v29  ;;  %v18433_v37 = vcombine.low %v1056_v23, %v1068_v26  ;;  %v105_v28 = vld [vmem:[#allocation5 + $0x68] sm:$0xff]  ;;  %v98_v29 = vld [vmem:[#allocation5 + $0x30] sm:$0xff] }
  0xf2   :  { %v1088_v32 = vld [vmem:[#allocation5 + $0x1f20] sm:$0xff] }
  0xf3   :  { %v1080_v33 = vld [vmem:[#allocation5 + $0x1ee0] sm:$0xff]  ;;  %v18450_v38 = vcombine.high %v1076_v31, %v1088_v32  ;;  %7748 = vmatprep.subr.bf16.mxu0 %v18434_v34  ;;  %v18449_v45 = vcombine.low %v1076_v31, %v1088_v32  ;;  %v110_v34 = vld [vmem:[#allocation5 + $0x90] sm:$0xff] }
  0xf4   :  { %v1092_v35 = vld [vmem:[#allocation5 + $0x1f40] sm:$0xff]  ;;  %7233 = vmatpush1.bf16.msra.mxu1 %v18425_v36  ;;  %7749 = vmatpush1.bf16.msra.mxu0 %v18433_v37  ;;  %v17468_v37 = vcombine.high %v93_v27, %v105_v28 }
  0xf5   :  { %v1100_v40 = vld [vmem:[#allocation5 + $0x1f80] sm:$0xff]  ;;  %v18458_v43 = vcombine.high %v1080_v33, %v1092_v35  ;;  %7234 = vmatprep.subr.bf16.mxu1 %v18450_v38  ;;  %v18457_v46 = vcombine.low %v1080_v33, %v1092_v35  ;;  %v84_v33 = vld [vmem:[#allocation2 + $0x50] sm:$0xff]  ;;  %v117_v38 = vld [vmem:[#allocation5 + $0xc8] sm:$0xff] }
  0xf6   :  { %v1112_v41 = vld [vmem:[#allocation5 + $0x1fe0] sm:$0xff] }
  0xf7   :  { %v1104_v42 = vld [vmem:[#allocation5 + $0x1fa0] sm:$0xff]  ;;  %v18474_v47 = vcombine.high %v1100_v40, %v1112_v41  ;;  %7750 = vmatprep.subr.bf16.mxu0 %v18458_v43  ;;  %v18473_v53 = vcombine.low %v1100_v40, %v1112_v41  ;;  %v129_v40 = vld [vmem:[#allocation5 + $0x128] sm:$0xff]  ;;  %v122_v41 = vld [vmem:[#allocation5 + $0xf0] sm:$0xff] }
  0xf8   :  { %v1116_v44 = vld [vmem:[#allocation5 + $0x2000] sm:$0xff]  ;;  %7235 = vmatpush1.bf16.msra.mxu1 %v18449_v45  ;;  %7751 = vmatpush1.bf16.msra.mxu0 %v18457_v46  ;;  %v134_v43 = vld [vmem:[#allocation5 + $0x150] sm:$0xff]  ;;  %v17467_v45 = vcombine.low %v93_v27, %v105_v28  ;;  %v17477_v46 = vcombine.low %v98_v29, %v110_v34  ;;  %v261_v27 = vld [vmem:[#allocation5 + $0x548] sm:$0xff] }
  0xf9   :  { %v1124_v48 = vld [vmem:[#allocation5 + $0x2040] sm:$0xff]  ;;  %v18482_v51 = vcombine.high %v1104_v42, %v1116_v44  ;;  %7236 = vmatprep.subr.bf16.mxu1 %v18474_v47  ;;  %v18481_v54 = vcombine.low %v1104_v42, %v1116_v44  ;;  %v17478_v42 = vcombine.high %v98_v29, %v110_v34  ;;  %v17492_v47 = vcombine.high %v117_v38, %v129_v40  ;;  %v273_v28 = vld [vmem:[#allocation5 + $0x5a8] sm:$0xff]  ;;  %v266_v29 = vld [vmem:[#allocation5 + $0x570] sm:$0xff] }
  0xfa   :  { %v1136_v49 = vld [vmem:[#allocation5 + $0x20a0] sm:$0xff] }
  0xfb   :  { %v1128_v50 = vld [vmem:[#allocation5 + $0x2060] sm:$0xff]  ;;  %v18498_v55 = vcombine.high %v1124_v48, %v1136_v49  ;;  %7752 = vmatprep.subr.bf16.mxu0 %v18482_v51  ;;  %v18497_v62 = vcombine.low %v1124_v48, %v1136_v49  ;;  %v141_v48 = vld [vmem:[#allocation5 + $0x188] sm:$0xff]  ;;  %v17502_v51 = vcombine.high %v122_v41, %v134_v43 }
  0xfc   :  { %v1140_v52 = vld [vmem:[#allocation5 + $0x20c0] sm:$0xff]  ;;  %7237 = vmatpush1.bf16.msra.mxu1 %v18473_v53  ;;  %7753 = vmatpush1.bf16.msra.mxu0 %v18481_v54  ;;  %v153_v49 = vld [vmem:[#allocation5 + $0x1e8] sm:$0xff]  ;;  %v17491_v53 = vcombine.low %v117_v38, %v129_v40  ;;  %v17501_v54 = vcombine.low %v122_v41, %v134_v43  ;;  %v290_v38 = vld [vmem:[#allocation5 + $0x630] sm:$0xff] }
  0xfd   :  { %v1148_v56 = vld [vmem:[#allocation5 + $0x2100] sm:$0xff]  ;;  %v18506_v60 = vcombine.high %v1128_v50, %v1140_v52  ;;  %7238 = vmatprep.subr.bf16.mxu1 %v18498_v55  ;;  %v18505_v63 = vcombine.low %v1128_v50, %v1140_v52  ;;  %v146_v50 = vld [vmem:[#allocation5 + $0x1b0] sm:$0xff]  ;;  %v17516_v55 = vcombine.high %v141_v48, %v153_v49 }
  0xfe   :  { %v1160_v57 = vld [vmem:[#allocation5 + $0x2160] sm:$0xff]  ;;  %v158_v52 = vld [vmem:[#allocation5 + $0x210] sm:$0xff] }
  0xff   :  { %v1152_v59 = vld [vmem:[#allocation5 + $0x2120] sm:$0xff]  ;;  %v18522_v0 = vcombine.high %v1148_v56, %v1160_v57  ;;  %7754 = vmatprep.subr.bf16.mxu0 %v18506_v60  ;;  %v18521_v6 = vcombine.low %v1148_v56, %v1160_v57  ;;  %v165_v56 = vld [vmem:[#allocation5 + $0x248] sm:$0xff]  ;;  %v17526_v60 = vcombine.high %v146_v50, %v158_v52  ;;  %v302_v41 = vld [vmem:[#allocation5 + $0x690] sm:$0xff] }
 0x100   :  { %v1164_v61 = vld [vmem:[#allocation5 + $0x2180] sm:$0xff]  ;;  %7239 = vmatpush1.bf16.msra.mxu1 %v18497_v62  ;;  %7755 = vmatpush1.bf16.msra.mxu0 %v18505_v63  ;;  %v177_v57 = vld [vmem:[#allocation5 + $0x2a8] sm:$0xff]  ;;  %v17515_v62 = vcombine.low %v141_v48, %v153_v49  ;;  %v17525_v63 = vcombine.low %v146_v50, %v158_v52  ;;  %v314_v48 = vld [vmem:[#allocation5 + $0x6f0] sm:$0xff]  ;;  %v17670_v49 = vcombine.high %v290_v38, %v302_v41 }
 0x101   :  { %v1172_v1 = vld [vmem:[#allocation5 + $0x21c0] sm:$0xff]  ;;  %v18530_v4 = vcombine.high %v1152_v59, %v1164_v61  ;;  %7240 = vmatprep.subr.bf16.mxu1 %v18522_v0  ;;  %v18529_v7 = vcombine.low %v1152_v59, %v1164_v61  ;;  %v170_v59 = vld [vmem:[#allocation5 + $0x270] sm:$0xff]  ;;  %v17540_v0 = vcombine.high %v165_v56, %v177_v57  ;;  %v17669_v52 = vcombine.low %v290_v38, %v302_v41 }
 0x102   :  { %v1184_v2 = vld [vmem:[#allocation5 + $0x2220] sm:$0xff]  ;;  %v182_v61 = vld [vmem:[#allocation5 + $0x2d0] sm:$0xff] }
 0x103   :  { %v1176_v3 = vld [vmem:[#allocation5 + $0x21e0] sm:$0xff]  ;;  %v18546_v8 = vcombine.high %v1172_v1, %v1184_v2  ;;  %7756 = vmatprep.subr.bf16.mxu0 %v18530_v4  ;;  %v18545_v14 = vcombine.low %v1172_v1, %v1184_v2  ;;  %v189_v1 = vld [vmem:[#allocation5 + $0x308] sm:$0xff]  ;;  %v17550_v4 = vcombine.high %v170_v59, %v182_v61  ;;  %v326_v50 = vld [vmem:[#allocation5 + $0x750] sm:$0xff] }
 0x104   :  { %v1188_v5 = vld [vmem:[#allocation5 + $0x2240] sm:$0xff]  ;;  %7241 = vmatpush1.bf16.msra.mxu1 %v18521_v6  ;;  %7757 = vmatpush1.bf16.msra.mxu0 %v18529_v7  ;;  %v201_v2 = vld [vmem:[#allocation5 + $0x368] sm:$0xff]  ;;  %v17539_v6 = vcombine.low %v165_v56, %v177_v57  ;;  %v17549_v7 = vcombine.low %v170_v59, %v182_v61  ;;  %v338_v56 = vld [vmem:[#allocation5 + $0x7b0] sm:$0xff]  ;;  %v17694_v57 = vcombine.high %v314_v48, %v326_v50 }
 0x105   :  { %v1196_v9 = vld [vmem:[#allocation5 + $0x2280] sm:$0xff]  ;;  %v18554_v12 = vcombine.high %v1176_v3, %v1188_v5  ;;  %7242 = vmatprep.subr.bf16.mxu1 %v18546_v8  ;;  %v18553_v16 = vcombine.low %v1176_v3, %v1188_v5  ;;  %v194_v3 = vld [vmem:[#allocation5 + $0x330] sm:$0xff]  ;;  %v17564_v8 = vcombine.high %v189_v1, %v201_v2  ;;  %v17693_v61 = vcombine.low %v314_v48, %v326_v50 }
 0x106   :  { %v1208_v10 = vld [vmem:[#allocation5 + $0x22e0] sm:$0xff]  ;;  %v206_v5 = vld [vmem:[#allocation5 + $0x390] sm:$0xff] }
 0x107   :  { %v1200_v11 = vld [vmem:[#allocation5 + $0x22a0] sm:$0xff]  ;;  %v18570_v17 = vcombine.high %v1196_v9, %v1208_v10  ;;  %7758 = vmatprep.subr.bf16.mxu0 %v18554_v12  ;;  %v18569_v23 = vcombine.low %v1196_v9, %v1208_v10  ;;  %v213_v9 = vld [vmem:[#allocation5 + $0x3c8] sm:$0xff]  ;;  %v17574_v12 = vcombine.high %v194_v3, %v206_v5  ;;  %v350_v59 = vld [vmem:[#allocation5 + $0x810] sm:$0xff] }
 0x108   :  { %v1212_v13 = vld [vmem:[#allocation5 + $0x2300] sm:$0xff]  ;;  %7243 = vmatpush1.bf16.msra.mxu1 %v18545_v14  ;;  %7759 = vmatpush1.bf16.msra.mxu0 %v18553_v16  ;;  %v225_v10 = vld [vmem:[#allocation5 + $0x428] sm:$0xff]  ;;  %v17563_v14 = vcombine.low %v189_v1, %v201_v2  ;;  %v17573_v16 = vcombine.low %v194_v3, %v206_v5  ;;  %v362_v1 = vld [vmem:[#allocation5 + $0x870] sm:$0xff]  ;;  %v17718_v2 = vcombine.high %v338_v56, %v350_v59 }
 0x109   :  { %v1220_v18 = vld [vmem:[#allocation5 + $0x2340] sm:$0xff]  ;;  %v18578_v21 = vcombine.high %v1200_v11, %v1212_v13  ;;  %7244 = vmatprep.subr.bf16.mxu1 %v18570_v17  ;;  %v18577_v24 = vcombine.low %v1200_v11, %v1212_v13  ;;  %v218_v11 = vld [vmem:[#allocation5 + $0x3f0] sm:$0xff]  ;;  %v17588_v17 = vcombine.high %v213_v9, %v225_v10  ;;  %v17717_v5 = vcombine.low %v338_v56, %v350_v59 }
 0x10a   :  { %v1232_v19 = vld [vmem:[#allocation5 + $0x23a0] sm:$0xff]  ;;  %v230_v13 = vld [vmem:[#allocation5 + $0x450] sm:$0xff] }
 0x10b   :  { %v1224_v20 = vld [vmem:[#allocation5 + $0x2360] sm:$0xff]  ;;  %v18594_v26 = vcombine.high %v1220_v18, %v1232_v19  ;;  %7760 = vmatprep.subr.bf16.mxu0 %v18578_v21  ;;  %v18593_v35 = vcombine.low %v1220_v18, %v1232_v19  ;;  %v237_v18 = vld [vmem:[#allocation5 + $0x488] sm:$0xff]  ;;  %v17598_v21 = vcombine.high %v218_v11, %v230_v13  ;;  %v374_v3 = vld [vmem:[#allocation5 + $0x8d0] sm:$0xff] }
 0x10c   :  { %v1236_v22 = vld [vmem:[#allocation5 + $0x23c0] sm:$0xff]  ;;  %7245 = vmatpush1.bf16.msra.mxu1 %v18569_v23  ;;  %7761 = vmatpush1.bf16.msra.mxu0 %v18577_v24  ;;  %v249_v19 = vld [vmem:[#allocation5 + $0x4e8] sm:$0xff]  ;;  %v17587_v23 = vcombine.low %v213_v9, %v225_v10  ;;  %v17597_v24 = vcombine.low %v218_v11, %v230_v13  ;;  %v386_v9 = vld [vmem:[#allocation5 + $0x930] sm:$0xff]  ;;  %v17742_v10 = vcombine.high %v362_v1, %v374_v3 }
 0x10d   :  { %v18602_v31 = vcombine.high %v1224_v20, %v1236_v22  ;;  %v78_v32 = vld [vmem:[#allocation2 + $0x20] sm:$0xff]  ;;  %7246 = vmatprep.subr.bf16.mxu1 %v18594_v26  ;;  %v18601_v36 = vcombine.low %v1224_v20, %v1236_v22  ;;  %v242_v20 = vld [vmem:[#allocation5 + $0x4b0] sm:$0xff]  ;;  %v17612_v26 = vcombine.high %v237_v18, %v249_v19  ;;  %v17741_v13 = vcombine.low %v362_v1, %v374_v3 }
 0x10e   :  { %v22137_v44 = vpack.c.bf16 %v84_v33, %v78_v32  ;;  %v254_v22 = vld [vmem:[#allocation5 + $0x510] sm:$0xff]  ;;  %v17611_v33 = vcombine.low %v237_v18, %v249_v19 }
 0x10f   :  { %7762 = vmatprep.subr.bf16.mxu0 %v18602_v31  ;;  %v17622_v31 = vcombine.high %v242_v20, %v254_v22  ;;  %v278_v32 = vld [vmem:[#allocation5 + $0x5d0] sm:$0xff]  ;;  %v17621_v34 = vcombine.low %v242_v20, %v254_v22 }
 0x110   :  { %7247 = vmatpush1.bf16.msra.mxu1 %v18593_v35  ;;  %7763 = vmatpush1.bf16.msra.mxu0 %v18601_v36  ;;  %v17636_v35 = vcombine.high %v261_v27, %v273_v28  ;;  %v285_v36 = vld [vmem:[#allocation5 + $0x608] sm:$0xff]  ;;  %v17646_v40 = vcombine.high %v266_v29, %v278_v32  ;;  %v17645_v43 = vcombine.low %v266_v29, %v278_v32  ;;  %v398_v11 = vld [vmem:[#allocation5 + $0x990] sm:$0xff] }
 0x111   :  { %7259 = vmatprep.subr.bf16.mxu1 %v17468_v37  ;;  %7904 = vmatprep.subr.bf16.mxu0 %v17478_v42  ;;  %v297_v37 = vld [vmem:[#allocation5 + $0x668] sm:$0xff]  ;;  %v17635_v42 = vcombine.low %v261_v27, %v273_v28  ;;  %v410_v18 = vld [vmem:[#allocation5 + $0x9f0] sm:$0xff]  ;;  %v17766_v19 = vcombine.high %v386_v9, %v398_v11  ;;  %v17765_v22 = vcombine.low %v386_v9, %v398_v11 }
 0x112   :  { %v422_v20 = vld [vmem:[#allocation5 + $0xa50] sm:$0xff] }
 0x113   :  { %7249 = vmatmul.mubr.bf16.vlgmr.msra.gmra.mrb[0].mxu1 %v22137_v44  ;;  %7765 = vmatmul.mubr.bf16.vlgmr.msra.gmra.mrb[0].mxu0 %v22137_v44  ;;  %v434_v27 = vld [vmem:[#allocation5 + $0xab0] sm:$0xff]  ;;  %v17790_v28 = vcombine.high %v410_v18, %v422_v20  ;;  %v17789_v32 = vcombine.low %v410_v18, %v422_v20 }
 0x114   :  { %7260 = vmatpush1.bf16.msra.mxu1 %v17467_v45  ;;  %7905 = vmatpush1.bf16.msra.mxu0 %v17477_v46  ;;  %v17660_v45 = vcombine.high %v285_v36, %v297_v37  ;;  %v309_v46 = vld [vmem:[#allocation5 + $0x6c8] sm:$0xff]  ;;  %v446_v29 = vld [vmem:[#allocation5 + $0xb10] sm:$0xff] }
 0x115   :  { %7261 = vmatprep.subr.bf16.mxu1 %v17492_v47  ;;  %7906 = vmatprep.subr.bf16.mxu0 %v17502_v51  ;;  %v321_v47 = vld [vmem:[#allocation5 + $0x728] sm:$0xff]  ;;  %v17659_v51 = vcombine.low %v285_v36, %v297_v37  ;;  %v458_v36 = vld [vmem:[#allocation5 + $0xb70] sm:$0xff]  ;;  %v17814_v37 = vcombine.high %v434_v27, %v446_v29  ;;  %v17813_v41 = vcombine.low %v434_v27, %v446_v29 }
 0x116   :  { %7291 = vmatprep.mubr.bf16.mxu1 %v22117_v58  ;;  %7936 = vmatprep.mubr.bf16.mxu0 %v22117_v58  ;;  %v470_v38 = vld [vmem:[#allocation5 + $0xbd0] sm:$0xff] }
 0x117   :  { %v494_v48 = vld [vmem:[#allocation5 + $0xc90] sm:$0xff]  ;;  %v17837_v50 = vcombine.low %v458_v36, %v470_v38 }
 0x118   :  { %7262 = vmatpush1.bf16.msra.mxu1 %v17491_v53  ;;  %7907 = vmatpush1.bf16.msra.mxu0 %v17501_v54  ;;  %v17684_v53 = vcombine.high %v309_v46, %v321_v47  ;;  %v333_v54 = vld [vmem:[#allocation5 + $0x788] sm:$0xff]  ;;  %v518_v56 = vld [vmem:[#allocation5 + $0xd50] sm:$0xff] }
 0x119   :  { %7263 = vmatprep.subr.bf16.mxu1 %v17516_v55  ;;  %7908 = vmatprep.subr.bf16.mxu0 %v17526_v60  ;;  %v345_v55 = vld [vmem:[#allocation5 + $0x7e8] sm:$0xff]  ;;  %v17683_v60 = vcombine.low %v309_v46, %v321_v47  ;;  %v482_v46 = vld [vmem:[#allocation5 + $0xc30] sm:$0xff]  ;;  %v17838_v47 = vcombine.high %v458_v36, %v470_v38 }
 0x11a   :  { %v17861_v59 = vcombine.low %v482_v46, %v494_v48  ;;  %v542_v1 = vld [vmem:[#allocation5 + $0xe10] sm:$0xff] }
 0x11b   :  { %v566_v9 = vld [vmem:[#allocation5 + $0xed0] sm:$0xff] }
 0x11c   :  { %7264 = vmatpush1.bf16.msra.mxu1 %v17515_v62  ;;  %7909 = vmatpush1.bf16.msra.mxu0 %v17525_v63  ;;  %v17708_v62 = vcombine.high %v333_v54, %v345_v55  ;;  %v357_v63 = vld [vmem:[#allocation5 + $0x848] sm:$0xff]  ;;  %v590_v18 = vld [vmem:[#allocation5 + $0xf90] sm:$0xff] }
 0x11d   :  { %7265 = vmatprep.subr.bf16.mxu1 %v17540_v0  ;;  %7910 = vmatprep.subr.bf16.mxu0 %v17550_v4  ;;  %v369_v0 = vld [vmem:[#allocation5 + $0x8a8] sm:$0xff]  ;;  %v17707_v4 = vcombine.low %v333_v54, %v345_v55  ;;  %v506_v54 = vld [vmem:[#allocation5 + $0xcf0] sm:$0xff]  ;;  %v17862_v55 = vcombine.high %v482_v46, %v494_v48 }
 0x11e   :  { %v17885_v3 = vcombine.low %v506_v54, %v518_v56  ;;  %v614_v27 = vld [vmem:[#allocation5 + $0x1050] sm:$0xff] }
 0x11f   :  { %v638_v36 = vld [vmem:[#allocation5 + $0x1110] sm:$0xff] }
 0x120   :  { %7266 = vmatpush1.bf16.msra.mxu1 %v17539_v6  ;;  %7911 = vmatpush1.bf16.msra.mxu0 %v17549_v7  ;;  %v17732_v6 = vcombine.high %v357_v63, %v369_v0  ;;  %v381_v7 = vld [vmem:[#allocation5 + $0x908] sm:$0xff]  ;;  %v662_v46 = vld [vmem:[#allocation5 + $0x11d0] sm:$0xff] }
 0x121   :  { %7267 = vmatprep.subr.bf16.mxu1 %v17564_v8  ;;  %7912 = vmatprep.subr.bf16.mxu0 %v17574_v12  ;;  %v393_v8 = vld [vmem:[#allocation5 + $0x968] sm:$0xff]  ;;  %v17731_v12 = vcombine.low %v357_v63, %v369_v0  ;;  %v530_v63 = vld [vmem:[#allocation5 + $0xdb0] sm:$0xff]  ;;  %v17886_v0 = vcombine.high %v506_v54, %v518_v56 }
 0x122   :  { %v17909_v11 = vcombine.low %v530_v63, %v542_v1  ;;  %v686_v54 = vld [vmem:[#allocation5 + $0x1290] sm:$0xff] }
 0x124   :  { %7268 = vmatpush1.bf16.msra.mxu1 %v17563_v14  ;;  %7913 = vmatpush1.bf16.msra.mxu0 %v17573_v16  ;;  %v17756_v14 = vcombine.high %v381_v7, %v393_v8  ;;  %v405_v16 = vld [vmem:[#allocation5 + $0x9c8] sm:$0xff] }
 0x125   :  { %7269 = vmatprep.subr.bf16.mxu1 %v17588_v17  ;;  %7914 = vmatprep.subr.bf16.mxu0 %v17598_v21  ;;  %v417_v17 = vld [vmem:[#allocation5 + $0xa28] sm:$0xff]  ;;  %v17755_v21 = vcombine.low %v381_v7, %v393_v8  ;;  %v554_v7 = vld [vmem:[#allocation5 + $0xe70] sm:$0xff]  ;;  %v17910_v8 = vcombine.high %v530_v63, %v542_v1 }
 0x126   :  { %v17933_v20 = vcombine.low %v554_v7, %v566_v9  ;;  %v710_v63 = vld [vmem:[#allocation5 + $0x1350] sm:$0xff] }
 0x128   :  { %7270 = vmatpush1.bf16.msra.mxu1 %v17587_v23  ;;  %7915 = vmatpush1.bf16.msra.mxu0 %v17597_v24  ;;  %v17780_v23 = vcombine.high %v405_v16, %v417_v17  ;;  %v429_v24 = vld [vmem:[#allocation5 + $0xa88] sm:$0xff] }
 0x129   :  { %7271 = vmatprep.subr.bf16.mxu1 %v17612_v26  ;;  %7916 = vmatprep.subr.bf16.mxu0 %v17622_v31  ;;  %v441_v26 = vld [vmem:[#allocation5 + $0xae8] sm:$0xff]  ;;  %v17779_v31 = vcombine.low %v405_v16, %v417_v17  ;;  %v578_v16 = vld [vmem:[#allocation5 + $0xf30] sm:$0xff]  ;;  %v17934_v17 = vcombine.high %v554_v7, %v566_v9 }
 0x12a   :  { %v17957_v29 = vcombine.low %v578_v16, %v590_v18  ;;  %v734_v7 = vld [vmem:[#allocation5 + $0x1410] sm:$0xff] }
 0x12c   :  { %7272 = vmatpush1.bf16.msra.mxu1 %v17611_v33  ;;  %7917 = vmatpush1.bf16.msra.mxu0 %v17621_v34  ;;  %v17804_v33 = vcombine.high %v429_v24, %v441_v26  ;;  %v453_v34 = vld [vmem:[#allocation5 + $0xb48] sm:$0xff] }
 0x12d   :  { %7273 = vmatprep.subr.bf16.mxu1 %v17636_v35  ;;  %7918 = vmatprep.subr.bf16.mxu0 %v17646_v40  ;;  %v465_v35 = vld [vmem:[#allocation5 + $0xba8] sm:$0xff]  ;;  %v17803_v40 = vcombine.low %v429_v24, %v441_v26  ;;  %v602_v24 = vld [vmem:[#allocation5 + $0xff0] sm:$0xff]  ;;  %v17958_v26 = vcombine.high %v578_v16, %v590_v18 }
 0x12e   :  { %v17981_v38 = vcombine.low %v602_v24, %v614_v27  ;;  %v758_v16 = vld [vmem:[#allocation5 + $0x14d0] sm:$0xff] }
 0x130   :  { %7274 = vmatpush1.bf16.msra.mxu1 %v17635_v42  ;;  %7919 = vmatpush1.bf16.msra.mxu0 %v17645_v43  ;;  %v17828_v42 = vcombine.high %v453_v34, %v465_v35  ;;  %v477_v43 = vld [vmem:[#allocation5 + $0xc08] sm:$0xff] }
 0x131   :  { %7275 = vmatprep.subr.bf16.mxu1 %v17660_v45  ;;  %7920 = vmatprep.subr.bf16.mxu0 %v17670_v49  ;;  %v489_v45 = vld [vmem:[#allocation5 + $0xc68] sm:$0xff]  ;;  %v17827_v49 = vcombine.low %v453_v34, %v465_v35  ;;  %v626_v34 = vld [vmem:[#allocation5 + $0x10b0] sm:$0xff]  ;;  %v17982_v35 = vcombine.high %v602_v24, %v614_v27 }
 0x132   :  { %v18005_v48 = vcombine.low %v626_v34, %v638_v36  ;;  %v782_v24 = vld [vmem:[#allocation5 + $0x1590] sm:$0xff] }
 0x134   :  { %7276 = vmatpush1.bf16.msra.mxu1 %v17659_v51  ;;  %7921 = vmatpush1.bf16.msra.mxu0 %v17669_v52  ;;  %v17852_v51 = vcombine.high %v477_v43, %v489_v45  ;;  %v501_v52 = vld [vmem:[#allocation5 + $0xcc8] sm:$0xff] }
 0x135   :  { %7277 = vmatprep.subr.bf16.mxu1 %v17684_v53  ;;  %7922 = vmatprep.subr.bf16.mxu0 %v17694_v57  ;;  %v513_v53 = vld [vmem:[#allocation5 + $0xd28] sm:$0xff]  ;;  %v17851_v57 = vcombine.low %v477_v43, %v489_v45  ;;  %v18006_v43 = vcombine.high %v626_v34, %v638_v36  ;;  %v650_v45 = vld [vmem:[#allocation5 + $0x1170] sm:$0xff] }
 0x136   :  { %v18029_v56 = vcombine.low %v650_v45, %v662_v46  ;;  %v806_v34 = vld [vmem:[#allocation5 + $0x1650] sm:$0xff] }
 0x138   :  { %7278 = vmatpush1.bf16.msra.mxu1 %v17683_v60  ;;  %7923 = vmatpush1.bf16.msra.mxu0 %v17693_v61  ;;  %v17876_v60 = vcombine.high %v501_v52, %v513_v53  ;;  %v525_v61 = vld [vmem:[#allocation5 + $0xd88] sm:$0xff] }
 0x139   :  { %7279 = vmatprep.subr.bf16.mxu1 %v17708_v62  ;;  %7924 = vmatprep.subr.bf16.mxu0 %v17718_v2  ;;  %v537_v62 = vld [vmem:[#allocation5 + $0xde8] sm:$0xff]  ;;  %v17875_v2 = vcombine.low %v501_v52, %v513_v53  ;;  %v674_v52 = vld [vmem:[#allocation5 + $0x1230] sm:$0xff]  ;;  %v18030_v53 = vcombine.high %v650_v45, %v662_v46 }
 0x13a   :  { %v18053_v1 = vcombine.low %v674_v52, %v686_v54 }
 0x13c   :  { %7280 = vmatpush1.bf16.msra.mxu1 %v17707_v4  ;;  %7925 = vmatpush1.bf16.msra.mxu0 %v17717_v5  ;;  %v17900_v4 = vcombine.high %v525_v61, %v537_v62  ;;  %v549_v5 = vld [vmem:[#allocation5 + $0xe48] sm:$0xff] }
 0x13d   :  { %7281 = vmatprep.subr.bf16.mxu1 %v17732_v6  ;;  %7926 = vmatprep.subr.bf16.mxu0 %v17742_v10  ;;  %v561_v6 = vld [vmem:[#allocation5 + $0xea8] sm:$0xff]  ;;  %v17899_v10 = vcombine.low %v525_v61, %v537_v62  ;;  %v698_v61 = vld [vmem:[#allocation5 + $0x12f0] sm:$0xff]  ;;  %v18054_v62 = vcombine.high %v674_v52, %v686_v54 }
 0x13e   :  { %v18077_v9 = vcombine.low %v698_v61, %v710_v63  ;;  %v854_v52 = vld [vmem:[#allocation5 + $0x17d0] sm:$0xff] }
 0x140   :  { %7282 = vmatpush1.bf16.msra.mxu1 %v17731_v12  ;;  %7927 = vmatpush1.bf16.msra.mxu0 %v17741_v13  ;;  %v17924_v12 = vcombine.high %v549_v5, %v561_v6  ;;  %v573_v13 = vld [vmem:[#allocation5 + $0xf08] sm:$0xff] }
 0x141   :  { %7283 = vmatprep.subr.bf16.mxu1 %v17756_v14  ;;  %7928 = vmatprep.subr.bf16.mxu0 %v17766_v19  ;;  %v585_v14 = vld [vmem:[#allocation5 + $0xf68] sm:$0xff]  ;;  %v17923_v19 = vcombine.low %v549_v5, %v561_v6  ;;  %v722_v5 = vld [vmem:[#allocation5 + $0x13b0] sm:$0xff]  ;;  %v18078_v6 = vcombine.high %v698_v61, %v710_v63 }
 0x142   :  { %v18101_v18 = vcombine.low %v722_v5, %v734_v7  ;;  %v878_v61 = vld [vmem:[#allocation5 + $0x1890] sm:$0xff] }
 0x144   :  { %7284 = vmatpush1.bf16.msra.mxu1 %v17755_v21  ;;  %7929 = vmatpush1.bf16.msra.mxu0 %v17765_v22  ;;  %v17948_v21 = vcombine.high %v573_v13, %v585_v14  ;;  %v597_v22 = vld [vmem:[#allocation5 + $0xfc8] sm:$0xff] }
 0x145   :  { %7285 = vmatprep.subr.bf16.mxu1 %v17780_v23  ;;  %7930 = vmatprep.subr.bf16.mxu0 %v17790_v28  ;;  %v609_v23 = vld [vmem:[#allocation5 + $0x1028] sm:$0xff]  ;;  %v17947_v28 = vcombine.low %v573_v13, %v585_v14  ;;  %v746_v13 = vld [vmem:[#allocation5 + $0x1470] sm:$0xff]  ;;  %v18102_v14 = vcombine.high %v722_v5, %v734_v7 }
 0x146   :  { %v18125_v27 = vcombine.low %v746_v13, %v758_v16  ;;  %v902_v5 = vld [vmem:[#allocation5 + $0x1950] sm:$0xff] }
 0x148   :  { %7286 = vmatpush1.bf16.msra.mxu1 %v17779_v31  ;;  %7931 = vmatpush1.bf16.msra.mxu0 %v17789_v32  ;;  %v17972_v31 = vcombine.high %v597_v22, %v609_v23  ;;  %v621_v32 = vld [vmem:[#allocation5 + $0x1088] sm:$0xff] }
 0x149   :  { %7287 = vmatprep.subr.bf16.mxu1 %v17804_v33  ;;  %7932 = vmatprep.subr.bf16.mxu0 %v17814_v37  ;;  %v633_v33 = vld [vmem:[#allocation5 + $0x10e8] sm:$0xff]  ;;  %v17971_v37 = vcombine.low %v597_v22, %v609_v23  ;;  %v770_v22 = vld [vmem:[#allocation5 + $0x1530] sm:$0xff]  ;;  %v18126_v23 = vcombine.high %v746_v13, %v758_v16 }
 0x14a   :  { %v18149_v36 = vcombine.low %v770_v22, %v782_v24  ;;  %v926_v13 = vld [vmem:[#allocation5 + $0x1a10] sm:$0xff] }
 0x14c   :  { %7288 = vmatpush1.bf16.msra.mxu1 %v17803_v40  ;;  %7933 = vmatpush1.bf16.msra.mxu0 %v17813_v41  ;;  %v17996_v40 = vcombine.high %v621_v32, %v633_v33  ;;  %v645_v41 = vld [vmem:[#allocation5 + $0x1148] sm:$0xff] }
 0x14d   :  { %7289 = vmatprep.subr.bf16.mxu1 %v17828_v42  ;;  %7934 = vmatprep.subr.bf16.mxu0 %v17838_v47  ;;  %v657_v42 = vld [vmem:[#allocation5 + $0x11a8] sm:$0xff]  ;;  %v17995_v47 = vcombine.low %v621_v32, %v633_v33  ;;  %v794_v32 = vld [vmem:[#allocation5 + $0x15f0] sm:$0xff]  ;;  %v18150_v33 = vcombine.high %v770_v22, %v782_v24 }
 0x14e   :  { %v18173_v46 = vcombine.low %v794_v32, %v806_v34  ;;  %v950_v22 = vld [vmem:[#allocation5 + $0x1ad0] sm:$0xff] }
 0x150   :  { %7290 = vmatpush1.bf16.msra.mxu1 %v17827_v49  ;;  %7935 = vmatpush1.bf16.msra.mxu0 %v17837_v50  ;;  %v18020_v49 = vcombine.high %v645_v41, %v657_v42  ;;  %v669_v50 = vld [vmem:[#allocation5 + $0x1208] sm:$0xff] }
 0x151   :  { %7302 = vmatprep.subr.bf16.mxu1 %v17852_v51  ;;  %7947 = vmatprep.subr.bf16.mxu0 %v17862_v55  ;;  %v681_v51 = vld [vmem:[#allocation5 + $0x1268] sm:$0xff]  ;;  %v18019_v55 = vcombine.low %v645_v41, %v657_v42  ;;  %v818_v41 = vld [vmem:[#allocation5 + $0x16b0] sm:$0xff]  ;;  %v18174_v42 = vcombine.high %v794_v32, %v806_v34 }
 0x152   :  { %v974_v32 = vld [vmem:[#allocation5 + $0x1b90] sm:$0xff] }
 0x153   :  { %7292 = vmatmul.mubr.bf16.vlgmr.msra.gmra.mrb[4].mxu1 %v22121_v15  ;;  %7937 = vmatmul.mubr.bf16.vlgmr.msra.gmra.mrb[4].mxu0 %v22121_v15 }
 0x154   :  { %7303 = vmatpush1.bf16.msra.mxu1 %v17851_v57  ;;  %7948 = vmatpush1.bf16.msra.mxu0 %v17861_v59  ;;  %v18044_v57 = vcombine.high %v669_v50, %v681_v51  ;;  %v693_v59 = vld [vmem:[#allocation5 + $0x12c8] sm:$0xff] }
 0x155   :  { %7304 = vmatprep.subr.bf16.mxu1 %v17876_v60  ;;  %7949 = vmatprep.subr.bf16.mxu0 %v17886_v0  ;;  %v705_v60 = vld [vmem:[#allocation5 + $0x1328] sm:$0xff]  ;;  %v18043_v0 = vcombine.low %v669_v50, %v681_v51  ;;  %v842_v50 = vld [vmem:[#allocation5 + $0x1770] sm:$0xff] }
 0x156   :  { %7334 = vmatprep.mubr.bf16.mxu1 %v22123_v25  ;;  %7979 = vmatprep.mubr.bf16.mxu0 %v22123_v25  ;;  %v18221_v63 = vcombine.low %v842_v50, %v854_v52 }
 0x158   :  { %7305 = vmatpush1.bf16.msra.mxu1 %v17875_v2  ;;  %7950 = vmatpush1.bf16.msra.mxu0 %v17885_v3  ;;  %v18068_v2 = vcombine.high %v693_v59, %v705_v60  ;;  %v717_v3 = vld [vmem:[#allocation5 + $0x1388] sm:$0xff] }
 0x159   :  { %7306 = vmatprep.subr.bf16.mxu1 %v17900_v4  ;;  %7951 = vmatprep.subr.bf16.mxu0 %v17910_v8  ;;  %v729_v4 = vld [vmem:[#allocation5 + $0x13e8] sm:$0xff]  ;;  %v18067_v8 = vcombine.low %v693_v59, %v705_v60  ;;  %v866_v59 = vld [vmem:[#allocation5 + $0x1830] sm:$0xff]  ;;  %v18222_v60 = vcombine.high %v842_v50, %v854_v52 }
 0x15a   :  { %v18245_v7 = vcombine.low %v866_v59, %v878_v61  ;;  %v1022_v50 = vld [vmem:[#allocation5 + $0x1d10] sm:$0xff] }
 0x15c   :  { %7307 = vmatpush1.bf16.msra.mxu1 %v17899_v10  ;;  %7952 = vmatpush1.bf16.msra.mxu0 %v17909_v11  ;;  %v18092_v10 = vcombine.high %v717_v3, %v729_v4  ;;  %v741_v11 = vld [vmem:[#allocation5 + $0x1448] sm:$0xff] }
 0x15d   :  { %7308 = vmatprep.subr.bf16.mxu1 %v17924_v12  ;;  %7953 = vmatprep.subr.bf16.mxu0 %v17934_v17  ;;  %v753_v12 = vld [vmem:[#allocation5 + $0x14a8] sm:$0xff]  ;;  %v18091_v17 = vcombine.low %v717_v3, %v729_v4  ;;  %v890_v3 = vld [vmem:[#allocation5 + $0x18f0] sm:$0xff]  ;;  %v18246_v4 = vcombine.high %v866_v59, %v878_v61 }
 0x15e   :  { %v18269_v16 = vcombine.low %v890_v3, %v902_v5  ;;  %v1046_v59 = vld [vmem:[#allocation5 + $0x1dd0] sm:$0xff] }
 0x160   :  { %7309 = vmatpush1.bf16.msra.mxu1 %v17923_v19  ;;  %7954 = vmatpush1.bf16.msra.mxu0 %v17933_v20  ;;  %v18116_v19 = vcombine.high %v741_v11, %v753_v12  ;;  %v765_v20 = vld [vmem:[#allocation5 + $0x1508] sm:$0xff] }
 0x161   :  { %7310 = vmatprep.subr.bf16.mxu1 %v17948_v21  ;;  %7955 = vmatprep.subr.bf16.mxu0 %v17958_v26  ;;  %v777_v21 = vld [vmem:[#allocation5 + $0x1568] sm:$0xff]  ;;  %v18115_v26 = vcombine.low %v741_v11, %v753_v12  ;;  %v914_v11 = vld [vmem:[#allocation5 + $0x19b0] sm:$0xff]  ;;  %v18270_v12 = vcombine.high %v890_v3, %v902_v5 }
 0x162   :  { %v18293_v24 = vcombine.low %v914_v11, %v926_v13  ;;  %v1070_v3 = vld [vmem:[#allocation5 + $0x1e90] sm:$0xff] }
 0x164   :  { %7311 = vmatpush1.bf16.msra.mxu1 %v17947_v28  ;;  %7956 = vmatpush1.bf16.msra.mxu0 %v17957_v29  ;;  %v18140_v28 = vcombine.high %v765_v20, %v777_v21  ;;  %v789_v29 = vld [vmem:[#allocation5 + $0x15c8] sm:$0xff] }
 0x165   :  { %7312 = vmatprep.subr.bf16.mxu1 %v17972_v31  ;;  %7957 = vmatprep.subr.bf16.mxu0 %v17982_v35  ;;  %v801_v31 = vld [vmem:[#allocation5 + $0x1628] sm:$0xff]  ;;  %v18139_v35 = vcombine.low %v765_v20, %v777_v21  ;;  %v938_v20 = vld [vmem:[#allocation5 + $0x1a70] sm:$0xff]  ;;  %v18294_v21 = vcombine.high %v914_v11, %v926_v13 }
 0x166   :  { %v18163_v45 = vcombine.low %v789_v29, %v801_v31  ;;  %v18317_v34 = vcombine.low %v938_v20, %v950_v22  ;;  %v1094_v11 = vld [vmem:[#allocation5 + $0x1f50] sm:$0xff] }
 0x168   :  { %7313 = vmatpush1.bf16.msra.mxu1 %v17971_v37  ;;  %7958 = vmatpush1.bf16.msra.mxu0 %v17981_v38  ;;  %v18164_v37 = vcombine.high %v789_v29, %v801_v31  ;;  %v813_v38 = vld [vmem:[#allocation5 + $0x1688] sm:$0xff]  ;;  %v962_v29 = vld [vmem:[#allocation5 + $0x1b30] sm:$0xff]  ;;  %v18318_v31 = vcombine.high %v938_v20, %v950_v22 }
 0x169   :  { %7314 = vmatprep.subr.bf16.mxu1 %v17996_v40  ;;  %7959 = vmatprep.subr.bf16.mxu0 %v18006_v43  ;;  %v825_v40 = vld [vmem:[#allocation5 + $0x16e8] sm:$0xff]  ;;  %v830_v43 = vld [vmem:[#allocation5 + $0x1710] sm:$0xff] }
 0x16a   :  { %v18198_v51 = vcombine.high %v818_v41, %v830_v43  ;;  %v18197_v54 = vcombine.low %v818_v41, %v830_v43  ;;  %v998_v41 = vld [vmem:[#allocation5 + $0x1c50] sm:$0xff]  ;;  %v18341_v43 = vcombine.low %v962_v29, %v974_v32 }
 0x16b   :  { %v1118_v20 = vld [vmem:[#allocation5 + $0x2010] sm:$0xff] }
 0x16c   :  { %7315 = vmatpush1.bf16.msra.mxu1 %v17995_v47  ;;  %7960 = vmatpush1.bf16.msra.mxu0 %v18005_v48  ;;  %v18188_v47 = vcombine.high %v813_v38, %v825_v40  ;;  %v837_v48 = vld [vmem:[#allocation5 + $0x1748] sm:$0xff] }
 0x16d   :  { %7316 = vmatprep.subr.bf16.mxu1 %v18020_v49  ;;  %7961 = vmatprep.subr.bf16.mxu0 %v18030_v53  ;;  %v849_v49 = vld [vmem:[#allocation5 + $0x17a8] sm:$0xff]  ;;  %v18187_v53 = vcombine.low %v813_v38, %v825_v40  ;;  %v986_v38 = vld [vmem:[#allocation5 + $0x1bf0] sm:$0xff]  ;;  %v18342_v40 = vcombine.high %v962_v29, %v974_v32 }
 0x16e   :  { %v18365_v52 = vcombine.low %v986_v38, %v998_v41  ;;  %v1142_v29 = vld [vmem:[#allocation5 + $0x20d0] sm:$0xff] }
 0x170   :  { %7317 = vmatpush1.bf16.msra.mxu1 %v18019_v55  ;;  %7962 = vmatpush1.bf16.msra.mxu0 %v18029_v56  ;;  %v18212_v55 = vcombine.high %v837_v48, %v849_v49  ;;  %v861_v56 = vld [vmem:[#allocation5 + $0x1808] sm:$0xff] }
 0x171   :  { %7318 = vmatprep.subr.bf16.mxu1 %v18044_v57  ;;  %7963 = vmatprep.subr.bf16.mxu0 %v18054_v62  ;;  %v873_v57 = vld [vmem:[#allocation5 + $0x1868] sm:$0xff]  ;;  %v18211_v62 = vcombine.low %v837_v48, %v849_v49  ;;  %v1010_v48 = vld [vmem:[#allocation5 + $0x1cb0] sm:$0xff]  ;;  %v18366_v49 = vcombine.high %v986_v38, %v998_v41 }
 0x172   :  { %v18389_v61 = vcombine.low %v1010_v48, %v1022_v50  ;;  %v1166_v38 = vld [vmem:[#allocation5 + $0x2190] sm:$0xff] }
 0x174   :  { %7319 = vmatpush1.bf16.msra.mxu1 %v18043_v0  ;;  %7964 = vmatpush1.bf16.msra.mxu0 %v18053_v1  ;;  %v18236_v0 = vcombine.high %v861_v56, %v873_v57  ;;  %v885_v1 = vld [vmem:[#allocation5 + $0x18c8] sm:$0xff] }
 0x175   :  { %7320 = vmatprep.subr.bf16.mxu1 %v18068_v2  ;;  %7965 = vmatprep.subr.bf16.mxu0 %v18078_v6  ;;  %v897_v2 = vld [vmem:[#allocation5 + $0x1928] sm:$0xff]  ;;  %v18235_v6 = vcombine.low %v861_v56, %v873_v57  ;;  %v1034_v56 = vld [vmem:[#allocation5 + $0x1d70] sm:$0xff]  ;;  %v18390_v57 = vcombine.high %v1010_v48, %v1022_v50 }
 0x176   :  { %v18413_v5 = vcombine.low %v1034_v56, %v1046_v59  ;;  %v1190_v48 = vld [vmem:[#allocation5 + $0x2250] sm:$0xff] }
 0x178   :  { %7321 = vmatpush1.bf16.msra.mxu1 %v18067_v8  ;;  %7966 = vmatpush1.bf16.msra.mxu0 %v18077_v9  ;;  %v18260_v8 = vcombine.high %v885_v1, %v897_v2  ;;  %v909_v9 = vld [vmem:[#allocation5 + $0x1988] sm:$0xff] }
 0x179   :  { %7322 = vmatprep.subr.bf16.mxu1 %v18092_v10  ;;  %7967 = vmatprep.subr.bf16.mxu0 %v18102_v14  ;;  %v921_v10 = vld [vmem:[#allocation5 + $0x19e8] sm:$0xff]  ;;  %v18259_v14 = vcombine.low %v885_v1, %v897_v2  ;;  %v1058_v1 = vld [vmem:[#allocation5 + $0x1e30] sm:$0xff]  ;;  %v18414_v2 = vcombine.high %v1034_v56, %v1046_v59 }
 0x17a   :  { %v18437_v13 = vcombine.low %v1058_v1, %v1070_v3  ;;  %v1214_v56 = vld [vmem:[#allocation5 + $0x2310] sm:$0xff] }
 0x17c   :  { %7323 = vmatpush1.bf16.msra.mxu1 %v18091_v17  ;;  %7968 = vmatpush1.bf16.msra.mxu0 %v18101_v18  ;;  %v18284_v17 = vcombine.high %v909_v9, %v921_v10  ;;  %v933_v18 = vld [vmem:[#allocation5 + $0x1a48] sm:$0xff] }
 0x17d   :  { %7324 = vmatprep.subr.bf16.mxu1 %v18116_v19  ;;  %7969 = vmatprep.subr.bf16.mxu0 %v18126_v23  ;;  %v945_v19 = vld [vmem:[#allocation5 + $0x1aa8] sm:$0xff]  ;;  %v18283_v23 = vcombine.low %v909_v9, %v921_v10  ;;  %v1082_v9 = vld [vmem:[#allocation5 + $0x1ef0] sm:$0xff]  ;;  %v18438_v10 = vcombine.high %v1058_v1, %v1070_v3 }
 0x17e   :  { %v18461_v22 = vcombine.low %v1082_v9, %v1094_v11  ;;  %v1238_v1 = vld [vmem:[#allocation5 + $0x23d0] sm:$0xff] }
 0x180   :  { %7325 = vmatpush1.bf16.msra.mxu1 %v18115_v26  ;;  %7970 = vmatpush1.bf16.msra.mxu0 %v18125_v27  ;;  %v18308_v26 = vcombine.high %v933_v18, %v945_v19  ;;  %v957_v27 = vld [vmem:[#allocation5 + $0x1b08] sm:$0xff] }
 0x181   :  { %7326 = vmatprep.subr.bf16.mxu1 %v18140_v28  ;;  %7971 = vmatprep.subr.bf16.mxu0 %v18150_v33  ;;  %v969_v28 = vld [vmem:[#allocation5 + $0x1b68] sm:$0xff]  ;;  %v18307_v33 = vcombine.low %v933_v18, %v945_v19  ;;  %v1106_v18 = vld [vmem:[#allocation5 + $0x1fb0] sm:$0xff]  ;;  %v18462_v19 = vcombine.high %v1082_v9, %v1094_v11  ;;  %v112_v9 = vld [vmem:[#allocation5 + $0xa0] sm:$0xff] }
 0x182   :  { %v18485_v32 = vcombine.low %v1106_v18, %v1118_v20 }
 0x184   :  { %7327 = vmatpush1.bf16.msra.mxu1 %v18139_v35  ;;  %7972 = vmatpush1.bf16.msra.mxu0 %v18149_v36  ;;  %v18332_v35 = vcombine.high %v957_v27, %v969_v28  ;;  %v981_v36 = vld [vmem:[#allocation5 + $0x1bc8] sm:$0xff] }
 0x185   :  { %7328 = vmatprep.subr.bf16.mxu1 %v18164_v37  ;;  %7973 = vmatprep.subr.bf16.mxu0 %v18174_v42  ;;  %v993_v37 = vld [vmem:[#allocation5 + $0x1c28] sm:$0xff]  ;;  %v18331_v42 = vcombine.low %v957_v27, %v969_v28  ;;  %v1130_v27 = vld [vmem:[#allocation5 + $0x2070] sm:$0xff]  ;;  %v18486_v28 = vcombine.high %v1106_v18, %v1118_v20  ;;  %v136_v18 = vld [vmem:[#allocation5 + $0x160] sm:$0xff] }
 0x186   :  { %v18509_v41 = vcombine.low %v1130_v27, %v1142_v29 }
 0x188   :  { %7329 = vmatpush1.bf16.msra.mxu1 %v18163_v45  ;;  %7974 = vmatpush1.bf16.msra.mxu0 %v18173_v46  ;;  %v18356_v45 = vcombine.high %v981_v36, %v993_v37  ;;  %v1005_v46 = vld [vmem:[#allocation5 + $0x1c88] sm:$0xff] }
 0x189   :  { %7330 = vmatprep.subr.bf16.mxu1 %v18188_v47  ;;  %7975 = vmatprep.subr.bf16.mxu0 %v18198_v51  ;;  %v1017_v47 = vld [vmem:[#allocation5 + $0x1ce8] sm:$0xff]  ;;  %v18355_v51 = vcombine.low %v981_v36, %v993_v37  ;;  %v1154_v36 = vld [vmem:[#allocation5 + $0x2130] sm:$0xff]  ;;  %v18510_v37 = vcombine.high %v1130_v27, %v1142_v29  ;;  %v160_v27 = vld [vmem:[#allocation5 + $0x220] sm:$0xff] }
 0x18a   :  { %v18533_v50 = vcombine.low %v1154_v36, %v1166_v38 }
 0x18c   :  { %7331 = vmatpush1.bf16.msra.mxu1 %v18187_v53  ;;  %7976 = vmatpush1.bf16.msra.mxu0 %v18197_v54  ;;  %v18380_v53 = vcombine.high %v1005_v46, %v1017_v47  ;;  %v1029_v54 = vld [vmem:[#allocation5 + $0x1d48] sm:$0xff] }
 0x18d   :  { %7332 = vmatprep.subr.bf16.mxu1 %v18212_v55  ;;  %7977 = vmatprep.subr.bf16.mxu0 %v18222_v60  ;;  %v1041_v55 = vld [vmem:[#allocation5 + $0x1da8] sm:$0xff]  ;;  %v18379_v60 = vcombine.low %v1005_v46, %v1017_v47  ;;  %v1178_v46 = vld [vmem:[#allocation5 + $0x21f0] sm:$0xff]  ;;  %v18534_v47 = vcombine.high %v1154_v36, %v1166_v38  ;;  %v184_v36 = vld [vmem:[#allocation5 + $0x2e0] sm:$0xff] }
 0x18e   :  { %v18557_v59 = vcombine.low %v1178_v46, %v1190_v48 }
 0x190   :  { %7333 = vmatpush1.bf16.msra.mxu1 %v18211_v62  ;;  %7978 = vmatpush1.bf16.msra.mxu0 %v18221_v63  ;;  %v18404_v62 = vcombine.high %v1029_v54, %v1041_v55  ;;  %v1053_v63 = vld [vmem:[#allocation5 + $0x1e08] sm:$0xff] }
 0x191   :  { %7345 = vmatprep.subr.bf16.mxu1 %v18236_v0  ;;  %7990 = vmatprep.subr.bf16.mxu0 %v18246_v4  ;;  %v1065_v0 = vld [vmem:[#allocation5 + $0x1e68] sm:$0xff]  ;;  %v18403_v4 = vcombine.low %v1029_v54, %v1041_v55  ;;  %v18558_v54 = vcombine.high %v1178_v46, %v1190_v48  ;;  %v1202_v55 = vld [vmem:[#allocation5 + $0x22b0] sm:$0xff] }
 0x192   :  { %v18581_v3 = vcombine.low %v1202_v55, %v1214_v56 }
 0x193   :  { %7335 = vmatmul.mubr.bf16.vlgmr.msra.gmra.mrb[4].mxu1 %v22129_v30  ;;  %7980 = vmatmul.mubr.bf16.vlgmr.msra.gmra.mrb[4].mxu0 %v22129_v30 }
 0x194   :  { %7346 = vmatpush1.bf16.msra.mxu1 %v18235_v6  ;;  %7991 = vmatpush1.bf16.msra.mxu0 %v18245_v7  ;;  %v18428_v6 = vcombine.high %v1053_v63, %v1065_v0  ;;  %v1077_v7 = vld [vmem:[#allocation5 + $0x1ec8] sm:$0xff] }
 0x195   :  { %7347 = vmatprep.subr.bf16.mxu1 %v18260_v8  ;;  %7992 = vmatprep.subr.bf16.mxu0 %v18270_v12  ;;  %v1089_v8 = vld [vmem:[#allocation5 + $0x1f28] sm:$0xff]  ;;  %v18427_v12 = vcombine.low %v1053_v63, %v1065_v0  ;;  %v1226_v63 = vld [vmem:[#allocation5 + $0x2370] sm:$0xff]  ;;  %v18582_v0 = vcombine.high %v1202_v55, %v1214_v56  ;;  %v1244_v56 = vld [vmem:[#allocation7] sm:$0xff] }
 0x196   :  { %7377 = vmatprep.mubr.bf16.mxu1 %v22131_v39  ;;  %8022 = vmatprep.mubr.bf16.mxu0 %v22131_v39  ;;  %v18605_v11 = vcombine.low %v1226_v63, %v1238_v1 }
 0x198   :  { %7348 = vmatpush1.bf16.msra.mxu1 %v18259_v14  ;;  %7993 = vmatpush1.bf16.msra.mxu0 %v18269_v16  ;;  %v18452_v14 = vcombine.high %v1077_v7, %v1089_v8  ;;  %v1101_v16 = vld [vmem:[#allocation5 + $0x1f88] sm:$0xff] }
 0x199   :  { %7349 = vmatprep.subr.bf16.mxu1 %v18284_v17  ;;  %7994 = vmatprep.subr.bf16.mxu0 %v18294_v21  ;;  %v1113_v17 = vld [vmem:[#allocation5 + $0x1fe8] sm:$0xff]  ;;  %v18451_v21 = vcombine.low %v1077_v7, %v1089_v8  ;;  %v100_v7 = vld [vmem:[#allocation5 + $0x40] sm:$0xff]  ;;  %v18606_v8 = vcombine.high %v1226_v63, %v1238_v1  ;;  %v250_v1 = vld [vmem:[#allocation5 + $0x4f0] sm:$0xff] }
 0x19a   :  { %v17481_v20 = vcombine.low %v100_v7, %v112_v9 }
 0x19c   :  { %7350 = vmatpush1.bf16.msra.mxu1 %v18283_v23  ;;  %7995 = vmatpush1.bf16.msra.mxu0 %v18293_v24  ;;  %v18476_v23 = vcombine.high %v1101_v16, %v1113_v17  ;;  %v1125_v24 = vld [vmem:[#allocation5 + $0x2048] sm:$0xff] }
 0x19d   :  { %7351 = vmatprep.subr.bf16.mxu1 %v18308_v26  ;;  %7996 = vmatprep.subr.bf16.mxu0 %v18318_v31  ;;  %v1137_v26 = vld [vmem:[#allocation5 + $0x20a8] sm:$0xff]  ;;  %v18475_v31 = vcombine.low %v1101_v16, %v1113_v17  ;;  %v124_v16 = vld [vmem:[#allocation5 + $0x100] sm:$0xff]  ;;  %v17482_v17 = vcombine.high %v100_v7, %v112_v9 }
 0x19e   :  { %v17505_v29 = vcombine.low %v124_v16, %v136_v18 }
 0x1a0   :  { %7352 = vmatpush1.bf16.msra.mxu1 %v18307_v33  ;;  %7997 = vmatpush1.bf16.msra.mxu0 %v18317_v34  ;;  %v18500_v33 = vcombine.high %v1125_v24, %v1137_v26  ;;  %v1149_v34 = vld [vmem:[#allocation5 + $0x2108] sm:$0xff] }
 0x1a1   :  { %7353 = vmatprep.subr.bf16.mxu1 %v18332_v35  ;;  %7998 = vmatprep.subr.bf16.mxu0 %v18342_v40  ;;  %v1161_v35 = vld [vmem:[#allocation5 + $0x2168] sm:$0xff]  ;;  %v18499_v40 = vcombine.low %v1125_v24, %v1137_v26  ;;  %v148_v24 = vld [vmem:[#allocation5 + $0x1c0] sm:$0xff]  ;;  %v17506_v26 = vcombine.high %v124_v16, %v136_v18 }
 0x1a4   :  { %7354 = vmatpush1.bf16.msra.mxu1 %v18331_v42  ;;  %7999 = vmatpush1.bf16.msra.mxu0 %v18341_v43  ;;  %v18524_v42 = vcombine.high %v1149_v34, %v1161_v35  ;;  %v1173_v43 = vld [vmem:[#allocation5 + $0x21c8] sm:$0xff] }
 0x1a5   :  { %7355 = vmatprep.subr.bf16.mxu1 %v18356_v45  ;;  %8000 = vmatprep.subr.bf16.mxu0 %v18366_v49  ;;  %v1185_v45 = vld [vmem:[#allocation5 + $0x2228] sm:$0xff]  ;;  %v18523_v49 = vcombine.low %v1149_v34, %v1161_v35  ;;  %v172_v34 = vld [vmem:[#allocation5 + $0x280] sm:$0xff]  ;;  %v17530_v35 = vcombine.high %v148_v24, %v160_v27 }
 0x1a6   :  { %v17554_v46 = vcombine.high %v172_v34, %v184_v36 }
 0x1a8   :  { %7356 = vmatpush1.bf16.msra.mxu1 %v18355_v51  ;;  %8001 = vmatpush1.bf16.msra.mxu0 %v18365_v52  ;;  %v18548_v51 = vcombine.high %v1173_v43, %v1185_v45  ;;  %v1197_v52 = vld [vmem:[#allocation5 + $0x2288] sm:$0xff] }
 0x1a9   :  { %7357 = vmatprep.subr.bf16.mxu1 %v18380_v53  ;;  %8002 = vmatprep.subr.bf16.mxu0 %v18390_v57  ;;  %v1209_v53 = vld [vmem:[#allocation5 + $0x22e8] sm:$0xff]  ;;  %v18547_v57 = vcombine.low %v1173_v43, %v1185_v45  ;;  %v202_v43 = vld [vmem:[#allocation5 + $0x370] sm:$0xff]  ;;  %v196_v45 = vld [vmem:[#allocation5 + $0x340] sm:$0xff] }
 0x1ac   :  { %7358 = vmatpush1.bf16.msra.mxu1 %v18379_v60  ;;  %8003 = vmatpush1.bf16.msra.mxu0 %v18389_v61  ;;  %v18572_v60 = vcombine.high %v1197_v52, %v1209_v53  ;;  %v1221_v61 = vld [vmem:[#allocation5 + $0x2348] sm:$0xff] }
 0x1ad   :  { %7359 = vmatprep.subr.bf16.mxu1 %v18404_v62  ;;  %8004 = vmatprep.subr.bf16.mxu0 %v18414_v2  ;;  %v1233_v62 = vld [vmem:[#allocation5 + $0x23a8] sm:$0xff]  ;;  %v18571_v2 = vcombine.low %v1197_v52, %v1209_v53  ;;  %v214_v52 = vld [vmem:[#allocation5 + $0x3d0] sm:$0xff] }
 0x1ae   :  { %v226_v53 = vld [vmem:[#allocation5 + $0x430] sm:$0xff] }
 0x1b0   :  { %7360 = vmatpush1.bf16.msra.mxu1 %v18403_v4  ;;  %8005 = vmatpush1.bf16.msra.mxu0 %v18413_v5  ;;  %v18596_v4 = vcombine.high %v1221_v61, %v1233_v62  ;;  %v94_v5 = vld [vmem:[#allocation5 + $0x10] sm:$0xff] }
 0x1b1   :  { %7361 = vmatprep.subr.bf16.mxu1 %v18428_v6  ;;  %8006 = vmatprep.subr.bf16.mxu0 %v18438_v10  ;;  %v106_v6 = vld [vmem:[#allocation5 + $0x70] sm:$0xff]  ;;  %v18595_v10 = vcombine.low %v1221_v61, %v1233_v62 }
 0x1b2   :  { %v238_v62 = vld [vmem:[#allocation5 + $0x490] sm:$0xff] }
 0x1b4   :  { %7362 = vmatpush1.bf16.msra.mxu1 %v18427_v12  ;;  %8007 = vmatpush1.bf16.msra.mxu0 %v18437_v13  ;;  %v17470_v12 = vcombine.high %v94_v5, %v106_v6  ;;  %v118_v13 = vld [vmem:[#allocation5 + $0xd0] sm:$0xff] }
 0x1b5   :  { %7363 = vmatprep.subr.bf16.mxu1 %v18452_v14  ;;  %8008 = vmatprep.subr.bf16.mxu0 %v18462_v19  ;;  %v130_v14 = vld [vmem:[#allocation5 + $0x130] sm:$0xff]  ;;  %v17469_v19 = vcombine.low %v94_v5, %v106_v6  ;;  %v256_v5 = vld [vmem:[#allocation5 + $0x520] sm:$0xff] }
 0x1b8   :  { %7364 = vmatpush1.bf16.msra.mxu1 %v18451_v21  ;;  %8009 = vmatpush1.bf16.msra.mxu0 %v18461_v22  ;;  %v17494_v21 = vcombine.high %v118_v13, %v130_v14  ;;  %v142_v22 = vld [vmem:[#allocation5 + $0x190] sm:$0xff] }
 0x1b9   :  { %7365 = vmatprep.subr.bf16.mxu1 %v18476_v23  ;;  %8010 = vmatprep.subr.bf16.mxu0 %v18486_v28  ;;  %v154_v23 = vld [vmem:[#allocation5 + $0x1f0] sm:$0xff]  ;;  %v17493_v28 = vcombine.low %v118_v13, %v130_v14  ;;  %v268_v14 = vld [vmem:[#allocation5 + $0x580] sm:$0xff] }
 0x1ba   :  { %v17517_v38 = vcombine.low %v142_v22, %v154_v23  ;;  %v274_v13 = vld [vmem:[#allocation5 + $0x5b0] sm:$0xff] }
 0x1bc   :  { %7366 = vmatpush1.bf16.msra.mxu1 %v18475_v31  ;;  %8011 = vmatpush1.bf16.msra.mxu0 %v18485_v32  ;;  %v17518_v31 = vcombine.high %v142_v22, %v154_v23  ;;  %v166_v32 = vld [vmem:[#allocation5 + $0x250] sm:$0xff] }
 0x1bd   :  { %7367 = vmatprep.subr.bf16.mxu1 %v18500_v33  ;;  %8012 = vmatprep.subr.bf16.mxu0 %v18510_v37  ;;  %v178_v33 = vld [vmem:[#allocation5 + $0x2b0] sm:$0xff]  ;;  %v1250_v37 = vlaneseq }
 0x1bf   :  { %v22155_v48 = vshrl.u32 %v1250_v37, 7 }
 0x1c0   :  { %7368 = vmatpush1.bf16.msra.mxu1 %v18499_v40  ;;  %8013 = vmatpush1.bf16.msra.mxu0 %v18509_v41  ;;  %v17529_v40 = vcombine.low %v148_v24, %v160_v27  ;;  %v17542_v41 = vcombine.high %v166_v32, %v178_v33 }
 0x1c1   :  { %7369 = vmatprep.subr.bf16.mxu1 %v18524_v42  ;;  %8014 = vmatprep.subr.bf16.mxu0 %v18534_v47  ;;  %v190_v42 = vld [vmem:[#allocation5 + $0x310] sm:$0xff]  ;;  %v208_v47 = vld [vmem:[#allocation5 + $0x3a0] sm:$0xff]  ;;  %v22161_v61 = vsub.s32 1, %v22155_v48 }
 0x1c2   :  { %v17578_v55 = vcombine.high %v196_v45, %v208_v47  ;;  %v17577_v63 = vcombine.low %v196_v45, %v208_v47  ;;  %v292_v47 = vld [vmem:[#allocation5 + $0x640] sm:$0xff] }
 0x1c3   :  { %v1257_v7 = vrot.slane %v1244_v56, %v22161_v61 }
 0x1c4   :  { %7370 = vmatpush1.bf16.msra.mxu1 %v18523_v49  ;;  %8015 = vmatpush1.bf16.msra.mxu0 %v18533_v50  ;;  %v17541_v49 = vcombine.low %v166_v32, %v178_v33  ;;  %v17553_v50 = vcombine.low %v172_v34, %v184_v36  ;;  %v298_v36 = vld [vmem:[#allocation5 + $0x670] sm:$0xff] }
 0x1c5   :  { %7371 = vmatprep.subr.bf16.mxu1 %v18548_v51  ;;  %8016 = vmatprep.subr.bf16.mxu0 %v18558_v54  ;;  %v17566_v51 = vcombine.high %v190_v42, %v202_v43  ;;  %v220_v54 = vld [vmem:[#allocation5 + $0x400] sm:$0xff] }
 0x1c8   :  { %7372 = vmatpush1.bf16.msra.mxu1 %v18547_v57  ;;  %8017 = vmatpush1.bf16.msra.mxu0 %v18557_v59  ;;  %v232_v57 = vld [vmem:[#allocation5 + $0x460] sm:$0xff]  ;;  %v22158_v59 = vsub.s32 0, %v22155_v48 }
 0x1c9   :  { %7373 = vmatprep.subr.bf16.mxu1 %v18572_v60  ;;  %8018 = vmatprep.subr.bf16.mxu0 %v18582_v0  ;;  %v17565_v60 = vcombine.low %v190_v42, %v202_v43  ;;  %v17590_v0 = vcombine.high %v214_v52, %v226_v53 }
 0x1ca   :  { %v1253_v6 = vrot.slane %v1244_v56, %v22158_v59 }
 0x1cc   :  { %7374 = vmatpush1.bf16.msra.mxu1 %v18571_v2  ;;  %8019 = vmatpush1.bf16.msra.mxu0 %v18581_v3  ;;  %v244_v2 = vld [vmem:[#allocation5 + $0x4c0] sm:$0xff]  ;;  %v1245_v3 = vld [vmem:[#allocation7 + $0x8] sm:$0xff] }
 0x1cd   :  { %7375 = vmatprep.subr.bf16.mxu1 %v18596_v4  ;;  %8020 = vmatprep.subr.bf16.mxu0 %v18606_v8  ;;  %v17602_v4 = vcombine.high %v220_v54, %v232_v57  ;;  %v17589_v8 = vcombine.low %v214_v52, %v226_v53  ;;  %v1285_v9 = vrot.slane %v1245_v3, %v22158_v59 }
 0x1ce   :  { %v1289_v16 = vrot.slane %v1245_v3, %v22161_v61  ;;  %v17626_v18 = vcombine.high %v244_v2, %v256_v5  ;;  %v17625_v27 = vcombine.low %v244_v2, %v256_v5  ;;  %v22190_v3 = vld [vmem:[#allocation5 + $0x790] sm:$0xff] }
 0x1d0   :  { %7376 = vmatpush1.bf16.msra.mxu1 %v18595_v10  ;;  %8021 = vmatpush1.bf16.msra.mxu0 %v18605_v11  ;;  %v17601_v10 = vcombine.low %v220_v54, %v232_v57  ;;  %v17614_v11 = vcombine.high %v238_v62, %v250_v1  ;;  %v310_v54 = vld [vmem:[#allocation5 + $0x6d0] sm:$0xff] }
 0x1d1   :  { %7388 = vmatprep.subr.bf16.mxu1 %v17470_v12  ;;  %8162 = vmatprep.subr.bf16.mxu0 %v17482_v17  ;;  %v262_v12 = vld [vmem:[#allocation5 + $0x550] sm:$0xff] }
 0x1d2   :  { %v17638_v34 = vcombine.high %v262_v12, %v274_v13 }
 0x1d3   :  { %7378 = vmatmul.mubr.bf16.vlgmr.msra.gmra.mrb[4].mxu1 %v22137_v44  ;;  %8023 = vmatmul.mubr.bf16.vlgmr.msra.gmra.mrb[4].mxu0 %v22137_v44 }
 0x1d4   :  { %7389 = vmatpush1.bf16.msra.mxu1 %v17469_v19  ;;  %8163 = vmatpush1.bf16.msra.mxu0 %v17481_v20  ;;  %v280_v19 = vld [vmem:[#allocation5 + $0x5e0] sm:$0xff] }
 0x1d5   :  { %7390 = vmatprep.subr.bf16.mxu1 %v17494_v21  ;;  %8164 = vmatprep.subr.bf16.mxu0 %v17506_v26  ;;  %v17613_v26 = vcombine.low %v238_v62, %v250_v1  ;;  %v17650_v42 = vcombine.high %v268_v14, %v280_v19  ;;  %v17649_v52 = vcombine.low %v268_v14, %v280_v19  ;;  %v22200_v19 = vld [vmem:[#allocation5 + $0x8e0] sm:$0xff] }
 0x1d6   :  { %7420 = vmatprep.mubr.bf16.mxu1 %v22117_v58  ;;  %8194 = vmatprep.mubr.bf16.mxu0 %v22117_v58 }
 0x1d8   :  { %7391 = vmatpush1.bf16.msra.mxu1 %v17493_v28  ;;  %8165 = vmatpush1.bf16.msra.mxu0 %v17505_v29 }
 0x1d9   :  { %7392 = vmatprep.subr.bf16.mxu1 %v17518_v31  ;;  %8166 = vmatprep.subr.bf16.mxu0 %v17530_v35  ;;  %v286_v35 = vld [vmem:[#allocation5 + $0x610] sm:$0xff] }
 0x1da   :  { %v17662_v53 = vcombine.high %v286_v35, %v298_v36  ;;  %v17661_v2 = vcombine.low %v286_v35, %v298_v36 }
 0x1dc   :  { %7393 = vmatpush1.bf16.msra.mxu1 %v17517_v38  ;;  %8167 = vmatpush1.bf16.msra.mxu0 %v17529_v40 }
 0x1dd   :  { %7394 = vmatprep.subr.bf16.mxu1 %v17542_v41  ;;  %8168 = vmatprep.subr.bf16.mxu0 %v17554_v46  ;;  %v17637_v46 = vcombine.low %v262_v12, %v274_v13  ;;  %v22195_v12 = vld [vmem:[#allocation5 + $0x8b0] sm:$0xff] }
 0x1e0   :  { %7395 = vmatpush1.bf16.msra.mxu1 %v17541_v49  ;;  %8169 = vmatpush1.bf16.msra.mxu0 %v17553_v50  ;;  %v304_v49 = vld [vmem:[#allocation5 + $0x6a0] sm:$0xff] }
 0x1e1   :  { %7396 = vmatprep.subr.bf16.mxu1 %v17566_v51  ;;  %8170 = vmatprep.subr.bf16.mxu0 %v17578_v55  ;;  %v322_v55 = vld [vmem:[#allocation5 + $0x730] sm:$0xff]  ;;  %v17674_v62 = vcombine.high %v292_v47, %v304_v49  ;;  %v17673_v5 = vcombine.low %v292_v47, %v304_v49 }
 0x1e2   :  { %v17685_v13 = vcombine.low %v310_v54, %v322_v55 }
 0x1e4   :  { %7397 = vmatpush1.bf16.msra.mxu1 %v17565_v60  ;;  %8171 = vmatpush1.bf16.msra.mxu0 %v17577_v63  ;;  %v316_v63 = vld [vmem:[#allocation5 + $0x700] sm:$0xff] }
 0x1e5   :  { %7398 = vmatprep.subr.bf16.mxu1 %v17590_v0  ;;  %8172 = vmatprep.subr.bf16.mxu0 %v17602_v4  ;;  %v328_v0 = vld [vmem:[#allocation5 + $0x760] sm:$0xff] }
 0x1e6   :  { %v7250_v17 = vpop.f32.mrb[0].mxu1  ;;  %v7766_v22 = vpop.f32.mrb[0].mxu0 }
 0x1e7   :  { %v22167_v20 = vadd.f32 %v7250_v17, %v1253_v6  ;;  %v7252_v21 = vpop.f32.mrb[1].mxu1  ;;  %v22171_v28 = vadd.f32 %v7766_v22, %v1285_v9  ;;  %v7768_v29 = vpop.f32.mrb[1].mxu0 }
 0x1e8   :  { %v22169_v23 = vadd.f32 %v7252_v21, %v1257_v7  ;;  %v7254_v24 = vpop.f32.mrb[2].mxu1  ;;  %7399 = vmatpush1.bf16.msra.mxu1 %v17589_v8  ;;  %8173 = vmatpush1.bf16.msra.mxu0 %v17601_v10  ;;  %v22176_v37 = vadd.f32 %v7768_v29, %v1289_v16  ;;  %v7770_v38 = vpop.f32.mrb[2].mxu0  ;;  %v340_v8 = vld [vmem:[#allocation5 + $0x7c0] sm:$0xff]  ;;  %v17698_v10 = vcombine.high %v316_v63, %v328_v0 }
 0x1e9   :  { %v8726_v31 = vmul.f32 0.70710677, %v22167_v20  ;;  %v22174_v32 = vadd.f32 %v7254_v24, %v1253_v6  ;;  %v7256_v33 = vpop.f32.mrb[3].mxu1  ;;  %7400 = vmatprep.subr.bf16.mxu1 %v17614_v11  ;;  %8174 = vmatprep.subr.bf16.mxu0 %v17626_v18  ;;  %v7772_v43 = vpop.f32.mrb[3].mxu0  ;;  %v8734_v50 = vmul.f32 0.70710677, %v22171_v28  ;;  %v22185_v57 = vadd.f32 %v7770_v38, %v1285_v9 }
 0x1ea   :  { %v8727_v40 = vmul.f32 0.70710677, %v22169_v23  ;;  %v22179_v41 = vadd.f32 %v7256_v33, %v1257_v7  ;;  %v8735_v56 = vmul.f32 0.70710677, %v22176_v37  ;;  %v22187_v60 = vadd.f32 %v7772_v43, %v1289_v16  ;;  %v346_v7 = vld [vmem:[#allocation5 + $0x7f0] sm:$0xff]  ;;  %v352_v9 = vld [vmem:[#allocation5 + $0x820] sm:$0xff] }
 0x1eb   :  { %21796 = verf.f32 %v8726_v31  ;;  %v8750_v45 = vmul.f32 0.70710677, %v22174_v32  ;;  %v8758_v1 = vmul.f32 0.70710677, %v22185_v57  ;;  %v17686_v6 = vcombine.high %v310_v54, %v322_v55  ;;  %v22193_v11 = vld [vmem:[#allocation5 + $0x850] sm:$0xff]  ;;  %v22198_v18 = vld [vmem:[#allocation5 + $0x880] sm:$0xff] }
 0x1ec   :  { %21798 = verf.f32 %v8727_v40  ;;  %v8751_v51 = vmul.f32 0.70710677, %v22179_v41  ;;  %7401 = vmatpush1.bf16.msra.mxu1 %v17613_v26  ;;  %8175 = vmatpush1.bf16.msra.mxu0 %v17625_v27  ;;  %v8759_v4 = vmul.f32 0.70710677, %v22187_v60  ;;  %v17697_v16 = vcombine.low %v316_v63, %v328_v0  ;;  %v382_v43 = vld [vmem:[#allocation5 + $0x910] sm:$0xff]  ;;  %v400_v55 = vld [vmem:[#allocation5 + $0x9a0] sm:$0xff] }
 0x1ed   :  { %21800 = verf.f32 %v8750_v45  ;;  %7402 = vmatprep.subr.bf16.mxu1 %v17638_v34  ;;  %8176 = vmatprep.subr.bf16.mxu0 %v17650_v42  ;;  %v17710_v17 = vcombine.high %v22190_v3, %v346_v7  ;;  %v17709_v24 = vcombine.low %v22190_v3, %v346_v7  ;;  %v17721_v26 = vcombine.low %v340_v8, %v352_v9  ;;  %v412_v7 = vld [vmem:[#allocation5 + $0xa00] sm:$0xff] }
 0x1ee   :  { %21802 = verf.f32 %v8751_v51  ;;  %v17722_v27 = vcombine.high %v340_v8, %v352_v9  ;;  %v8678_v31 = vmul.f32 0.5, %v22167_v20  ;;  %v17733_v34 = vcombine.low %v22193_v11, %v22195_v12  ;;  %v388_v51 = vld [vmem:[#allocation5 + $0x940] sm:$0xff] }
 0x1ef   :  { %21804 = verf.f32 %v8734_v50  ;;  %v17734_v35 = vcombine.high %v22193_v11, %v22195_v12  ;;  %v8702_v38 = vmul.f32 0.5, %v22174_v32  ;;  %v17746_v42 = vcombine.high %v22198_v18, %v22200_v19  ;;  %v394_v50 = vld [vmem:[#allocation5 + $0x970] sm:$0xff]  ;;  %v424_v11 = vld [vmem:[#allocation5 + $0xa60] sm:$0xff] }
 0x1f0   :  { %7403 = vmatpush1.bf16.msra.mxu1 %v17637_v46  ;;  %21806 = verf.f32 %v8735_v56  ;;  %8177 = vmatpush1.bf16.msra.mxu0 %v17649_v52  ;;  %v8686_v45 = vmul.f32 0.5, %v22171_v28  ;;  %v8679_v20 = vmul.f32 0.5, %v22169_v23  ;;  %v8703_v47 = vmul.f32 0.5, %v22179_v41 }
 0x1f1   :  { %7404 = vmatprep.subr.bf16.mxu1 %v17662_v53  ;;  %21808 = verf.f32 %v8758_v1  ;;  %8178 = vmatprep.subr.bf16.mxu0 %v17674_v62  ;;  %v8687_v32 = vmul.f32 0.5, %v22176_v37  ;;  %v8710_v28 = vmul.f32 0.5, %v22185_v57  ;;  %v8711_v41 = vmul.f32 0.5, %v22187_v60  ;;  %v418_v57 = vld [vmem:[#allocation5 + $0xa30] sm:$0xff] }
 0x1f2   :  { %21810 = verf.f32 %v8759_v4  ;;  %v17745_v37 = vcombine.low %v22198_v18, %v22200_v19  ;;  %v17770_v60 = vcombine.high %v388_v51, %v400_v55  ;;  %v430_v19 = vld [vmem:[#allocation5 + $0xa90] sm:$0xff] }
 0x1f4   :  { %7405 = vmatpush1.bf16.msra.mxu1 %v17661_v2  ;;  %8179 = vmatpush1.bf16.msra.mxu0 %v17673_v5  ;;  %v17758_v5 = vcombine.high %v382_v43, %v394_v50 }
 0x1f5   :  { %v21797_v14 = vpop.eup %21796  ;;  %7406 = vmatprep.subr.bf16.mxu1 %v17686_v6  ;;  %8180 = vmatprep.subr.bf16.mxu0 %v17698_v10  ;;  %v406_v6 = vld [vmem:[#allocation5 + $0x9d0] sm:$0xff] }
 0x1f6   :  { %v21799_v21 = vpop.eup %21798  ;;  %v8822_v22 = vadd.f32 1.0, %v21797_v14  ;;  %v17757_v14 = vcombine.low %v382_v43, %v394_v50  ;;  %v17782_v18 = vcombine.high %v406_v6, %v418_v57  ;;  %v496_v50 = vld [vmem:[#allocation5 + $0xca0] sm:$0xff] }
 0x1f7   :  { %v21801_v29 = vpop.eup %21800  ;;  %v8823_v33 = vadd.f32 1.0, %v21799_v21  ;;  %v442_v21 = vld [vmem:[#allocation5 + $0xaf0] sm:$0xff] }
 0x1f8   :  { %v21803_v36 = vpop.eup %21802  ;;  %v8846_v40 = vadd.f32 1.0, %v21801_v29  ;;  %7407 = vmatpush1.bf16.msra.mxu1 %v17685_v13  ;;  %8181 = vmatpush1.bf16.msra.mxu0 %v17697_v16  ;;  %v8870_v53 = vmul.f32 %v8822_v22, %v8678_v31  ;;  %v436_v22 = vld [vmem:[#allocation5 + $0xac0] sm:$0xff]  ;;  %v17781_v29 = vcombine.low %v406_v6, %v418_v57  ;;  %v17793_v31 = vcombine.low %v412_v7, %v424_v11  ;;  %v550_v57 = vld [vmem:[#allocation5 + $0xe50] sm:$0xff] }
 0x1f9   :  { %v21805_v46 = vpop.eup %21804  ;;  %v8847_v49 = vadd.f32 1.0, %v21803_v36  ;;  %7408 = vmatprep.subr.bf16.mxu1 %v17710_v17  ;;  %8182 = vmatprep.subr.bf16.mxu0 %v17722_v27  ;;  %v8871_v63 = vmul.f32 %v8823_v33, %v8679_v20  ;;  %v17769_v17 = vcombine.low %v388_v51, %v400_v55  ;;  %v448_v27 = vld [vmem:[#allocation5 + $0xb20] sm:$0xff]  ;;  %v17806_v33 = vcombine.high %v430_v19, %v442_v21  ;;  %v490_v20 = vld [vmem:[#allocation5 + $0xc70] sm:$0xff] }
 0x1fa   :  { %v21807_v52 = vpop.eup %21806  ;;  %v8894_v54 = vmul.f32 %v8846_v40, %v8702_v38  ;;  %v8830_v56 = vadd.f32 1.0, %v21805_v46  ;;  %v460_v36 = vld [vmem:[#allocation5 + $0xb80] sm:$0xff]  ;;  %v17818_v38 = vcombine.high %v436_v22, %v448_v27  ;;  %v17817_v43 = vcombine.low %v436_v22, %v448_v27  ;;  %v478_v46 = vld [vmem:[#allocation5 + $0xc10] sm:$0xff] }
 0x1fb   :  { %v21809_v62 = vpop.eup %21808  ;;  %v8895_v23 = vmul.f32 %v8847_v49, %v8703_v47  ;;  %v8831_v0 = vadd.f32 1.0, %v21807_v52  ;;  %v472_v40 = vld [vmem:[#allocation5 + $0xbe0] sm:$0xff]  ;;  %v17854_v52 = vcombine.high %v478_v46, %v490_v20 }
 0x1fc   :  { %v21811_v1 = vpop.eup %21810  ;;  %v22217_v2 = vpack.c.bf16 %v8894_v54, %v8870_v53  ;;  %7409 = vmatpush1.bf16.msra.mxu1 %v17709_v24  ;;  %v8878_v3 = vmul.f32 %v8830_v56, %v8686_v45  ;;  %v8854_v4 = vadd.f32 1.0, %v21809_v62  ;;  %8183 = vmatpush1.bf16.msra.mxu0 %v17721_v26  ;;  %v17794_v26 = vcombine.high %v412_v7, %v424_v11  ;;  %v484_v47 = vld [vmem:[#allocation5 + $0xc40] sm:$0xff]  ;;  %v502_v53 = vld [vmem:[#allocation5 + $0xcd0] sm:$0xff] }
 0x1fd   :  { %7410 = vmatprep.subr.bf16.mxu1 %v17734_v35  ;;  %v8879_v8 = vmul.f32 %v8831_v0, %v8687_v32  ;;  %v8855_v9 = vadd.f32 1.0, %v21811_v1  ;;  %v22221_v10 = vpack.c.bf16 %v8895_v23, %v8871_v63  ;;  %8184 = vmatprep.subr.bf16.mxu0 %v17746_v42  ;;  %v466_v35 = vld [vmem:[#allocation5 + $0xbb0] sm:$0xff]  ;;  %v17805_v42 = vcombine.low %v430_v19, %v442_v21  ;;  %v508_v55 = vld [vmem:[#allocation5 + $0xd00] sm:$0xff] }
 0x1fe   :  { %v8902_v12 = vmul.f32 %v8854_v4, %v8710_v28  ;;  %v17842_v49 = vcombine.high %v460_v36, %v472_v40  ;;  %v17841_v32 = vcombine.low %v460_v36, %v472_v40  ;;  %v514_v54 = vld [vmem:[#allocation5 + $0xd30] sm:$0xff]  ;;  %v17866_v56 = vcombine.high %v484_v47, %v496_v50  ;;  %v520_v28 = vld [vmem:[#allocation5 + $0xd60] sm:$0xff] }
 0x1ff   :  { %v8903_v13 = vmul.f32 %v8855_v9, %v8711_v41  ;;  %v17853_v62 = vcombine.low %v478_v46, %v490_v20  ;;  %v17865_v63 = vcombine.low %v484_v47, %v496_v50  ;;  %v17878_v23 = vcombine.high %v502_v53, %v514_v54  ;;  %v526_v0 = vld [vmem:[#allocation5 + $0xd90] sm:$0xff]  ;;  %v532_v1 = vld [vmem:[#allocation5 + $0xdc0] sm:$0xff] }
 0x200   :  { %7411 = vmatpush1.bf16.msra.mxu1 %v17733_v34  ;;  %v22223_v16 = vpack.c.bf16 %v8902_v12, %v8878_v3  ;;  %8185 = vmatpush1.bf16.msra.mxu0 %v17745_v37  ;;  %v454_v34 = vld [vmem:[#allocation5 + $0xb50] sm:$0xff]  ;;  %v17890_v37 = vcombine.high %v508_v55, %v520_v28  ;;  %v544_v3 = vld [vmem:[#allocation5 + $0xe20] sm:$0xff]  ;;  %v17877_v4 = vcombine.low %v502_v53, %v514_v54 }
 0x201   :  { %7412 = vmatprep.subr.bf16.mxu1 %v17758_v5  ;;  %v22225_v24 = vpack.c.bf16 %v8903_v13, %v8879_v8  ;;  %8186 = vmatprep.subr.bf16.mxu0 %v17770_v60  ;;  %v17830_v45 = vcombine.high %v454_v34, %v466_v35  ;;  %v17829_v51 = vcombine.low %v454_v34, %v466_v35  ;;  %v538_v41 = vld [vmem:[#allocation5 + $0xdf0] sm:$0xff]  ;;  %v556_v8 = vld [vmem:[#allocation5 + $0xe80] sm:$0xff] }
 0x202   :  { %v17889_v5 = vcombine.low %v508_v55, %v520_v28  ;;  %v17902_v6 = vcombine.high %v526_v0, %v538_v41  ;;  %v562_v7 = vld [vmem:[#allocation5 + $0xeb0] sm:$0xff]  ;;  %v17914_v9 = vcombine.high %v532_v1, %v544_v3  ;;  %v568_v60 = vld [vmem:[#allocation5 + $0xee0] sm:$0xff]  ;;  %v17901_v11 = vcombine.low %v526_v0, %v538_v41 }
 0x203   :  { %v17913_v12 = vcombine.low %v532_v1, %v544_v3  ;;  %v17926_v13 = vcombine.high %v550_v57, %v562_v7  ;;  %v17938_v19 = vcombine.high %v556_v8, %v568_v60  ;;  %v592_v21 = vld [vmem:[#allocation5 + $0xfa0] sm:$0xff]  ;;  %v17925_v22 = vcombine.low %v550_v57, %v562_v7 }
 0x204   :  { %7413 = vmatpush1.bf16.msra.mxu1 %v17757_v14  ;;  %8187 = vmatpush1.bf16.msra.mxu0 %v17769_v17  ;;  %v574_v14 = vld [vmem:[#allocation5 + $0xf10] sm:$0xff]  ;;  %v616_v35 = vld [vmem:[#allocation5 + $0x1060] sm:$0xff] }
 0x205   :  { %7414 = vmatprep.subr.bf16.mxu1 %v17782_v18  ;;  %8188 = vmatprep.subr.bf16.mxu0 %v17794_v26  ;;  %v586_v17 = vld [vmem:[#allocation5 + $0xf70] sm:$0xff]  ;;  %v580_v18 = vld [vmem:[#allocation5 + $0xf40] sm:$0xff]  ;;  %v17937_v26 = vcombine.low %v556_v8, %v568_v60 }
 0x206   :  { %v17950_v27 = vcombine.high %v574_v14, %v586_v17  ;;  %v17962_v34 = vcombine.high %v580_v18, %v592_v21  ;;  %v17949_v36 = vcombine.low %v574_v14, %v586_v17  ;;  %v640_v20 = vld [vmem:[#allocation5 + $0x1120] sm:$0xff] }
 0x207   :  { %v664_v54 = vld [vmem:[#allocation5 + $0x11e0] sm:$0xff] }
 0x208   :  { %7415 = vmatpush1.bf16.msra.mxu1 %v17781_v29  ;;  %8189 = vmatpush1.bf16.msra.mxu0 %v17793_v31  ;;  %v598_v29 = vld [vmem:[#allocation5 + $0xfd0] sm:$0xff]  ;;  %v688_v41 = vld [vmem:[#allocation5 + $0x12a0] sm:$0xff] }
 0x209   :  { %7416 = vmatprep.subr.bf16.mxu1 %v17806_v33  ;;  %8190 = vmatprep.subr.bf16.mxu0 %v17818_v38  ;;  %v610_v31 = vld [vmem:[#allocation5 + $0x1030] sm:$0xff]  ;;  %v604_v33 = vld [vmem:[#allocation5 + $0x1000] sm:$0xff]  ;;  %v17961_v38 = vcombine.low %v580_v18, %v592_v21 }
 0x20a   :  { %v17974_v40 = vcombine.high %v598_v29, %v610_v31  ;;  %v17986_v46 = vcombine.high %v604_v33, %v616_v35  ;;  %v17973_v47 = vcombine.low %v598_v29, %v610_v31  ;;  %v712_v7 = vld [vmem:[#allocation5 + $0x1360] sm:$0xff] }
 0x20b   :  { %v736_v17 = vld [vmem:[#allocation5 + $0x1420] sm:$0xff] }
 0x20c   :  { %7417 = vmatpush1.bf16.msra.mxu1 %v17805_v42  ;;  %8191 = vmatpush1.bf16.msra.mxu0 %v17817_v43  ;;  %v622_v42 = vld [vmem:[#allocation5 + $0x1090] sm:$0xff]  ;;  %v760_v31 = vld [vmem:[#allocation5 + $0x14e0] sm:$0xff] }
 0x20d   :  { %7418 = vmatprep.subr.bf16.mxu1 %v17830_v45  ;;  %8192 = vmatprep.subr.bf16.mxu0 %v17842_v49  ;;  %v634_v43 = vld [vmem:[#allocation5 + $0x10f0] sm:$0xff]  ;;  %v628_v45 = vld [vmem:[#allocation5 + $0x10c0] sm:$0xff]  ;;  %v17985_v49 = vcombine.low %v604_v33, %v616_v35 }
 0x20e   :  { %v17998_v50 = vcombine.high %v622_v42, %v634_v43  ;;  %v18010_v53 = vcombine.high %v628_v45, %v640_v20  ;;  %v17997_v55 = vcombine.low %v622_v42, %v634_v43  ;;  %v784_v43 = vld [vmem:[#allocation5 + $0x15a0] sm:$0xff] }
 0x210   :  { %7419 = vmatpush1.bf16.msra.mxu1 %v17829_v51  ;;  %8193 = vmatpush1.bf16.msra.mxu0 %v17841_v32  ;;  %v646_v51 = vld [vmem:[#allocation5 + $0x1150] sm:$0xff] }
 0x211   :  { %7431 = vmatprep.subr.bf16.mxu1 %v17854_v52  ;;  %8205 = vmatprep.subr.bf16.mxu0 %v17866_v56  ;;  %v658_v32 = vld [vmem:[#allocation5 + $0x11b0] sm:$0xff]  ;;  %v652_v52 = vld [vmem:[#allocation5 + $0x1180] sm:$0xff]  ;;  %v18009_v56 = vcombine.low %v628_v45, %v640_v20 }
 0x212   :  { %v18022_v28 = vcombine.high %v646_v51, %v658_v32  ;;  %v18034_v0 = vcombine.high %v652_v52, %v664_v54  ;;  %v18021_v1 = vcombine.low %v646_v51, %v658_v32  ;;  %v808_v32 = vld [vmem:[#allocation5 + $0x1660] sm:$0xff] }
 0x213   :  { %7421 = vmatmul.mubr.bf16.vlgmr.msra.gmra.mrb[8].mxu1 %v22121_v15  ;;  %8195 = vmatmul.mubr.bf16.vlgmr.msra.gmra.mrb[8].mxu0 %v22121_v15 }
 0x214   :  { %7432 = vmatpush1.bf16.msra.mxu1 %v17853_v62  ;;  %8206 = vmatpush1.bf16.msra.mxu0 %v17865_v63  ;;  %v670_v62 = vld [vmem:[#allocation5 + $0x1210] sm:$0xff] }
 0x215   :  { %7433 = vmatprep.subr.bf16.mxu1 %v17878_v23  ;;  %8207 = vmatprep.subr.bf16.mxu0 %v17890_v37  ;;  %v682_v63 = vld [vmem:[#allocation5 + $0x1270] sm:$0xff]  ;;  %v676_v23 = vld [vmem:[#allocation5 + $0x1240] sm:$0xff]  ;;  %v18033_v37 = vcombine.low %v652_v52, %v664_v54 }
 0x216   :  { %7463 = vmatprep.mubr.bf16.mxu1 %v22123_v25  ;;  %8237 = vmatprep.mubr.bf16.mxu0 %v22123_v25  ;;  %v18046_v3 = vcombine.high %v670_v62, %v682_v63  ;;  %v18058_v57 = vcombine.high %v676_v23, %v688_v41  ;;  %v18045_v8 = vcombine.low %v670_v62, %v682_v63  ;;  %v832_v63 = vld [vmem:[#allocation5 + $0x1720] sm:$0xff] }
 0x218   :  { %7434 = vmatpush1.bf16.msra.mxu1 %v17877_v4  ;;  %8208 = vmatpush1.bf16.msra.mxu0 %v17889_v5  ;;  %v694_v4 = vld [vmem:[#allocation5 + $0x12d0] sm:$0xff] }
 0x219   :  { %7435 = vmatprep.subr.bf16.mxu1 %v17902_v6  ;;  %8209 = vmatprep.subr.bf16.mxu0 %v17914_v9  ;;  %v706_v5 = vld [vmem:[#allocation5 + $0x1330] sm:$0xff]  ;;  %v700_v6 = vld [vmem:[#allocation5 + $0x1300] sm:$0xff]  ;;  %v18057_v9 = vcombine.low %v676_v23, %v688_v41 }
 0x21a   :  { %v18070_v60 = vcombine.high %v694_v4, %v706_v5  ;;  %v18082_v14 = vcombine.high %v700_v6, %v712_v7  ;;  %v18069_v18 = vcombine.low %v694_v4, %v706_v5  ;;  %v856_v5 = vld [vmem:[#allocation5 + $0x17e0] sm:$0xff] }
 0x21c   :  { %7436 = vmatpush1.bf16.msra.mxu1 %v17901_v11  ;;  %8210 = vmatpush1.bf16.msra.mxu0 %v17913_v12  ;;  %v718_v11 = vld [vmem:[#allocation5 + $0x1390] sm:$0xff] }
 0x21d   :  { %7437 = vmatprep.subr.bf16.mxu1 %v17926_v13  ;;  %8211 = vmatprep.subr.bf16.mxu0 %v17938_v19  ;;  %v730_v12 = vld [vmem:[#allocation5 + $0x13f0] sm:$0xff]  ;;  %v724_v13 = vld [vmem:[#allocation5 + $0x13c0] sm:$0xff]  ;;  %v18081_v19 = vcombine.low %v700_v6, %v712_v7 }
 0x21e   :  { %v18094_v21 = vcombine.high %v718_v11, %v730_v12  ;;  %v18106_v29 = vcombine.high %v724_v13, %v736_v17  ;;  %v18093_v33 = vcombine.low %v718_v11, %v730_v12  ;;  %v880_v12 = vld [vmem:[#allocation5 + $0x18a0] sm:$0xff] }
 0x220   :  { %7438 = vmatpush1.bf16.msra.mxu1 %v17925_v22  ;;  %8212 = vmatpush1.bf16.msra.mxu0 %v17937_v26  ;;  %v742_v22 = vld [vmem:[#allocation5 + $0x1450] sm:$0xff] }
 0x221   :  { %7439 = vmatprep.subr.bf16.mxu1 %v17950_v27  ;;  %8213 = vmatprep.subr.bf16.mxu0 %v17962_v34  ;;  %v754_v26 = vld [vmem:[#allocation5 + $0x14b0] sm:$0xff]  ;;  %v748_v27 = vld [vmem:[#allocation5 + $0x1480] sm:$0xff]  ;;  %v18105_v34 = vcombine.low %v724_v13, %v736_v17 }
 0x222   :  { %v18118_v35 = vcombine.high %v742_v22, %v754_v26  ;;  %v18130_v42 = vcombine.high %v748_v27, %v760_v31  ;;  %v18117_v45 = vcombine.low %v742_v22, %v754_v26  ;;  %v904_v26 = vld [vmem:[#allocation5 + $0x1960] sm:$0xff] }
 0x224   :  { %7440 = vmatpush1.bf16.msra.mxu1 %v17949_v36  ;;  %8214 = vmatpush1.bf16.msra.mxu0 %v17961_v38  ;;  %v766_v36 = vld [vmem:[#allocation5 + $0x1510] sm:$0xff] }
 0x225   :  { %7441 = vmatprep.subr.bf16.mxu1 %v17974_v40  ;;  %8215 = vmatprep.subr.bf16.mxu0 %v17986_v46  ;;  %v778_v38 = vld [vmem:[#allocation5 + $0x1570] sm:$0xff]  ;;  %v772_v40 = vld [vmem:[#allocation5 + $0x1540] sm:$0xff]  ;;  %v18129_v46 = vcombine.low %v748_v27, %v760_v31 }
 0x226   :  { %v18142_v20 = vcombine.high %v766_v36, %v778_v38  ;;  %v18154_v51 = vcombine.high %v772_v40, %v784_v43  ;;  %v18141_v52 = vcombine.low %v766_v36, %v778_v38  ;;  %v928_v38 = vld [vmem:[#allocation5 + $0x1a20] sm:$0xff] }
 0x228   :  { %7442 = vmatpush1.bf16.msra.mxu1 %v17973_v47  ;;  %8216 = vmatpush1.bf16.msra.mxu0 %v17985_v49  ;;  %v790_v47 = vld [vmem:[#allocation5 + $0x15d0] sm:$0xff] }
 0x229   :  { %7443 = vmatprep.subr.bf16.mxu1 %v17998_v50  ;;  %8217 = vmatprep.subr.bf16.mxu0 %v18010_v53  ;;  %v802_v49 = vld [vmem:[#allocation5 + $0x1630] sm:$0xff]  ;;  %v796_v50 = vld [vmem:[#allocation5 + $0x1600] sm:$0xff]  ;;  %v18153_v53 = vcombine.low %v772_v40, %v784_v43 }
 0x22a   :  { %v18166_v54 = vcombine.high %v790_v47, %v802_v49  ;;  %v18178_v62 = vcombine.high %v796_v50, %v808_v32  ;;  %v18165_v23 = vcombine.low %v790_v47, %v802_v49  ;;  %v952_v49 = vld [vmem:[#allocation5 + $0x1ae0] sm:$0xff] }
 0x22c   :  { %7444 = vmatpush1.bf16.msra.mxu1 %v17997_v55  ;;  %8218 = vmatpush1.bf16.msra.mxu0 %v18009_v56  ;;  %v814_v55 = vld [vmem:[#allocation5 + $0x1690] sm:$0xff] }
 0x22d   :  { %7445 = vmatprep.subr.bf16.mxu1 %v18022_v28  ;;  %8219 = vmatprep.subr.bf16.mxu0 %v18034_v0  ;;  %v826_v56 = vld [vmem:[#allocation5 + $0x16f0] sm:$0xff]  ;;  %v820_v28 = vld [vmem:[#allocation5 + $0x16c0] sm:$0xff]  ;;  %v18177_v0 = vcombine.low %v796_v50, %v808_v32 }
 0x22e   :  { %v18190_v41 = vcombine.high %v814_v55, %v826_v56  ;;  %v18202_v4 = vcombine.high %v820_v28, %v832_v63  ;;  %v18189_v6 = vcombine.low %v814_v55, %v826_v56  ;;  %v976_v56 = vld [vmem:[#allocation5 + $0x1ba0] sm:$0xff] }
 0x230   :  { %7446 = vmatpush1.bf16.msra.mxu1 %v18021_v1  ;;  %8220 = vmatpush1.bf16.msra.mxu0 %v18033_v37  ;;  %v838_v1 = vld [vmem:[#allocation5 + $0x1750] sm:$0xff] }
 0x231   :  { %7447 = vmatprep.subr.bf16.mxu1 %v18046_v3  ;;  %8221 = vmatprep.subr.bf16.mxu0 %v18058_v57  ;;  %v850_v37 = vld [vmem:[#allocation5 + $0x17b0] sm:$0xff]  ;;  %v844_v3 = vld [vmem:[#allocation5 + $0x1780] sm:$0xff]  ;;  %v18201_v57 = vcombine.low %v820_v28, %v832_v63 }
 0x232   :  { %v18214_v7 = vcombine.high %v838_v1, %v850_v37  ;;  %v18226_v11 = vcombine.high %v844_v3, %v856_v5  ;;  %v18213_v13 = vcombine.low %v838_v1, %v850_v37  ;;  %v1000_v37 = vld [vmem:[#allocation5 + $0x1c60] sm:$0xff] }
 0x234   :  { %7448 = vmatpush1.bf16.msra.mxu1 %v18045_v8  ;;  %8222 = vmatpush1.bf16.msra.mxu0 %v18057_v9  ;;  %v862_v8 = vld [vmem:[#allocation5 + $0x1810] sm:$0xff] }
 0x235   :  { %7449 = vmatprep.subr.bf16.mxu1 %v18070_v60  ;;  %8223 = vmatprep.subr.bf16.mxu0 %v18082_v14  ;;  %v874_v9 = vld [vmem:[#allocation5 + $0x1870] sm:$0xff]  ;;  %v868_v60 = vld [vmem:[#allocation5 + $0x1840] sm:$0xff]  ;;  %v18225_v14 = vcombine.low %v844_v3, %v856_v5 }
 0x236   :  { %v18238_v17 = vcombine.high %v862_v8, %v874_v9  ;;  %v18250_v22 = vcombine.high %v868_v60, %v880_v12  ;;  %v18237_v27 = vcombine.low %v862_v8, %v874_v9  ;;  %v1024_v9 = vld [vmem:[#allocation5 + $0x1d20] sm:$0xff] }
 0x238   :  { %7450 = vmatpush1.bf16.msra.mxu1 %v18069_v18  ;;  %8224 = vmatpush1.bf16.msra.mxu0 %v18081_v19  ;;  %v886_v18 = vld [vmem:[#allocation5 + $0x18d0] sm:$0xff] }
 0x239   :  { %7451 = vmatprep.subr.bf16.mxu1 %v18094_v21  ;;  %8225 = vmatprep.subr.bf16.mxu0 %v18106_v29  ;;  %v898_v19 = vld [vmem:[#allocation5 + $0x1930] sm:$0xff]  ;;  %v892_v21 = vld [vmem:[#allocation5 + $0x1900] sm:$0xff]  ;;  %v18249_v29 = vcombine.low %v868_v60, %v880_v12 }
 0x23a   :  { %v18262_v31 = vcombine.high %v886_v18, %v898_v19  ;;  %v18274_v36 = vcombine.high %v892_v21, %v904_v26  ;;  %v18261_v40 = vcombine.low %v886_v18, %v898_v19  ;;  %v1048_v19 = vld [vmem:[#allocation5 + $0x1de0] sm:$0xff] }
 0x23c   :  { %7452 = vmatpush1.bf16.msra.mxu1 %v18093_v33  ;;  %8226 = vmatpush1.bf16.msra.mxu0 %v18105_v34  ;;  %v910_v33 = vld [vmem:[#allocation5 + $0x1990] sm:$0xff] }
 0x23d   :  { %7453 = vmatprep.subr.bf16.mxu1 %v18118_v35  ;;  %8227 = vmatprep.subr.bf16.mxu0 %v18130_v42  ;;  %v922_v34 = vld [vmem:[#allocation5 + $0x19f0] sm:$0xff]  ;;  %v916_v35 = vld [vmem:[#allocation5 + $0x19c0] sm:$0xff]  ;;  %v18273_v42 = vcombine.low %v892_v21, %v904_v26 }
 0x23e   :  { %v18286_v43 = vcombine.high %v910_v33, %v922_v34  ;;  %v18298_v47 = vcombine.high %v916_v35, %v928_v38  ;;  %v18285_v50 = vcombine.low %v910_v33, %v922_v34  ;;  %v1072_v34 = vld [vmem:[#allocation5 + $0x1ea0] sm:$0xff] }
 0x240   :  { %7454 = vmatpush1.bf16.msra.mxu1 %v18117_v45  ;;  %8228 = vmatpush1.bf16.msra.mxu0 %v18129_v46  ;;  %v934_v45 = vld [vmem:[#allocation5 + $0x1a50] sm:$0xff] }
 0x241   :  { %7455 = vmatprep.subr.bf16.mxu1 %v18142_v20  ;;  %8229 = vmatprep.subr.bf16.mxu0 %v18154_v51  ;;  %v946_v46 = vld [vmem:[#allocation5 + $0x1ab0] sm:$0xff]  ;;  %v940_v20 = vld [vmem:[#allocation5 + $0x1a80] sm:$0xff]  ;;  %v18297_v51 = vcombine.low %v916_v35, %v928_v38 }
 0x242   :  { %v18310_v32 = vcombine.high %v934_v45, %v946_v46  ;;  %v18322_v55 = vcombine.high %v940_v20, %v952_v49  ;;  %v18309_v28 = vcombine.low %v934_v45, %v946_v46  ;;  %v1096_v46 = vld [vmem:[#allocation5 + $0x1f60] sm:$0xff] }
 0x244   :  { %7456 = vmatpush1.bf16.msra.mxu1 %v18141_v52  ;;  %8230 = vmatpush1.bf16.msra.mxu0 %v18153_v53  ;;  %v958_v52 = vld [vmem:[#allocation5 + $0x1b10] sm:$0xff] }
 0x245   :  { %7457 = vmatprep.subr.bf16.mxu1 %v18166_v54  ;;  %8231 = vmatprep.subr.bf16.mxu0 %v18178_v62  ;;  %v970_v53 = vld [vmem:[#allocation5 + $0x1b70] sm:$0xff]  ;;  %v964_v54 = vld [vmem:[#allocation5 + $0x1b40] sm:$0xff]  ;;  %v18321_v62 = vcombine.low %v940_v20, %v952_v49 }
 0x246   :  { %v18334_v63 = vcombine.high %v958_v52, %v970_v53  ;;  %v18346_v1 = vcombine.high %v964_v54, %v976_v56  ;;  %v18333_v3 = vcombine.low %v958_v52, %v970_v53  ;;  %v1120_v53 = vld [vmem:[#allocation5 + $0x2020] sm:$0xff] }
 0x248   :  { %7458 = vmatpush1.bf16.msra.mxu1 %v18165_v23  ;;  %8232 = vmatpush1.bf16.msra.mxu0 %v18177_v0  ;;  %v982_v23 = vld [vmem:[#allocation5 + $0x1bd0] sm:$0xff] }
 0x249   :  { %7459 = vmatprep.subr.bf16.mxu1 %v18190_v41  ;;  %8233 = vmatprep.subr.bf16.mxu0 %v18202_v4  ;;  %v994_v0 = vld [vmem:[#allocation5 + $0x1c30] sm:$0xff]  ;;  %v988_v41 = vld [vmem:[#allocation5 + $0x1c00] sm:$0xff]  ;;  %v18345_v4 = vcombine.low %v964_v54, %v976_v56 }
 0x24a   :  { %v18358_v5 = vcombine.high %v982_v23, %v994_v0  ;;  %v18370_v8 = vcombine.high %v988_v41, %v1000_v37  ;;  %v18357_v60 = vcombine.low %v982_v23, %v994_v0  ;;  %v1144_v0 = vld [vmem:[#allocation5 + $0x20e0] sm:$0xff] }
 0x24c   :  { %7460 = vmatpush1.bf16.msra.mxu1 %v18189_v6  ;;  %8234 = vmatpush1.bf16.msra.mxu0 %v18201_v57  ;;  %v1006_v6 = vld [vmem:[#allocation5 + $0x1c90] sm:$0xff] }
 0x24d   :  { %7461 = vmatprep.subr.bf16.mxu1 %v18214_v7  ;;  %8235 = vmatprep.subr.bf16.mxu0 %v18226_v11  ;;  %v1018_v57 = vld [vmem:[#allocation5 + $0x1cf0] sm:$0xff]  ;;  %v1012_v7 = vld [vmem:[#allocation5 + $0x1cc0] sm:$0xff]  ;;  %v18369_v11 = vcombine.low %v988_v41, %v1000_v37 }
 0x24e   :  { %v18382_v12 = vcombine.high %v1006_v6, %v1018_v57  ;;  %v18394_v18 = vcombine.high %v1012_v7, %v1024_v9  ;;  %v18381_v21 = vcombine.low %v1006_v6, %v1018_v57  ;;  %v1168_v57 = vld [vmem:[#allocation5 + $0x21a0] sm:$0xff] }
 0x250   :  { %7462 = vmatpush1.bf16.msra.mxu1 %v18213_v13  ;;  %8236 = vmatpush1.bf16.msra.mxu0 %v18225_v14  ;;  %v1030_v13 = vld [vmem:[#allocation5 + $0x1d50] sm:$0xff] }
 0x251   :  { %7474 = vmatprep.subr.bf16.mxu1 %v18238_v17  ;;  %8248 = vmatprep.subr.bf16.mxu0 %v18250_v22  ;;  %v1042_v14 = vld [vmem:[#allocation5 + $0x1db0] sm:$0xff]  ;;  %v1036_v17 = vld [vmem:[#allocation5 + $0x1d80] sm:$0xff]  ;;  %v18393_v22 = vcombine.low %v1012_v7, %v1024_v9 }
 0x252   :  { %v18406_v26 = vcombine.high %v1030_v13, %v1042_v14  ;;  %v18418_v33 = vcombine.high %v1036_v17, %v1048_v19  ;;  %v18405_v35 = vcombine.low %v1030_v13, %v1042_v14  ;;  %v1192_v14 = vld [vmem:[#allocation5 + $0x2260] sm:$0xff] }
 0x253   :  { %7464 = vmatmul.mubr.bf16.vlgmr.msra.gmra.mrb[8].mxu1 %v22129_v30  ;;  %8238 = vmatmul.mubr.bf16.vlgmr.msra.gmra.mrb[8].mxu0 %v22129_v30 }
 0x254   :  { %7475 = vmatpush1.bf16.msra.mxu1 %v18237_v27  ;;  %8249 = vmatpush1.bf16.msra.mxu0 %v18249_v29  ;;  %v1054_v27 = vld [vmem:[#allocation5 + $0x1e10] sm:$0xff] }
 0x255   :  { %7476 = vmatprep.subr.bf16.mxu1 %v18262_v31  ;;  %8250 = vmatprep.subr.bf16.mxu0 %v18274_v36  ;;  %v1066_v29 = vld [vmem:[#allocation5 + $0x1e70] sm:$0xff]  ;;  %v1060_v31 = vld [vmem:[#allocation5 + $0x1e40] sm:$0xff]  ;;  %v18417_v36 = vcombine.low %v1036_v17, %v1048_v19 }
 0x256   :  { %7506 = vmatprep.mubr.bf16.mxu1 %v22131_v39  ;;  %8280 = vmatprep.mubr.bf16.mxu0 %v22131_v39  ;;  %v18430_v38 = vcombine.high %v1054_v27, %v1066_v29  ;;  %v18442_v45 = vcombine.high %v1060_v31, %v1072_v34  ;;  %v18429_v20 = vcombine.low %v1054_v27, %v1066_v29  ;;  %v1216_v29 = vld [vmem:[#allocation5 + $0x2320] sm:$0xff] }
 0x258   :  { %7477 = vmatpush1.bf16.msra.mxu1 %v18261_v40  ;;  %8251 = vmatpush1.bf16.msra.mxu0 %v18273_v42  ;;  %v1078_v40 = vld [vmem:[#allocation5 + $0x1ed0] sm:$0xff] }
 0x259   :  { %7478 = vmatprep.subr.bf16.mxu1 %v18286_v43  ;;  %8252 = vmatprep.subr.bf16.mxu0 %v18298_v47  ;;  %v1090_v42 = vld [vmem:[#allocation5 + $0x1f30] sm:$0xff]  ;;  %v1084_v43 = vld [vmem:[#allocation5 + $0x1f00] sm:$0xff]  ;;  %v18441_v47 = vcombine.low %v1060_v31, %v1072_v34 }
 0x25a   :  { %v18454_v49 = vcombine.high %v1078_v40, %v1090_v42  ;;  %v18466_v52 = vcombine.high %v1084_v43, %v1096_v46  ;;  %v18453_v54 = vcombine.low %v1078_v40, %v1090_v42  ;;  %v1240_v42 = vld [vmem:[#allocation5 + $0x23e0] sm:$0xff] }
 0x25c   :  { %7479 = vmatpush1.bf16.msra.mxu1 %v18285_v50  ;;  %8253 = vmatpush1.bf16.msra.mxu0 %v18297_v51  ;;  %v1102_v50 = vld [vmem:[#allocation5 + $0x1f90] sm:$0xff] }
 0x25d   :  { %7480 = vmatprep.subr.bf16.mxu1 %v18310_v32  ;;  %8254 = vmatprep.subr.bf16.mxu0 %v18322_v55  ;;  %v1114_v51 = vld [vmem:[#allocation5 + $0x1ff0] sm:$0xff]  ;;  %v1108_v32 = vld [vmem:[#allocation5 + $0x1fc0] sm:$0xff]  ;;  %v18465_v55 = vcombine.low %v1084_v43, %v1096_v46 }
 0x25e   :  { %v18478_v56 = vcombine.high %v1102_v50, %v1114_v51  ;;  %v18490_v23 = vcombine.high %v1108_v32, %v1120_v53  ;;  %v18477_v41 = vcombine.low %v1102_v50, %v1114_v51  ;;  %v114_v51 = vld [vmem:[#allocation5 + $0xb0] sm:$0xff] }
 0x260   :  { %7481 = vmatpush1.bf16.msra.mxu1 %v18309_v28  ;;  %8255 = vmatpush1.bf16.msra.mxu0 %v18321_v62  ;;  %v1126_v28 = vld [vmem:[#allocation5 + $0x2050] sm:$0xff] }
 0x261   :  { %7482 = vmatprep.subr.bf16.mxu1 %v18334_v63  ;;  %8256 = vmatprep.subr.bf16.mxu0 %v18346_v1  ;;  %v1138_v62 = vld [vmem:[#allocation5 + $0x20b0] sm:$0xff]  ;;  %v1132_v63 = vld [vmem:[#allocation5 + $0x2080] sm:$0xff]  ;;  %v18489_v1 = vcombine.low %v1108_v32, %v1120_v53 }
 0x262   :  { %v18502_v37 = vcombine.high %v1126_v28, %v1138_v62  ;;  %v18514_v6 = vcombine.high %v1132_v63, %v1144_v0  ;;  %v18501_v7 = vcombine.low %v1126_v28, %v1138_v62  ;;  %v138_v62 = vld [vmem:[#allocation5 + $0x170] sm:$0xff] }
 0x264   :  { %7483 = vmatpush1.bf16.msra.mxu1 %v18333_v3  ;;  %8257 = vmatpush1.bf16.msra.mxu0 %v18345_v4  ;;  %v1150_v3 = vld [vmem:[#allocation5 + $0x2110] sm:$0xff] }
 0x265   :  { %7484 = vmatprep.subr.bf16.mxu1 %v18358_v5  ;;  %8258 = vmatprep.subr.bf16.mxu0 %v18370_v8  ;;  %v1162_v4 = vld [vmem:[#allocation5 + $0x2170] sm:$0xff]  ;;  %v1156_v5 = vld [vmem:[#allocation5 + $0x2140] sm:$0xff]  ;;  %v18513_v8 = vcombine.low %v1132_v63, %v1144_v0 }
 0x266   :  { %v18526_v9 = vcombine.high %v1150_v3, %v1162_v4  ;;  %v18538_v13 = vcombine.high %v1156_v5, %v1168_v57  ;;  %v18525_v17 = vcombine.low %v1150_v3, %v1162_v4  ;;  %v162_v4 = vld [vmem:[#allocation5 + $0x230] sm:$0xff] }
 0x268   :  { %7485 = vmatpush1.bf16.msra.mxu1 %v18357_v60  ;;  %8259 = vmatpush1.bf16.msra.mxu0 %v18369_v11  ;;  %v1174_v60 = vld [vmem:[#allocation5 + $0x21d0] sm:$0xff] }
 0x269   :  { %7486 = vmatprep.subr.bf16.mxu1 %v18382_v12  ;;  %8260 = vmatprep.subr.bf16.mxu0 %v18394_v18  ;;  %v1186_v11 = vld [vmem:[#allocation5 + $0x2230] sm:$0xff]  ;;  %v1180_v12 = vld [vmem:[#allocation5 + $0x2200] sm:$0xff]  ;;  %v18537_v18 = vcombine.low %v1156_v5, %v1168_v57 }
 0x26a   :  { %v18550_v19 = vcombine.high %v1174_v60, %v1186_v11  ;;  %v18562_v27 = vcombine.high %v1180_v12, %v1192_v14  ;;  %v18549_v31 = vcombine.low %v1174_v60, %v1186_v11  ;;  %v186_v11 = vld [vmem:[#allocation5 + $0x2f0] sm:$0xff] }
 0x26c   :  { %7487 = vmatpush1.bf16.msra.mxu1 %v18381_v21  ;;  %8261 = vmatpush1.bf16.msra.mxu0 %v18393_v22  ;;  %v1198_v21 = vld [vmem:[#allocation5 + $0x2290] sm:$0xff] }
 0x26d   :  { %7488 = vmatprep.subr.bf16.mxu1 %v18406_v26  ;;  %8262 = vmatprep.subr.bf16.mxu0 %v18418_v33  ;;  %v1210_v22 = vld [vmem:[#allocation5 + $0x22f0] sm:$0xff]  ;;  %v1204_v26 = vld [vmem:[#allocation5 + $0x22c0] sm:$0xff]  ;;  %v18561_v33 = vcombine.low %v1180_v12, %v1192_v14 }
 0x26e   :  { %v18574_v34 = vcombine.high %v1198_v21, %v1210_v22  ;;  %v18586_v40 = vcombine.high %v1204_v26, %v1216_v29  ;;  %v18573_v43 = vcombine.low %v1198_v21, %v1210_v22  ;;  %v210_v22 = vld [vmem:[#allocation5 + $0x3b0] sm:$0xff] }
 0x270   :  { %7489 = vmatpush1.bf16.msra.mxu1 %v18405_v35  ;;  %8263 = vmatpush1.bf16.msra.mxu0 %v18417_v36  ;;  %v1222_v35 = vld [vmem:[#allocation5 + $0x2350] sm:$0xff] }
 0x271   :  { %7490 = vmatprep.subr.bf16.mxu1 %v18430_v38  ;;  %8264 = vmatprep.subr.bf16.mxu0 %v18442_v45  ;;  %v1234_v36 = vld [vmem:[#allocation5 + $0x23b0] sm:$0xff]  ;;  %v1228_v38 = vld [vmem:[#allocation5 + $0x2380] sm:$0xff]  ;;  %v18585_v45 = vcombine.low %v1204_v26, %v1216_v29 }
 0x272   :  { %v18598_v46 = vcombine.high %v1222_v35, %v1234_v36  ;;  %v18610_v50 = vcombine.high %v1228_v38, %v1240_v42  ;;  %v18597_v32 = vcombine.low %v1222_v35, %v1234_v36  ;;  %v234_v36 = vld [vmem:[#allocation5 + $0x470] sm:$0xff] }
 0x274   :  { %7491 = vmatpush1.bf16.msra.mxu1 %v18429_v20  ;;  %8265 = vmatpush1.bf16.msra.mxu0 %v18441_v47  ;;  %v95_v20 = vld [vmem:[#allocation5 + $0x18] sm:$0xff] }
 0x275   :  { %7492 = vmatprep.subr.bf16.mxu1 %v18454_v49  ;;  %8266 = vmatprep.subr.bf16.mxu0 %v18466_v52  ;;  %v107_v47 = vld [vmem:[#allocation5 + $0x78] sm:$0xff]  ;;  %v102_v49 = vld [vmem:[#allocation5 + $0x50] sm:$0xff]  ;;  %v18609_v52 = vcombine.low %v1228_v38, %v1240_v42  ;;  %v22240_v38 = vsub.s32 2, %v22155_v48  ;;  %v22243_v42 = vsub.s32 3, %v22155_v48 }
 0x276   :  { %v17472_v53 = vcombine.high %v95_v20, %v107_v47  ;;  %v17486_v28 = vcombine.high %v102_v49, %v114_v51  ;;  %v17471_v63 = vcombine.low %v95_v20, %v107_v47  ;;  %v239_v20 = vld [vmem:[#allocation5 + $0x498] sm:$0xff] }
 0x277   :  { %v251_v47 = vld [vmem:[#allocation5 + $0x4f8] sm:$0xff] }
 0x278   :  { %7493 = vmatpush1.bf16.msra.mxu1 %v18453_v54  ;;  %8267 = vmatpush1.bf16.msra.mxu0 %v18465_v55  ;;  %v119_v54 = vld [vmem:[#allocation5 + $0xd8] sm:$0xff] }
 0x279   :  { %7494 = vmatprep.subr.bf16.mxu1 %v18478_v56  ;;  %8268 = vmatprep.subr.bf16.mxu0 %v18490_v23  ;;  %v131_v55 = vld [vmem:[#allocation5 + $0x138] sm:$0xff]  ;;  %v126_v56 = vld [vmem:[#allocation5 + $0x110] sm:$0xff]  ;;  %v17485_v23 = vcombine.low %v102_v49, %v114_v51 }
 0x27a   :  { %v17496_v0 = vcombine.high %v119_v54, %v131_v55  ;;  %v17510_v3 = vcombine.high %v126_v56, %v138_v62  ;;  %v17495_v5 = vcombine.low %v119_v54, %v131_v55  ;;  %v246_v49 = vld [vmem:[#allocation5 + $0x4d0] sm:$0xff] }
 0x27c   :  { %7495 = vmatpush1.bf16.msra.mxu1 %v18477_v41  ;;  %8269 = vmatpush1.bf16.msra.mxu0 %v18489_v1  ;;  %v143_v41 = vld [vmem:[#allocation5 + $0x198] sm:$0xff] }
 0x27d   :  { %7496 = vmatprep.subr.bf16.mxu1 %v18502_v37  ;;  %8270 = vmatprep.subr.bf16.mxu0 %v18514_v6  ;;  %v155_v1 = vld [vmem:[#allocation5 + $0x1f8] sm:$0xff]  ;;  %v150_v37 = vld [vmem:[#allocation5 + $0x1d0] sm:$0xff]  ;;  %v17509_v6 = vcombine.low %v126_v56, %v138_v62  ;;  %v21893_v56 = vld [vmem:[#allocation7 + $0x8] sm:$0xff] }
 0x27e   :  { %v17520_v57 = vcombine.high %v143_v41, %v155_v1  ;;  %v17534_v60 = vcombine.high %v150_v37, %v162_v4  ;;  %v17519_v12 = vcombine.low %v143_v41, %v155_v1  ;;  %v270_v41 = vld [vmem:[#allocation5 + $0x590] sm:$0xff] }
 0x280   :  { %7497 = vmatpush1.bf16.msra.mxu1 %v18501_v7  ;;  %8271 = vmatpush1.bf16.msra.mxu0 %v18513_v8  ;;  %v167_v7 = vld [vmem:[#allocation5 + $0x258] sm:$0xff] }
 0x281   :  { %7498 = vmatprep.subr.bf16.mxu1 %v18526_v9  ;;  %8272 = vmatprep.subr.bf16.mxu0 %v18538_v13  ;;  %v179_v8 = vld [vmem:[#allocation5 + $0x2b8] sm:$0xff]  ;;  %v174_v9 = vld [vmem:[#allocation5 + $0x290] sm:$0xff]  ;;  %v17533_v13 = vcombine.low %v150_v37, %v162_v4 }
 0x282   :  { %v17544_v14 = vcombine.high %v167_v7, %v179_v8  ;;  %v17558_v21 = vcombine.high %v174_v9, %v186_v11  ;;  %v17543_v26 = vcombine.low %v167_v7, %v179_v8  ;;  %v282_v4 = vld [vmem:[#allocation5 + $0x5f0] sm:$0xff] }
 0x284   :  { %7499 = vmatpush1.bf16.msra.mxu1 %v18525_v17  ;;  %8273 = vmatpush1.bf16.msra.mxu0 %v18537_v18  ;;  %v191_v17 = vld [vmem:[#allocation5 + $0x318] sm:$0xff] }
 0x285   :  { %7500 = vmatprep.subr.bf16.mxu1 %v18550_v19  ;;  %8274 = vmatprep.subr.bf16.mxu0 %v18562_v27  ;;  %v203_v18 = vld [vmem:[#allocation5 + $0x378] sm:$0xff]  ;;  %v198_v19 = vld [vmem:[#allocation5 + $0x350] sm:$0xff]  ;;  %v17557_v27 = vcombine.low %v174_v9, %v186_v11  ;;  %v17615_v9 = vcombine.low %v239_v20, %v251_v47 }
 0x286   :  { %v17568_v29 = vcombine.high %v191_v17, %v203_v18  ;;  %v17582_v35 = vcombine.high %v198_v19, %v210_v22 }
 0x288   :  { %7501 = vmatpush1.bf16.msra.mxu1 %v18549_v31  ;;  %8275 = vmatpush1.bf16.msra.mxu0 %v18561_v33  ;;  %v215_v31 = vld [vmem:[#allocation5 + $0x3d8] sm:$0xff] }
 0x289   :  { %7502 = vmatprep.subr.bf16.mxu1 %v18574_v34  ;;  %8276 = vmatprep.subr.bf16.mxu0 %v18586_v40  ;;  %v227_v33 = vld [vmem:[#allocation5 + $0x438] sm:$0xff]  ;;  %v222_v34 = vld [vmem:[#allocation5 + $0x410] sm:$0xff]  ;;  %v17567_v40 = vcombine.low %v191_v17, %v203_v18 }
 0x28a   :  { %v17606_v51 = vcombine.high %v222_v34, %v234_v36  ;;  %v17591_v55 = vcombine.low %v215_v31, %v227_v33  ;;  %v17605_v62 = vcombine.low %v222_v34, %v234_v36  ;;  %v294_v36 = vld [vmem:[#allocation5 + $0x650] sm:$0xff] }
 0x28c   :  { %7503 = vmatpush1.bf16.msra.mxu1 %v18573_v43  ;;  %8277 = vmatpush1.bf16.msra.mxu0 %v18585_v45  ;;  %v22246_v43 = vsub.s32 4, %v22155_v48  ;;  %v17581_v45 = vcombine.low %v198_v19, %v210_v22  ;;  %v287_v19 = vld [vmem:[#allocation5 + $0x618] sm:$0xff] }
 0x28d   :  { %7504 = vmatprep.subr.bf16.mxu1 %v18598_v46  ;;  %8278 = vmatprep.subr.bf16.mxu0 %v18610_v50  ;;  %v17592_v46 = vcombine.high %v215_v31, %v227_v33  ;;  %v22249_v50 = vsub.s32 5, %v22155_v48  ;;  %v17654_v31 = vcombine.high %v270_v41, %v282_v4 }
 0x28f   :  { %v1305_v1 = vrot.slane %v21893_v56, %v22249_v50 }
 0x290   :  { %7505 = vmatpush1.bf16.msra.mxu1 %v18597_v32  ;;  %8279 = vmatpush1.bf16.msra.mxu0 %v18609_v52  ;;  %v258_v32 = vld [vmem:[#allocation5 + $0x530] sm:$0xff]  ;;  %v21892_v52 = vld [vmem:[#allocation7] sm:$0xff] }
 0x291   :  { %7517 = vmatprep.subr.bf16.mxu1 %v17472_v53  ;;  %8420 = vmatprep.subr.bf16.mxu0 %v17486_v28  ;;  %v1261_v53 = vrot.slane %v21892_v52, %v22240_v38  ;;  %v1265_v54 = vrot.slane %v21892_v52, %v22243_v42  ;;  %v1301_v28 = vrot.slane %v21893_v56, %v22246_v43  ;;  %v330_v56 = vld [vmem:[#allocation5 + $0x770] sm:$0xff] }
 0x293   :  { %7507 = vmatmul.mubr.bf16.vlgmr.msra.gmra.mrb[8].mxu1 %v22137_v44  ;;  %8281 = vmatmul.mubr.bf16.vlgmr.msra.gmra.mrb[8].mxu0 %v22137_v44 }
 0x294   :  { %7518 = vmatpush1.bf16.msra.mxu1 %v17471_v63  ;;  %8421 = vmatpush1.bf16.msra.mxu0 %v17485_v23  ;;  %v17616_v63 = vcombine.high %v239_v20, %v251_v47  ;;  %v263_v23 = vld [vmem:[#allocation5 + $0x558] sm:$0xff]  ;;  %v17653_v20 = vcombine.low %v270_v41, %v282_v4 }
 0x295   :  { %7519 = vmatprep.subr.bf16.mxu1 %v17496_v0  ;;  %8422 = vmatprep.subr.bf16.mxu0 %v17510_v3  ;;  %v275_v0 = vld [vmem:[#allocation5 + $0x5b8] sm:$0xff]  ;;  %v17630_v3 = vcombine.high %v246_v49, %v258_v32 }
 0x296   :  { %7549 = vmatprep.mubr.bf16.mxu1 %v22117_v58  ;;  %8452 = vmatprep.mubr.bf16.mxu0 %v22117_v58  ;;  %v17640_v18 = vcombine.high %v263_v23, %v275_v0 }
 0x298   :  { %7520 = vmatpush1.bf16.msra.mxu1 %v17495_v5  ;;  %8423 = vmatpush1.bf16.msra.mxu0 %v17509_v6 }
 0x299   :  { %7521 = vmatprep.subr.bf16.mxu1 %v17520_v57  ;;  %8424 = vmatprep.subr.bf16.mxu0 %v17534_v60  ;;  %v17629_v60 = vcombine.low %v246_v49, %v258_v32  ;;  %v311_v49 = vld [vmem:[#allocation5 + $0x6d8] sm:$0xff] }
 0x29c   :  { %7522 = vmatpush1.bf16.msra.mxu1 %v17519_v12  ;;  %8425 = vmatpush1.bf16.msra.mxu0 %v17533_v13 }
 0x29d   :  { %7523 = vmatprep.subr.bf16.mxu1 %v17544_v14  ;;  %8426 = vmatprep.subr.bf16.mxu0 %v17558_v21  ;;  %v299_v21 = vld [vmem:[#allocation5 + $0x678] sm:$0xff] }
 0x29e   :  { %v17664_v47 = vcombine.high %v287_v19, %v299_v21 }
 0x2a0   :  { %7524 = vmatpush1.bf16.msra.mxu1 %v17543_v26  ;;  %8427 = vmatpush1.bf16.msra.mxu0 %v17557_v27 }
 0x2a1   :  { %7525 = vmatprep.subr.bf16.mxu1 %v17568_v29  ;;  %8428 = vmatprep.subr.bf16.mxu0 %v17582_v35  ;;  %v17639_v35 = vcombine.low %v263_v23, %v275_v0  ;;  %v22278_v23 = vld [vmem:[#allocation5 + $0x798] sm:$0xff] }
 0x2a4   :  { %7526 = vmatpush1.bf16.msra.mxu1 %v17567_v40  ;;  %8429 = vmatpush1.bf16.msra.mxu0 %v17581_v45  ;;  %v306_v40 = vld [vmem:[#allocation5 + $0x6b0] sm:$0xff] }
 0x2a5   :  { %7527 = vmatprep.subr.bf16.mxu1 %v17592_v46  ;;  %8430 = vmatprep.subr.bf16.mxu0 %v17606_v51  ;;  %v323_v51 = vld [vmem:[#allocation5 + $0x738] sm:$0xff] }
 0x2a6   :  { %v7379_v37 = vpop.f32.mrb[4].mxu1  ;;  %v8024_v57 = vpop.f32.mrb[4].mxu0  ;;  %v17688_v41 = vcombine.high %v311_v49, %v323_v51 }
 0x2a7   :  { %v22255_v5 = vadd.f32 %v7379_v37, %v1261_v53  ;;  %v7381_v6 = vpop.f32.mrb[5].mxu1  ;;  %v22259_v11 = vadd.f32 %v8024_v57, %v1301_v28  ;;  %v8026_v12 = vpop.f32.mrb[5].mxu0  ;;  %v342_v37 = vld [vmem:[#allocation5 + $0x7d0] sm:$0xff]  ;;  %v22283_v57 = vld [vmem:[#allocation5 + $0x8b8] sm:$0xff] }
 0x2a8   :  { %v22257_v7 = vadd.f32 %v7381_v6, %v1265_v54  ;;  %v7383_v8 = vpop.f32.mrb[6].mxu1  ;;  %7528 = vmatpush1.bf16.msra.mxu1 %v17591_v55  ;;  %8431 = vmatpush1.bf16.msra.mxu0 %v17605_v62  ;;  %v22264_v22 = vadd.f32 %v8026_v12, %v1305_v1  ;;  %v8028_v26 = vpop.f32.mrb[6].mxu0  ;;  %v318_v55 = vld [vmem:[#allocation5 + $0x710] sm:$0xff]  ;;  %v22281_v6 = vld [vmem:[#allocation5 + $0x858] sm:$0xff] }
 0x2a9   :  { %v8728_v13 = vmul.f32 0.70710677, %v22255_v5  ;;  %v22262_v14 = vadd.f32 %v7383_v8, %v1261_v53  ;;  %v7385_v17 = vpop.f32.mrb[7].mxu1  ;;  %7529 = vmatprep.subr.bf16.mxu1 %v17616_v63  ;;  %8432 = vmatprep.subr.bf16.mxu0 %v17630_v3  ;;  %v8030_v33 = vpop.f32.mrb[7].mxu0  ;;  %v8738_v45 = vmul.f32 0.70710677, %v22259_v11  ;;  %v22273_v52 = vadd.f32 %v8028_v26, %v1301_v28 }
 0x2aa   :  { %v8729_v27 = vmul.f32 0.70710677, %v22257_v7  ;;  %v22267_v29 = vadd.f32 %v7385_v17, %v1265_v54  ;;  %v8739_v32 = vmul.f32 0.70710677, %v22264_v22  ;;  %v22275_v53 = vadd.f32 %v8030_v33, %v1305_v1  ;;  %v347_v1 = vld [vmem:[#allocation5 + $0x7f8] sm:$0xff]  ;;  %v354_v3 = vld [vmem:[#allocation5 + $0x830] sm:$0xff] }
 0x2ab   :  { %21812 = verf.f32 %v8728_v13  ;;  %v8752_v34 = vmul.f32 0.70710677, %v22262_v14  ;;  %v17678_v54 = vcombine.high %v294_v36, %v306_v40  ;;  %v8762_v62 = vmul.f32 0.70710677, %v22273_v52  ;;  %v22286_v13 = vld [vmem:[#allocation5 + $0x890] sm:$0xff] }
 0x2ac   :  { %21814 = verf.f32 %v8729_v27  ;;  %v8753_v46 = vmul.f32 0.70710677, %v22267_v29  ;;  %7530 = vmatpush1.bf16.msra.mxu1 %v17615_v9  ;;  %8433 = vmatpush1.bf16.msra.mxu0 %v17629_v60  ;;  %v17663_v63 = vcombine.low %v287_v19, %v299_v21  ;;  %v8763_v0 = vmul.f32 0.70710677, %v22275_v53  ;;  %v22288_v17 = vld [vmem:[#allocation5 + $0x8f0] sm:$0xff] }
 0x2ad   :  { %21816 = verf.f32 %v8752_v34  ;;  %7531 = vmatprep.subr.bf16.mxu1 %v17640_v18  ;;  %8434 = vmatprep.subr.bf16.mxu0 %v17654_v31  ;;  %v17677_v28 = vcombine.low %v294_v36, %v306_v40  ;;  %v17702_v4 = vcombine.high %v318_v55, %v330_v56  ;;  %v17687_v8 = vcombine.low %v311_v49, %v323_v51 }
 0x2ae   :  { %21818 = verf.f32 %v8753_v46  ;;  %v17701_v60 = vcombine.low %v318_v55, %v330_v56  ;;  %v17712_v12 = vcombine.high %v22278_v23, %v347_v1  ;;  %v17711_v21 = vcombine.low %v22278_v23, %v347_v1  ;;  %v395_v55 = vld [vmem:[#allocation5 + $0x978] sm:$0xff]  ;;  %v390_v56 = vld [vmem:[#allocation5 + $0x950] sm:$0xff] }
 0x2af   :  { %21820 = verf.f32 %v8738_v45  ;;  %v17725_v26 = vcombine.low %v342_v37, %v354_v3  ;;  %v17726_v27 = vcombine.high %v342_v37, %v354_v3  ;;  %v8680_v33 = vmul.f32 0.5, %v22255_v5 }
 0x2b0   :  { %7532 = vmatpush1.bf16.msra.mxu1 %v17639_v35  ;;  %21822 = verf.f32 %v8739_v32  ;;  %8435 = vmatpush1.bf16.msra.mxu0 %v17653_v20  ;;  %v17735_v35 = vcombine.low %v22281_v6, %v22283_v57  ;;  %v17736_v36 = vcombine.high %v22281_v6, %v22283_v57  ;;  %v8704_v45 = vmul.f32 0.5, %v22262_v14 }
 0x2b1   :  { %7533 = vmatprep.subr.bf16.mxu1 %v17664_v47  ;;  %21824 = verf.f32 %v8762_v62  ;;  %8436 = vmatprep.subr.bf16.mxu0 %v17678_v54  ;;  %v17750_v20 = vcombine.high %v22286_v13, %v22288_v17  ;;  %v383_v47 = vld [vmem:[#allocation5 + $0x918] sm:$0xff]  ;;  %v8690_v49 = vmul.f32 0.5, %v22259_v11  ;;  %v8681_v5 = vmul.f32 0.5, %v22257_v7 }
 0x2b2   :  { %21826 = verf.f32 %v8763_v0  ;;  %v8705_v32 = vmul.f32 0.5, %v22267_v29  ;;  %v8691_v14 = vmul.f32 0.5, %v22264_v22  ;;  %v402_v0 = vld [vmem:[#allocation5 + $0x9b0] sm:$0xff]  ;;  %v8714_v11 = vmul.f32 0.5, %v22273_v52  ;;  %v419_v52 = vld [vmem:[#allocation5 + $0xa38] sm:$0xff] }
 0x2b3   :  { %v8715_v29 = vmul.f32 0.5, %v22275_v53  ;;  %v17749_v22 = vcombine.low %v22286_v13, %v22288_v17  ;;  %v17774_v53 = vcombine.high %v390_v56, %v402_v0  ;;  %v17773_v17 = vcombine.low %v390_v56, %v402_v0  ;;  %v486_v0 = vld [vmem:[#allocation5 + $0xc50] sm:$0xff] }
 0x2b4   :  { %7534 = vmatpush1.bf16.msra.mxu1 %v17663_v63  ;;  %8437 = vmatpush1.bf16.msra.mxu0 %v17677_v28 }
 0x2b5   :  { %v21813_v9 = vpop.eup %21812  ;;  %7535 = vmatprep.subr.bf16.mxu1 %v17688_v41  ;;  %8438 = vmatprep.subr.bf16.mxu0 %v17702_v4 }
 0x2b6   :  { %v21815_v18 = vpop.eup %21814  ;;  %v8824_v19 = vadd.f32 1.0, %v21813_v9  ;;  %v407_v9 = vld [vmem:[#allocation5 + $0x9d8] sm:$0xff] }
 0x2b7   :  { %v21817_v31 = vpop.eup %21816  ;;  %v8825_v34 = vadd.f32 1.0, %v21815_v18 }
 0x2b8   :  { %v21819_v40 = vpop.eup %21818  ;;  %v8848_v46 = vadd.f32 1.0, %v21817_v31  ;;  %7536 = vmatpush1.bf16.msra.mxu1 %v17687_v8  ;;  %8439 = vmatpush1.bf16.msra.mxu0 %v17701_v60  ;;  %v8872_v63 = vmul.f32 %v8824_v19, %v8680_v33  ;;  %v17760_v8 = vcombine.high %v383_v47, %v395_v55  ;;  %v414_v60 = vld [vmem:[#allocation5 + $0xa10] sm:$0xff]  ;;  %v17759_v33 = vcombine.low %v383_v47, %v395_v55 }
 0x2b9   :  { %v21821_v51 = vpop.eup %21820  ;;  %v8849_v54 = vadd.f32 1.0, %v21819_v40  ;;  %7537 = vmatprep.subr.bf16.mxu1 %v17712_v12  ;;  %8440 = vmatprep.subr.bf16.mxu0 %v17726_v27  ;;  %v8873_v1 = vmul.f32 %v8825_v34, %v8681_v5  ;;  %v426_v27 = vld [vmem:[#allocation5 + $0xa70] sm:$0xff]  ;;  %v431_v34 = vld [vmem:[#allocation5 + $0xa98] sm:$0xff] }
 0x2ba   :  { %v21823_v62 = vpop.eup %21822  ;;  %v8896_v23 = vmul.f32 %v8848_v46, %v8704_v45  ;;  %v8834_v28 = vadd.f32 1.0, %v21821_v51  ;;  %v438_v40 = vld [vmem:[#allocation5 + $0xad0] sm:$0xff]  ;;  %v17798_v46 = vcombine.high %v414_v60, %v426_v27  ;;  %v455_v51 = vld [vmem:[#allocation5 + $0xb58] sm:$0xff] }
 0x2bb   :  { %v21825_v41 = vpop.eup %21824  ;;  %v8897_v7 = vmul.f32 %v8849_v54, %v8705_v32  ;;  %v8835_v37 = vadd.f32 1.0, %v21823_v62  ;;  %v467_v5 = vld [vmem:[#allocation5 + $0xbb8] sm:$0xff]  ;;  %v462_v32 = vld [vmem:[#allocation5 + $0xb90] sm:$0xff] }
 0x2bc   :  { %v21827_v3 = vpop.eup %21826  ;;  %v22305_v4 = vpack.c.bf16 %v8896_v23, %v8872_v63  ;;  %7538 = vmatpush1.bf16.msra.mxu1 %v17711_v21  ;;  %v8882_v6 = vmul.f32 %v8834_v28, %v8690_v49  ;;  %v8858_v57 = vadd.f32 1.0, %v21825_v41  ;;  %8441 = vmatpush1.bf16.msra.mxu0 %v17725_v26  ;;  %v17784_v26 = vcombine.high %v407_v9, %v419_v52  ;;  %v474_v55 = vld [vmem:[#allocation5 + $0xbf0] sm:$0xff]  ;;  %v479_v63 = vld [vmem:[#allocation5 + $0xc18] sm:$0xff] }
 0x2bd   :  { %7539 = vmatprep.subr.bf16.mxu1 %v17736_v36  ;;  %v8883_v12 = vmul.f32 %v8835_v37, %v8691_v14  ;;  %v8859_v18 = vadd.f32 1.0, %v21827_v3  ;;  %v22309_v19 = vpack.c.bf16 %v8897_v7, %v8873_v1  ;;  %8442 = vmatprep.subr.bf16.mxu0 %v17750_v20  ;;  %v443_v36 = vld [vmem:[#allocation5 + $0xaf8] sm:$0xff]  ;;  %v450_v20 = vld [vmem:[#allocation5 + $0xb30] sm:$0xff]  ;;  %v17783_v49 = vcombine.low %v407_v9, %v419_v52 }
 0x2be   :  { %v8906_v31 = vmul.f32 %v8858_v57, %v8714_v11  ;;  %v17808_v47 = vcombine.high %v431_v34, %v443_v36  ;;  %v17822_v54 = vcombine.high %v438_v40, %v450_v20  ;;  %v17807_v56 = vcombine.low %v431_v34, %v443_v36  ;;  %v491_v23 = vld [vmem:[#allocation5 + $0xc78] sm:$0xff]  ;;  %v498_v11 = vld [vmem:[#allocation5 + $0xcb0] sm:$0xff] }
 0x2bf   :  { %v8907_v21 = vmul.f32 %v8859_v18, %v8715_v29  ;;  %v17821_v14 = vcombine.low %v438_v40, %v450_v20  ;;  %v17832_v62 = vcombine.high %v455_v51, %v467_v5  ;;  %v17846_v28 = vcombine.high %v462_v32, %v474_v55  ;;  %v503_v37 = vld [vmem:[#allocation5 + $0xcd8] sm:$0xff]  ;;  %v510_v3 = vld [vmem:[#allocation5 + $0xd10] sm:$0xff] }
 0x2c0   :  { %7540 = vmatpush1.bf16.msra.mxu1 %v17735_v35  ;;  %v22311_v13 = vpack.c.bf16 %v8906_v31, %v8882_v6  ;;  %8443 = vmatpush1.bf16.msra.mxu0 %v17749_v22  ;;  %v17797_v35 = vcombine.low %v414_v60, %v426_v27  ;;  %v17831_v41 = vcombine.low %v455_v51, %v467_v5  ;;  %v515_v29 = vld [vmem:[#allocation5 + $0xd38] sm:$0xff]  ;;  %v522_v6 = vld [vmem:[#allocation5 + $0xd70] sm:$0xff] }
 0x2c1   :  { %7541 = vmatprep.subr.bf16.mxu1 %v17760_v8  ;;  %v22313_v45 = vpack.c.bf16 %v8907_v21, %v8883_v12  ;;  %8444 = vmatprep.subr.bf16.mxu0 %v17774_v53  ;;  %v17845_v1 = vcombine.low %v462_v32, %v474_v55  ;;  %v17856_v7 = vcombine.high %v479_v63, %v491_v23  ;;  %v527_v52 = vld [vmem:[#allocation5 + $0xd98] sm:$0xff]  ;;  %v534_v18 = vld [vmem:[#allocation5 + $0xdd0] sm:$0xff] }
 0x2c2   :  { %v17870_v22 = vcombine.high %v486_v0, %v498_v11  ;;  %v17855_v57 = vcombine.low %v479_v63, %v491_v23  ;;  %v17869_v8 = vcombine.low %v486_v0, %v498_v11  ;;  %v17880_v9 = vcombine.high %v503_v37, %v515_v29  ;;  %v539_v60 = vld [vmem:[#allocation5 + $0xdf8] sm:$0xff]  ;;  %v546_v53 = vld [vmem:[#allocation5 + $0xe30] sm:$0xff] }
 0x2c3   :  { %v17894_v12 = vcombine.high %v510_v3, %v522_v6  ;;  %v17879_v27 = vcombine.low %v503_v37, %v515_v29  ;;  %v17893_v31 = vcombine.low %v510_v3, %v522_v6  ;;  %v17904_v21 = vcombine.high %v527_v52, %v539_v60  ;;  %v558_v34 = vld [vmem:[#allocation5 + $0xe90] sm:$0xff] }
 0x2c4   :  { %7542 = vmatpush1.bf16.msra.mxu1 %v17759_v33  ;;  %8445 = vmatpush1.bf16.msra.mxu0 %v17773_v17  ;;  %v551_v33 = vld [vmem:[#allocation5 + $0xe58] sm:$0xff]  ;;  %v570_v36 = vld [vmem:[#allocation5 + $0xef0] sm:$0xff]  ;;  %v17903_v40 = vcombine.low %v527_v52, %v539_v60 }
 0x2c5   :  { %7543 = vmatprep.subr.bf16.mxu1 %v17784_v26  ;;  %8446 = vmatprep.subr.bf16.mxu0 %v17798_v46  ;;  %v563_v17 = vld [vmem:[#allocation5 + $0xeb8] sm:$0xff]  ;;  %v17918_v26 = vcombine.high %v534_v18, %v546_v53  ;;  %v17917_v46 = vcombine.low %v534_v18, %v546_v53  ;;  %v17942_v51 = vcombine.high %v558_v34, %v570_v36  ;;  %v594_v5 = vld [vmem:[#allocation5 + $0xfb0] sm:$0xff] }
 0x2c6   :  { %v17928_v20 = vcombine.high %v551_v33, %v563_v17  ;;  %v17927_v32 = vcombine.low %v551_v33, %v563_v17  ;;  %v606_v63 = vld [vmem:[#allocation5 + $0x1010] sm:$0xff] }
 0x2c7   :  { %v618_v23 = vld [vmem:[#allocation5 + $0x1070] sm:$0xff] }
 0x2c8   :  { %7544 = vmatpush1.bf16.msra.mxu1 %v17783_v49  ;;  %8447 = vmatpush1.bf16.msra.mxu0 %v17797_v35  ;;  %v575_v49 = vld [vmem:[#allocation5 + $0xf18] sm:$0xff]  ;;  %v630_v37 = vld [vmem:[#allocation5 + $0x10d0] sm:$0xff] }
 0x2c9   :  { %7545 = vmatprep.subr.bf16.mxu1 %v17808_v47  ;;  %8448 = vmatprep.subr.bf16.mxu0 %v17822_v54  ;;  %v587_v35 = vld [vmem:[#allocation5 + $0xf78] sm:$0xff]  ;;  %v582_v47 = vld [vmem:[#allocation5 + $0xf50] sm:$0xff]  ;;  %v17941_v54 = vcombine.low %v558_v34, %v570_v36 }
 0x2ca   :  { %v17952_v55 = vcombine.high %v575_v49, %v587_v35  ;;  %v17951_v0 = vcombine.low %v575_v49, %v587_v35  ;;  %v642_v29 = vld [vmem:[#allocation5 + $0x1130] sm:$0xff] }
 0x2cb   :  { %v654_v52 = vld [vmem:[#allocation5 + $0x1190] sm:$0xff]  ;;  %v18013_v18 = vcombine.low %v630_v37, %v642_v29 }
 0x2cc   :  { %7546 = vmatpush1.bf16.msra.mxu1 %v17807_v56  ;;  %8449 = vmatpush1.bf16.msra.mxu0 %v17821_v14  ;;  %v599_v56 = vld [vmem:[#allocation5 + $0xfd8] sm:$0xff]  ;;  %v17966_v14 = vcombine.high %v582_v47, %v594_v5  ;;  %v666_v60 = vld [vmem:[#allocation5 + $0x11f0] sm:$0xff] }
 0x2cd   :  { %7547 = vmatprep.subr.bf16.mxu1 %v17832_v62  ;;  %8450 = vmatprep.subr.bf16.mxu0 %v17846_v28  ;;  %v611_v62 = vld [vmem:[#allocation5 + $0x1038] sm:$0xff]  ;;  %v17965_v28 = vcombine.low %v582_v47, %v594_v5  ;;  %v678_v33 = vld [vmem:[#allocation5 + $0x1250] sm:$0xff]  ;;  %v18037_v34 = vcombine.low %v654_v52, %v666_v60 }
 0x2ce   :  { %v17976_v11 = vcombine.high %v599_v56, %v611_v62  ;;  %v17975_v3 = vcombine.low %v599_v56, %v611_v62  ;;  %v690_v17 = vld [vmem:[#allocation5 + $0x12b0] sm:$0xff] }
 0x2cf   :  { %v702_v49 = vld [vmem:[#allocation5 + $0x1310] sm:$0xff] }
 0x2d0   :  { %7548 = vmatpush1.bf16.msra.mxu1 %v17831_v41  ;;  %8451 = vmatpush1.bf16.msra.mxu0 %v17845_v1  ;;  %v17990_v41 = vcombine.high %v606_v63, %v618_v23  ;;  %v623_v1 = vld [vmem:[#allocation5 + $0x1098] sm:$0xff]  ;;  %v714_v35 = vld [vmem:[#allocation5 + $0x1370] sm:$0xff] }
 0x2d1   :  { %7560 = vmatprep.subr.bf16.mxu1 %v17856_v7  ;;  %8463 = vmatprep.subr.bf16.mxu0 %v17870_v22  ;;  %v635_v7 = vld [vmem:[#allocation5 + $0x10f8] sm:$0xff]  ;;  %v17989_v22 = vcombine.low %v606_v63, %v618_v23  ;;  %v726_v56 = vld [vmem:[#allocation5 + $0x13d0] sm:$0xff]  ;;  %v18085_v63 = vcombine.low %v702_v49, %v714_v35 }
 0x2d2   :  { %v18000_v6 = vcombine.high %v623_v1, %v635_v7 }
 0x2d3   :  { %7550 = vmatmul.mubr.bf16.vlgmr.msra.gmra.mrb[12].mxu1 %v22121_v15  ;;  %8453 = vmatmul.mubr.bf16.vlgmr.msra.gmra.mrb[12].mxu0 %v22121_v15 }
 0x2d4   :  { %7561 = vmatpush1.bf16.msra.mxu1 %v17855_v57  ;;  %8464 = vmatpush1.bf16.msra.mxu0 %v17869_v8  ;;  %v18014_v57 = vcombine.high %v630_v37, %v642_v29  ;;  %v647_v8 = vld [vmem:[#allocation5 + $0x1158] sm:$0xff] }
 0x2d5   :  { %7562 = vmatprep.subr.bf16.mxu1 %v17880_v9  ;;  %8465 = vmatprep.subr.bf16.mxu0 %v17894_v12  ;;  %v659_v9 = vld [vmem:[#allocation5 + $0x11b8] sm:$0xff]  ;;  %v17999_v12 = vcombine.low %v623_v1, %v635_v7  ;;  %v762_v1 = vld [vmem:[#allocation5 + $0x14f0] sm:$0xff] }
 0x2d6   :  { %7592 = vmatprep.mubr.bf16.mxu1 %v22123_v25  ;;  %8495 = vmatprep.mubr.bf16.mxu0 %v22123_v25  ;;  %v18024_v53 = vcombine.high %v647_v8, %v659_v9 }
 0x2d8   :  { %7563 = vmatpush1.bf16.msra.mxu1 %v17879_v27  ;;  %8466 = vmatpush1.bf16.msra.mxu0 %v17893_v31  ;;  %v18038_v27 = vcombine.high %v654_v52, %v666_v60  ;;  %v671_v31 = vld [vmem:[#allocation5 + $0x1218] sm:$0xff] }
 0x2d9   :  { %7564 = vmatprep.subr.bf16.mxu1 %v17904_v21  ;;  %8467 = vmatprep.subr.bf16.mxu0 %v17918_v26  ;;  %v683_v21 = vld [vmem:[#allocation5 + $0x1278] sm:$0xff]  ;;  %v18023_v26 = vcombine.low %v647_v8, %v659_v9  ;;  %v786_v8 = vld [vmem:[#allocation5 + $0x15b0] sm:$0xff] }
 0x2da   :  { %v18048_v36 = vcombine.high %v671_v31, %v683_v21  ;;  %v18047_v47 = vcombine.low %v671_v31, %v683_v21  ;;  %v810_v31 = vld [vmem:[#allocation5 + $0x1670] sm:$0xff] }
 0x2dc   :  { %7565 = vmatpush1.bf16.msra.mxu1 %v17903_v40  ;;  %8468 = vmatpush1.bf16.msra.mxu0 %v17917_v46  ;;  %v18062_v40 = vcombine.high %v678_v33, %v690_v17  ;;  %v695_v46 = vld [vmem:[#allocation5 + $0x12d8] sm:$0xff] }
 0x2dd   :  { %7566 = vmatprep.subr.bf16.mxu1 %v17928_v20  ;;  %8469 = vmatprep.subr.bf16.mxu0 %v17942_v51  ;;  %v707_v20 = vld [vmem:[#allocation5 + $0x1338] sm:$0xff]  ;;  %v18061_v51 = vcombine.low %v678_v33, %v690_v17 }
 0x2de   :  { %v18072_v5 = vcombine.high %v695_v46, %v707_v20  ;;  %v18071_v62 = vcombine.low %v695_v46, %v707_v20  ;;  %v834_v46 = vld [vmem:[#allocation5 + $0x1730] sm:$0xff] }
 0x2e0   :  { %7567 = vmatpush1.bf16.msra.mxu1 %v17927_v32  ;;  %8470 = vmatpush1.bf16.msra.mxu0 %v17941_v54  ;;  %v18086_v32 = vcombine.high %v702_v49, %v714_v35  ;;  %v719_v54 = vld [vmem:[#allocation5 + $0x1398] sm:$0xff] }
 0x2e1   :  { %7568 = vmatprep.subr.bf16.mxu1 %v17952_v55  ;;  %8471 = vmatprep.subr.bf16.mxu0 %v17966_v14  ;;  %v731_v55 = vld [vmem:[#allocation5 + $0x13f8] sm:$0xff]  ;;  %v738_v14 = vld [vmem:[#allocation5 + $0x1430] sm:$0xff] }
 0x2e2   :  { %v18096_v23 = vcombine.high %v719_v54, %v731_v55  ;;  %v18095_v7 = vcombine.low %v719_v54, %v731_v55  ;;  %v18109_v37 = vcombine.low %v726_v56, %v738_v14  ;;  %v858_v54 = vld [vmem:[#allocation5 + $0x17f0] sm:$0xff] }
 0x2e4   :  { %7569 = vmatpush1.bf16.msra.mxu1 %v17951_v0  ;;  %8472 = vmatpush1.bf16.msra.mxu0 %v17965_v28  ;;  %v18110_v0 = vcombine.high %v726_v56, %v738_v14  ;;  %v743_v28 = vld [vmem:[#allocation5 + $0x1458] sm:$0xff] }
 0x2e5   :  { %7570 = vmatprep.subr.bf16.mxu1 %v17976_v11  ;;  %8473 = vmatprep.subr.bf16.mxu0 %v17990_v41  ;;  %v755_v11 = vld [vmem:[#allocation5 + $0x14b8] sm:$0xff]  ;;  %v750_v41 = vld [vmem:[#allocation5 + $0x1490] sm:$0xff] }
 0x2e6   :  { %v18120_v29 = vcombine.high %v743_v28, %v755_v11  ;;  %v18119_v9 = vcombine.low %v743_v28, %v755_v11  ;;  %v18133_v52 = vcombine.low %v750_v41, %v762_v1  ;;  %v882_v28 = vld [vmem:[#allocation5 + $0x18b0] sm:$0xff] }
 0x2e8   :  { %7571 = vmatpush1.bf16.msra.mxu1 %v17975_v3  ;;  %8474 = vmatpush1.bf16.msra.mxu0 %v17989_v22  ;;  %v18134_v3 = vcombine.high %v750_v41, %v762_v1  ;;  %v767_v22 = vld [vmem:[#allocation5 + $0x1518] sm:$0xff] }
 0x2e9   :  { %7572 = vmatprep.subr.bf16.mxu1 %v18000_v6  ;;  %8475 = vmatprep.subr.bf16.mxu0 %v18014_v57  ;;  %v779_v6 = vld [vmem:[#allocation5 + $0x1578] sm:$0xff]  ;;  %v774_v57 = vld [vmem:[#allocation5 + $0x1550] sm:$0xff] }
 0x2ea   :  { %v18144_v60 = vcombine.high %v767_v22, %v779_v6  ;;  %v18143_v21 = vcombine.low %v767_v22, %v779_v6  ;;  %v18157_v33 = vcombine.low %v774_v57, %v786_v8  ;;  %v906_v22 = vld [vmem:[#allocation5 + $0x1970] sm:$0xff] }
 0x2ec   :  { %7573 = vmatpush1.bf16.msra.mxu1 %v17999_v12  ;;  %8476 = vmatpush1.bf16.msra.mxu0 %v18013_v18  ;;  %v18158_v12 = vcombine.high %v774_v57, %v786_v8  ;;  %v791_v18 = vld [vmem:[#allocation5 + $0x15d8] sm:$0xff] }
 0x2ed   :  { %7574 = vmatprep.subr.bf16.mxu1 %v18024_v53  ;;  %8477 = vmatprep.subr.bf16.mxu0 %v18038_v27  ;;  %v803_v53 = vld [vmem:[#allocation5 + $0x1638] sm:$0xff]  ;;  %v798_v27 = vld [vmem:[#allocation5 + $0x1610] sm:$0xff] }
 0x2ee   :  { %v18168_v17 = vcombine.high %v791_v18, %v803_v53  ;;  %v18167_v20 = vcombine.low %v791_v18, %v803_v53  ;;  %v18181_v49 = vcombine.low %v798_v27, %v810_v31  ;;  %v930_v18 = vld [vmem:[#allocation5 + $0x1a30] sm:$0xff] }
 0x2f0   :  { %7575 = vmatpush1.bf16.msra.mxu1 %v18023_v26  ;;  %8478 = vmatpush1.bf16.msra.mxu0 %v18037_v34  ;;  %v18182_v26 = vcombine.high %v798_v27, %v810_v31  ;;  %v815_v34 = vld [vmem:[#allocation5 + $0x1698] sm:$0xff] }
 0x2f1   :  { %7576 = vmatprep.subr.bf16.mxu1 %v18048_v36  ;;  %8479 = vmatprep.subr.bf16.mxu0 %v18062_v40  ;;  %v827_v36 = vld [vmem:[#allocation5 + $0x16f8] sm:$0xff]  ;;  %v822_v40 = vld [vmem:[#allocation5 + $0x16d0] sm:$0xff] }
 0x2f2   :  { %v18192_v35 = vcombine.high %v815_v34, %v827_v36  ;;  %v18191_v55 = vcombine.low %v815_v34, %v827_v36  ;;  %v18205_v56 = vcombine.low %v822_v40, %v834_v46  ;;  %v954_v34 = vld [vmem:[#allocation5 + $0x1af0] sm:$0xff] }
 0x2f4   :  { %7577 = vmatpush1.bf16.msra.mxu1 %v18047_v47  ;;  %8480 = vmatpush1.bf16.msra.mxu0 %v18061_v51  ;;  %v18206_v47 = vcombine.high %v822_v40, %v834_v46  ;;  %v839_v51 = vld [vmem:[#allocation5 + $0x1758] sm:$0xff] }
 0x2f5   :  { %7578 = vmatprep.subr.bf16.mxu1 %v18072_v5  ;;  %8481 = vmatprep.subr.bf16.mxu0 %v18086_v32  ;;  %v851_v5 = vld [vmem:[#allocation5 + $0x17b8] sm:$0xff]  ;;  %v846_v32 = vld [vmem:[#allocation5 + $0x1790] sm:$0xff] }
 0x2f6   :  { %v18216_v14 = vcombine.high %v839_v51, %v851_v5  ;;  %v18215_v11 = vcombine.low %v839_v51, %v851_v5  ;;  %v18229_v41 = vcombine.low %v846_v32, %v858_v54  ;;  %v978_v51 = vld [vmem:[#allocation5 + $0x1bb0] sm:$0xff] }
 0x2f8   :  { %7579 = vmatpush1.bf16.msra.mxu1 %v18071_v62  ;;  %8482 = vmatpush1.bf16.msra.mxu0 %v18085_v63  ;;  %v18230_v62 = vcombine.high %v846_v32, %v858_v54  ;;  %v863_v63 = vld [vmem:[#allocation5 + $0x1818] sm:$0xff] }
 0x2f9   :  { %7580 = vmatprep.subr.bf16.mxu1 %v18096_v23  ;;  %8483 = vmatprep.subr.bf16.mxu0 %v18110_v0  ;;  %v875_v23 = vld [vmem:[#allocation5 + $0x1878] sm:$0xff]  ;;  %v870_v0 = vld [vmem:[#allocation5 + $0x1850] sm:$0xff] }
 0x2fa   :  { %v18240_v1 = vcombine.high %v863_v63, %v875_v23  ;;  %v18239_v6 = vcombine.low %v863_v63, %v875_v23  ;;  %v18253_v57 = vcombine.low %v870_v0, %v882_v28  ;;  %v1002_v63 = vld [vmem:[#allocation5 + $0x1c70] sm:$0xff] }
 0x2fc   :  { %7581 = vmatpush1.bf16.msra.mxu1 %v18095_v7  ;;  %8484 = vmatpush1.bf16.msra.mxu0 %v18109_v37  ;;  %v18254_v7 = vcombine.high %v870_v0, %v882_v28  ;;  %v887_v37 = vld [vmem:[#allocation5 + $0x18d8] sm:$0xff] }
 0x2fd   :  { %7582 = vmatprep.subr.bf16.mxu1 %v18120_v29  ;;  %8485 = vmatprep.subr.bf16.mxu0 %v18134_v3  ;;  %v899_v29 = vld [vmem:[#allocation5 + $0x1938] sm:$0xff]  ;;  %v894_v3 = vld [vmem:[#allocation5 + $0x1910] sm:$0xff] }
 0x2fe   :  { %v18264_v8 = vcombine.high %v887_v37, %v899_v29  ;;  %v18263_v53 = vcombine.low %v887_v37, %v899_v29  ;;  %v18277_v27 = vcombine.low %v894_v3, %v906_v22  ;;  %v1026_v37 = vld [vmem:[#allocation5 + $0x1d30] sm:$0xff] }
 0x300   :  { %7583 = vmatpush1.bf16.msra.mxu1 %v18119_v9  ;;  %8486 = vmatpush1.bf16.msra.mxu0 %v18133_v52  ;;  %v18278_v9 = vcombine.high %v894_v3, %v906_v22  ;;  %v911_v52 = vld [vmem:[#allocation5 + $0x1998] sm:$0xff] }
 0x301   :  { %7584 = vmatprep.subr.bf16.mxu1 %v18144_v60  ;;  %8487 = vmatprep.subr.bf16.mxu0 %v18158_v12  ;;  %v923_v60 = vld [vmem:[#allocation5 + $0x19f8] sm:$0xff]  ;;  %v918_v12 = vld [vmem:[#allocation5 + $0x19d0] sm:$0xff] }
 0x302   :  { %v18288_v31 = vcombine.high %v911_v52, %v923_v60  ;;  %v18287_v36 = vcombine.low %v911_v52, %v923_v60  ;;  %v18301_v40 = vcombine.low %v918_v12, %v930_v18  ;;  %v1050_v52 = vld [vmem:[#allocation5 + $0x1df0] sm:$0xff] }
 0x304   :  { %7585 = vmatpush1.bf16.msra.mxu1 %v18143_v21  ;;  %8488 = vmatpush1.bf16.msra.mxu0 %v18157_v33  ;;  %v18302_v21 = vcombine.high %v918_v12, %v930_v18  ;;  %v935_v33 = vld [vmem:[#allocation5 + $0x1a58] sm:$0xff] }
 0x305   :  { %7586 = vmatprep.subr.bf16.mxu1 %v18168_v17  ;;  %8489 = vmatprep.subr.bf16.mxu0 %v18182_v26  ;;  %v947_v17 = vld [vmem:[#allocation5 + $0x1ab8] sm:$0xff]  ;;  %v942_v26 = vld [vmem:[#allocation5 + $0x1a90] sm:$0xff] }
 0x306   :  { %v18312_v46 = vcombine.high %v935_v33, %v947_v17  ;;  %v18311_v5 = vcombine.low %v935_v33, %v947_v17  ;;  %v18325_v32 = vcombine.low %v942_v26, %v954_v34  ;;  %v1074_v33 = vld [vmem:[#allocation5 + $0x1eb0] sm:$0xff] }
 0x308   :  { %7587 = vmatpush1.bf16.msra.mxu1 %v18167_v20  ;;  %8490 = vmatpush1.bf16.msra.mxu0 %v18181_v49  ;;  %v18326_v20 = vcombine.high %v942_v26, %v954_v34  ;;  %v959_v49 = vld [vmem:[#allocation5 + $0x1b18] sm:$0xff] }
 0x309   :  { %7588 = vmatprep.subr.bf16.mxu1 %v18192_v35  ;;  %8491 = vmatprep.subr.bf16.mxu0 %v18206_v47  ;;  %v971_v35 = vld [vmem:[#allocation5 + $0x1b78] sm:$0xff]  ;;  %v966_v47 = vld [vmem:[#allocation5 + $0x1b50] sm:$0xff] }
 0x30a   :  { %v18336_v54 = vcombine.high %v959_v49, %v971_v35  ;;  %v18335_v23 = vcombine.low %v959_v49, %v971_v35  ;;  %v18349_v0 = vcombine.low %v966_v47, %v978_v51  ;;  %v1098_v49 = vld [vmem:[#allocation5 + $0x1f70] sm:$0xff] }
 0x30c   :  { %7589 = vmatpush1.bf16.msra.mxu1 %v18191_v55  ;;  %8492 = vmatpush1.bf16.msra.mxu0 %v18205_v56  ;;  %v18350_v55 = vcombine.high %v966_v47, %v978_v51  ;;  %v983_v56 = vld [vmem:[#allocation5 + $0x1bd8] sm:$0xff] }
 0x30d   :  { %7590 = vmatprep.subr.bf16.mxu1 %v18216_v14  ;;  %8493 = vmatprep.subr.bf16.mxu0 %v18230_v62  ;;  %v995_v14 = vld [vmem:[#allocation5 + $0x1c38] sm:$0xff]  ;;  %v990_v62 = vld [vmem:[#allocation5 + $0x1c10] sm:$0xff] }
 0x30e   :  { %v18360_v28 = vcombine.high %v983_v56, %v995_v14  ;;  %v18359_v29 = vcombine.low %v983_v56, %v995_v14  ;;  %v18373_v3 = vcombine.low %v990_v62, %v1002_v63  ;;  %v1122_v56 = vld [vmem:[#allocation5 + $0x2030] sm:$0xff] }
 0x310   :  { %7591 = vmatpush1.bf16.msra.mxu1 %v18215_v11  ;;  %8494 = vmatpush1.bf16.msra.mxu0 %v18229_v41  ;;  %v18374_v11 = vcombine.high %v990_v62, %v1002_v63  ;;  %v1007_v41 = vld [vmem:[#allocation5 + $0x1c98] sm:$0xff] }
 0x311   :  { %7603 = vmatprep.subr.bf16.mxu1 %v18240_v1  ;;  %8506 = vmatprep.subr.bf16.mxu0 %v18254_v7  ;;  %v1019_v1 = vld [vmem:[#allocation5 + $0x1cf8] sm:$0xff]  ;;  %v1014_v7 = vld [vmem:[#allocation5 + $0x1cd0] sm:$0xff] }
 0x312   :  { %v18384_v22 = vcombine.high %v1007_v41, %v1019_v1  ;;  %v18383_v60 = vcombine.low %v1007_v41, %v1019_v1  ;;  %v18397_v12 = vcombine.low %v1014_v7, %v1026_v37  ;;  %v1146_v41 = vld [vmem:[#allocation5 + $0x20f0] sm:$0xff] }
 0x313   :  { %7593 = vmatmul.mubr.bf16.vlgmr.msra.gmra.mrb[12].mxu1 %v22129_v30  ;;  %8496 = vmatmul.mubr.bf16.vlgmr.msra.gmra.mrb[12].mxu0 %v22129_v30 }
 0x314   :  { %7604 = vmatpush1.bf16.msra.mxu1 %v18239_v6  ;;  %8507 = vmatpush1.bf16.msra.mxu0 %v18253_v57  ;;  %v18398_v6 = vcombine.high %v1014_v7, %v1026_v37  ;;  %v1031_v57 = vld [vmem:[#allocation5 + $0x1d58] sm:$0xff] }
 0x315   :  { %7605 = vmatprep.subr.bf16.mxu1 %v18264_v8  ;;  %8508 = vmatprep.subr.bf16.mxu0 %v18278_v9  ;;  %v1043_v8 = vld [vmem:[#allocation5 + $0x1db8] sm:$0xff]  ;;  %v1038_v9 = vld [vmem:[#allocation5 + $0x1d90] sm:$0xff] }
 0x316   :  { %7635 = vmatprep.mubr.bf16.mxu1 %v22131_v39  ;;  %8538 = vmatprep.mubr.bf16.mxu0 %v22131_v39  ;;  %v18408_v18 = vcombine.high %v1031_v57, %v1043_v8  ;;  %v18407_v17 = vcombine.low %v1031_v57, %v1043_v8  ;;  %v18421_v26 = vcombine.low %v1038_v9, %v1050_v52  ;;  %v1170_v57 = vld [vmem:[#allocation5 + $0x21b0] sm:$0xff] }
 0x318   :  { %7606 = vmatpush1.bf16.msra.mxu1 %v18263_v53  ;;  %8509 = vmatpush1.bf16.msra.mxu0 %v18277_v27  ;;  %v18422_v53 = vcombine.high %v1038_v9, %v1050_v52  ;;  %v1055_v27 = vld [vmem:[#allocation5 + $0x1e18] sm:$0xff] }
 0x319   :  { %7607 = vmatprep.subr.bf16.mxu1 %v18288_v31  ;;  %8510 = vmatprep.subr.bf16.mxu0 %v18302_v21  ;;  %v1067_v31 = vld [vmem:[#allocation5 + $0x1e78] sm:$0xff]  ;;  %v1062_v21 = vld [vmem:[#allocation5 + $0x1e50] sm:$0xff] }
 0x31a   :  { %v18432_v34 = vcombine.high %v1055_v27, %v1067_v31  ;;  %v18431_v35 = vcombine.low %v1055_v27, %v1067_v31  ;;  %v18445_v47 = vcombine.low %v1062_v21, %v1074_v33  ;;  %v1194_v27 = vld [vmem:[#allocation5 + $0x2270] sm:$0xff] }
 0x31c   :  { %7608 = vmatpush1.bf16.msra.mxu1 %v18287_v36  ;;  %8511 = vmatpush1.bf16.msra.mxu0 %v18301_v40  ;;  %v18446_v36 = vcombine.high %v1062_v21, %v1074_v33  ;;  %v1079_v40 = vld [vmem:[#allocation5 + $0x1ed8] sm:$0xff] }
 0x31d   :  { %7609 = vmatprep.subr.bf16.mxu1 %v18312_v46  ;;  %8512 = vmatprep.subr.bf16.mxu0 %v18326_v20  ;;  %v1091_v46 = vld [vmem:[#allocation5 + $0x1f38] sm:$0xff]  ;;  %v1086_v20 = vld [vmem:[#allocation5 + $0x1f10] sm:$0xff] }
 0x31e   :  { %v18456_v51 = vcombine.high %v1079_v40, %v1091_v46  ;;  %v18455_v14 = vcombine.low %v1079_v40, %v1091_v46  ;;  %v18469_v62 = vcombine.low %v1086_v20, %v1098_v49  ;;  %v1218_v40 = vld [vmem:[#allocation5 + $0x2330] sm:$0xff] }
 0x320   :  { %7610 = vmatpush1.bf16.msra.mxu1 %v18311_v5  ;;  %8513 = vmatpush1.bf16.msra.mxu0 %v18325_v32  ;;  %v18470_v5 = vcombine.high %v1086_v20, %v1098_v49  ;;  %v1103_v32 = vld [vmem:[#allocation5 + $0x1f98] sm:$0xff] }
 0x321   :  { %7611 = vmatprep.subr.bf16.mxu1 %v18336_v54  ;;  %8514 = vmatprep.subr.bf16.mxu0 %v18350_v55  ;;  %v1115_v54 = vld [vmem:[#allocation5 + $0x1ff8] sm:$0xff]  ;;  %v1110_v55 = vld [vmem:[#allocation5 + $0x1fd0] sm:$0xff] }
 0x322   :  { %v18480_v63 = vcombine.high %v1103_v32, %v1115_v54  ;;  %v18479_v1 = vcombine.low %v1103_v32, %v1115_v54  ;;  %v18493_v7 = vcombine.low %v1110_v55, %v1122_v56  ;;  %v1242_v32 = vld [vmem:[#allocation5 + $0x23f0] sm:$0xff] }
 0x324   :  { %7612 = vmatpush1.bf16.msra.mxu1 %v18335_v23  ;;  %8515 = vmatpush1.bf16.msra.mxu0 %v18349_v0  ;;  %v18494_v23 = vcombine.high %v1110_v55, %v1122_v56  ;;  %v1127_v0 = vld [vmem:[#allocation5 + $0x2058] sm:$0xff] }
 0x325   :  { %7613 = vmatprep.subr.bf16.mxu1 %v18360_v28  ;;  %8516 = vmatprep.subr.bf16.mxu0 %v18374_v11  ;;  %v1139_v28 = vld [vmem:[#allocation5 + $0x20b8] sm:$0xff]  ;;  %v1134_v11 = vld [vmem:[#allocation5 + $0x2090] sm:$0xff] }
 0x326   :  { %v18504_v37 = vcombine.high %v1127_v0, %v1139_v28  ;;  %v18503_v8 = vcombine.low %v1127_v0, %v1139_v28  ;;  %v18517_v9 = vcombine.low %v1134_v11, %v1146_v41 }
 0x328   :  { %7614 = vmatpush1.bf16.msra.mxu1 %v18359_v29  ;;  %8517 = vmatpush1.bf16.msra.mxu0 %v18373_v3  ;;  %v18518_v29 = vcombine.high %v1134_v11, %v1146_v41  ;;  %v1151_v3 = vld [vmem:[#allocation5 + $0x2118] sm:$0xff]  ;;  %v121_v41 = vld [vmem:[#allocation5 + $0xe8] sm:$0xff] }
 0x329   :  { %7615 = vmatprep.subr.bf16.mxu1 %v18384_v22  ;;  %8518 = vmatprep.subr.bf16.mxu0 %v18398_v6  ;;  %v1163_v22 = vld [vmem:[#allocation5 + $0x2178] sm:$0xff]  ;;  %v1158_v6 = vld [vmem:[#allocation5 + $0x2150] sm:$0xff] }
 0x32a   :  { %v18528_v52 = vcombine.high %v1151_v3, %v1163_v22  ;;  %v18527_v31 = vcombine.low %v1151_v3, %v1163_v22  ;;  %v18541_v21 = vcombine.low %v1158_v6, %v1170_v57  ;;  %v20070_v11 = vld [vmem:[#allocation8 + $0x4] ss:$24 sps:$4 sm:$0xff]   ;;  %v20073_v3 = vld [vmem:[#allocation8 + $0x34] ss:$24 sps:$4 sm:$0xff]  }
 0x32b   :  { %v145_v22 = vld [vmem:[#allocation5 + $0x1a8] sm:$0xff] }
 0x32c   :  { %7616 = vmatpush1.bf16.msra.mxu1 %v18383_v60  ;;  %8519 = vmatpush1.bf16.msra.mxu0 %v18397_v12  ;;  %v18542_v60 = vcombine.high %v1158_v6, %v1170_v57  ;;  %v1175_v12 = vld [vmem:[#allocation5 + $0x21d8] sm:$0xff]  ;;  %v157_v6 = vld [vmem:[#allocation5 + $0x208] sm:$0xff] }
 0x32d   :  { %7617 = vmatprep.subr.bf16.mxu1 %v18408_v18  ;;  %8520 = vmatprep.subr.bf16.mxu0 %v18422_v53  ;;  %v1187_v18 = vld [vmem:[#allocation5 + $0x2238] sm:$0xff]  ;;  %v1182_v53 = vld [vmem:[#allocation5 + $0x2210] sm:$0xff] }
 0x32e   :  { %v18552_v33 = vcombine.high %v1175_v12, %v1187_v18  ;;  %v18551_v46 = vcombine.low %v1175_v12, %v1187_v18  ;;  %v18565_v20 = vcombine.low %v1182_v53, %v1194_v27  ;;  %v181_v12 = vld [vmem:[#allocation5 + $0x2c8] sm:$0xff]  ;;  %v17523_v18 = vcombine.low %v145_v22, %v157_v6 }
 0x330   :  { %7618 = vmatpush1.bf16.msra.mxu1 %v18407_v17  ;;  %8521 = vmatpush1.bf16.msra.mxu0 %v18421_v26  ;;  %v18566_v17 = vcombine.high %v1182_v53, %v1194_v27  ;;  %v1199_v26 = vld [vmem:[#allocation5 + $0x2298] sm:$0xff] }
 0x331   :  { %7619 = vmatprep.subr.bf16.mxu1 %v18432_v34  ;;  %8522 = vmatprep.subr.bf16.mxu0 %v18446_v36  ;;  %v1211_v34 = vld [vmem:[#allocation5 + $0x22f8] sm:$0xff]  ;;  %v1206_v36 = vld [vmem:[#allocation5 + $0x22d0] sm:$0xff] }
 0x332   :  { %v18576_v49 = vcombine.high %v1199_v26, %v1211_v34  ;;  %v18575_v54 = vcombine.low %v1199_v26, %v1211_v34  ;;  %v18589_v55 = vcombine.low %v1206_v36, %v1218_v40  ;;  %v20074_v53 = vld [vmem:[#allocation8 + $0x60] ss:$24 sps:$4 sm:$0xff]   ;;  %v20077_v26 = vld [vmem:[#allocation8 + $0x90] ss:$24 sps:$4 sm:$0xff]  }
 0x334   :  { %7620 = vmatpush1.bf16.msra.mxu1 %v18431_v35  ;;  %8523 = vmatpush1.bf16.msra.mxu0 %v18445_v47  ;;  %v18590_v35 = vcombine.high %v1206_v36, %v1218_v40  ;;  %v1223_v47 = vld [vmem:[#allocation5 + $0x2358] sm:$0xff]  ;;  %v217_v40 = vld [vmem:[#allocation5 + $0x3e8] sm:$0xff] }
 0x335   :  { %7621 = vmatprep.subr.bf16.mxu1 %v18456_v51  ;;  %8524 = vmatprep.subr.bf16.mxu0 %v18470_v5  ;;  %v1235_v51 = vld [vmem:[#allocation5 + $0x23b8] sm:$0xff]  ;;  %v1230_v5 = vld [vmem:[#allocation5 + $0x2390] sm:$0xff] }
 0x336   :  { %v18600_v56 = vcombine.high %v1223_v47, %v1235_v51  ;;  %v18613_v0 = vcombine.low %v1230_v5, %v1242_v32  ;;  %v20082_v36 = vld [vmem:[#allocation8 + $0xc4] ss:$24 sps:$4 sm:$0xff]  }
 0x338   :  { %7622 = vmatpush1.bf16.msra.mxu1 %v18455_v14  ;;  %8525 = vmatpush1.bf16.msra.mxu0 %v18469_v62  ;;  %v18614_v14 = vcombine.high %v1230_v5, %v1242_v32  ;;  %v97_v62 = vld [vmem:[#allocation5 + $0x28] sm:$0xff] }
 0x339   :  { %7623 = vmatprep.subr.bf16.mxu1 %v18480_v63  ;;  %8526 = vmatprep.subr.bf16.mxu0 %v18494_v23  ;;  %v109_v63 = vld [vmem:[#allocation5 + $0x88] sm:$0xff]  ;;  %v18599_v23 = vcombine.low %v1223_v47, %v1235_v51  ;;  %v1246_v47 = vld [vmem:[#allocation7 + $0x10] sm:$0xff] }
 0x33a   :  { %v17476_v28 = vcombine.high %v97_v62, %v109_v63  ;;  %v20085_v51 = vld [vmem:[#allocation8 + $0xf4] ss:$24 sps:$4 sm:$0xff]  }
 0x33b   :  { %v241_v5 = vld [vmem:[#allocation5 + $0x4a8] sm:$0xff] }
 0x33c   :  { %7624 = vmatpush1.bf16.msra.mxu1 %v18479_v1  ;;  %8527 = vmatpush1.bf16.msra.mxu0 %v18493_v7  ;;  %v133_v1 = vld [vmem:[#allocation5 + $0x148] sm:$0xff]  ;;  %v17475_v7 = vcombine.low %v97_v62, %v109_v63  ;;  %v1317_v62 = vrot.slane %v1246_v47, %v22158_v59 }
 0x33d   :  { %7625 = vmatprep.subr.bf16.mxu1 %v18504_v37  ;;  %8528 = vmatprep.subr.bf16.mxu0 %v18518_v29  ;;  %v20068_v37 = vld [vmem:[#allocation8] ss:$24 sps:$4 sm:$0xff]   ;;  %v17500_v29 = vcombine.high %v121_v41, %v133_v1  ;;  %v17499_v57 = vcombine.low %v121_v41, %v133_v1  ;;  %v253_v32 = vld [vmem:[#allocation5 + $0x508] sm:$0xff] }
 0x33e   :  { %v20083_v63 = vld [vmem:[#allocation8 + $0xf0] ss:$24 sps:$4 sm:$0xff]  }
 0x33f   :  { %v265_v41 = vld [vmem:[#allocation5 + $0x568] sm:$0xff] }
 0x340   :  { %7626 = vmatpush1.bf16.msra.mxu1 %v18503_v8  ;;  %8529 = vmatpush1.bf16.msra.mxu0 %v18517_v9  ;;  %v20071_v8 = vld [vmem:[#allocation8 + $0x30] ss:$24 sps:$4 sm:$0xff]   ;;  %v17524_v9 = vcombine.high %v145_v22, %v157_v6  ;;  %v17619_v6 = vcombine.low %v241_v5, %v253_v32 }
 0x341   :  { %7627 = vmatprep.subr.bf16.mxu1 %v18528_v52  ;;  %8530 = vmatprep.subr.bf16.mxu0 %v18542_v60  ;;  %v20076_v52 = vld [vmem:[#allocation8 + $0x64] ss:$24 sps:$4 sm:$0xff]   ;;  %v169_v60 = vld [vmem:[#allocation5 + $0x268] sm:$0xff] }
 0x342   :  { %v17548_v27 = vcombine.high %v169_v60, %v181_v12  ;;  %v277_v1 = vld [vmem:[#allocation5 + $0x5c8] sm:$0xff] }
 0x344   :  { %7628 = vmatpush1.bf16.msra.mxu1 %v18527_v31  ;;  %8531 = vmatpush1.bf16.msra.mxu0 %v18541_v21  ;;  %v20079_v31 = vld [vmem:[#allocation8 + $0x94] ss:$24 sps:$4 sm:$0xff]  }
 0x345   :  { %7629 = vmatprep.subr.bf16.mxu1 %v18552_v33  ;;  %8532 = vmatprep.subr.bf16.mxu0 %v18566_v17  ;;  %v193_v21 = vld [vmem:[#allocation5 + $0x328] sm:$0xff]  ;;  %v17547_v17 = vcombine.low %v169_v60, %v181_v12 }
 0x346   :  { %v205_v33 = vld [vmem:[#allocation5 + $0x388] sm:$0xff] }
 0x347   :  { %v17572_v34 = vcombine.high %v193_v21, %v205_v33 }
 0x348   :  { %7630 = vmatpush1.bf16.msra.mxu1 %v18551_v46  ;;  %8533 = vmatpush1.bf16.msra.mxu0 %v18565_v20  ;;  %v229_v46 = vld [vmem:[#allocation5 + $0x448] sm:$0xff]  ;;  %v17571_v20 = vcombine.low %v193_v21, %v205_v33 }
 0x349   :  { %7631 = vmatprep.subr.bf16.mxu1 %v18576_v49  ;;  %8534 = vmatprep.subr.bf16.mxu0 %v18590_v35  ;;  %v20080_v49 = vld [vmem:[#allocation8 + $0xc0] ss:$24 sps:$4 sm:$0xff]   ;;  %v17596_v35 = vcombine.high %v217_v40, %v229_v46 }
 0x34c   :  { %7632 = vmatpush1.bf16.msra.mxu1 %v18575_v54  ;;  %8535 = vmatpush1.bf16.msra.mxu0 %v18589_v55  ;;  %v21894_v54 = vld [vmem:[#allocation7] sm:$0xff] }
 0x34d   :  { %7633 = vmatprep.subr.bf16.mxu1 %v18600_v56  ;;  %8536 = vmatprep.subr.bf16.mxu0 %v18614_v14  ;;  %v1269_v55 = vrot.slane %v21894_v54, %v22246_v43  ;;  %v1273_v56 = vrot.slane %v21894_v54, %v22249_v50  ;;  %v17595_v14 = vcombine.low %v217_v40, %v229_v46  ;;  %v313_v54 = vld [vmem:[#allocation5 + $0x6e8] sm:$0xff] }
 0x350   :  { %7634 = vmatpush1.bf16.msra.mxu1 %v18599_v23  ;;  %8537 = vmatpush1.bf16.msra.mxu0 %v18613_v0  ;;  %v17620_v23 = vcombine.high %v241_v5, %v253_v32  ;;  %v1321_v0 = vrot.slane %v1246_v47, %v22161_v61  ;;  %v20094_v32 = vld [vmem:[#allocation8 + $0x184] ss:$24 sps:$4 sm:$0xff]  }
 0x351   :  { %7775 = vmatprep.subr.bf16.mxu1 %v17476_v28  ;;  %15886 = vmatprep.subr.bf16.mxu0 %v20070_v11  ;;  %v20088_v11 = vld [vmem:[#allocation8 + $0x124] ss:$24 sps:$4 sm:$0xff]  }
 0x353   :  { %7636 = vmatmul.mubr.bf16.vlgmr.msra.gmra.mrb[12].mxu1 %v22137_v44  ;;  %8539 = vmatmul.mubr.bf16.vlgmr.msra.gmra.mrb[12].mxu0 %v22137_v44 }
 0x354   :  { %7776 = vmatpush1.bf16.msra.mxu1 %v17475_v7  ;;  %15887 = vmatpush1.bf16.msra.mxu0 %v20068_v37 }
 0x355   :  { %15918 = vmatprep.mubr.bf16.mxu0 %v22221_v10  ;;  %7777 = vmatprep.subr.bf16.mxu1 %v17500_v29 }
 0x356   :  { %15888 = vmatprep.subr.bf16.mxu0 %v20073_v3  ;;  %7807 = vmatprep.mubr.bf16.mxu1 %v22117_v58 }
 0x358   :  { %7778 = vmatpush1.bf16.msra.mxu1 %v17499_v57  ;;  %15889 = vmatpush1.bf16.msra.mxu0 %v20071_v8  ;;  %v20086_v57 = vld [vmem:[#allocation8 + $0x120] ss:$24 sps:$4 sm:$0xff]  }
 0x359   :  { %7779 = vmatprep.subr.bf16.mxu1 %v17524_v9  ;;  %15890 = vmatprep.subr.bf16.mxu0 %v20076_v52 }
 0x35c   :  { %7780 = vmatpush1.bf16.msra.mxu1 %v17523_v18  ;;  %15891 = vmatpush1.bf16.msra.mxu0 %v20074_v53  ;;  %v17644_v18 = vcombine.high %v265_v41, %v277_v1  ;;  %v289_v53 = vld [vmem:[#allocation5 + $0x628] sm:$0xff] }
 0x35d   :  { %7781 = vmatprep.subr.bf16.mxu1 %v17548_v27  ;;  %15892 = vmatprep.subr.bf16.mxu0 %v20079_v31  ;;  %v301_v27 = vld [vmem:[#allocation5 + $0x688] sm:$0xff] }
 0x360   :  { %7782 = vmatpush1.bf16.msra.mxu1 %v17547_v17  ;;  %15893 = vmatpush1.bf16.msra.mxu0 %v20077_v26  ;;  %v20091_v26 = vld [vmem:[#allocation8 + $0x154] ss:$24 sps:$4 sm:$0xff]  }
 0x361   :  { %7783 = vmatprep.subr.bf16.mxu1 %v17572_v34  ;;  %15894 = vmatprep.subr.bf16.mxu0 %v20082_v36 }
 0x364   :  { %7784 = vmatpush1.bf16.msra.mxu1 %v17571_v20  ;;  %15895 = vmatpush1.bf16.msra.mxu0 %v20080_v49  ;;  %v17643_v20 = vcombine.low %v265_v41, %v277_v1  ;;  %v17668_v49 = vcombine.high %v289_v53, %v301_v27  ;;  %v361_v1 = vld [vmem:[#allocation5 + $0x868] sm:$0xff] }
 0x365   :  { %7785 = vmatprep.subr.bf16.mxu1 %v17596_v35  ;;  %15896 = vmatprep.subr.bf16.mxu0 %v20085_v51  ;;  %v20089_v35 = vld [vmem:[#allocation8 + $0x150] ss:$24 sps:$4 sm:$0xff]  }
 0x366   :  { %v7508_v28 = vpop.f32.mrb[8].mxu1  ;;  %v8282_v29 = vpop.f32.mrb[8].mxu0 }
 0x367   :  { %v22331_v7 = vadd.f32 %v7508_v28, %v1269_v55  ;;  %v7510_v37 = vpop.f32.mrb[9].mxu1  ;;  %v22335_v8 = vadd.f32 %v8282_v29, %v1317_v62  ;;  %v8284_v9 = vpop.f32.mrb[9].mxu0 }
 0x368   :  { %v22333_v3 = vadd.f32 %v7510_v37, %v1273_v56  ;;  %v7512_v22 = vpop.f32.mrb[10].mxu1  ;;  %7786 = vmatpush1.bf16.msra.mxu1 %v17595_v14  ;;  %15897 = vmatpush1.bf16.msra.mxu0 %v20083_v63  ;;  %v22340_v31 = vadd.f32 %v8284_v9, %v1321_v0  ;;  %v8286_v21 = vpop.f32.mrb[10].mxu0  ;;  %v17667_v14 = vcombine.low %v289_v53, %v301_v27  ;;  %v373_v37 = vld [vmem:[#allocation5 + $0x8c8] sm:$0xff] }
 0x369   :  { %v8730_v52 = vmul.f32 0.70710677, %v22331_v7  ;;  %v22338_v60 = vadd.f32 %v7512_v22, %v1269_v55  ;;  %v7514_v12 = vpop.f32.mrb[11].mxu1  ;;  %7787 = vmatprep.subr.bf16.mxu1 %v17620_v23  ;;  %15898 = vmatprep.subr.bf16.mxu0 %v20088_v11  ;;  %v8288_v34 = vpop.f32.mrb[11].mxu0  ;;  %v8742_v40 = vmul.f32 0.70710677, %v22335_v8  ;;  %v19803_v51 = vadd.f32 %v8286_v21, %v1317_v62 }
 0x36a   :  { %v8731_v33 = vmul.f32 0.70710677, %v22333_v3  ;;  %v22343_v17 = vadd.f32 %v7514_v12, %v1273_v56  ;;  %v8743_v47 = vmul.f32 0.70710677, %v22340_v31  ;;  %v22349_v5 = vadd.f32 %v8288_v34, %v1321_v0  ;;  %v325_v55 = vld [vmem:[#allocation5 + $0x748] sm:$0xff] }
 0x36b   :  { %21828 = verf.f32 %v8730_v52  ;;  %v8754_v36 = vmul.f32 0.70710677, %v22338_v60  ;;  %v8766_v56 = vmul.f32 0.70710677, %v19803_v51  ;;  %v20092_v23 = vld [vmem:[#allocation8 + $0x180] ss:$24 sps:$4 sm:$0xff]   ;;  %v17692_v28 = vcombine.high %v313_v54, %v325_v55 }
 0x36c   :  { %21830 = verf.f32 %v8731_v33  ;;  %v8755_v46 = vmul.f32 0.70710677, %v22343_v17  ;;  %7788 = vmatpush1.bf16.msra.mxu1 %v17619_v6  ;;  %15899 = vmatpush1.bf16.msra.mxu0 %v20086_v57  ;;  %v8767_v63 = vmul.f32 0.70710677, %v22349_v5  ;;  %v20097_v62 = vld [vmem:[#allocation8 + $0x1b4] ss:$24 sps:$4 sm:$0xff]   ;;  %v17691_v41 = vcombine.low %v313_v54, %v325_v55 }
 0x36d   :  { %21832 = verf.f32 %v8754_v36  ;;  %7789 = vmatprep.subr.bf16.mxu1 %v17644_v18  ;;  %15900 = vmatprep.subr.bf16.mxu0 %v20091_v26  ;;  %v337_v0 = vld [vmem:[#allocation5 + $0x7a8] sm:$0xff]  ;;  %v20100_v52 = vld [vmem:[#allocation8 + $0x1e4] ss:$24 sps:$4 sm:$0xff]   ;;  %v17740_v27 = vcombine.high %v361_v1, %v373_v37  ;;  %v8682_v33 = vmul.f32 0.5, %v22331_v7  ;;  %v8706_v26 = vmul.f32 0.5, %v22338_v60 }
 0x36e   :  { %21834 = verf.f32 %v8755_v46  ;;  %v349_v11 = vld [vmem:[#allocation5 + $0x808] sm:$0xff]  ;;  %v8694_v36 = vmul.f32 0.5, %v22335_v8  ;;  %v8683_v46 = vmul.f32 0.5, %v22333_v3  ;;  %v8718_v8 = vmul.f32 0.5, %v19803_v51 }
 0x36f   :  { %21836 = verf.f32 %v8742_v40  ;;  %v20095_v22 = vld [vmem:[#allocation8 + $0x1b0] ss:$24 sps:$4 sm:$0xff]   ;;  %v17716_v6 = vcombine.high %v337_v0, %v349_v11  ;;  %v17715_v53 = vcombine.low %v337_v0, %v349_v11  ;;  %v20103_v60 = vld [vmem:[#allocation8 + $0x214] ss:$24 sps:$4 sm:$0xff]  }
 0x370   :  { %7790 = vmatpush1.bf16.msra.mxu1 %v17643_v20  ;;  %21838 = verf.f32 %v8743_v47  ;;  %15901 = vmatpush1.bf16.msra.mxu0 %v20089_v35  ;;  %v8707_v20 = vmul.f32 0.5, %v22343_v17  ;;  %v20098_v35 = vld [vmem:[#allocation8 + $0x1e0] ss:$24 sps:$4 sm:$0xff]   ;;  %v8695_v47 = vmul.f32 0.5, %v22340_v31  ;;  %v385_v55 = vld [vmem:[#allocation5 + $0x928] sm:$0xff]  ;;  %v8719_v17 = vmul.f32 0.5, %v22349_v5 }
 0x371   :  { %7791 = vmatprep.subr.bf16.mxu1 %v17668_v49  ;;  %21840 = verf.f32 %v8766_v56  ;;  %15902 = vmatprep.subr.bf16.mxu0 %v20094_v32  ;;  %v397_v56 = vld [vmem:[#allocation5 + $0x988] sm:$0xff]  ;;  %v17739_v31 = vcombine.low %v361_v1, %v373_v37  ;;  %v20104_v1 = vld [vmem:[#allocation8 + $0x240] ss:$24 sps:$4 sm:$0xff]  }
 0x372   :  { %21842 = verf.f32 %v8767_v63 }
 0x374   :  { %7792 = vmatpush1.bf16.msra.mxu1 %v17667_v14  ;;  %15903 = vmatpush1.bf16.msra.mxu0 %v20092_v23 }
 0x375   :  { %v21829_v29 = vpop.eup %21828  ;;  %7793 = vmatprep.subr.bf16.mxu1 %v17692_v28  ;;  %15904 = vmatprep.subr.bf16.mxu0 %v20097_v62 }
 0x376   :  { %v21831_v57 = vpop.eup %21830  ;;  %v8826_v9 = vadd.f32 1.0, %v21829_v29  ;;  %v20101_v29 = vld [vmem:[#allocation8 + $0x210] ss:$24 sps:$4 sm:$0xff]  }
 0x377   :  { %v21833_v12 = vpop.eup %21832  ;;  %v8827_v18 = vadd.f32 1.0, %v21831_v57 }
 0x378   :  { %v21835_v21 = vpop.eup %21834  ;;  %v8850_v34 = vadd.f32 1.0, %v21833_v12  ;;  %7794 = vmatpush1.bf16.msra.mxu1 %v17691_v41  ;;  %15905 = vmatpush1.bf16.msra.mxu0 %v20095_v22  ;;  %v8874_v54 = vmul.f32 %v8826_v9, %v8682_v33  ;;  %v17764_v22 = vcombine.high %v385_v55, %v397_v56  ;;  %v20106_v9 = vld [vmem:[#allocation8 + $0x244] ss:$24 sps:$4 sm:$0xff]   ;;  %v421_v12 = vld [vmem:[#allocation5 + $0xa48] sm:$0xff] }
 0x379   :  { %v21837_v40 = vpop.eup %21836  ;;  %v8851_v49 = vadd.f32 1.0, %v21835_v21  ;;  %7795 = vmatprep.subr.bf16.mxu1 %v17716_v6  ;;  %15906 = vmatprep.subr.bf16.mxu0 %v20100_v52  ;;  %v8875_v23 = vmul.f32 %v8827_v18, %v8683_v46  ;;  %v409_v52 = vld [vmem:[#allocation5 + $0x9e8] sm:$0xff]  ;;  %v17763_v21 = vcombine.low %v385_v55, %v397_v56 }
 0x37a   :  { %v21839_v32 = vpop.eup %21838  ;;  %v8898_v7 = vmul.f32 %v8850_v34, %v8706_v26  ;;  %v8838_v14 = vadd.f32 1.0, %v21837_v40  ;;  %v17788_v37 = vcombine.high %v409_v52, %v421_v12  ;;  %v20109_v33 = vld [vmem:[#allocation8 + $0x274] ss:$24 sps:$4 sm:$0xff]   ;;  %v20107_v40 = vld [vmem:[#allocation8 + $0x270] ss:$24 sps:$4 sm:$0xff]  }
 0x37b   :  { %v21841_v63 = vpop.eup %21840  ;;  %v8899_v3 = vmul.f32 %v8851_v49, %v8707_v20  ;;  %v8839_v28 = vadd.f32 1.0, %v21839_v32  ;;  %v433_v26 = vld [vmem:[#allocation5 + $0xaa8] sm:$0xff]  ;;  %v20112_v20 = vld [vmem:[#allocation8 + $0x2a4] ss:$24 sps:$4 sm:$0xff]   ;;  %v20110_v32 = vld [vmem:[#allocation8 + $0x2a0] ss:$24 sps:$4 sm:$0xff]  }
 0x37c   :  { %v21843_v62 = vpop.eup %21842  ;;  %v22359_v0 = vpack.c.bf16 %v8898_v7, %v8874_v54  ;;  %7796 = vmatpush1.bf16.msra.mxu1 %v17715_v53  ;;  %v8886_v11 = vmul.f32 %v8838_v14, %v8694_v36  ;;  %v8862_v41 = vadd.f32 1.0, %v21841_v63  ;;  %15907 = vmatpush1.bf16.msra.mxu0 %v20098_v35  ;;  %v445_v34 = vld [vmem:[#allocation5 + $0xb08] sm:$0xff]  ;;  %v17787_v36 = vcombine.low %v409_v52, %v421_v12  ;;  %v20118_v63 = vld [vmem:[#allocation8 + $0x304] ss:$24 sps:$4 sm:$0xff]  }
 0x37d   :  { %7797 = vmatprep.subr.bf16.mxu1 %v17740_v27  ;;  %v8887_v6 = vmul.f32 %v8839_v28, %v8695_v47  ;;  %v8863_v57 = vadd.f32 1.0, %v21843_v62  ;;  %v22361_v51 = vpack.c.bf16 %v8899_v3, %v8875_v23  ;;  %15908 = vmatprep.subr.bf16.mxu0 %v20103_v60  ;;  %v17812_v46 = vcombine.high %v433_v26, %v445_v34  ;;  %v457_v49 = vld [vmem:[#allocation5 + $0xb68] sm:$0xff] }
 0x37e   :  { %v8910_v5 = vmul.f32 %v8862_v41, %v8718_v8  ;;  %v469_v35 = vld [vmem:[#allocation5 + $0xbc8] sm:$0xff]  ;;  %v17811_v47 = vcombine.low %v433_v26, %v445_v34 }
 0x37f   :  { %v8911_v18 = vmul.f32 %v8863_v57, %v8719_v17  ;;  %v17836_v54 = vcombine.high %v457_v49, %v469_v35  ;;  %v20115_v7 = vld [vmem:[#allocation8 + $0x2d4] ss:$24 sps:$4 sm:$0xff]   ;;  %v17835_v56 = vcombine.low %v457_v49, %v469_v35  ;;  %v20113_v14 = vld [vmem:[#allocation8 + $0x2d0] ss:$24 sps:$4 sm:$0xff]   ;;  %v20116_v17 = vld [vmem:[#allocation8 + $0x300] ss:$24 sps:$4 sm:$0xff]  }
 0x380   :  { %7798 = vmatpush1.bf16.msra.mxu1 %v17739_v31  ;;  %v22363_v53 = vpack.c.bf16 %v8910_v5, %v8886_v11  ;;  %15909 = vmatpush1.bf16.msra.mxu0 %v20101_v29  ;;  %v481_v60 = vld [vmem:[#allocation5 + $0xc28] sm:$0xff]  ;;  %v20124_v57 = vld [vmem:[#allocation8 + $0x364] ss:$24 sps:$4 sm:$0xff]   ;;  %v20122_v5 = vld [vmem:[#allocation8 + $0x360] ss:$24 sps:$4 sm:$0xff]  }
 0x381   :  { %7799 = vmatprep.subr.bf16.mxu1 %v17764_v22  ;;  %v22365_v27 = vpack.c.bf16 %v8911_v18, %v8887_v6  ;;  %15910 = vmatprep.subr.bf16.mxu0 %v20106_v9  ;;  %v493_v55 = vld [vmem:[#allocation5 + $0xc88] sm:$0xff]  ;;  %v20128_v49 = vld [vmem:[#allocation8 + $0x3c0] ss:$24 sps:$4 sm:$0xff]  }
 0x382   :  { %v17860_v8 = vcombine.high %v481_v60, %v493_v55  ;;  %v505_v23 = vld [vmem:[#allocation5 + $0xce8] sm:$0xff]  ;;  %v17859_v28 = vcombine.low %v481_v60, %v493_v55 }
 0x383   :  { %v517_v3 = vld [vmem:[#allocation5 + $0xd48] sm:$0xff] }
 0x384   :  { %7800 = vmatpush1.bf16.msra.mxu1 %v17763_v21  ;;  %15911 = vmatpush1.bf16.msra.mxu0 %v20104_v1  ;;  %v17884_v62 = vcombine.high %v505_v23, %v517_v3  ;;  %v20121_v31 = vld [vmem:[#allocation8 + $0x334] ss:$24 sps:$4 sm:$0xff]   ;;  %v17883_v29 = vcombine.low %v505_v23, %v517_v3  ;;  %v20119_v22 = vld [vmem:[#allocation8 + $0x330] ss:$24 sps:$4 sm:$0xff]   ;;  %v20134_v23 = vld [vmem:[#allocation8 + $0x420] ss:$24 sps:$4 sm:$0xff]  }
 0x385   :  { %7801 = vmatprep.subr.bf16.mxu1 %v17788_v37  ;;  %15912 = vmatprep.subr.bf16.mxu0 %v20109_v33  ;;  %v529_v11 = vld [vmem:[#allocation5 + $0xda8] sm:$0xff] }
 0x386   :  { %v541_v41 = vld [vmem:[#allocation5 + $0xe08] sm:$0xff] }
 0x387   :  { %v17908_v6 = vcombine.high %v529_v11, %v541_v41  ;;  %v553_v9 = vld [vmem:[#allocation5 + $0xe68] sm:$0xff]  ;;  %v17907_v12 = vcombine.low %v529_v11, %v541_v41 }
 0x388   :  { %7802 = vmatpush1.bf16.msra.mxu1 %v17787_v36  ;;  %15913 = vmatpush1.bf16.msra.mxu0 %v20107_v40  ;;  %v565_v52 = vld [vmem:[#allocation5 + $0xec8] sm:$0xff]  ;;  %v20130_v36 = vld [vmem:[#allocation8 + $0x3c4] ss:$24 sps:$4 sm:$0xff]  }
 0x389   :  { %7803 = vmatprep.subr.bf16.mxu1 %v17812_v46  ;;  %15914 = vmatprep.subr.bf16.mxu0 %v20112_v20  ;;  %v17932_v18 = vcombine.high %v553_v9, %v565_v52  ;;  %v20127_v21 = vld [vmem:[#allocation8 + $0x394] ss:$24 sps:$4 sm:$0xff]   ;;  %v17931_v33 = vcombine.low %v553_v9, %v565_v52  ;;  %v20125_v26 = vld [vmem:[#allocation8 + $0x390] ss:$24 sps:$4 sm:$0xff]   ;;  %v20140_v9 = vld [vmem:[#allocation8 + $0x480] ss:$24 sps:$4 sm:$0xff]  }
 0x38a   :  { %v577_v1 = vld [vmem:[#allocation5 + $0xf28] sm:$0xff] }
 0x38b   :  { %v589_v37 = vld [vmem:[#allocation5 + $0xf88] sm:$0xff] }
 0x38c   :  { %7804 = vmatpush1.bf16.msra.mxu1 %v17811_v47  ;;  %15915 = vmatpush1.bf16.msra.mxu0 %v20110_v32  ;;  %v17956_v34 = vcombine.high %v577_v1, %v589_v37  ;;  %v601_v40 = vld [vmem:[#allocation5 + $0xfe8] sm:$0xff]  ;;  %v17955_v20 = vcombine.low %v577_v1, %v589_v37 }
 0x38d   :  { %7805 = vmatprep.subr.bf16.mxu1 %v17836_v54  ;;  %15916 = vmatprep.subr.bf16.mxu0 %v20115_v7  ;;  %v613_v46 = vld [vmem:[#allocation5 + $0x1048] sm:$0xff] }
 0x38e   :  { %v17980_v35 = vcombine.high %v601_v40, %v613_v46  ;;  %v20133_v47 = vld [vmem:[#allocation8 + $0x3f4] ss:$24 sps:$4 sm:$0xff]   ;;  %v17979_v7 = vcombine.low %v601_v40, %v613_v46  ;;  %v20131_v60 = vld [vmem:[#allocation8 + $0x3f0] ss:$24 sps:$4 sm:$0xff]   ;;  %v20146_v40 = vld [vmem:[#allocation8 + $0x4e0] ss:$24 sps:$4 sm:$0xff]  }
 0x38f   :  { %v625_v32 = vld [vmem:[#allocation5 + $0x10a8] sm:$0xff] }
 0x390   :  { %7806 = vmatpush1.bf16.msra.mxu1 %v17835_v56  ;;  %15917 = vmatpush1.bf16.msra.mxu0 %v20113_v14  ;;  %v637_v54 = vld [vmem:[#allocation5 + $0x1108] sm:$0xff]  ;;  %v20136_v56 = vld [vmem:[#allocation8 + $0x424] ss:$24 sps:$4 sm:$0xff]  }
 0x391   :  { %7818 = vmatprep.subr.bf16.mxu1 %v17860_v8  ;;  %15929 = vmatprep.subr.bf16.mxu0 %v20118_v63  ;;  %v18004_v55 = vcombine.high %v625_v32, %v637_v54  ;;  %v649_v14 = vld [vmem:[#allocation5 + $0x1168] sm:$0xff]  ;;  %v18003_v63 = vcombine.low %v625_v32, %v637_v54 }
 0x392   :  { %v661_v8 = vld [vmem:[#allocation5 + $0x11c8] sm:$0xff] }
 0x393   :  { %7808 = vmatmul.mubr.bf16.vlgmr.msra.gmra.mrb[16].mxu1 %v22121_v15  ;;  %15919 = vmatmul.mubr.bf16.vlgmr.msra.gmra.mrb[16].mxu0 %v22217_v2  ;;  %v18028_v3 = vcombine.high %v649_v14, %v661_v8  ;;  %v20137_v11 = vld [vmem:[#allocation8 + $0x450] ss:$24 sps:$4 sm:$0xff]  }
 0x394   :  { %7819 = vmatpush1.bf16.msra.mxu1 %v17859_v28  ;;  %15930 = vmatpush1.bf16.msra.mxu0 %v20116_v17  ;;  %v20139_v28 = vld [vmem:[#allocation8 + $0x454] ss:$24 sps:$4 sm:$0xff]   ;;  %v20143_v1 = vld [vmem:[#allocation8 + $0x4b0] ss:$24 sps:$4 sm:$0xff]  }
 0x395   :  { %15961 = vmatprep.mubr.bf16.mxu0 %v22309_v19  ;;  %7820 = vmatprep.subr.bf16.mxu1 %v17884_v62  ;;  %v673_v17 = vld [vmem:[#allocation5 + $0x1228] sm:$0xff] }
 0x396   :  { %15931 = vmatprep.subr.bf16.mxu0 %v20121_v31  ;;  %7850 = vmatprep.mubr.bf16.mxu1 %v22123_v25  ;;  %v685_v62 = vld [vmem:[#allocation5 + $0x1288] sm:$0xff]  ;;  %v18027_v31 = vcombine.low %v649_v14, %v661_v8  ;;  %v20152_v14 = vld [vmem:[#allocation8 + $0x540] ss:$24 sps:$4 sm:$0xff]  }
 0x397   :  { %v18052_v41 = vcombine.high %v673_v17, %v685_v62  ;;  %v20149_v32 = vld [vmem:[#allocation8 + $0x510] ss:$24 sps:$4 sm:$0xff]  }
 0x398   :  { %7821 = vmatpush1.bf16.msra.mxu1 %v17883_v29  ;;  %15932 = vmatpush1.bf16.msra.mxu0 %v20119_v22  ;;  %v20142_v29 = vld [vmem:[#allocation8 + $0x484] ss:$24 sps:$4 sm:$0xff]   ;;  %v697_v22 = vld [vmem:[#allocation5 + $0x12e8] sm:$0xff] }
 0x399   :  { %7822 = vmatprep.subr.bf16.mxu1 %v17908_v6  ;;  %15933 = vmatprep.subr.bf16.mxu0 %v20124_v57  ;;  %v709_v6 = vld [vmem:[#allocation5 + $0x1348] sm:$0xff]  ;;  %v18051_v57 = vcombine.low %v673_v17, %v685_v62 }
 0x39a   :  { %v18076_v52 = vcombine.high %v697_v22, %v709_v6  ;;  %v20155_v17 = vld [vmem:[#allocation8 + $0x570] ss:$24 sps:$4 sm:$0xff]  }
 0x39c   :  { %7823 = vmatpush1.bf16.msra.mxu1 %v17907_v12  ;;  %15934 = vmatpush1.bf16.msra.mxu0 %v20122_v5  ;;  %v20145_v12 = vld [vmem:[#allocation8 + $0x4b4] ss:$24 sps:$4 sm:$0xff]  }
 0x39d   :  { %7824 = vmatprep.subr.bf16.mxu1 %v17932_v18  ;;  %15935 = vmatprep.subr.bf16.mxu0 %v20127_v21  ;;  %v721_v5 = vld [vmem:[#allocation5 + $0x13a8] sm:$0xff]  ;;  %v18075_v21 = vcombine.low %v697_v22, %v709_v6  ;;  %v20158_v22 = vld [vmem:[#allocation8 + $0x5a0] ss:$24 sps:$4 sm:$0xff]  }
 0x39e   :  { %v733_v18 = vld [vmem:[#allocation5 + $0x1408] sm:$0xff] }
 0x39f   :  { %v18100_v37 = vcombine.high %v721_v5, %v733_v18 }
 0x3a0   :  { %7825 = vmatpush1.bf16.msra.mxu1 %v17931_v33  ;;  %15936 = vmatpush1.bf16.msra.mxu0 %v20125_v26  ;;  %v20148_v33 = vld [vmem:[#allocation8 + $0x4e4] ss:$24 sps:$4 sm:$0xff]   ;;  %v745_v26 = vld [vmem:[#allocation5 + $0x1468] sm:$0xff] }
 0x3a1   :  { %7826 = vmatprep.subr.bf16.mxu1 %v17956_v34  ;;  %15937 = vmatprep.subr.bf16.mxu0 %v20130_v36  ;;  %v757_v34 = vld [vmem:[#allocation5 + $0x14c8] sm:$0xff]  ;;  %v18099_v36 = vcombine.low %v721_v5, %v733_v18 }
 0x3a2   :  { %v18124_v46 = vcombine.high %v745_v26, %v757_v34  ;;  %v20161_v5 = vld [vmem:[#allocation8 + $0x5d0] ss:$24 sps:$4 sm:$0xff]  }
 0x3a4   :  { %7827 = vmatpush1.bf16.msra.mxu1 %v17955_v20  ;;  %15938 = vmatpush1.bf16.msra.mxu0 %v20128_v49  ;;  %v20151_v20 = vld [vmem:[#allocation8 + $0x514] ss:$24 sps:$4 sm:$0xff]  }
 0x3a5   :  { %7828 = vmatprep.subr.bf16.mxu1 %v17980_v35  ;;  %15939 = vmatprep.subr.bf16.mxu0 %v20133_v47  ;;  %v769_v49 = vld [vmem:[#allocation5 + $0x1528] sm:$0xff]  ;;  %v18123_v47 = vcombine.low %v745_v26, %v757_v34  ;;  %v20164_v26 = vld [vmem:[#allocation8 + $0x600] ss:$24 sps:$4 sm:$0xff]  }
 0x3a6   :  { %v781_v35 = vld [vmem:[#allocation5 + $0x1588] sm:$0xff] }
 0x3a7   :  { %v18148_v54 = vcombine.high %v769_v49, %v781_v35 }
 0x3a8   :  { %7829 = vmatpush1.bf16.msra.mxu1 %v17979_v7  ;;  %15940 = vmatpush1.bf16.msra.mxu0 %v20131_v60  ;;  %v20154_v7 = vld [vmem:[#allocation8 + $0x544] ss:$24 sps:$4 sm:$0xff]   ;;  %v793_v60 = vld [vmem:[#allocation5 + $0x15e8] sm:$0xff] }
 0x3a9   :  { %7830 = vmatprep.subr.bf16.mxu1 %v18004_v55  ;;  %15941 = vmatprep.subr.bf16.mxu0 %v20136_v56  ;;  %v805_v55 = vld [vmem:[#allocation5 + $0x1648] sm:$0xff]  ;;  %v18147_v56 = vcombine.low %v769_v49, %v781_v35 }
 0x3aa   :  { %v18172_v8 = vcombine.high %v793_v60, %v805_v55  ;;  %v20167_v49 = vld [vmem:[#allocation8 + $0x630] ss:$24 sps:$4 sm:$0xff]  }
 0x3ac   :  { %7831 = vmatpush1.bf16.msra.mxu1 %v18003_v63  ;;  %15942 = vmatpush1.bf16.msra.mxu0 %v20134_v23  ;;  %v20157_v63 = vld [vmem:[#allocation8 + $0x574] ss:$24 sps:$4 sm:$0xff]  }
 0x3ad   :  { %7832 = vmatprep.subr.bf16.mxu1 %v18028_v3  ;;  %15943 = vmatprep.subr.bf16.mxu0 %v20139_v28  ;;  %v817_v23 = vld [vmem:[#allocation5 + $0x16a8] sm:$0xff]  ;;  %v18171_v28 = vcombine.low %v793_v60, %v805_v55  ;;  %v20170_v60 = vld [vmem:[#allocation8 + $0x660] ss:$24 sps:$4 sm:$0xff]  }
 0x3ae   :  { %v829_v3 = vld [vmem:[#allocation5 + $0x1708] sm:$0xff] }
 0x3af   :  { %v18196_v62 = vcombine.high %v817_v23, %v829_v3 }
 0x3b0   :  { %7833 = vmatpush1.bf16.msra.mxu1 %v18027_v31  ;;  %15944 = vmatpush1.bf16.msra.mxu0 %v20137_v11  ;;  %v20160_v31 = vld [vmem:[#allocation8 + $0x5a4] ss:$24 sps:$4 sm:$0xff]   ;;  %v841_v11 = vld [vmem:[#allocation5 + $0x1768] sm:$0xff] }
 0x3b1   :  { %7834 = vmatprep.subr.bf16.mxu1 %v18052_v41  ;;  %15945 = vmatprep.subr.bf16.mxu0 %v20142_v29  ;;  %v853_v41 = vld [vmem:[#allocation5 + $0x17c8] sm:$0xff]  ;;  %v18195_v29 = vcombine.low %v817_v23, %v829_v3 }
 0x3b2   :  { %v18220_v6 = vcombine.high %v841_v11, %v853_v41  ;;  %v20173_v23 = vld [vmem:[#allocation8 + $0x690] ss:$24 sps:$4 sm:$0xff]  }
 0x3b4   :  { %7835 = vmatpush1.bf16.msra.mxu1 %v18051_v57  ;;  %15946 = vmatpush1.bf16.msra.mxu0 %v20140_v9  ;;  %v20163_v57 = vld [vmem:[#allocation8 + $0x5d4] ss:$24 sps:$4 sm:$0xff]  }
 0x3b5   :  { %7836 = vmatprep.subr.bf16.mxu1 %v18076_v52  ;;  %15947 = vmatprep.subr.bf16.mxu0 %v20145_v12  ;;  %v865_v9 = vld [vmem:[#allocation5 + $0x1828] sm:$0xff]  ;;  %v18219_v12 = vcombine.low %v841_v11, %v853_v41  ;;  %v20176_v11 = vld [vmem:[#allocation8 + $0x6c0] ss:$24 sps:$4 sm:$0xff]  }
 0x3b6   :  { %v877_v52 = vld [vmem:[#allocation5 + $0x1888] sm:$0xff] }
 0x3b7   :  { %v18244_v18 = vcombine.high %v865_v9, %v877_v52 }
 0x3b8   :  { %7837 = vmatpush1.bf16.msra.mxu1 %v18075_v21  ;;  %15948 = vmatpush1.bf16.msra.mxu0 %v20143_v1  ;;  %v20166_v21 = vld [vmem:[#allocation8 + $0x604] ss:$24 sps:$4 sm:$0xff]   ;;  %v889_v1 = vld [vmem:[#allocation5 + $0x18e8] sm:$0xff] }
 0x3b9   :  { %7838 = vmatprep.subr.bf16.mxu1 %v18100_v37  ;;  %15949 = vmatprep.subr.bf16.mxu0 %v20148_v33  ;;  %v901_v37 = vld [vmem:[#allocation5 + $0x1948] sm:$0xff]  ;;  %v18243_v33 = vcombine.low %v865_v9, %v877_v52 }
 0x3ba   :  { %v18268_v34 = vcombine.high %v889_v1, %v901_v37  ;;  %v20179_v9 = vld [vmem:[#allocation8 + $0x6f0] ss:$24 sps:$4 sm:$0xff]  }
 0x3bc   :  { %7839 = vmatpush1.bf16.msra.mxu1 %v18099_v36  ;;  %15950 = vmatpush1.bf16.msra.mxu0 %v20146_v40  ;;  %v20169_v36 = vld [vmem:[#allocation8 + $0x634] ss:$24 sps:$4 sm:$0xff]  }
 0x3bd   :  { %7840 = vmatprep.subr.bf16.mxu1 %v18124_v46  ;;  %15951 = vmatprep.subr.bf16.mxu0 %v20151_v20  ;;  %v913_v40 = vld [vmem:[#allocation5 + $0x19a8] sm:$0xff]  ;;  %v18267_v20 = vcombine.low %v889_v1, %v901_v37  ;;  %v20182_v1 = vld [vmem:[#allocation8 + $0x720] ss:$24 sps:$4 sm:$0xff]  }
 0x3be   :  { %v925_v46 = vld [vmem:[#allocation5 + $0x1a08] sm:$0xff] }
 0x3bf   :  { %v18292_v35 = vcombine.high %v913_v40, %v925_v46 }
 0x3c0   :  { %7841 = vmatpush1.bf16.msra.mxu1 %v18123_v47  ;;  %15952 = vmatpush1.bf16.msra.mxu0 %v20149_v32  ;;  %v20172_v47 = vld [vmem:[#allocation8 + $0x664] ss:$24 sps:$4 sm:$0xff]   ;;  %v937_v32 = vld [vmem:[#allocation5 + $0x1a68] sm:$0xff] }
 0x3c1   :  { %7842 = vmatprep.subr.bf16.mxu1 %v18148_v54  ;;  %15953 = vmatprep.subr.bf16.mxu0 %v20154_v7  ;;  %v949_v54 = vld [vmem:[#allocation5 + $0x1ac8] sm:$0xff]  ;;  %v18291_v7 = vcombine.low %v913_v40, %v925_v46 }
 0x3c2   :  { %v18316_v55 = vcombine.high %v937_v32, %v949_v54  ;;  %v20185_v40 = vld [vmem:[#allocation8 + $0x750] ss:$24 sps:$4 sm:$0xff]  }
 0x3c4   :  { %7843 = vmatpush1.bf16.msra.mxu1 %v18147_v56  ;;  %15954 = vmatpush1.bf16.msra.mxu0 %v20152_v14  ;;  %v20175_v56 = vld [vmem:[#allocation8 + $0x694] ss:$24 sps:$4 sm:$0xff]  }
 0x3c5   :  { %7844 = vmatprep.subr.bf16.mxu1 %v18172_v8  ;;  %15955 = vmatprep.subr.bf16.mxu0 %v20157_v63  ;;  %v961_v14 = vld [vmem:[#allocation5 + $0x1b28] sm:$0xff]  ;;  %v18315_v63 = vcombine.low %v937_v32, %v949_v54  ;;  %v20188_v32 = vld [vmem:[#allocation8 + $0x780] ss:$24 sps:$4 sm:$0xff]  }
 0x3c6   :  { %v973_v8 = vld [vmem:[#allocation5 + $0x1b88] sm:$0xff] }
 0x3c7   :  { %v18340_v3 = vcombine.high %v961_v14, %v973_v8 }
 0x3c8   :  { %7845 = vmatpush1.bf16.msra.mxu1 %v18171_v28  ;;  %15956 = vmatpush1.bf16.msra.mxu0 %v20155_v17  ;;  %v20178_v28 = vld [vmem:[#allocation8 + $0x6c4] ss:$24 sps:$4 sm:$0xff]   ;;  %v985_v17 = vld [vmem:[#allocation5 + $0x1be8] sm:$0xff] }
 0x3c9   :  { %7846 = vmatprep.subr.bf16.mxu1 %v18196_v62  ;;  %15957 = vmatprep.subr.bf16.mxu0 %v20160_v31  ;;  %v997_v62 = vld [vmem:[#allocation5 + $0x1c48] sm:$0xff]  ;;  %v18339_v31 = vcombine.low %v961_v14, %v973_v8 }
 0x3ca   :  { %v18364_v41 = vcombine.high %v985_v17, %v997_v62  ;;  %v20191_v14 = vld [vmem:[#allocation8 + $0x7b0] ss:$24 sps:$4 sm:$0xff]  }
 0x3cc   :  { %7847 = vmatpush1.bf16.msra.mxu1 %v18195_v29  ;;  %15958 = vmatpush1.bf16.msra.mxu0 %v20158_v22  ;;  %v20181_v29 = vld [vmem:[#allocation8 + $0x6f4] ss:$24 sps:$4 sm:$0xff]  }
 0x3cd   :  { %7848 = vmatprep.subr.bf16.mxu1 %v18220_v6  ;;  %15959 = vmatprep.subr.bf16.mxu0 %v20163_v57  ;;  %v1009_v22 = vld [vmem:[#allocation5 + $0x1ca8] sm:$0xff]  ;;  %v18363_v57 = vcombine.low %v985_v17, %v997_v62  ;;  %v20194_v17 = vld [vmem:[#allocation8 + $0x7e0] ss:$24 sps:$4 sm:$0xff]  }
 0x3ce   :  { %v1021_v6 = vld [vmem:[#allocation5 + $0x1d08] sm:$0xff] }
 0x3cf   :  { %v18388_v52 = vcombine.high %v1009_v22, %v1021_v6 }
 0x3d0   :  { %7849 = vmatpush1.bf16.msra.mxu1 %v18219_v12  ;;  %15960 = vmatpush1.bf16.msra.mxu0 %v20161_v5  ;;  %v20184_v12 = vld [vmem:[#allocation8 + $0x724] ss:$24 sps:$4 sm:$0xff]   ;;  %v1033_v5 = vld [vmem:[#allocation5 + $0x1d68] sm:$0xff] }
 0x3d1   :  { %7861 = vmatprep.subr.bf16.mxu1 %v18244_v18  ;;  %15972 = vmatprep.subr.bf16.mxu0 %v20166_v21  ;;  %v1045_v18 = vld [vmem:[#allocation5 + $0x1dc8] sm:$0xff]  ;;  %v18387_v21 = vcombine.low %v1009_v22, %v1021_v6 }
 0x3d2   :  { %v18412_v37 = vcombine.high %v1033_v5, %v1045_v18  ;;  %v20197_v22 = vld [vmem:[#allocation8 + $0x810] ss:$24 sps:$4 sm:$0xff]  }
 0x3d3   :  { %7851 = vmatmul.mubr.bf16.vlgmr.msra.gmra.mrb[16].mxu1 %v22129_v30  ;;  %15962 = vmatmul.mubr.bf16.vlgmr.msra.gmra.mrb[16].mxu0 %v22305_v4 }
 0x3d4   :  { %7862 = vmatpush1.bf16.msra.mxu1 %v18243_v33  ;;  %15973 = vmatpush1.bf16.msra.mxu0 %v20164_v26  ;;  %v20187_v33 = vld [vmem:[#allocation8 + $0x754] ss:$24 sps:$4 sm:$0xff]  }
 0x3d5   :  { %16004 = vmatprep.mubr.bf16.mxu0 %v22361_v51  ;;  %7863 = vmatprep.subr.bf16.mxu1 %v18268_v34  ;;  %v1057_v26 = vld [vmem:[#allocation5 + $0x1e28] sm:$0xff] }
 0x3d6   :  { %15974 = vmatprep.subr.bf16.mxu0 %v20169_v36  ;;  %7893 = vmatprep.mubr.bf16.mxu1 %v22131_v39  ;;  %v1069_v34 = vld [vmem:[#allocation5 + $0x1e88] sm:$0xff]  ;;  %v18411_v36 = vcombine.low %v1033_v5, %v1045_v18  ;;  %v20200_v5 = vld [vmem:[#allocation8 + $0x840] ss:$24 sps:$4 sm:$0xff]  }
 0x3d7   :  { %v18436_v46 = vcombine.high %v1057_v26, %v1069_v34 }
 0x3d8   :  { %7864 = vmatpush1.bf16.msra.mxu1 %v18267_v20  ;;  %15975 = vmatpush1.bf16.msra.mxu0 %v20167_v49  ;;  %v20190_v20 = vld [vmem:[#allocation8 + $0x784] ss:$24 sps:$4 sm:$0xff]   ;;  %v1081_v49 = vld [vmem:[#allocation5 + $0x1ee8] sm:$0xff] }
 0x3d9   :  { %7865 = vmatprep.subr.bf16.mxu1 %v18292_v35  ;;  %15976 = vmatprep.subr.bf16.mxu0 %v20172_v47  ;;  %v1093_v35 = vld [vmem:[#allocation5 + $0x1f48] sm:$0xff]  ;;  %v18435_v47 = vcombine.low %v1057_v26, %v1069_v34 }
 0x3da   :  { %v18460_v54 = vcombine.high %v1081_v49, %v1093_v35  ;;  %v20203_v26 = vld [vmem:[#allocation8 + $0x870] ss:$24 sps:$4 sm:$0xff]  }
 0x3dc   :  { %7866 = vmatpush1.bf16.msra.mxu1 %v18291_v7  ;;  %15977 = vmatpush1.bf16.msra.mxu0 %v20170_v60  ;;  %v20193_v7 = vld [vmem:[#allocation8 + $0x7b4] ss:$24 sps:$4 sm:$0xff]  }
 0x3dd   :  { %7867 = vmatprep.subr.bf16.mxu1 %v18316_v55  ;;  %15978 = vmatprep.subr.bf16.mxu0 %v20175_v56  ;;  %v1105_v60 = vld [vmem:[#allocation5 + $0x1fa8] sm:$0xff]  ;;  %v18459_v56 = vcombine.low %v1081_v49, %v1093_v35  ;;  %v20206_v49 = vld [vmem:[#allocation8 + $0x8a0] ss:$24 sps:$4 sm:$0xff]  }
 0x3de   :  { %v1117_v55 = vld [vmem:[#allocation5 + $0x2008] sm:$0xff] }
 0x3df   :  { %v18484_v8 = vcombine.high %v1105_v60, %v1117_v55 }
 0x3e0   :  { %7868 = vmatpush1.bf16.msra.mxu1 %v18315_v63  ;;  %15979 = vmatpush1.bf16.msra.mxu0 %v20173_v23  ;;  %v20196_v63 = vld [vmem:[#allocation8 + $0x7e4] ss:$24 sps:$4 sm:$0xff]   ;;  %v1129_v23 = vld [vmem:[#allocation5 + $0x2068] sm:$0xff] }
 0x3e1   :  { %7869 = vmatprep.subr.bf16.mxu1 %v18340_v3  ;;  %15980 = vmatprep.subr.bf16.mxu0 %v20178_v28  ;;  %v1141_v3 = vld [vmem:[#allocation5 + $0x20c8] sm:$0xff]  ;;  %v18483_v28 = vcombine.low %v1105_v60, %v1117_v55 }
 0x3e2   :  { %v18508_v62 = vcombine.high %v1129_v23, %v1141_v3  ;;  %v20209_v60 = vld [vmem:[#allocation8 + $0x8d0] ss:$24 sps:$4 sm:$0xff]  }
 0x3e4   :  { %7870 = vmatpush1.bf16.msra.mxu1 %v18339_v31  ;;  %15981 = vmatpush1.bf16.msra.mxu0 %v20176_v11  ;;  %v20199_v31 = vld [vmem:[#allocation8 + $0x814] ss:$24 sps:$4 sm:$0xff]  }
 0x3e5   :  { %7871 = vmatprep.subr.bf16.mxu1 %v18364_v41  ;;  %15982 = vmatprep.subr.bf16.mxu0 %v20181_v29  ;;  %v1153_v11 = vld [vmem:[#allocation5 + $0x2128] sm:$0xff]  ;;  %v18507_v29 = vcombine.low %v1129_v23, %v1141_v3  ;;  %v20212_v23 = vld [vmem:[#allocation8 + $0x900] ss:$24 sps:$4 sm:$0xff]  }
 0x3e6   :  { %v1165_v41 = vld [vmem:[#allocation5 + $0x2188] sm:$0xff] }
 0x3e7   :  { %v18532_v6 = vcombine.high %v1153_v11, %v1165_v41 }
 0x3e8   :  { %7872 = vmatpush1.bf16.msra.mxu1 %v18363_v57  ;;  %15983 = vmatpush1.bf16.msra.mxu0 %v20179_v9  ;;  %v20202_v57 = vld [vmem:[#allocation8 + $0x844] ss:$24 sps:$4 sm:$0xff]   ;;  %v1177_v9 = vld [vmem:[#allocation5 + $0x21e8] sm:$0xff] }
 0x3e9   :  { %7873 = vmatprep.subr.bf16.mxu1 %v18388_v52  ;;  %15984 = vmatprep.subr.bf16.mxu0 %v20184_v12  ;;  %v1189_v52 = vld [vmem:[#allocation5 + $0x2248] sm:$0xff]  ;;  %v18531_v12 = vcombine.low %v1153_v11, %v1165_v41 }
 0x3ea   :  { %v18556_v18 = vcombine.high %v1177_v9, %v1189_v52  ;;  %v20215_v11 = vld [vmem:[#allocation8 + $0x930] ss:$24 sps:$4 sm:$0xff]  }
 0x3ec   :  { %7874 = vmatpush1.bf16.msra.mxu1 %v18387_v21  ;;  %15985 = vmatpush1.bf16.msra.mxu0 %v20182_v1  ;;  %v20205_v21 = vld [vmem:[#allocation8 + $0x874] ss:$24 sps:$4 sm:$0xff]  }
 0x3ed   :  { %7875 = vmatprep.subr.bf16.mxu1 %v18412_v37  ;;  %15986 = vmatprep.subr.bf16.mxu0 %v20187_v33  ;;  %v1201_v1 = vld [vmem:[#allocation5 + $0x22a8] sm:$0xff]  ;;  %v18555_v33 = vcombine.low %v1177_v9, %v1189_v52  ;;  %v20218_v9 = vld [vmem:[#allocation8 + $0x960] ss:$24 sps:$4 sm:$0xff]  }
 0x3ee   :  { %v1213_v37 = vld [vmem:[#allocation5 + $0x2308] sm:$0xff] }
 0x3ef   :  { %v18580_v34 = vcombine.high %v1201_v1, %v1213_v37 }
 0x3f0   :  { %7876 = vmatpush1.bf16.msra.mxu1 %v18411_v36  ;;  %15987 = vmatpush1.bf16.msra.mxu0 %v20185_v40  ;;  %v20208_v36 = vld [vmem:[#allocation8 + $0x8a4] ss:$24 sps:$4 sm:$0xff]   ;;  %v1225_v40 = vld [vmem:[#allocation5 + $0x2368] sm:$0xff] }
 0x3f1   :  { %7877 = vmatprep.subr.bf16.mxu1 %v18436_v46  ;;  %15988 = vmatprep.subr.bf16.mxu0 %v20190_v20  ;;  %v1237_v46 = vld [vmem:[#allocation5 + $0x23c8] sm:$0xff]  ;;  %v18579_v20 = vcombine.low %v1201_v1, %v1213_v37 }
 0x3f2   :  { %v18604_v35 = vcombine.high %v1225_v40, %v1237_v46  ;;  %v20221_v1 = vld [vmem:[#allocation8 + $0x990] ss:$24 sps:$4 sm:$0xff]  }
 0x3f4   :  { %7878 = vmatpush1.bf16.msra.mxu1 %v18435_v47  ;;  %15989 = vmatpush1.bf16.msra.mxu0 %v20188_v32  ;;  %v20211_v47 = vld [vmem:[#allocation8 + $0x8d4] ss:$24 sps:$4 sm:$0xff]   ;;  %v99_v32 = vld [vmem:[#allocation5 + $0x38] sm:$0xff] }
 0x3f5   :  { %7879 = vmatprep.subr.bf16.mxu1 %v18460_v54  ;;  %15990 = vmatprep.subr.bf16.mxu0 %v20193_v7  ;;  %v111_v54 = vld [vmem:[#allocation5 + $0x98] sm:$0xff]  ;;  %v18603_v7 = vcombine.low %v1225_v40, %v1237_v46  ;;  %v22382_v46 = vsub.s32 7, %v22155_v48 }
 0x3f6   :  { %v17480_v55 = vcombine.high %v99_v32, %v111_v54 }
 0x3f8   :  { %7880 = vmatpush1.bf16.msra.mxu1 %v18459_v56  ;;  %15991 = vmatpush1.bf16.msra.mxu0 %v20191_v14  ;;  %v20214_v56 = vld [vmem:[#allocation8 + $0x904] ss:$24 sps:$4 sm:$0xff]  }
 0x3f9   :  { %7881 = vmatprep.subr.bf16.mxu1 %v18484_v8  ;;  %15992 = vmatprep.subr.bf16.mxu0 %v20196_v63  ;;  %v123_v14 = vld [vmem:[#allocation5 + $0xf8] sm:$0xff]  ;;  %v17479_v63 = vcombine.low %v99_v32, %v111_v54  ;;  %v21895_v54 = vld [vmem:[#allocation7] sm:$0xff] }
 0x3fa   :  { %v135_v8 = vld [vmem:[#allocation5 + $0x158] sm:$0xff] }
 0x3fb   :  { %v17504_v3 = vcombine.high %v123_v14, %v135_v8  ;;  %v255_v32 = vld [vmem:[#allocation5 + $0x518] sm:$0xff] }
 0x3fc   :  { %7882 = vmatpush1.bf16.msra.mxu1 %v18483_v28  ;;  %15993 = vmatpush1.bf16.msra.mxu0 %v20194_v17  ;;  %v20217_v28 = vld [vmem:[#allocation8 + $0x934] ss:$24 sps:$4 sm:$0xff]   ;;  %v147_v17 = vld [vmem:[#allocation5 + $0x1b8] sm:$0xff] }
 0x3fd   :  { %7883 = vmatprep.subr.bf16.mxu1 %v18508_v62  ;;  %15994 = vmatprep.subr.bf16.mxu0 %v20199_v31  ;;  %v159_v62 = vld [vmem:[#allocation5 + $0x218] sm:$0xff]  ;;  %v17503_v31 = vcombine.low %v123_v14, %v135_v8 }
 0x3fe   :  { %v17528_v41 = vcombine.high %v147_v17, %v159_v62 }
 0x400   :  { %7884 = vmatpush1.bf16.msra.mxu1 %v18507_v29  ;;  %15995 = vmatpush1.bf16.msra.mxu0 %v20197_v22  ;;  %v20220_v29 = vld [vmem:[#allocation8 + $0x964] ss:$24 sps:$4 sm:$0xff]  }
 0x401   :  { %7885 = vmatprep.subr.bf16.mxu1 %v18532_v6  ;;  %15996 = vmatprep.subr.bf16.mxu0 %v20202_v57  ;;  %v171_v22 = vld [vmem:[#allocation5 + $0x278] sm:$0xff]  ;;  %v17527_v57 = vcombine.low %v147_v17, %v159_v62 }
 0x402   :  { %v183_v6 = vld [vmem:[#allocation5 + $0x2d8] sm:$0xff] }
 0x403   :  { %v17552_v52 = vcombine.high %v171_v22, %v183_v6  ;;  %v279_v17 = vld [vmem:[#allocation5 + $0x5d8] sm:$0xff] }
 0x404   :  { %7886 = vmatpush1.bf16.msra.mxu1 %v18531_v12  ;;  %15997 = vmatpush1.bf16.msra.mxu0 %v20200_v5  ;;  %v20223_v12 = vld [vmem:[#allocation8 + $0x994] ss:$24 sps:$4 sm:$0xff]   ;;  %v195_v5 = vld [vmem:[#allocation5 + $0x338] sm:$0xff] }
 0x405   :  { %7887 = vmatprep.subr.bf16.mxu1 %v18556_v18  ;;  %15998 = vmatprep.subr.bf16.mxu0 %v20205_v21  ;;  %v207_v18 = vld [vmem:[#allocation5 + $0x398] sm:$0xff]  ;;  %v17551_v21 = vcombine.low %v171_v22, %v183_v6 }
 0x406   :  { %v17576_v37 = vcombine.high %v195_v5, %v207_v18  ;;  %v17575_v40 = vcombine.low %v195_v5, %v207_v18  ;;  %v20230_v6 = vld [vmem:[#allocation8 + $0xa20] ss:$24 sps:$4 sm:$0xff]  }
 0x408   :  { %7888 = vmatpush1.bf16.msra.mxu1 %v18555_v33  ;;  %15999 = vmatpush1.bf16.msra.mxu0 %v20203_v26  ;;  %v20226_v33 = vld [vmem:[#allocation8 + $0x9c4] ss:$24 sps:$4 sm:$0xff]  }
 0x409   :  { %7889 = vmatprep.subr.bf16.mxu1 %v18580_v34  ;;  %16000 = vmatprep.subr.bf16.mxu0 %v20208_v36  ;;  %v219_v26 = vld [vmem:[#allocation5 + $0x3f8] sm:$0xff]  ;;  %v22379_v36 = vsub.s32 6, %v22155_v48  ;;  %v20227_v48 = vld [vmem:[#allocation8 + $0x9f0] ss:$24 sps:$4 sm:$0xff]  }
 0x40a   :  { %v231_v34 = vld [vmem:[#allocation5 + $0x458] sm:$0xff] }
 0x40c   :  { %7890 = vmatpush1.bf16.msra.mxu1 %v18579_v20  ;;  %16001 = vmatpush1.bf16.msra.mxu0 %v20206_v49  ;;  %v20224_v20 = vld [vmem:[#allocation8 + $0x9c0] ss:$24 sps:$4 sm:$0xff]   ;;  %v17600_v49 = vcombine.high %v219_v26, %v231_v34 }
 0x40d   :  { %7891 = vmatprep.subr.bf16.mxu1 %v18604_v35  ;;  %16002 = vmatprep.subr.bf16.mxu0 %v20211_v47  ;;  %v20229_v35 = vld [vmem:[#allocation8 + $0x9f4] ss:$24 sps:$4 sm:$0xff]   ;;  %v243_v47 = vld [vmem:[#allocation5 + $0x4b8] sm:$0xff] }
 0x40e   :  { %v17624_v8 = vcombine.high %v243_v47, %v255_v32  ;;  %v17623_v22 = vcombine.low %v243_v47, %v255_v32 }
 0x410   :  { %7892 = vmatpush1.bf16.msra.mxu1 %v18603_v7  ;;  %16003 = vmatpush1.bf16.msra.mxu0 %v20209_v60  ;;  %v1277_v7 = vrot.slane %v21895_v54, %v22379_v36  ;;  %v1281_v60 = vrot.slane %v21895_v54, %v22382_v46 }
 0x411   :  { %8033 = vmatprep.subr.bf16.mxu1 %v17480_v55  ;;  %16015 = vmatprep.subr.bf16.mxu0 %v20214_v56  ;;  %v17599_v55 = vcombine.low %v219_v26, %v231_v34  ;;  %v21896_v56 = vld [vmem:[#allocation7 + $0x10] sm:$0xff] }
 0x412   :  { %v1333_v14 = vrot.slane %v21896_v56, %v22246_v43 }
 0x413   :  { %7894 = vmatmul.mubr.bf16.vlgmr.msra.gmra.mrb[16].mxu1 %v22137_v44  ;;  %16005 = vmatmul.mubr.bf16.vlgmr.msra.gmra.mrb[16].mxu0 %v22359_v0 }
 0x414   :  { %8034 = vmatpush1.bf16.msra.mxu1 %v17479_v63  ;;  %16016 = vmatpush1.bf16.msra.mxu0 %v20212_v23  ;;  %v1337_v63 = vrot.slane %v21896_v56, %v22249_v50 }
 0x415   :  { %8035 = vmatprep.subr.bf16.mxu1 %v17504_v3  ;;  %16017 = vmatprep.subr.bf16.mxu0 %v20217_v28  ;;  %v20232_v3 = vld [vmem:[#allocation8 + $0xa24] ss:$24 sps:$4 sm:$0xff]  }
 0x416   :  { %8065 = vmatprep.mubr.bf16.mxu1 %v22117_v58  ;;  %v267_v28 = vld [vmem:[#allocation5 + $0x578] sm:$0xff] }
 0x417   :  { %v17648_v18 = vcombine.high %v267_v28, %v279_v17  ;;  %v17647_v32 = vcombine.low %v267_v28, %v279_v17  ;;  %v20236_v17 = vld [vmem:[#allocation8 + $0xa80] ss:$24 sps:$4 sm:$0xff]  }
 0x418   :  { %8036 = vmatpush1.bf16.msra.mxu1 %v17503_v31  ;;  %16018 = vmatpush1.bf16.msra.mxu0 %v20215_v11 }
 0x419   :  { %8037 = vmatprep.subr.bf16.mxu1 %v17528_v41  ;;  %16019 = vmatprep.subr.bf16.mxu0 %v20220_v29 }
 0x41c   :  { %8038 = vmatpush1.bf16.msra.mxu1 %v17527_v57  ;;  %16020 = vmatpush1.bf16.msra.mxu0 %v20218_v9 }
 0x41d   :  { %8039 = vmatprep.subr.bf16.mxu1 %v17552_v52  ;;  %16021 = vmatprep.subr.bf16.mxu0 %v20223_v12 }
 0x420   :  { %8040 = vmatpush1.bf16.msra.mxu1 %v17551_v21  ;;  %16022 = vmatpush1.bf16.msra.mxu0 %v20221_v1  ;;  %v291_v21 = vld [vmem:[#allocation5 + $0x638] sm:$0xff] }
 0x421   :  { %8041 = vmatprep.subr.bf16.mxu1 %v17576_v37  ;;  %16023 = vmatprep.subr.bf16.mxu0 %v20226_v33  ;;  %v303_v1 = vld [vmem:[#allocation5 + $0x698] sm:$0xff] }
 0x422   :  { %v17672_v54 = vcombine.high %v291_v21, %v303_v1 }
 0x424   :  { %8042 = vmatpush1.bf16.msra.mxu1 %v17575_v40  ;;  %16024 = vmatpush1.bf16.msra.mxu0 %v20224_v20  ;;  %v20235_v40 = vld [vmem:[#allocation8 + $0xa54] ss:$24 sps:$4 sm:$0xff]  }
 0x425   :  { %8043 = vmatprep.subr.bf16.mxu1 %v17600_v49  ;;  %16025 = vmatprep.subr.bf16.mxu0 %v20229_v35 }
 0x426   :  { %v7637_v23 = vpop.f32.mrb[12].mxu1  ;;  %v8540_v11 = vpop.f32.mrb[12].mxu0 }
 0x427   :  { %v22388_v62 = vadd.f32 %v7637_v23, %v1277_v7  ;;  %v7639_v31 = vpop.f32.mrb[13].mxu1  ;;  %v22392_v57 = vadd.f32 %v8540_v11, %v1333_v14  ;;  %v8542_v9 = vpop.f32.mrb[13].mxu0  ;;  %v327_v23 = vld [vmem:[#allocation5 + $0x758] sm:$0xff] }
 0x428   :  { %v22390_v41 = vadd.f32 %v7639_v31, %v1281_v60  ;;  %v7641_v29 = vpop.f32.mrb[14].mxu1  ;;  %8044 = vmatpush1.bf16.msra.mxu1 %v17599_v55  ;;  %16026 = vmatpush1.bf16.msra.mxu0 %v20227_v48  ;;  %v22397_v37 = vadd.f32 %v8542_v9, %v1337_v63  ;;  %v8544_v33 = vpop.f32.mrb[14].mxu0  ;;  %v20238_v48 = vld [vmem:[#allocation8 + $0xa84] ss:$24 sps:$4 sm:$0xff]   ;;  %v17671_v31 = vcombine.low %v291_v21, %v303_v1 }
 0x429   :  { %v8732_v52 = vmul.f32 0.70710677, %v22388_v62  ;;  %v22395_v12 = vadd.f32 %v7641_v29, %v1277_v7  ;;  %v7643_v5 = vpop.f32.mrb[15].mxu1  ;;  %8045 = vmatprep.subr.bf16.mxu1 %v17624_v8  ;;  %16027 = vmatprep.subr.bf16.mxu0 %v20232_v3  ;;  %v8546_v20 = vpop.f32.mrb[15].mxu0  ;;  %v8746_v35 = vmul.f32 0.70710677, %v22392_v57  ;;  %v19811_v55 = vadd.f32 %v8544_v33, %v1333_v14 }
 0x42a   :  { %v8733_v26 = vmul.f32 0.70710677, %v22390_v41  ;;  %v22400_v34 = vadd.f32 %v7643_v5, %v1281_v60  ;;  %v20233_v7 = vld [vmem:[#allocation8 + $0xa50] ss:$24 sps:$4 sm:$0xff]   ;;  %v8747_v60 = vmul.f32 0.70710677, %v22397_v37  ;;  %v22406_v56 = vadd.f32 %v8546_v20, %v1337_v63 }
 0x42b   :  { %21844 = verf.f32 %v8732_v52  ;;  %v8756_v49 = vmul.f32 0.70710677, %v22395_v12  ;;  %v315_v8 = vld [vmem:[#allocation5 + $0x6f8] sm:$0xff]  ;;  %v8770_v3 = vmul.f32 0.70710677, %v19811_v55 }
 0x42c   :  { %21846 = verf.f32 %v8733_v26  ;;  %v8757_v47 = vmul.f32 0.70710677, %v22400_v34  ;;  %8046 = vmatpush1.bf16.msra.mxu1 %v17623_v22  ;;  %16028 = vmatpush1.bf16.msra.mxu0 %v20230_v6  ;;  %v8771_v28 = vmul.f32 0.70710677, %v22406_v56  ;;  %v17696_v11 = vcombine.high %v315_v8, %v327_v23  ;;  %v20241_v14 = vld [vmem:[#allocation8 + $0xab4] ss:$24 sps:$4 sm:$0xff]  }
 0x42d   :  { %21848 = verf.f32 %v8756_v49  ;;  %8047 = vmatprep.subr.bf16.mxu1 %v17648_v18  ;;  %16029 = vmatprep.subr.bf16.mxu0 %v20235_v40  ;;  %v339_v63 = vld [vmem:[#allocation5 + $0x7b8] sm:$0xff]  ;;  %v17695_v22 = vcombine.low %v315_v8, %v327_v23  ;;  %v20239_v5 = vld [vmem:[#allocation8 + $0xab0] ss:$24 sps:$4 sm:$0xff]   ;;  %v8709_v8 = vmul.f32 0.5, %v22400_v34  ;;  %v8723_v34 = vmul.f32 0.5, %v22406_v56 }
 0x42e   :  { %21850 = verf.f32 %v8757_v47  ;;  %v351_v29 = vld [vmem:[#allocation5 + $0x818] sm:$0xff]  ;;  %v8684_v47 = vmul.f32 0.5, %v22388_v62 }
 0x42f   :  { %21852 = verf.f32 %v8746_v35  ;;  %v22409_v6 = vld [vmem:[#allocation5 + $0x878] sm:$0xff]  ;;  %v17720_v18 = vcombine.high %v339_v63, %v351_v29  ;;  %v17719_v20 = vcombine.low %v339_v63, %v351_v29 }
 0x430   :  { %8048 = vmatpush1.bf16.msra.mxu1 %v17647_v32  ;;  %21854 = verf.f32 %v8747_v60  ;;  %16030 = vmatpush1.bf16.msra.mxu0 %v20233_v7  ;;  %v375_v9 = vld [vmem:[#allocation5 + $0x8d8] sm:$0xff]  ;;  %v8708_v32 = vmul.f32 0.5, %v22395_v12  ;;  %v8698_v7 = vmul.f32 0.5, %v22392_v57  ;;  %v20247_v12 = vld [vmem:[#allocation8 + $0xb14] ss:$24 sps:$4 sm:$0xff]   ;;  %v8722_v57 = vmul.f32 0.5, %v19811_v55 }
 0x431   :  { %8049 = vmatprep.subr.bf16.mxu1 %v17672_v54  ;;  %21856 = verf.f32 %v8770_v3  ;;  %16031 = vmatprep.subr.bf16.mxu0 %v20238_v48  ;;  %v20244_v33 = vld [vmem:[#allocation8 + $0xae4] ss:$24 sps:$4 sm:$0xff]   ;;  %v17744_v49 = vcombine.high %v22409_v6, %v375_v9  ;;  %v8685_v48 = vmul.f32 0.5, %v22390_v41  ;;  %v20242_v3 = vld [vmem:[#allocation8 + $0xae0] ss:$24 sps:$4 sm:$0xff]  }
 0x432   :  { %21858 = verf.f32 %v8771_v28  ;;  %v423_v56 = vld [vmem:[#allocation5 + $0xa58] sm:$0xff] }
 0x434   :  { %8050 = vmatpush1.bf16.msra.mxu1 %v17671_v31  ;;  %16032 = vmatpush1.bf16.msra.mxu0 %v20236_v17  ;;  %v8699_v31 = vmul.f32 0.5, %v22397_v37  ;;  %v17743_v37 = vcombine.low %v22409_v6, %v375_v9 }
 0x435   :  { %v21845_v52 = vpop.eup %21844  ;;  %8051 = vmatprep.subr.bf16.mxu1 %v17696_v11  ;;  %16033 = vmatprep.subr.bf16.mxu0 %v20241_v14  ;;  %v387_v11 = vld [vmem:[#allocation5 + $0x938] sm:$0xff] }
 0x436   :  { %v21847_v21 = vpop.eup %21846  ;;  %v8828_v1 = vadd.f32 1.0, %v21845_v52  ;;  %v399_v14 = vld [vmem:[#allocation5 + $0x998] sm:$0xff] }
 0x437   :  { %v21849_v26 = vpop.eup %21848  ;;  %v8829_v40 = vadd.f32 1.0, %v21847_v21  ;;  %v17768_v55 = vcombine.high %v387_v11, %v399_v14  ;;  %v17767_v6 = vcombine.low %v387_v11, %v399_v14  ;;  %v20254_v14 = vld [vmem:[#allocation8 + $0xba0] ss:$24 sps:$4 sm:$0xff]  }
 0x438   :  { %v21851_v35 = vpop.eup %21850  ;;  %v8852_v54 = vadd.f32 1.0, %v21849_v26  ;;  %8052 = vmatpush1.bf16.msra.mxu1 %v17695_v22  ;;  %16034 = vmatpush1.bf16.msra.mxu0 %v20239_v5  ;;  %v8876_v17 = vmul.f32 %v8828_v1, %v8684_v47  ;;  %v20250_v47 = vld [vmem:[#allocation8 + $0xb44] ss:$24 sps:$4 sm:$0xff]  }
 0x439   :  { %v21853_v60 = vpop.eup %21852  ;;  %v8853_v23 = vadd.f32 1.0, %v21851_v35  ;;  %8053 = vmatprep.subr.bf16.mxu1 %v17720_v18  ;;  %16035 = vmatprep.subr.bf16.mxu0 %v20244_v33  ;;  %v8877_v22 = vmul.f32 %v8829_v40, %v8685_v48  ;;  %v20245_v33 = vld [vmem:[#allocation8 + $0xb10] ss:$24 sps:$4 sm:$0xff]   ;;  %v20253_v48 = vld [vmem:[#allocation8 + $0xb74] ss:$24 sps:$4 sm:$0xff]  }
 0x43a   :  { %v21855_v28 = vpop.eup %21854  ;;  %v8900_v62 = vmul.f32 %v8852_v54, %v8708_v32  ;;  %v8842_v63 = vadd.f32 1.0, %v21853_v60  ;;  %v411_v32 = vld [vmem:[#allocation5 + $0x9f8] sm:$0xff] }
 0x43b   :  { %v21857_v29 = vpop.eup %21856  ;;  %v8901_v41 = vmul.f32 %v8853_v23, %v8709_v8  ;;  %v8843_v52 = vadd.f32 1.0, %v21855_v28  ;;  %v435_v8 = vld [vmem:[#allocation5 + $0xab8] sm:$0xff] }
 0x43c   :  { %v21859_v5 = vpop.eup %21858  ;;  %v22419_v18 = vpack.c.bf16 %v8900_v62, %v8876_v17  ;;  %8054 = vmatpush1.bf16.msra.mxu1 %v17719_v20  ;;  %v8890_v21 = vmul.f32 %v8842_v63, %v8698_v7  ;;  %v8866_v1 = vadd.f32 1.0, %v21857_v29  ;;  %16036 = vmatpush1.bf16.msra.mxu0 %v20242_v3  ;;  %v17792_v7 = vcombine.high %v411_v32, %v423_v56  ;;  %v447_v23 = vld [vmem:[#allocation5 + $0xb18] sm:$0xff] }
 0x43d   :  { %8055 = vmatprep.subr.bf16.mxu1 %v17744_v49  ;;  %v22422_v26 = vpack.c.bf16 %v8901_v41, %v8877_v22  ;;  %v8891_v35 = vmul.f32 %v8843_v52, %v8699_v31  ;;  %v8867_v40 = vadd.f32 1.0, %v21859_v5  ;;  %16037 = vmatprep.subr.bf16.mxu0 %v20247_v12  ;;  %v20248_v49 = vld [vmem:[#allocation8 + $0xb40] ss:$24 sps:$4 sm:$0xff]   ;;  %v17791_v3 = vcombine.low %v411_v32, %v423_v56  ;;  %v20251_v31 = vld [vmem:[#allocation8 + $0xb70] ss:$24 sps:$4 sm:$0xff]  }
 0x43e   :  { %v8914_v54 = vmul.f32 %v8866_v1, %v8722_v57  ;;  %v17816_v28 = vcombine.high %v435_v8, %v447_v23  ;;  %v20256_v17 = vld [vmem:[#allocation8 + $0xba4] ss:$24 sps:$4 sm:$0xff]   ;;  %v17815_v11 = vcombine.low %v435_v8, %v447_v23  ;;  %v20259_v57 = vld [vmem:[#allocation8 + $0xbd4] ss:$24 sps:$4 sm:$0xff]   ;;  %v20257_v52 = vld [vmem:[#allocation8 + $0xbd0] ss:$24 sps:$4 sm:$0xff]  }
 0x43f   :  { %16047 = vmatprep.mubr.bf16.mxu0 %v22422_v26  ;;  %v8915_v20 = vmul.f32 %v8867_v40, %v8723_v34  ;;  %v459_v62 = vld [vmem:[#allocation5 + $0xb78] sm:$0xff]  ;;  %v20263_v56 = vld [vmem:[#allocation8 + $0xc30] ss:$24 sps:$4 sm:$0xff]   ;;  %v20271_v23 = vld [vmem:[#allocation8 + $0xc94] ss:$24 sps:$4 sm:$0xff]  }
 0x440   :  { %8056 = vmatpush1.bf16.msra.mxu1 %v17743_v37  ;;  %v22425_v9 = vpack.c.bf16 %v8914_v54, %v8890_v21  ;;  %16038 = vmatpush1.bf16.msra.mxu0 %v20245_v33  ;;  %v471_v12 = vld [vmem:[#allocation5 + $0xbd8] sm:$0xff] }
 0x441   :  { %8057 = vmatprep.subr.bf16.mxu1 %v17768_v55  ;;  %v22427_v60 = vpack.c.bf16 %v8915_v20, %v8891_v35  ;;  %16039 = vmatprep.subr.bf16.mxu0 %v20250_v47  ;;  %v17840_v63 = vcombine.high %v459_v62, %v471_v12  ;;  %v483_v29 = vld [vmem:[#allocation5 + $0xc38] sm:$0xff]  ;;  %v17839_v41 = vcombine.low %v459_v62, %v471_v12  ;;  %v20265_v35 = vld [vmem:[#allocation8 + $0xc34] ss:$24 sps:$4 sm:$0xff]  }
 0x442   :  { %v495_v22 = vld [vmem:[#allocation5 + $0xc98] sm:$0xff] }
 0x443   :  { %v17864_v34 = vcombine.high %v483_v29, %v495_v22  ;;  %v20262_v5 = vld [vmem:[#allocation8 + $0xc04] ss:$24 sps:$4 sm:$0xff]   ;;  %v17863_v1 = vcombine.low %v483_v29, %v495_v22  ;;  %v20260_v33 = vld [vmem:[#allocation8 + $0xc00] ss:$24 sps:$4 sm:$0xff]   ;;  %v20277_v22 = vld [vmem:[#allocation8 + $0xcf4] ss:$24 sps:$4 sm:$0xff]  }
 0x444   :  { %8058 = vmatpush1.bf16.msra.mxu1 %v17767_v6  ;;  %16040 = vmatpush1.bf16.msra.mxu0 %v20248_v49  ;;  %v507_v37 = vld [vmem:[#allocation5 + $0xcf8] sm:$0xff] }
 0x445   :  { %8059 = vmatprep.subr.bf16.mxu1 %v17792_v7  ;;  %16041 = vmatprep.subr.bf16.mxu0 %v20253_v48  ;;  %v519_v21 = vld [vmem:[#allocation5 + $0xd58] sm:$0xff] }
 0x446   :  { %v17888_v55 = vcombine.high %v507_v37, %v519_v21  ;;  %v531_v40 = vld [vmem:[#allocation5 + $0xdb8] sm:$0xff]  ;;  %v17887_v32 = vcombine.low %v507_v37, %v519_v21 }
 0x447   :  { %v543_v47 = vld [vmem:[#allocation5 + $0xe18] sm:$0xff] }
 0x448   :  { %8060 = vmatpush1.bf16.msra.mxu1 %v17791_v3  ;;  %16042 = vmatpush1.bf16.msra.mxu0 %v20251_v31  ;;  %v17912_v54 = vcombine.high %v531_v40, %v543_v47  ;;  %v20268_v20 = vld [vmem:[#allocation8 + $0xc64] ss:$24 sps:$4 sm:$0xff]   ;;  %v17911_v7 = vcombine.low %v531_v40, %v543_v47  ;;  %v20266_v48 = vld [vmem:[#allocation8 + $0xc60] ss:$24 sps:$4 sm:$0xff]   ;;  %v20283_v47 = vld [vmem:[#allocation8 + $0xd54] ss:$24 sps:$4 sm:$0xff]  }
 0x449   :  { %8061 = vmatprep.subr.bf16.mxu1 %v17816_v28  ;;  %16043 = vmatprep.subr.bf16.mxu0 %v20256_v17  ;;  %v555_v6 = vld [vmem:[#allocation5 + $0xe78] sm:$0xff]  ;;  %v20269_v17 = vld [vmem:[#allocation8 + $0xc90] ss:$24 sps:$4 sm:$0xff]  }
 0x44a   :  { %v567_v49 = vld [vmem:[#allocation5 + $0xed8] sm:$0xff] }
 0x44b   :  { %v17936_v8 = vcombine.high %v555_v6, %v567_v49  ;;  %v579_v3 = vld [vmem:[#allocation5 + $0xf38] sm:$0xff]  ;;  %v17935_v28 = vcombine.low %v555_v6, %v567_v49 }
 0x44c   :  { %8062 = vmatpush1.bf16.msra.mxu1 %v17815_v11  ;;  %16044 = vmatpush1.bf16.msra.mxu0 %v20254_v14  ;;  %v591_v31 = vld [vmem:[#allocation5 + $0xf98] sm:$0xff] }
 0x44d   :  { %8063 = vmatprep.subr.bf16.mxu1 %v17840_v63  ;;  %16045 = vmatprep.subr.bf16.mxu0 %v20259_v57  ;;  %v17960_v62 = vcombine.high %v579_v3, %v591_v31  ;;  %v20274_v12 = vld [vmem:[#allocation8 + $0xcc4] ss:$24 sps:$4 sm:$0xff]   ;;  %v17959_v63 = vcombine.low %v579_v3, %v591_v31  ;;  %v20272_v57 = vld [vmem:[#allocation8 + $0xcc0] ss:$24 sps:$4 sm:$0xff]   ;;  %v20289_v31 = vld [vmem:[#allocation8 + $0xdb4] ss:$24 sps:$4 sm:$0xff]  }
 0x44e   :  { %v603_v11 = vld [vmem:[#allocation5 + $0xff8] sm:$0xff] }
 0x44f   :  { %v615_v14 = vld [vmem:[#allocation5 + $0x1058] sm:$0xff] }
 0x450   :  { %8064 = vmatpush1.bf16.msra.mxu1 %v17839_v41  ;;  %16046 = vmatpush1.bf16.msra.mxu0 %v20257_v52  ;;  %v17984_v29 = vcombine.high %v603_v11, %v615_v14  ;;  %v627_v41 = vld [vmem:[#allocation5 + $0x10b8] sm:$0xff] }
 0x451   :  { %8076 = vmatprep.subr.bf16.mxu1 %v17864_v34  ;;  %16058 = vmatprep.subr.bf16.mxu0 %v20262_v5  ;;  %v639_v52 = vld [vmem:[#allocation5 + $0x1118] sm:$0xff]  ;;  %v17983_v34 = vcombine.low %v603_v11, %v615_v14  ;;  %v20275_v5 = vld [vmem:[#allocation8 + $0xcf0] ss:$24 sps:$4 sm:$0xff]  }
 0x452   :  { %v18008_v37 = vcombine.high %v627_v41, %v639_v52  ;;  %v20280_v21 = vld [vmem:[#allocation8 + $0xd24] ss:$24 sps:$4 sm:$0xff]  }
 0x453   :  { %8066 = vmatmul.mubr.bf16.vlgmr.msra.gmra.mrb[20].mxu1 %v22121_v15  ;;  %16048 = vmatmul.mubr.bf16.vlgmr.msra.gmra.mrb[16].mxu0 %v22419_v18  ;;  %v20286_v49 = vld [vmem:[#allocation8 + $0xd84] ss:$24 sps:$4 sm:$0xff]  }
 0x454   :  { %8077 = vmatpush1.bf16.msra.mxu1 %v17863_v1  ;;  %16059 = vmatpush1.bf16.msra.mxu0 %v20260_v33  ;;  %v651_v1 = vld [vmem:[#allocation5 + $0x1178] sm:$0xff] }
 0x455   :  { %16090 = vmatprep.mubr.bf16.mxu0 %v22225_v24  ;;  %8078 = vmatprep.subr.bf16.mxu1 %v17888_v55  ;;  %v663_v33 = vld [vmem:[#allocation5 + $0x11d8] sm:$0xff]  ;;  %v18007_v55 = vcombine.low %v627_v41, %v639_v52  ;;  %v20295_v52 = vld [vmem:[#allocation8 + $0xe14] ss:$24 sps:$4 sm:$0xff]  }
 0x456   :  { %16060 = vmatprep.subr.bf16.mxu0 %v20265_v35  ;;  %8108 = vmatprep.mubr.bf16.mxu1 %v22123_v25  ;;  %v20278_v35 = vld [vmem:[#allocation8 + $0xd20] ss:$24 sps:$4 sm:$0xff]   ;;  %v18032_v40 = vcombine.high %v651_v1, %v663_v33  ;;  %v20292_v14 = vld [vmem:[#allocation8 + $0xde4] ss:$24 sps:$4 sm:$0xff]  }
 0x458   :  { %8079 = vmatpush1.bf16.msra.mxu1 %v17887_v32  ;;  %16061 = vmatpush1.bf16.msra.mxu0 %v20263_v56  ;;  %v675_v32 = vld [vmem:[#allocation5 + $0x1238] sm:$0xff] }
 0x459   :  { %8080 = vmatprep.subr.bf16.mxu1 %v17912_v54  ;;  %16062 = vmatprep.subr.bf16.mxu0 %v20268_v20  ;;  %v687_v56 = vld [vmem:[#allocation5 + $0x1298] sm:$0xff]  ;;  %v18031_v54 = vcombine.low %v651_v1, %v663_v33  ;;  %v20281_v20 = vld [vmem:[#allocation8 + $0xd50] ss:$24 sps:$4 sm:$0xff]  }
 0x45a   :  { %v18056_v6 = vcombine.high %v675_v32, %v687_v56  ;;  %v20298_v33 = vld [vmem:[#allocation8 + $0xe44] ss:$24 sps:$4 sm:$0xff]  }
 0x45c   :  { %8081 = vmatpush1.bf16.msra.mxu1 %v17911_v7  ;;  %16063 = vmatpush1.bf16.msra.mxu0 %v20266_v48  ;;  %v699_v7 = vld [vmem:[#allocation5 + $0x12f8] sm:$0xff] }
 0x45d   :  { %8082 = vmatprep.subr.bf16.mxu1 %v17936_v8  ;;  %16064 = vmatprep.subr.bf16.mxu0 %v20271_v23  ;;  %v711_v48 = vld [vmem:[#allocation5 + $0x1358] sm:$0xff]  ;;  %v18055_v8 = vcombine.low %v675_v32, %v687_v56  ;;  %v20301_v56 = vld [vmem:[#allocation8 + $0xe74] ss:$24 sps:$4 sm:$0xff]  }
 0x45e   :  { %v20284_v23 = vld [vmem:[#allocation8 + $0xd80] ss:$24 sps:$4 sm:$0xff]   ;;  %v18080_v3 = vcombine.high %v699_v7, %v711_v48 }
 0x460   :  { %8083 = vmatpush1.bf16.msra.mxu1 %v17935_v28  ;;  %16065 = vmatpush1.bf16.msra.mxu0 %v20269_v17  ;;  %v723_v28 = vld [vmem:[#allocation5 + $0x13b8] sm:$0xff] }
 0x461   :  { %8084 = vmatprep.subr.bf16.mxu1 %v17960_v62  ;;  %16066 = vmatprep.subr.bf16.mxu0 %v20274_v12  ;;  %v735_v17 = vld [vmem:[#allocation5 + $0x1418] sm:$0xff]  ;;  %v18079_v62 = vcombine.low %v699_v7, %v711_v48  ;;  %v20287_v12 = vld [vmem:[#allocation8 + $0xdb0] ss:$24 sps:$4 sm:$0xff]  }
 0x462   :  { %v18104_v11 = vcombine.high %v723_v28, %v735_v17  ;;  %v20304_v48 = vld [vmem:[#allocation8 + $0xea4] ss:$24 sps:$4 sm:$0xff]  }
 0x464   :  { %8085 = vmatpush1.bf16.msra.mxu1 %v17959_v63  ;;  %16067 = vmatpush1.bf16.msra.mxu0 %v20272_v57  ;;  %v747_v63 = vld [vmem:[#allocation5 + $0x1478] sm:$0xff] }
 0x465   :  { %8086 = vmatprep.subr.bf16.mxu1 %v17984_v29  ;;  %16068 = vmatprep.subr.bf16.mxu0 %v20277_v22  ;;  %v759_v57 = vld [vmem:[#allocation5 + $0x14d8] sm:$0xff]  ;;  %v18103_v29 = vcombine.low %v723_v28, %v735_v17  ;;  %v20307_v17 = vld [vmem:[#allocation8 + $0xed4] ss:$24 sps:$4 sm:$0xff]  }
 0x466   :  { %v20290_v22 = vld [vmem:[#allocation8 + $0xde0] ss:$24 sps:$4 sm:$0xff]   ;;  %v18128_v41 = vcombine.high %v747_v63, %v759_v57 }
 0x468   :  { %8087 = vmatpush1.bf16.msra.mxu1 %v17983_v34  ;;  %16069 = vmatpush1.bf16.msra.mxu0 %v20275_v5  ;;  %v771_v34 = vld [vmem:[#allocation5 + $0x1538] sm:$0xff] }
 0x469   :  { %8088 = vmatprep.subr.bf16.mxu1 %v18008_v37  ;;  %16070 = vmatprep.subr.bf16.mxu0 %v20280_v21  ;;  %v783_v5 = vld [vmem:[#allocation5 + $0x1598] sm:$0xff]  ;;  %v18127_v37 = vcombine.low %v747_v63, %v759_v57  ;;  %v20293_v21 = vld [vmem:[#allocation8 + $0xe10] ss:$24 sps:$4 sm:$0xff]  }
 0x46a   :  { %v18152_v1 = vcombine.high %v771_v34, %v783_v5  ;;  %v891_v57 = vld [vmem:[#allocation5 + $0x18f8] sm:$0xff] }
 0x46c   :  { %8089 = vmatpush1.bf16.msra.mxu1 %v18007_v55  ;;  %16071 = vmatpush1.bf16.msra.mxu0 %v20278_v35  ;;  %v795_v55 = vld [vmem:[#allocation5 + $0x15f8] sm:$0xff] }
 0x46d   :  { %8090 = vmatprep.subr.bf16.mxu1 %v18032_v40  ;;  %16072 = vmatprep.subr.bf16.mxu0 %v20283_v47  ;;  %v807_v35 = vld [vmem:[#allocation5 + $0x1658] sm:$0xff]  ;;  %v18151_v40 = vcombine.low %v771_v34, %v783_v5 }
 0x46e   :  { %v20296_v47 = vld [vmem:[#allocation8 + $0xe40] ss:$24 sps:$4 sm:$0xff]   ;;  %v18176_v32 = vcombine.high %v795_v55, %v807_v35 }
 0x46f   :  { %v20308_v34 = vld [vmem:[#allocation8 + $0xf00] ss:$24 sps:$4 sm:$0xff]  }
 0x470   :  { %8091 = vmatpush1.bf16.msra.mxu1 %v18031_v54  ;;  %16073 = vmatpush1.bf16.msra.mxu0 %v20281_v20  ;;  %v819_v54 = vld [vmem:[#allocation5 + $0x16b8] sm:$0xff] }
 0x471   :  { %8092 = vmatprep.subr.bf16.mxu1 %v18056_v6  ;;  %16074 = vmatprep.subr.bf16.mxu0 %v20286_v49  ;;  %v831_v20 = vld [vmem:[#allocation5 + $0x1718] sm:$0xff]  ;;  %v18175_v6 = vcombine.low %v795_v55, %v807_v35  ;;  %v20299_v49 = vld [vmem:[#allocation8 + $0xe70] ss:$24 sps:$4 sm:$0xff]  }
 0x472   :  { %v18200_v7 = vcombine.high %v819_v54, %v831_v20  ;;  %v915_v5 = vld [vmem:[#allocation5 + $0x19b8] sm:$0xff]  ;;  %v20311_v55 = vld [vmem:[#allocation8 + $0xf30] ss:$24 sps:$4 sm:$0xff]  }
 0x473   :  { %v939_v35 = vld [vmem:[#allocation5 + $0x1a78] sm:$0xff] }
 0x474   :  { %8093 = vmatpush1.bf16.msra.mxu1 %v18055_v8  ;;  %16075 = vmatpush1.bf16.msra.mxu0 %v20284_v23  ;;  %v843_v8 = vld [vmem:[#allocation5 + $0x1778] sm:$0xff] }
 0x475   :  { %8094 = vmatprep.subr.bf16.mxu1 %v18080_v3  ;;  %16076 = vmatprep.subr.bf16.mxu0 %v20289_v31  ;;  %v855_v23 = vld [vmem:[#allocation5 + $0x17d8] sm:$0xff]  ;;  %v18199_v3 = vcombine.low %v819_v54, %v831_v20 }
 0x476   :  { %v20302_v31 = vld [vmem:[#allocation8 + $0xea0] ss:$24 sps:$4 sm:$0xff]   ;;  %v18224_v28 = vcombine.high %v843_v8, %v855_v23 }
 0x477   :  { %v20314_v54 = vld [vmem:[#allocation8 + $0xf60] ss:$24 sps:$4 sm:$0xff]  }
 0x478   :  { %8095 = vmatpush1.bf16.msra.mxu1 %v18079_v62  ;;  %16077 = vmatpush1.bf16.msra.mxu0 %v20287_v12  ;;  %v867_v62 = vld [vmem:[#allocation5 + $0x1838] sm:$0xff] }
 0x479   :  { %8096 = vmatprep.subr.bf16.mxu1 %v18104_v11  ;;  %16078 = vmatprep.subr.bf16.mxu0 %v20292_v14  ;;  %v879_v12 = vld [vmem:[#allocation5 + $0x1898] sm:$0xff]  ;;  %v18223_v11 = vcombine.low %v843_v8, %v855_v23  ;;  %v20305_v14 = vld [vmem:[#allocation8 + $0xed0] ss:$24 sps:$4 sm:$0xff]  }
 0x47a   :  { %v18248_v63 = vcombine.high %v867_v62, %v879_v12  ;;  %v963_v20 = vld [vmem:[#allocation5 + $0x1b38] sm:$0xff]  ;;  %v20317_v8 = vld [vmem:[#allocation8 + $0xf90] ss:$24 sps:$4 sm:$0xff]  }
 0x47b   :  { %v987_v23 = vld [vmem:[#allocation5 + $0x1bf8] sm:$0xff] }
 0x47c   :  { %8097 = vmatpush1.bf16.msra.mxu1 %v18103_v29  ;;  %16079 = vmatpush1.bf16.msra.mxu0 %v20290_v22  ;;  %v903_v29 = vld [vmem:[#allocation5 + $0x1958] sm:$0xff] }
 0x47d   :  { %8098 = vmatprep.subr.bf16.mxu1 %v18128_v41  ;;  %16080 = vmatprep.subr.bf16.mxu0 %v20295_v52  ;;  %v20310_v22 = vld [vmem:[#allocation8 + $0xf04] ss:$24 sps:$4 sm:$0xff]   ;;  %v18247_v41 = vcombine.low %v867_v62, %v879_v12  ;;  %v18272_v52 = vcombine.high %v891_v57, %v903_v29  ;;  %v20320_v62 = vld [vmem:[#allocation8 + $0xfc0] ss:$24 sps:$4 sm:$0xff]  }
 0x47e   :  { %v1011_v12 = vld [vmem:[#allocation5 + $0x1cb8] sm:$0xff] }
 0x480   :  { %8099 = vmatpush1.bf16.msra.mxu1 %v18127_v37  ;;  %16081 = vmatpush1.bf16.msra.mxu0 %v20293_v21  ;;  %v927_v37 = vld [vmem:[#allocation5 + $0x1a18] sm:$0xff]  ;;  %v20313_v21 = vld [vmem:[#allocation8 + $0xf34] ss:$24 sps:$4 sm:$0xff]  }
 0x481   :  { %8100 = vmatprep.subr.bf16.mxu1 %v18152_v1  ;;  %16082 = vmatprep.subr.bf16.mxu0 %v20298_v33  ;;  %v18271_v1 = vcombine.low %v891_v57, %v903_v29  ;;  %v18296_v33 = vcombine.high %v915_v5, %v927_v37  ;;  %v20323_v29 = vld [vmem:[#allocation8 + $0xff0] ss:$24 sps:$4 sm:$0xff]  }
 0x484   :  { %8101 = vmatpush1.bf16.msra.mxu1 %v18151_v40  ;;  %16083 = vmatpush1.bf16.msra.mxu0 %v20296_v47  ;;  %v951_v40 = vld [vmem:[#allocation5 + $0x1ad8] sm:$0xff] }
 0x485   :  { %8102 = vmatprep.subr.bf16.mxu1 %v18176_v32  ;;  %16084 = vmatprep.subr.bf16.mxu0 %v20301_v56  ;;  %v20316_v47 = vld [vmem:[#allocation8 + $0xf64] ss:$24 sps:$4 sm:$0xff]   ;;  %v18295_v32 = vcombine.low %v915_v5, %v927_v37  ;;  %v18320_v56 = vcombine.high %v939_v35, %v951_v40  ;;  %v20326_v37 = vld [vmem:[#allocation8 + $0x1020] ss:$24 sps:$4 sm:$0xff]  }
 0x488   :  { %8103 = vmatpush1.bf16.msra.mxu1 %v18175_v6  ;;  %16085 = vmatpush1.bf16.msra.mxu0 %v20299_v49  ;;  %v975_v6 = vld [vmem:[#allocation5 + $0x1b98] sm:$0xff]  ;;  %v20319_v49 = vld [vmem:[#allocation8 + $0xf94] ss:$24 sps:$4 sm:$0xff]  }
 0x489   :  { %8104 = vmatprep.subr.bf16.mxu1 %v18200_v7  ;;  %16086 = vmatprep.subr.bf16.mxu0 %v20304_v48  ;;  %v18319_v7 = vcombine.low %v939_v35, %v951_v40  ;;  %v18344_v48 = vcombine.high %v963_v20, %v975_v6  ;;  %v20329_v40 = vld [vmem:[#allocation8 + $0x1050] ss:$24 sps:$4 sm:$0xff]  }
 0x48c   :  { %8105 = vmatpush1.bf16.msra.mxu1 %v18199_v3  ;;  %16087 = vmatpush1.bf16.msra.mxu0 %v20302_v31  ;;  %v999_v3 = vld [vmem:[#allocation5 + $0x1c58] sm:$0xff] }
 0x48d   :  { %8106 = vmatprep.subr.bf16.mxu1 %v18224_v28  ;;  %16088 = vmatprep.subr.bf16.mxu0 %v20307_v17  ;;  %v20322_v31 = vld [vmem:[#allocation8 + $0xfc4] ss:$24 sps:$4 sm:$0xff]   ;;  %v18343_v28 = vcombine.low %v963_v20, %v975_v6  ;;  %v18368_v17 = vcombine.high %v987_v23, %v999_v3  ;;  %v20332_v6 = vld [vmem:[#allocation8 + $0x1080] ss:$24 sps:$4 sm:$0xff]  }
 0x490   :  { %8107 = vmatpush1.bf16.msra.mxu1 %v18223_v11  ;;  %16089 = vmatpush1.bf16.msra.mxu0 %v20305_v14  ;;  %v1023_v11 = vld [vmem:[#allocation5 + $0x1d18] sm:$0xff]  ;;  %v20325_v14 = vld [vmem:[#allocation8 + $0xff4] ss:$24 sps:$4 sm:$0xff]  }
 0x491   :  { %8119 = vmatprep.subr.bf16.mxu1 %v18248_v63  ;;  %16101 = vmatprep.subr.bf16.mxu0 %v20310_v22  ;;  %v18367_v63 = vcombine.low %v987_v23, %v999_v3  ;;  %v18392_v57 = vcombine.high %v1011_v12, %v1023_v11  ;;  %v1035_v22 = vld [vmem:[#allocation5 + $0x1d78] sm:$0xff]  ;;  %v20335_v3 = vld [vmem:[#allocation8 + $0x10b0] ss:$24 sps:$4 sm:$0xff]  }
 0x493   :  { %8109 = vmatmul.mubr.bf16.vlgmr.msra.gmra.mrb[20].mxu1 %v22129_v30  ;;  %16091 = vmatmul.mubr.bf16.vlgmr.msra.gmra.mrb[16].mxu0 %v22223_v16 }
 0x494   :  { %8120 = vmatpush1.bf16.msra.mxu1 %v18247_v41  ;;  %16102 = vmatpush1.bf16.msra.mxu0 %v20308_v34  ;;  %v1047_v41 = vld [vmem:[#allocation5 + $0x1dd8] sm:$0xff]  ;;  %v18391_v34 = vcombine.low %v1011_v12, %v1023_v11 }
 0x495   :  { %8121 = vmatprep.subr.bf16.mxu1 %v18272_v52  ;;  %16103 = vmatprep.subr.bf16.mxu0 %v20313_v21  ;;  %v20328_v52 = vld [vmem:[#allocation8 + $0x1024] ss:$24 sps:$4 sm:$0xff]   ;;  %v18416_v5 = vcombine.high %v1035_v22, %v1047_v41  ;;  %v20338_v11 = vld [vmem:[#allocation8 + $0x10e0] ss:$24 sps:$4 sm:$0xff]  }
 0x496   :  { %8151 = vmatprep.mubr.bf16.mxu1 %v22131_v39  ;;  %v1059_v21 = vld [vmem:[#allocation5 + $0x1e38] sm:$0xff] }
 0x498   :  { %8122 = vmatpush1.bf16.msra.mxu1 %v18271_v1  ;;  %16104 = vmatpush1.bf16.msra.mxu0 %v20311_v55  ;;  %v1071_v1 = vld [vmem:[#allocation5 + $0x1e98] sm:$0xff]  ;;  %v18415_v55 = vcombine.low %v1035_v22, %v1047_v41  ;;  %v20341_v41 = vld [vmem:[#allocation8 + $0x1110] ss:$24 sps:$4 sm:$0xff]  }
 0x499   :  { %8123 = vmatprep.subr.bf16.mxu1 %v18296_v33  ;;  %16105 = vmatprep.subr.bf16.mxu0 %v20316_v47  ;;  %v20331_v33 = vld [vmem:[#allocation8 + $0x1054] ss:$24 sps:$4 sm:$0xff]   ;;  %v18440_v35 = vcombine.high %v1059_v21, %v1071_v1  ;;  %v1083_v47 = vld [vmem:[#allocation5 + $0x1ef8] sm:$0xff] }
 0x49c   :  { %8124 = vmatpush1.bf16.msra.mxu1 %v18295_v32  ;;  %16106 = vmatpush1.bf16.msra.mxu0 %v20314_v54  ;;  %v1095_v32 = vld [vmem:[#allocation5 + $0x1f58] sm:$0xff]  ;;  %v18439_v54 = vcombine.low %v1059_v21, %v1071_v1 }
 0x49d   :  { %8125 = vmatprep.subr.bf16.mxu1 %v18320_v56  ;;  %16107 = vmatprep.subr.bf16.mxu0 %v20319_v49  ;;  %v20334_v56 = vld [vmem:[#allocation8 + $0x1084] ss:$24 sps:$4 sm:$0xff]   ;;  %v18464_v20 = vcombine.high %v1083_v47, %v1095_v32  ;;  %v20344_v1 = vld [vmem:[#allocation8 + $0x1140] ss:$24 sps:$4 sm:$0xff]  }
 0x49e   :  { %v1107_v49 = vld [vmem:[#allocation5 + $0x1fb8] sm:$0xff] }
 0x4a0   :  { %8126 = vmatpush1.bf16.msra.mxu1 %v18319_v7  ;;  %16108 = vmatpush1.bf16.msra.mxu0 %v20317_v8  ;;  %v1119_v7 = vld [vmem:[#allocation5 + $0x2018] sm:$0xff]  ;;  %v18463_v8 = vcombine.low %v1083_v47, %v1095_v32  ;;  %v20347_v32 = vld [vmem:[#allocation8 + $0x1170] ss:$24 sps:$4 sm:$0xff]  }
 0x4a1   :  { %8127 = vmatprep.subr.bf16.mxu1 %v18344_v48  ;;  %16109 = vmatprep.subr.bf16.mxu0 %v20322_v31  ;;  %v20337_v48 = vld [vmem:[#allocation8 + $0x10b4] ss:$24 sps:$4 sm:$0xff]   ;;  %v18488_v23 = vcombine.high %v1107_v49, %v1119_v7  ;;  %v1131_v31 = vld [vmem:[#allocation5 + $0x2078] sm:$0xff] }
 0x4a4   :  { %8128 = vmatpush1.bf16.msra.mxu1 %v18343_v28  ;;  %16110 = vmatpush1.bf16.msra.mxu0 %v20320_v62  ;;  %v1143_v28 = vld [vmem:[#allocation5 + $0x20d8] sm:$0xff]  ;;  %v18487_v62 = vcombine.low %v1107_v49, %v1119_v7 }
 0x4a5   :  { %8129 = vmatprep.subr.bf16.mxu1 %v18368_v17  ;;  %16111 = vmatprep.subr.bf16.mxu0 %v20325_v14  ;;  %v20340_v17 = vld [vmem:[#allocation8 + $0x10e4] ss:$24 sps:$4 sm:$0xff]   ;;  %v18512_v12 = vcombine.high %v1131_v31, %v1143_v28  ;;  %v20350_v7 = vld [vmem:[#allocation8 + $0x11a0] ss:$24 sps:$4 sm:$0xff]  }
 0x4a6   :  { %v1155_v14 = vld [vmem:[#allocation5 + $0x2138] sm:$0xff] }
 0x4a8   :  { %8130 = vmatpush1.bf16.msra.mxu1 %v18367_v63  ;;  %16112 = vmatpush1.bf16.msra.mxu0 %v20323_v29  ;;  %v1167_v63 = vld [vmem:[#allocation5 + $0x2198] sm:$0xff]  ;;  %v18511_v29 = vcombine.low %v1131_v31, %v1143_v28  ;;  %v20353_v28 = vld [vmem:[#allocation8 + $0x11d0] ss:$24 sps:$4 sm:$0xff]  }
 0x4a9   :  { %8131 = vmatprep.subr.bf16.mxu1 %v18392_v57  ;;  %16113 = vmatprep.subr.bf16.mxu0 %v20328_v52  ;;  %v20343_v57 = vld [vmem:[#allocation8 + $0x1114] ss:$24 sps:$4 sm:$0xff]   ;;  %v18536_v22 = vcombine.high %v1155_v14, %v1167_v63  ;;  %v1179_v52 = vld [vmem:[#allocation5 + $0x21f8] sm:$0xff] }
 0x4ac   :  { %8132 = vmatpush1.bf16.msra.mxu1 %v18391_v34  ;;  %16114 = vmatpush1.bf16.msra.mxu0 %v20326_v37  ;;  %v1191_v34 = vld [vmem:[#allocation5 + $0x2258] sm:$0xff]  ;;  %v18535_v37 = vcombine.low %v1155_v14, %v1167_v63  ;;  %v149_v63 = vld [vmem:[#allocation5 + $0x1c8] sm:$0xff] }
 0x4ad   :  { %8133 = vmatprep.subr.bf16.mxu1 %v18416_v5  ;;  %16115 = vmatprep.subr.bf16.mxu0 %v20331_v33  ;;  %v20346_v5 = vld [vmem:[#allocation8 + $0x1144] ss:$24 sps:$4 sm:$0xff]   ;;  %v18560_v21 = vcombine.high %v1179_v52, %v1191_v34 }
 0x4ae   :  { %v1203_v33 = vld [vmem:[#allocation5 + $0x22b8] sm:$0xff] }
 0x4b0   :  { %8134 = vmatpush1.bf16.msra.mxu1 %v18415_v55  ;;  %16116 = vmatpush1.bf16.msra.mxu0 %v20329_v40  ;;  %v1215_v55 = vld [vmem:[#allocation5 + $0x2318] sm:$0xff]  ;;  %v18559_v40 = vcombine.low %v1179_v52, %v1191_v34  ;;  %v185_v52 = vld [vmem:[#allocation5 + $0x2e8] sm:$0xff] }
 0x4b1   :  { %8135 = vmatprep.subr.bf16.mxu1 %v18440_v35  ;;  %16117 = vmatprep.subr.bf16.mxu0 %v20334_v56  ;;  %v20349_v35 = vld [vmem:[#allocation8 + $0x1174] ss:$24 sps:$4 sm:$0xff]   ;;  %v18584_v47 = vcombine.high %v1203_v33, %v1215_v55  ;;  %v1227_v56 = vld [vmem:[#allocation5 + $0x2378] sm:$0xff] }
 0x4b4   :  { %8136 = vmatpush1.bf16.msra.mxu1 %v18439_v54  ;;  %16118 = vmatpush1.bf16.msra.mxu0 %v20332_v6  ;;  %v1239_v54 = vld [vmem:[#allocation5 + $0x23d8] sm:$0xff]  ;;  %v18583_v6 = vcombine.low %v1203_v33, %v1215_v55  ;;  %v221_v55 = vld [vmem:[#allocation5 + $0x408] sm:$0xff] }
 0x4b5   :  { %8137 = vmatprep.subr.bf16.mxu1 %v18464_v20  ;;  %16119 = vmatprep.subr.bf16.mxu0 %v20337_v48  ;;  %v20352_v20 = vld [vmem:[#allocation8 + $0x11a4] ss:$24 sps:$4 sm:$0xff]   ;;  %v18608_v49 = vcombine.high %v1227_v56, %v1239_v54  ;;  %v101_v48 = vld [vmem:[#allocation5 + $0x48] sm:$0xff] }
 0x4b8   :  { %8138 = vmatpush1.bf16.msra.mxu1 %v18463_v8  ;;  %16120 = vmatpush1.bf16.msra.mxu0 %v20335_v3  ;;  %v113_v8 = vld [vmem:[#allocation5 + $0xa8] sm:$0xff]  ;;  %v18607_v3 = vcombine.low %v1227_v56, %v1239_v54 }
 0x4b9   :  { %8139 = vmatprep.subr.bf16.mxu1 %v18488_v23  ;;  %16121 = vmatprep.subr.bf16.mxu0 %v20340_v17  ;;  %v20355_v23 = vld [vmem:[#allocation8 + $0x11d4] ss:$24 sps:$4 sm:$0xff]   ;;  %v17484_v31 = vcombine.high %v101_v48, %v113_v8 }
 0x4ba   :  { %v125_v17 = vld [vmem:[#allocation5 + $0x108] sm:$0xff] }
 0x4bb   :  { %v257_v56 = vld [vmem:[#allocation5 + $0x528] sm:$0xff] }
 0x4bc   :  { %8140 = vmatpush1.bf16.msra.mxu1 %v18487_v62  ;;  %16122 = vmatpush1.bf16.msra.mxu0 %v20338_v11  ;;  %v137_v62 = vld [vmem:[#allocation5 + $0x168] sm:$0xff]  ;;  %v17483_v11 = vcombine.low %v101_v48, %v113_v8 }
 0x4bd   :  { %8141 = vmatprep.subr.bf16.mxu1 %v18512_v12  ;;  %16123 = vmatprep.subr.bf16.mxu0 %v20343_v57  ;;  %v20358_v12 = vld [vmem:[#allocation8 + $0x1204] ss:$24 sps:$4 sm:$0xff]   ;;  %v17508_v14 = vcombine.high %v125_v17, %v137_v62  ;;  %v161_v57 = vld [vmem:[#allocation5 + $0x228] sm:$0xff] }
 0x4be   :  { %v17531_v34 = vcombine.low %v149_v63, %v161_v57  ;;  %v22438_v54 = vld [vmem:[#allocation7 + $0x8] sm:$0xff] }
 0x4bf   :  { %v269_v8 = vld [vmem:[#allocation5 + $0x588] sm:$0xff] }
 0x4c0   :  { %8142 = vmatpush1.bf16.msra.mxu1 %v18511_v29  ;;  %16124 = vmatpush1.bf16.msra.mxu0 %v20341_v41  ;;  %v17507_v29 = vcombine.low %v125_v17, %v137_v62  ;;  %v173_v41 = vld [vmem:[#allocation5 + $0x288] sm:$0xff] }
 0x4c1   :  { %8143 = vmatprep.subr.bf16.mxu1 %v18536_v22  ;;  %16125 = vmatprep.subr.bf16.mxu0 %v20346_v5  ;;  %v17532_v22 = vcombine.high %v149_v63, %v161_v57  ;;  %v17556_v5 = vcombine.high %v173_v41, %v185_v52 }
 0x4c4   :  { %8144 = vmatpush1.bf16.msra.mxu1 %v18535_v37  ;;  %16126 = vmatpush1.bf16.msra.mxu0 %v20344_v1  ;;  %v197_v37 = vld [vmem:[#allocation5 + $0x348] sm:$0xff]  ;;  %v17555_v1 = vcombine.low %v173_v41, %v185_v52 }
 0x4c5   :  { %8145 = vmatprep.subr.bf16.mxu1 %v18560_v21  ;;  %16127 = vmatprep.subr.bf16.mxu0 %v20349_v35  ;;  %v209_v21 = vld [vmem:[#allocation5 + $0x3a8] sm:$0xff] }
 0x4c6   :  { %v17580_v33 = vcombine.high %v197_v37, %v209_v21  ;;  %v233_v35 = vld [vmem:[#allocation5 + $0x468] sm:$0xff] }
 0x4c7   :  { %v305_v41 = vld [vmem:[#allocation5 + $0x6a8] sm:$0xff] }
 0x4c8   :  { %8146 = vmatpush1.bf16.msra.mxu1 %v18559_v40  ;;  %16128 = vmatpush1.bf16.msra.mxu0 %v20347_v32  ;;  %v17579_v40 = vcombine.low %v197_v37, %v209_v21  ;;  %v245_v32 = vld [vmem:[#allocation5 + $0x4c8] sm:$0xff] }
 0x4c9   :  { %8147 = vmatprep.subr.bf16.mxu1 %v18584_v47  ;;  %16129 = vmatprep.subr.bf16.mxu0 %v20352_v20  ;;  %v17604_v47 = vcombine.high %v221_v55, %v233_v35  ;;  %v1293_v20 = vrot.slane %v22438_v54, %v22240_v38  ;;  %v17627_v62 = vcombine.low %v245_v32, %v257_v56  ;;  %v317_v21 = vld [vmem:[#allocation5 + $0x708] sm:$0xff] }
 0x4cc   :  { %8148 = vmatpush1.bf16.msra.mxu1 %v18583_v6  ;;  %16130 = vmatpush1.bf16.msra.mxu0 %v20350_v7  ;;  %v1297_v6 = vrot.slane %v22438_v54, %v22243_v42  ;;  %v17628_v7 = vcombine.high %v245_v32, %v257_v56 }
 0x4cd   :  { %8149 = vmatprep.subr.bf16.mxu1 %v18608_v49  ;;  %16131 = vmatprep.subr.bf16.mxu0 %v20355_v23  ;;  %v17603_v49 = vcombine.low %v221_v55, %v233_v35  ;;  %v281_v23 = vld [vmem:[#allocation5 + $0x5e8] sm:$0xff] }
 0x4ce   :  { %v17652_v63 = vcombine.high %v269_v8, %v281_v23  ;;  %v341_v35 = vld [vmem:[#allocation5 + $0x7c8] sm:$0xff] }
 0x4d0   :  { %8150 = vmatpush1.bf16.msra.mxu1 %v18607_v3  ;;  %16132 = vmatpush1.bf16.msra.mxu0 %v20353_v28 }
 0x4d1   :  { %8291 = vmatprep.subr.bf16.mxu1 %v17484_v31  ;;  %16144 = vmatprep.subr.bf16.mxu0 %v20358_v12 }
 0x4d3   :  { %8152 = vmatmul.mubr.bf16.vlgmr.msra.gmra.mrb[20].mxu1 %v22137_v44 }
 0x4d4   :  { %8292 = vmatpush1.bf16.msra.mxu1 %v17483_v11  ;;  %8323 = vmatprep.mubr.bf16.mxu1 %v22117_v58 }
 0x4d5   :  { %8293 = vmatprep.subr.bf16.mxu1 %v17508_v14 }
 0x4d8   :  { %8294 = vmatpush1.bf16.msra.mxu1 %v17507_v29 }
 0x4d9   :  { %8295 = vmatprep.subr.bf16.mxu1 %v17532_v22  ;;  %v293_v22 = vld [vmem:[#allocation5 + $0x648] sm:$0xff] }
 0x4da   :  { %v17676_v37 = vcombine.high %v293_v22, %v305_v41 }
 0x4dc   :  { %8296 = vmatpush1.bf16.msra.mxu1 %v17531_v34 }
 0x4dd   :  { %8297 = vmatprep.subr.bf16.mxu1 %v17556_v5  ;;  %v17651_v5 = vcombine.low %v269_v8, %v281_v23 }
 0x4e0   :  { %8298 = vmatpush1.bf16.msra.mxu1 %v17555_v1  ;;  %v329_v1 = vld [vmem:[#allocation5 + $0x768] sm:$0xff] }
 0x4e1   :  { %8299 = vmatprep.subr.bf16.mxu1 %v17580_v33  ;;  %v17675_v33 = vcombine.low %v293_v22, %v305_v41  ;;  %v17700_v55 = vcombine.high %v317_v21, %v329_v1 }
 0x4e4   :  { %8300 = vmatpush1.bf16.msra.mxu1 %v17579_v40  ;;  %v353_v40 = vld [vmem:[#allocation5 + $0x828] sm:$0xff] }
 0x4e5   :  { %8301 = vmatprep.subr.bf16.mxu1 %v17604_v47  ;;  %v17699_v47 = vcombine.low %v317_v21, %v329_v1  ;;  %v17724_v56 = vcombine.high %v341_v35, %v353_v40  ;;  %v401_v21 = vld [vmem:[#allocation5 + $0x9a8] sm:$0xff] }
 0x4e6   :  { %v7895_v48 = vpop.f32.mrb[16].mxu1 }
 0x4e7   :  { %v19789_v3 = vadd.f32 %v7895_v48, %v1293_v20  ;;  %v7897_v31 = vpop.f32.mrb[17].mxu1 }
 0x4e8   :  { %v19790_v28 = vadd.f32 %v7897_v31, %v1297_v6  ;;  %v7899_v17 = vpop.f32.mrb[18].mxu1  ;;  %8302 = vmatpush1.bf16.msra.mxu1 %v17603_v49  ;;  %v365_v49 = vld [vmem:[#allocation5 + $0x888] sm:$0xff] }
 0x4e9   :  { %v8736_v12 = vmul.f32 0.70710677, %v19789_v3  ;;  %v19791_v11 = vadd.f32 %v7899_v17, %v1293_v20  ;;  %v7901_v14 = vpop.f32.mrb[19].mxu1  ;;  %8303 = vmatprep.subr.bf16.mxu1 %v17628_v7  ;;  %v377_v7 = vld [vmem:[#allocation5 + $0x8e8] sm:$0xff]  ;;  %v8688_v31 = vmul.f32 0.5, %v19789_v3 }
 0x4ea   :  { %v8737_v57 = vmul.f32 0.70710677, %v19790_v28  ;;  %v19792_v29 = vadd.f32 %v7901_v14, %v1297_v6  ;;  %v8689_v14 = vmul.f32 0.5, %v19790_v28  ;;  %v17748_v22 = vcombine.high %v365_v49, %v377_v7  ;;  %v20361_v28 = vld [vmem:[#allocation8 + $0x1234] ss:$24 sps:$4 sm:$0xff]  }
 0x4eb   :  { %21860 = verf.f32 %v8736_v12  ;;  %v8760_v52 = vmul.f32 0.70710677, %v19791_v11  ;;  %v8712_v17 = vmul.f32 0.5, %v19791_v11  ;;  %v17723_v12 = vcombine.low %v341_v35, %v353_v40  ;;  %v20356_v11 = vld [vmem:[#allocation8 + $0x1200] ss:$24 sps:$4 sm:$0xff]   ;;  %v425_v35 = vld [vmem:[#allocation5 + $0xa68] sm:$0xff] }
 0x4ec   :  { %21862 = verf.f32 %v8737_v57  ;;  %v8761_v34 = vmul.f32 0.70710677, %v19792_v29  ;;  %8304 = vmatpush1.bf16.msra.mxu1 %v17627_v62 }
 0x4ed   :  { %21864 = verf.f32 %v8760_v52  ;;  %8305 = vmatprep.subr.bf16.mxu1 %v17652_v63  ;;  %v8713_v63 = vmul.f32 0.5, %v19792_v29  ;;  %v413_v29 = vld [vmem:[#allocation5 + $0xa08] sm:$0xff] }
 0x4ee   :  { %21866 = verf.f32 %v8761_v34 }
 0x4f0   :  { %8306 = vmatpush1.bf16.msra.mxu1 %v17651_v5 }
 0x4f1   :  { %8307 = vmatprep.subr.bf16.mxu1 %v17676_v37  ;;  %v389_v37 = vld [vmem:[#allocation5 + $0x948] sm:$0xff] }
 0x4f2   :  { %v17771_v40 = vcombine.low %v389_v37, %v401_v21 }
 0x4f4   :  { %8308 = vmatpush1.bf16.msra.mxu1 %v17675_v33  ;;  %v17747_v33 = vcombine.low %v365_v49, %v377_v7  ;;  %v17795_v49 = vcombine.low %v413_v29, %v425_v35  ;;  %v20362_v7 = vld [vmem:[#allocation8 + $0x1260] ss:$24 sps:$4 sm:$0xff]  }
 0x4f5   :  { %v21861_v32 = vpop.eup %21860  ;;  %8309 = vmatprep.subr.bf16.mxu1 %v17700_v55  ;;  %v17772_v55 = vcombine.high %v389_v37, %v401_v21  ;;  %v521_v37 = vld [vmem:[#allocation5 + $0xd68] sm:$0xff] }
 0x4f6   :  { %v21863_v20 = vpop.eup %21862  ;;  %v8832_v6 = vadd.f32 1.0, %v21861_v32  ;;  %v17796_v32 = vcombine.high %v413_v29, %v425_v35  ;;  %v545_v29 = vld [vmem:[#allocation5 + $0xe28] sm:$0xff] }
 0x4f7   :  { %v21865_v48 = vpop.eup %21864  ;;  %v8833_v8 = vadd.f32 1.0, %v21863_v20  ;;  %v437_v20 = vld [vmem:[#allocation5 + $0xac8] sm:$0xff] }
 0x4f8   :  { %v21867_v23 = vpop.eup %21866  ;;  %v8856_v62 = vadd.f32 1.0, %v21865_v48  ;;  %8310 = vmatpush1.bf16.msra.mxu1 %v17699_v47  ;;  %v8880_v41 = vmul.f32 %v8832_v6, %v8688_v31  ;;  %v20359_v47 = vld [vmem:[#allocation8 + $0x1230] ss:$24 sps:$4 sm:$0xff]  }
 0x4f9   :  { %v8857_v57 = vadd.f32 1.0, %v21867_v23  ;;  %8311 = vmatprep.subr.bf16.mxu1 %v17724_v56  ;;  %v8881_v34 = vmul.f32 %v8833_v8, %v8689_v14  ;;  %v20364_v56 = vld [vmem:[#allocation8 + $0x1264] ss:$24 sps:$4 sm:$0xff]   ;;  %v449_v6 = vld [vmem:[#allocation5 + $0xb28] sm:$0xff] }
 0x4fa   :  { %v8904_v52 = vmul.f32 %v8856_v62, %v8712_v17  ;;  %v17820_v48 = vcombine.high %v437_v20, %v449_v6  ;;  %v20367_v8 = vld [vmem:[#allocation8 + $0x1294] ss:$24 sps:$4 sm:$0xff]   ;;  %v17819_v17 = vcombine.low %v437_v20, %v449_v6  ;;  %v20365_v62 = vld [vmem:[#allocation8 + $0x1290] ss:$24 sps:$4 sm:$0xff]   ;;  %v20370_v14 = vld [vmem:[#allocation8 + $0x12c4] ss:$24 sps:$4 sm:$0xff]  }
 0x4fb   :  { %v8905_v5 = vmul.f32 %v8857_v57, %v8713_v63  ;;  %v461_v23 = vld [vmem:[#allocation5 + $0xb88] sm:$0xff] }
 0x4fc   :  { %v22444_v1 = vpack.c.bf16 %v8904_v52, %v8880_v41  ;;  %8312 = vmatpush1.bf16.msra.mxu1 %v17723_v12  ;;  %v473_v31 = vld [vmem:[#allocation5 + $0xbe8] sm:$0xff]  ;;  %v20368_v41 = vld [vmem:[#allocation8 + $0x12c0] ss:$24 sps:$4 sm:$0xff]  }
 0x4fd   :  { %8313 = vmatprep.subr.bf16.mxu1 %v17748_v22  ;;  %v22446_v3 = vpack.c.bf16 %v8905_v5, %v8881_v34  ;;  %v17844_v12 = vcombine.high %v461_v23, %v473_v31  ;;  %v485_v63 = vld [vmem:[#allocation5 + $0xc48] sm:$0xff]  ;;  %v17843_v22 = vcombine.low %v461_v23, %v473_v31 }
 0x4fe   :  { %v497_v57 = vld [vmem:[#allocation5 + $0xca8] sm:$0xff] }
 0x4ff   :  { %16133 = vmatprep.mubr.bf16.mxu0 %v22446_v3  ;;  %v17868_v52 = vcombine.high %v485_v63, %v497_v57  ;;  %v20373_v34 = vld [vmem:[#allocation8 + $0x12f4] ss:$24 sps:$4 sm:$0xff]   ;;  %v17867_v21 = vcombine.low %v485_v63, %v497_v57 }
 0x500   :  { %8314 = vmatpush1.bf16.msra.mxu1 %v17747_v33  ;;  %16134 = vmatmul.mubr.bf16.vlgmr.msra.gmra.mrb[16].mxu0 %v22444_v1  ;;  %v509_v5 = vld [vmem:[#allocation5 + $0xd08] sm:$0xff] }
 0x501   :  { %16145 = vmatpush1.bf16.msra.mxu0 %v20356_v11  ;;  %16176 = vmatprep.mubr.bf16.mxu0 %v22313_v45  ;;  %v20371_v33 = vld [vmem:[#allocation8 + $0x12f0] ss:$24 sps:$4 sm:$0xff]   ;;  %v17892_v11 = vcombine.high %v509_v5, %v521_v37  ;;  %v17891_v35 = vcombine.low %v509_v5, %v521_v37 }
 0x502   :  { %8315 = vmatprep.subr.bf16.mxu1 %v17772_v55  ;;  %16146 = vmatprep.subr.bf16.mxu0 %v20361_v28  ;;  %v20376_v55 = vld [vmem:[#allocation8 + $0x1324] ss:$24 sps:$4 sm:$0xff]   ;;  %v533_v28 = vld [vmem:[#allocation5 + $0xdc8] sm:$0xff] }
 0x503   :  { %v569_v20 = vld [vmem:[#allocation5 + $0xee8] sm:$0xff]  ;;  %v17915_v6 = vcombine.low %v533_v28, %v545_v29 }
 0x504   :  { %8316 = vmatpush1.bf16.msra.mxu1 %v17771_v40  ;;  %v20374_v40 = vld [vmem:[#allocation8 + $0x1320] ss:$24 sps:$4 sm:$0xff]   ;;  %v593_v23 = vld [vmem:[#allocation5 + $0xfa8] sm:$0xff] }
 0x505   :  { %16147 = vmatpush1.bf16.msra.mxu0 %v20359_v47  ;;  %8317 = vmatprep.subr.bf16.mxu1 %v17796_v32  ;;  %v17916_v47 = vcombine.high %v533_v28, %v545_v29  ;;  %v20379_v32 = vld [vmem:[#allocation8 + $0x1354] ss:$24 sps:$4 sm:$0xff]  }
 0x506   :  { %16148 = vmatprep.subr.bf16.mxu0 %v20364_v56  ;;  %v557_v56 = vld [vmem:[#allocation5 + $0xe88] sm:$0xff] }
 0x507   :  { %v17939_v31 = vcombine.low %v557_v56, %v569_v20  ;;  %v617_v63 = vld [vmem:[#allocation5 + $0x1068] sm:$0xff] }
 0x508   :  { %8318 = vmatpush1.bf16.msra.mxu1 %v17795_v49  ;;  %v20377_v49 = vld [vmem:[#allocation8 + $0x1350] ss:$24 sps:$4 sm:$0xff]  }
 0x509   :  { %16149 = vmatpush1.bf16.msra.mxu0 %v20362_v7  ;;  %8319 = vmatprep.subr.bf16.mxu1 %v17820_v48  ;;  %v17940_v7 = vcombine.high %v557_v56, %v569_v20  ;;  %v20382_v48 = vld [vmem:[#allocation8 + $0x1384] ss:$24 sps:$4 sm:$0xff]   ;;  %v641_v5 = vld [vmem:[#allocation5 + $0x1128] sm:$0xff] }
 0x50a   :  { %16150 = vmatprep.subr.bf16.mxu0 %v20367_v8  ;;  %v581_v8 = vld [vmem:[#allocation5 + $0xf48] sm:$0xff] }
 0x50b   :  { %v17963_v57 = vcombine.low %v581_v8, %v593_v23  ;;  %v665_v28 = vld [vmem:[#allocation5 + $0x11e8] sm:$0xff] }
 0x50c   :  { %8320 = vmatpush1.bf16.msra.mxu1 %v17819_v17  ;;  %v20380_v17 = vld [vmem:[#allocation8 + $0x1380] ss:$24 sps:$4 sm:$0xff]   ;;  %v689_v56 = vld [vmem:[#allocation5 + $0x12a8] sm:$0xff] }
 0x50d   :  { %16151 = vmatpush1.bf16.msra.mxu0 %v20365_v62  ;;  %8321 = vmatprep.subr.bf16.mxu1 %v17844_v12  ;;  %v17964_v62 = vcombine.high %v581_v8, %v593_v23  ;;  %v20385_v12 = vld [vmem:[#allocation8 + $0x13b4] ss:$24 sps:$4 sm:$0xff]  }
 0x50e   :  { %16152 = vmatprep.subr.bf16.mxu0 %v20370_v14  ;;  %v605_v14 = vld [vmem:[#allocation5 + $0x1008] sm:$0xff] }
 0x50f   :  { %v17987_v37 = vcombine.low %v605_v14, %v617_v63  ;;  %v713_v8 = vld [vmem:[#allocation5 + $0x1368] sm:$0xff] }
 0x510   :  { %8322 = vmatpush1.bf16.msra.mxu1 %v17843_v22  ;;  %v20383_v22 = vld [vmem:[#allocation8 + $0x13b0] ss:$24 sps:$4 sm:$0xff]  }
 0x511   :  { %16153 = vmatpush1.bf16.msra.mxu0 %v20368_v41  ;;  %8334 = vmatprep.subr.bf16.mxu1 %v17868_v52  ;;  %v17988_v41 = vcombine.high %v605_v14, %v617_v63  ;;  %v20388_v52 = vld [vmem:[#allocation8 + $0x13e4] ss:$24 sps:$4 sm:$0xff]   ;;  %v737_v14 = vld [vmem:[#allocation5 + $0x1428] sm:$0xff] }
 0x512   :  { %16154 = vmatprep.subr.bf16.mxu0 %v20373_v34  ;;  %v629_v34 = vld [vmem:[#allocation5 + $0x10c8] sm:$0xff] }
 0x513   :  { %8324 = vmatmul.mubr.bf16.vlgmr.msra.gmra.mrb[24].mxu1 %v22121_v15  ;;  %v18011_v29 = vcombine.low %v629_v34, %v641_v5 }
 0x514   :  { %8335 = vmatpush1.bf16.msra.mxu1 %v17867_v21  ;;  %8366 = vmatprep.mubr.bf16.mxu1 %v22123_v25  ;;  %v20386_v21 = vld [vmem:[#allocation8 + $0x13e0] ss:$24 sps:$4 sm:$0xff]  }
 0x515   :  { %16155 = vmatpush1.bf16.msra.mxu0 %v20371_v33  ;;  %8336 = vmatprep.subr.bf16.mxu1 %v17892_v11  ;;  %v18012_v33 = vcombine.high %v629_v34, %v641_v5  ;;  %v20391_v11 = vld [vmem:[#allocation8 + $0x1414] ss:$24 sps:$4 sm:$0xff]  }
 0x516   :  { %16156 = vmatprep.subr.bf16.mxu0 %v20376_v55  ;;  %v653_v55 = vld [vmem:[#allocation5 + $0x1188] sm:$0xff] }
 0x517   :  { %v18035_v20 = vcombine.low %v653_v55, %v665_v28  ;;  %v761_v34 = vld [vmem:[#allocation5 + $0x14e8] sm:$0xff] }
 0x518   :  { %8337 = vmatpush1.bf16.msra.mxu1 %v17891_v35  ;;  %v20389_v35 = vld [vmem:[#allocation8 + $0x1410] ss:$24 sps:$4 sm:$0xff]  }
 0x519   :  { %16157 = vmatpush1.bf16.msra.mxu0 %v20374_v40  ;;  %8338 = vmatprep.subr.bf16.mxu1 %v17916_v47  ;;  %v18036_v40 = vcombine.high %v653_v55, %v665_v28  ;;  %v20394_v47 = vld [vmem:[#allocation8 + $0x1444] ss:$24 sps:$4 sm:$0xff]  }
 0x51a   :  { %16158 = vmatprep.subr.bf16.mxu0 %v20379_v32  ;;  %v677_v32 = vld [vmem:[#allocation5 + $0x1248] sm:$0xff]  ;;  %v20406_v55 = vld [vmem:[#allocation8 + $0x1504] ss:$24 sps:$4 sm:$0xff]  }
 0x51b   :  { %v18059_v23 = vcombine.low %v677_v32, %v689_v56 }
 0x51c   :  { %8339 = vmatpush1.bf16.msra.mxu1 %v17915_v6  ;;  %v20392_v6 = vld [vmem:[#allocation8 + $0x1440] ss:$24 sps:$4 sm:$0xff]  }
 0x51d   :  { %16159 = vmatpush1.bf16.msra.mxu0 %v20377_v49  ;;  %8340 = vmatprep.subr.bf16.mxu1 %v17940_v7  ;;  %v18060_v49 = vcombine.high %v677_v32, %v689_v56  ;;  %v20397_v7 = vld [vmem:[#allocation8 + $0x1474] ss:$24 sps:$4 sm:$0xff]  }
 0x51e   :  { %16160 = vmatprep.subr.bf16.mxu0 %v20382_v48  ;;  %v701_v48 = vld [vmem:[#allocation5 + $0x1308] sm:$0xff] }
 0x51f   :  { %v18083_v63 = vcombine.low %v701_v48, %v713_v8  ;;  %v20409_v32 = vld [vmem:[#allocation8 + $0x1534] ss:$24 sps:$4 sm:$0xff]  }
 0x520   :  { %8341 = vmatpush1.bf16.msra.mxu1 %v17939_v31  ;;  %v20395_v31 = vld [vmem:[#allocation8 + $0x1470] ss:$24 sps:$4 sm:$0xff]  }
 0x521   :  { %16161 = vmatpush1.bf16.msra.mxu0 %v20380_v17  ;;  %8342 = vmatprep.subr.bf16.mxu1 %v17964_v62  ;;  %v18084_v17 = vcombine.high %v701_v48, %v713_v8  ;;  %v20400_v62 = vld [vmem:[#allocation8 + $0x14a4] ss:$24 sps:$4 sm:$0xff]  }
 0x522   :  { %16162 = vmatprep.subr.bf16.mxu0 %v20385_v12  ;;  %v725_v12 = vld [vmem:[#allocation5 + $0x13c8] sm:$0xff]  ;;  %v20412_v48 = vld [vmem:[#allocation8 + $0x1564] ss:$24 sps:$4 sm:$0xff]  }
 0x523   :  { %v18107_v5 = vcombine.low %v725_v12, %v737_v14 }
 0x524   :  { %8343 = vmatpush1.bf16.msra.mxu1 %v17963_v57  ;;  %v20398_v57 = vld [vmem:[#allocation8 + $0x14a0] ss:$24 sps:$4 sm:$0xff]  }
 0x525   :  { %16163 = vmatpush1.bf16.msra.mxu0 %v20383_v22  ;;  %8344 = vmatprep.subr.bf16.mxu1 %v17988_v41  ;;  %v18108_v22 = vcombine.high %v725_v12, %v737_v14  ;;  %v20403_v41 = vld [vmem:[#allocation8 + $0x14d4] ss:$24 sps:$4 sm:$0xff]  }
 0x526   :  { %16164 = vmatprep.subr.bf16.mxu0 %v20388_v52  ;;  %v749_v52 = vld [vmem:[#allocation5 + $0x1488] sm:$0xff] }
 0x527   :  { %v18131_v28 = vcombine.low %v749_v52, %v761_v34  ;;  %v20415_v12 = vld [vmem:[#allocation8 + $0x1594] ss:$24 sps:$4 sm:$0xff]  }
 0x528   :  { %8345 = vmatpush1.bf16.msra.mxu1 %v17987_v37  ;;  %v20401_v37 = vld [vmem:[#allocation8 + $0x14d0] ss:$24 sps:$4 sm:$0xff]  }
 0x529   :  { %16165 = vmatpush1.bf16.msra.mxu0 %v20386_v21  ;;  %8346 = vmatprep.subr.bf16.mxu1 %v18012_v33  ;;  %v18132_v21 = vcombine.high %v749_v52, %v761_v34  ;;  %v773_v33 = vld [vmem:[#allocation5 + $0x1548] sm:$0xff]  ;;  %v20418_v52 = vld [vmem:[#allocation8 + $0x15c4] ss:$24 sps:$4 sm:$0xff]  }
 0x52a   :  { %16166 = vmatprep.subr.bf16.mxu0 %v20391_v11  ;;  %v785_v11 = vld [vmem:[#allocation5 + $0x15a8] sm:$0xff] }
 0x52b   :  { %v18155_v56 = vcombine.low %v773_v33, %v785_v11 }
 0x52c   :  { %8347 = vmatpush1.bf16.msra.mxu1 %v18011_v29  ;;  %v18156_v29 = vcombine.high %v773_v33, %v785_v11  ;;  %v905_v33 = vld [vmem:[#allocation5 + $0x1968] sm:$0xff] }
 0x52d   :  { %16167 = vmatpush1.bf16.msra.mxu0 %v20389_v35  ;;  %8348 = vmatprep.subr.bf16.mxu1 %v18036_v40  ;;  %v20404_v35 = vld [vmem:[#allocation8 + $0x1500] ss:$24 sps:$4 sm:$0xff]   ;;  %v797_v40 = vld [vmem:[#allocation5 + $0x1608] sm:$0xff] }
 0x52e   :  { %16168 = vmatprep.subr.bf16.mxu0 %v20394_v47  ;;  %v809_v47 = vld [vmem:[#allocation5 + $0x1668] sm:$0xff] }
 0x52f   :  { %v18179_v8 = vcombine.low %v797_v40, %v809_v47  ;;  %v20421_v11 = vld [vmem:[#allocation8 + $0x15f4] ss:$24 sps:$4 sm:$0xff]  }
 0x530   :  { %8349 = vmatpush1.bf16.msra.mxu1 %v18035_v20  ;;  %v18180_v20 = vcombine.high %v797_v40, %v809_v47  ;;  %v929_v40 = vld [vmem:[#allocation5 + $0x1a28] sm:$0xff]  ;;  %v20424_v47 = vld [vmem:[#allocation8 + $0x1624] ss:$24 sps:$4 sm:$0xff]  }
 0x531   :  { %16169 = vmatpush1.bf16.msra.mxu0 %v20392_v6  ;;  %8350 = vmatprep.subr.bf16.mxu1 %v18060_v49  ;;  %v20407_v6 = vld [vmem:[#allocation8 + $0x1530] ss:$24 sps:$4 sm:$0xff]  }
 0x532   :  { %16170 = vmatprep.subr.bf16.mxu0 %v20397_v7  ;;  %v821_v49 = vld [vmem:[#allocation5 + $0x16c8] sm:$0xff] }
 0x533   :  { %v833_v7 = vld [vmem:[#allocation5 + $0x1728] sm:$0xff] }
 0x534   :  { %8351 = vmatpush1.bf16.msra.mxu1 %v18059_v23  ;;  %v18204_v23 = vcombine.high %v821_v49, %v833_v7  ;;  %v18203_v14 = vcombine.low %v821_v49, %v833_v7  ;;  %v953_v49 = vld [vmem:[#allocation5 + $0x1ae8] sm:$0xff] }
 0x535   :  { %16171 = vmatpush1.bf16.msra.mxu0 %v20395_v31  ;;  %8352 = vmatprep.subr.bf16.mxu1 %v18084_v17  ;;  %v20410_v31 = vld [vmem:[#allocation8 + $0x1560] ss:$24 sps:$4 sm:$0xff]   ;;  %v845_v17 = vld [vmem:[#allocation5 + $0x1788] sm:$0xff] }
 0x536   :  { %16172 = vmatprep.subr.bf16.mxu0 %v20400_v62  ;;  %v857_v62 = vld [vmem:[#allocation5 + $0x17e8] sm:$0xff] }
 0x537   :  { %v18227_v34 = vcombine.low %v845_v17, %v857_v62  ;;  %v20427_v7 = vld [vmem:[#allocation8 + $0x1654] ss:$24 sps:$4 sm:$0xff]  }
 0x538   :  { %8353 = vmatpush1.bf16.msra.mxu1 %v18083_v63  ;;  %v18228_v63 = vcombine.high %v845_v17, %v857_v62  ;;  %v977_v17 = vld [vmem:[#allocation5 + $0x1ba8] sm:$0xff]  ;;  %v20430_v62 = vld [vmem:[#allocation8 + $0x1684] ss:$24 sps:$4 sm:$0xff]  }
 0x539   :  { %16173 = vmatpush1.bf16.msra.mxu0 %v20398_v57  ;;  %8354 = vmatprep.subr.bf16.mxu1 %v18108_v22  ;;  %v20413_v57 = vld [vmem:[#allocation8 + $0x1590] ss:$24 sps:$4 sm:$0xff]  }
 0x53a   :  { %16174 = vmatprep.subr.bf16.mxu0 %v20403_v41  ;;  %v869_v22 = vld [vmem:[#allocation5 + $0x1848] sm:$0xff] }
 0x53b   :  { %v881_v41 = vld [vmem:[#allocation5 + $0x18a8] sm:$0xff] }
 0x53c   :  { %8355 = vmatpush1.bf16.msra.mxu1 %v18107_v5  ;;  %v18252_v5 = vcombine.high %v869_v22, %v881_v41 }
 0x53d   :  { %16175 = vmatpush1.bf16.msra.mxu0 %v20401_v37  ;;  %8356 = vmatprep.subr.bf16.mxu1 %v18132_v21  ;;  %v20416_v37 = vld [vmem:[#allocation8 + $0x15c0] ss:$24 sps:$4 sm:$0xff]   ;;  %v893_v21 = vld [vmem:[#allocation5 + $0x1908] sm:$0xff] }
 0x53e   :  { %16187 = vmatprep.subr.bf16.mxu0 %v20406_v55  ;;  %v18251_v55 = vcombine.low %v869_v22, %v881_v41  ;;  %v1001_v22 = vld [vmem:[#allocation5 + $0x1c68] sm:$0xff] }
 0x53f   :  { %v20433_v41 = vld [vmem:[#allocation8 + $0x16b4] ss:$24 sps:$4 sm:$0xff]  }
 0x540   :  { %16177 = vmatmul.mubr.bf16.vlgmr.msra.gmra.mrb[16].mxu0 %v22311_v13  ;;  %8357 = vmatpush1.bf16.msra.mxu1 %v18131_v28  ;;  %v18276_v28 = vcombine.high %v893_v21, %v905_v33 }
 0x541   :  { %8358 = vmatprep.subr.bf16.mxu1 %v18156_v29  ;;  %16188 = vmatpush1.bf16.msra.mxu0 %v20404_v35  ;;  %v20419_v29 = vld [vmem:[#allocation8 + $0x15f0] ss:$24 sps:$4 sm:$0xff]  }
 0x542   :  { %16189 = vmatprep.subr.bf16.mxu0 %v20409_v32  ;;  %v917_v35 = vld [vmem:[#allocation5 + $0x19c8] sm:$0xff]  ;;  %v18275_v32 = vcombine.low %v893_v21, %v905_v33  ;;  %v20436_v33 = vld [vmem:[#allocation8 + $0x16e4] ss:$24 sps:$4 sm:$0xff]  }
 0x543   :  { %v1025_v21 = vld [vmem:[#allocation5 + $0x1d28] sm:$0xff] }
 0x544   :  { %8359 = vmatpush1.bf16.msra.mxu1 %v18155_v56  ;;  %v18300_v56 = vcombine.high %v917_v35, %v929_v40 }
 0x545   :  { %8360 = vmatprep.subr.bf16.mxu1 %v18180_v20  ;;  %16190 = vmatpush1.bf16.msra.mxu0 %v20407_v6  ;;  %v20422_v20 = vld [vmem:[#allocation8 + $0x1620] ss:$24 sps:$4 sm:$0xff]   ;;  %v941_v6 = vld [vmem:[#allocation5 + $0x1a88] sm:$0xff] }
 0x546   :  { %16191 = vmatprep.subr.bf16.mxu0 %v20412_v48  ;;  %v18299_v48 = vcombine.low %v917_v35, %v929_v40  ;;  %v1049_v35 = vld [vmem:[#allocation5 + $0x1de8] sm:$0xff] }
 0x547   :  { %v20439_v40 = vld [vmem:[#allocation8 + $0x1714] ss:$24 sps:$4 sm:$0xff]  }
 0x548   :  { %8361 = vmatpush1.bf16.msra.mxu1 %v18179_v8  ;;  %v18324_v8 = vcombine.high %v941_v6, %v953_v49 }
 0x549   :  { %8362 = vmatprep.subr.bf16.mxu1 %v18204_v23  ;;  %16192 = vmatpush1.bf16.msra.mxu0 %v20410_v31  ;;  %v20425_v23 = vld [vmem:[#allocation8 + $0x1650] ss:$24 sps:$4 sm:$0xff]  }
 0x54a   :  { %16193 = vmatprep.subr.bf16.mxu0 %v20415_v12  ;;  %v965_v31 = vld [vmem:[#allocation5 + $0x1b48] sm:$0xff]  ;;  %v18323_v12 = vcombine.low %v941_v6, %v953_v49  ;;  %v20442_v49 = vld [vmem:[#allocation8 + $0x1744] ss:$24 sps:$4 sm:$0xff]  }
 0x54b   :  { %v1073_v6 = vld [vmem:[#allocation5 + $0x1ea8] sm:$0xff] }
 0x54c   :  { %8363 = vmatpush1.bf16.msra.mxu1 %v18203_v14  ;;  %v18348_v14 = vcombine.high %v965_v31, %v977_v17 }
 0x54d   :  { %8364 = vmatprep.subr.bf16.mxu1 %v18228_v63  ;;  %16194 = vmatpush1.bf16.msra.mxu0 %v20413_v57  ;;  %v20428_v63 = vld [vmem:[#allocation8 + $0x1680] ss:$24 sps:$4 sm:$0xff]   ;;  %v989_v57 = vld [vmem:[#allocation5 + $0x1c08] sm:$0xff] }
 0x54e   :  { %16195 = vmatprep.subr.bf16.mxu0 %v20418_v52  ;;  %v18347_v52 = vcombine.low %v965_v31, %v977_v17  ;;  %v1097_v31 = vld [vmem:[#allocation5 + $0x1f68] sm:$0xff] }
 0x54f   :  { %v20445_v17 = vld [vmem:[#allocation8 + $0x1774] ss:$24 sps:$4 sm:$0xff]  }
 0x550   :  { %8365 = vmatpush1.bf16.msra.mxu1 %v18227_v34  ;;  %v18372_v34 = vcombine.high %v989_v57, %v1001_v22 }
 0x551   :  { %8377 = vmatprep.subr.bf16.mxu1 %v18252_v5  ;;  %16196 = vmatpush1.bf16.msra.mxu0 %v20416_v37  ;;  %v20431_v5 = vld [vmem:[#allocation8 + $0x16b0] ss:$24 sps:$4 sm:$0xff]  }
 0x552   :  { %16197 = vmatprep.subr.bf16.mxu0 %v20421_v11  ;;  %v1013_v37 = vld [vmem:[#allocation5 + $0x1cc8] sm:$0xff]  ;;  %v18371_v11 = vcombine.low %v989_v57, %v1001_v22  ;;  %v20448_v22 = vld [vmem:[#allocation8 + $0x17a4] ss:$24 sps:$4 sm:$0xff]  }
 0x553   :  { %8367 = vmatmul.mubr.bf16.vlgmr.msra.gmra.mrb[24].mxu1 %v22129_v30  ;;  %v1121_v57 = vld [vmem:[#allocation5 + $0x2028] sm:$0xff] }
 0x554   :  { %8378 = vmatpush1.bf16.msra.mxu1 %v18251_v55  ;;  %8409 = vmatprep.mubr.bf16.mxu1 %v22131_v39  ;;  %v18396_v55 = vcombine.high %v1013_v37, %v1025_v21 }
 0x555   :  { %8379 = vmatprep.subr.bf16.mxu1 %v18276_v28  ;;  %16198 = vmatpush1.bf16.msra.mxu0 %v20419_v29  ;;  %v20434_v28 = vld [vmem:[#allocation8 + $0x16e0] ss:$24 sps:$4 sm:$0xff]   ;;  %v1037_v29 = vld [vmem:[#allocation5 + $0x1d88] sm:$0xff] }
 0x556   :  { %16199 = vmatprep.subr.bf16.mxu0 %v20424_v47  ;;  %v18395_v47 = vcombine.low %v1013_v37, %v1025_v21  ;;  %v1145_v37 = vld [vmem:[#allocation5 + $0x20e8] sm:$0xff] }
 0x557   :  { %v20451_v21 = vld [vmem:[#allocation8 + $0x17d4] ss:$24 sps:$4 sm:$0xff]  }
 0x558   :  { %8380 = vmatpush1.bf16.msra.mxu1 %v18275_v32  ;;  %v18420_v32 = vcombine.high %v1037_v29, %v1049_v35 }
 0x559   :  { %8381 = vmatprep.subr.bf16.mxu1 %v18300_v56  ;;  %16200 = vmatpush1.bf16.msra.mxu0 %v20422_v20  ;;  %v20437_v56 = vld [vmem:[#allocation8 + $0x1710] ss:$24 sps:$4 sm:$0xff]  }
 0x55a   :  { %16201 = vmatprep.subr.bf16.mxu0 %v20427_v7  ;;  %v1061_v20 = vld [vmem:[#allocation5 + $0x1e48] sm:$0xff]  ;;  %v18419_v7 = vcombine.low %v1037_v29, %v1049_v35  ;;  %v20454_v35 = vld [vmem:[#allocation8 + $0x1804] ss:$24 sps:$4 sm:$0xff]  }
 0x55b   :  { %v1169_v29 = vld [vmem:[#allocation5 + $0x21a8] sm:$0xff] }
 0x55c   :  { %8382 = vmatpush1.bf16.msra.mxu1 %v18299_v48  ;;  %v18444_v48 = vcombine.high %v1061_v20, %v1073_v6 }
 0x55d   :  { %8383 = vmatprep.subr.bf16.mxu1 %v18324_v8  ;;  %16202 = vmatpush1.bf16.msra.mxu0 %v20425_v23  ;;  %v20440_v8 = vld [vmem:[#allocation8 + $0x1740] ss:$24 sps:$4 sm:$0xff]   ;;  %v1085_v23 = vld [vmem:[#allocation5 + $0x1f08] sm:$0xff] }
 0x55e   :  { %16203 = vmatprep.subr.bf16.mxu0 %v20430_v62  ;;  %v18443_v62 = vcombine.low %v1061_v20, %v1073_v6 }
 0x560   :  { %8384 = vmatpush1.bf16.msra.mxu1 %v18323_v12  ;;  %v18468_v12 = vcombine.high %v1085_v23, %v1097_v31 }
 0x561   :  { %8385 = vmatprep.subr.bf16.mxu1 %v18348_v14  ;;  %16204 = vmatpush1.bf16.msra.mxu0 %v20428_v63  ;;  %v20443_v14 = vld [vmem:[#allocation8 + $0x1770] ss:$24 sps:$4 sm:$0xff]  }
 0x562   :  { %16205 = vmatprep.subr.bf16.mxu0 %v20433_v41  ;;  %v1109_v63 = vld [vmem:[#allocation5 + $0x1fc8] sm:$0xff]  ;;  %v18467_v41 = vcombine.low %v1085_v23, %v1097_v31 }
 0x563   :  { %v1229_v23 = vld [vmem:[#allocation5 + $0x2388] sm:$0xff] }
 0x564   :  { %8386 = vmatpush1.bf16.msra.mxu1 %v18347_v52  ;;  %v18492_v52 = vcombine.high %v1109_v63, %v1121_v57  ;;  %v1241_v31 = vld [vmem:[#allocation5 + $0x23e8] sm:$0xff] }
 0x565   :  { %8387 = vmatprep.subr.bf16.mxu1 %v18372_v34  ;;  %16206 = vmatpush1.bf16.msra.mxu0 %v20431_v5  ;;  %v20446_v34 = vld [vmem:[#allocation8 + $0x17a0] ss:$24 sps:$4 sm:$0xff]   ;;  %v1133_v5 = vld [vmem:[#allocation5 + $0x2088] sm:$0xff] }
 0x566   :  { %16207 = vmatprep.subr.bf16.mxu0 %v20436_v33  ;;  %v18491_v33 = vcombine.low %v1109_v63, %v1121_v57  ;;  %v18611_v63 = vcombine.low %v1229_v23, %v1241_v31 }
 0x568   :  { %8388 = vmatpush1.bf16.msra.mxu1 %v18371_v11  ;;  %v18516_v11 = vcombine.high %v1133_v5, %v1145_v37 }
 0x569   :  { %8389 = vmatprep.subr.bf16.mxu1 %v18396_v55  ;;  %16208 = vmatpush1.bf16.msra.mxu0 %v20434_v28  ;;  %v20449_v55 = vld [vmem:[#allocation8 + $0x17d0] ss:$24 sps:$4 sm:$0xff]  }
 0x56a   :  { %16209 = vmatprep.subr.bf16.mxu0 %v20439_v40  ;;  %v1157_v28 = vld [vmem:[#allocation5 + $0x2148] sm:$0xff]  ;;  %v18515_v40 = vcombine.low %v1133_v5, %v1145_v37  ;;  %v151_v5 = vld [vmem:[#allocation5 + $0x1d8] sm:$0xff] }
 0x56b   :  { %v18539_v20 = vcombine.low %v1157_v28, %v1169_v29  ;;  %v163_v37 = vld [vmem:[#allocation5 + $0x238] sm:$0xff] }
 0x56c   :  { %8390 = vmatpush1.bf16.msra.mxu1 %v18395_v47  ;;  %v18540_v47 = vcombine.high %v1157_v28, %v1169_v29  ;;  %v17535_v28 = vcombine.low %v151_v5, %v163_v37 }
 0x56d   :  { %8391 = vmatprep.subr.bf16.mxu1 %v18420_v32  ;;  %16210 = vmatpush1.bf16.msra.mxu0 %v20437_v56  ;;  %v1181_v32 = vld [vmem:[#allocation5 + $0x2208] sm:$0xff] }
 0x56e   :  { %16211 = vmatprep.subr.bf16.mxu0 %v20442_v49  ;;  %v1193_v56 = vld [vmem:[#allocation5 + $0x2268] sm:$0xff] }
 0x56f   :  { %v18564_v6 = vcombine.high %v1181_v32, %v1193_v56  ;;  %v1205_v49 = vld [vmem:[#allocation5 + $0x22c8] sm:$0xff] }
 0x570   :  { %8392 = vmatpush1.bf16.msra.mxu1 %v18419_v7  ;;  %v1217_v7 = vld [vmem:[#allocation5 + $0x2328] sm:$0xff] }
 0x571   :  { %8393 = vmatprep.subr.bf16.mxu1 %v18444_v48  ;;  %16212 = vmatpush1.bf16.msra.mxu0 %v20440_v8  ;;  %v18563_v48 = vcombine.low %v1181_v32, %v1193_v56  ;;  %v18588_v8 = vcombine.high %v1205_v49, %v1217_v7  ;;  %v223_v56 = vld [vmem:[#allocation5 + $0x418] sm:$0xff] }
 0x572   :  { %16213 = vmatprep.subr.bf16.mxu0 %v20445_v17  ;;  %v18587_v17 = vcombine.low %v1205_v49, %v1217_v7  ;;  %v247_v49 = vld [vmem:[#allocation5 + $0x4d8] sm:$0xff] }
 0x573   :  { %v259_v7 = vld [vmem:[#allocation5 + $0x538] sm:$0xff] }
 0x574   :  { %8394 = vmatpush1.bf16.msra.mxu1 %v18443_v62  ;;  %v18612_v62 = vcombine.high %v1229_v23, %v1241_v31  ;;  %v17632_v31 = vcombine.high %v247_v49, %v259_v7 }
 0x575   :  { %8395 = vmatprep.subr.bf16.mxu1 %v18468_v12  ;;  %16214 = vmatpush1.bf16.msra.mxu0 %v20443_v14  ;;  %v103_v12 = vld [vmem:[#allocation5 + $0x58] sm:$0xff] }
 0x576   :  { %16215 = vmatprep.subr.bf16.mxu0 %v20448_v22  ;;  %v115_v14 = vld [vmem:[#allocation5 + $0xb8] sm:$0xff] }
 0x577   :  { %v17488_v57 = vcombine.high %v103_v12, %v115_v14  ;;  %v127_v22 = vld [vmem:[#allocation5 + $0x118] sm:$0xff] }
 0x578   :  { %8396 = vmatpush1.bf16.msra.mxu1 %v18467_v41  ;;  %v139_v41 = vld [vmem:[#allocation5 + $0x178] sm:$0xff] }
 0x579   :  { %8397 = vmatprep.subr.bf16.mxu1 %v18492_v52  ;;  %16216 = vmatpush1.bf16.msra.mxu0 %v20446_v34  ;;  %v17487_v52 = vcombine.low %v103_v12, %v115_v14  ;;  %v17512_v34 = vcombine.high %v127_v22, %v139_v41  ;;  %v283_v12 = vld [vmem:[#allocation5 + $0x5f8] sm:$0xff] }
 0x57a   :  { %16217 = vmatprep.subr.bf16.mxu0 %v20451_v21  ;;  %v17511_v21 = vcombine.low %v127_v22, %v139_v41  ;;  %v17631_v41 = vcombine.low %v247_v49, %v259_v7 }
 0x57c   :  { %8398 = vmatpush1.bf16.msra.mxu1 %v18491_v33  ;;  %v17536_v33 = vcombine.high %v151_v5, %v163_v37 }
 0x57d   :  { %8399 = vmatprep.subr.bf16.mxu1 %v18516_v11  ;;  %16218 = vmatpush1.bf16.msra.mxu0 %v20449_v55  ;;  %v175_v11 = vld [vmem:[#allocation5 + $0x298] sm:$0xff] }
 0x57e   :  { %16230 = vmatprep.subr.bf16.mxu0 %v20454_v35  ;;  %v187_v55 = vld [vmem:[#allocation5 + $0x2f8] sm:$0xff] }
 0x57f   :  { %v17560_v29 = vcombine.high %v175_v11, %v187_v55  ;;  %v199_v35 = vld [vmem:[#allocation5 + $0x358] sm:$0xff] }
 0x580   :  { %8400 = vmatpush1.bf16.msra.mxu1 %v18515_v40  ;;  %v211_v40 = vld [vmem:[#allocation5 + $0x3b8] sm:$0xff] }
 0x581   :  { %8401 = vmatprep.subr.bf16.mxu1 %v18540_v47  ;;  %v17559_v47 = vcombine.low %v175_v11, %v187_v55  ;;  %v17584_v32 = vcombine.high %v199_v35, %v211_v40  ;;  %v307_v11 = vld [vmem:[#allocation5 + $0x6b8] sm:$0xff] }
 0x584   :  { %8402 = vmatpush1.bf16.msra.mxu1 %v18539_v20  ;;  %v235_v20 = vld [vmem:[#allocation5 + $0x478] sm:$0xff] }
 0x585   :  { %8403 = vmatprep.subr.bf16.mxu1 %v18564_v6  ;;  %v17583_v6 = vcombine.low %v199_v35, %v211_v40  ;;  %v17607_v23 = vcombine.low %v223_v56, %v235_v20  ;;  %v319_v40 = vld [vmem:[#allocation5 + $0x718] sm:$0xff] }
 0x588   :  { %8404 = vmatpush1.bf16.msra.mxu1 %v18563_v48  ;;  %v1309_v48 = vrot.slane %v22438_v54, %v22379_v36 }
 0x589   :  { %8405 = vmatprep.subr.bf16.mxu1 %v18588_v8  ;;  %v1313_v8 = vrot.slane %v22438_v54, %v22382_v46  ;;  %v295_v54 = vld [vmem:[#allocation5 + $0x658] sm:$0xff] }
 0x58a   :  { %v17680_v35 = vcombine.high %v295_v54, %v307_v11 }
 0x58c   :  { %8406 = vmatpush1.bf16.msra.mxu1 %v18587_v17 }
 0x58d   :  { %8407 = vmatprep.subr.bf16.mxu1 %v18612_v62  ;;  %v271_v62 = vld [vmem:[#allocation5 + $0x598] sm:$0xff] }
 0x58e   :  { %v17656_v37 = vcombine.high %v271_v62, %v283_v12 }
 0x590   :  { %8408 = vmatpush1.bf16.msra.mxu1 %v18611_v63 }
 0x591   :  { %8549 = vmatprep.subr.bf16.mxu1 %v17488_v57 }
 0x593   :  { %8410 = vmatmul.mubr.bf16.vlgmr.msra.gmra.mrb[24].mxu1 %v22137_v44 }
 0x594   :  { %8550 = vmatpush1.bf16.msra.mxu1 %v17487_v52  ;;  %8581 = vmatprep.mubr.bf16.mxu1 %v22117_v58  ;;  %v17608_v58 = vcombine.high %v223_v56, %v235_v20  ;;  %v343_v20 = vld [vmem:[#allocation5 + $0x7d8] sm:$0xff] }
 0x595   :  { %8551 = vmatprep.subr.bf16.mxu1 %v17512_v34 }
 0x598   :  { %8552 = vmatpush1.bf16.msra.mxu1 %v17511_v21 }
 0x599   :  { %8553 = vmatprep.subr.bf16.mxu1 %v17536_v33 }
 0x59c   :  { %8554 = vmatpush1.bf16.msra.mxu1 %v17535_v28 }
 0x59d   :  { %8555 = vmatprep.subr.bf16.mxu1 %v17560_v29  ;;  %v17655_v29 = vcombine.low %v271_v62, %v283_v12 }
 0x5a0   :  { %8556 = vmatpush1.bf16.msra.mxu1 %v17559_v47  ;;  %v331_v47 = vld [vmem:[#allocation5 + $0x778] sm:$0xff] }
 0x5a1   :  { %8557 = vmatprep.subr.bf16.mxu1 %v17584_v32  ;;  %v17679_v32 = vcombine.low %v295_v54, %v307_v11  ;;  %v17704_v56 = vcombine.high %v319_v40, %v331_v47 }
 0x5a4   :  { %8558 = vmatpush1.bf16.msra.mxu1 %v17583_v6  ;;  %v355_v6 = vld [vmem:[#allocation5 + $0x838] sm:$0xff] }
 0x5a5   :  { %8559 = vmatprep.subr.bf16.mxu1 %v17608_v58  ;;  %v17703_v58 = vcombine.low %v319_v40, %v331_v47  ;;  %v17728_v7 = vcombine.high %v343_v20, %v355_v6  ;;  %v403_v40 = vld [vmem:[#allocation5 + $0x9b8] sm:$0xff] }
 0x5a6   :  { %v8153_v17 = vpop.f32.mrb[20].mxu1 }
 0x5a7   :  { %v19797_v14 = vadd.f32 %v8153_v17, %v1309_v48  ;;  %v8155_v63 = vpop.f32.mrb[21].mxu1 }
 0x5a8   :  { %v19798_v57 = vadd.f32 %v8155_v63, %v1313_v8  ;;  %v8157_v22 = vpop.f32.mrb[22].mxu1  ;;  %8560 = vmatpush1.bf16.msra.mxu1 %v17607_v23  ;;  %v367_v23 = vld [vmem:[#allocation5 + $0x898] sm:$0xff] }
 0x5a9   :  { %v8740_v52 = vmul.f32 0.70710677, %v19797_v14  ;;  %v19799_v34 = vadd.f32 %v8157_v22, %v1309_v48  ;;  %v8159_v5 = vpop.f32.mrb[23].mxu1  ;;  %8561 = vmatprep.subr.bf16.mxu1 %v17632_v31  ;;  %v379_v31 = vld [vmem:[#allocation5 + $0x8f8] sm:$0xff]  ;;  %v8692_v63 = vmul.f32 0.5, %v19797_v14 }
 0x5aa   :  { %v8741_v21 = vmul.f32 0.70710677, %v19798_v57  ;;  %v19800_v33 = vadd.f32 %v8159_v5, %v1313_v8  ;;  %v8693_v5 = vmul.f32 0.5, %v19798_v57  ;;  %v17752_v54 = vcombine.high %v367_v23, %v379_v31  ;;  %v20457_v57 = vld [vmem:[#allocation8 + $0x1834] ss:$24 sps:$4 sm:$0xff]  }
 0x5ab   :  { %21868 = verf.f32 %v8740_v52  ;;  %v8764_v55 = vmul.f32 0.70710677, %v19799_v34  ;;  %v8716_v22 = vmul.f32 0.5, %v19799_v34  ;;  %v17727_v52 = vcombine.low %v343_v20, %v355_v6  ;;  %v20452_v34 = vld [vmem:[#allocation8 + $0x1800] ss:$24 sps:$4 sm:$0xff]  }
 0x5ac   :  { %21870 = verf.f32 %v8741_v21  ;;  %v8765_v28 = vmul.f32 0.70710677, %v19800_v33  ;;  %8562 = vmatpush1.bf16.msra.mxu1 %v17631_v41  ;;  %v427_v20 = vld [vmem:[#allocation5 + $0xa78] sm:$0xff] }
 0x5ad   :  { %21872 = verf.f32 %v8764_v55  ;;  %8563 = vmatprep.subr.bf16.mxu1 %v17656_v37  ;;  %v8717_v37 = vmul.f32 0.5, %v19800_v33  ;;  %v415_v33 = vld [vmem:[#allocation5 + $0xa18] sm:$0xff] }
 0x5ae   :  { %21874 = verf.f32 %v8765_v28 }
 0x5b0   :  { %8564 = vmatpush1.bf16.msra.mxu1 %v17655_v29 }
 0x5b1   :  { %8565 = vmatprep.subr.bf16.mxu1 %v17680_v35  ;;  %v391_v35 = vld [vmem:[#allocation5 + $0x958] sm:$0xff] }
 0x5b2   :  { %v17775_v6 = vcombine.low %v391_v35, %v403_v40 }
 0x5b4   :  { %8566 = vmatpush1.bf16.msra.mxu1 %v17679_v32  ;;  %v17751_v32 = vcombine.low %v367_v23, %v379_v31  ;;  %v17799_v23 = vcombine.low %v415_v33, %v427_v20  ;;  %v20458_v31 = vld [vmem:[#allocation8 + $0x1860] ss:$24 sps:$4 sm:$0xff]  }
 0x5b5   :  { %v21869_v49 = vpop.eup %21868  ;;  %8567 = vmatprep.subr.bf16.mxu1 %v17704_v56  ;;  %v17776_v56 = vcombine.high %v391_v35, %v403_v40  ;;  %v523_v35 = vld [vmem:[#allocation5 + $0xd78] sm:$0xff] }
 0x5b6   :  { %v21871_v48 = vpop.eup %21870  ;;  %v8836_v8 = vadd.f32 1.0, %v21869_v49  ;;  %v17800_v49 = vcombine.high %v415_v33, %v427_v20  ;;  %v547_v33 = vld [vmem:[#allocation5 + $0xe38] sm:$0xff] }
 0x5b7   :  { %v21873_v17 = vpop.eup %21872  ;;  %v8837_v62 = vadd.f32 1.0, %v21871_v48  ;;  %v439_v48 = vld [vmem:[#allocation5 + $0xad8] sm:$0xff] }
 0x5b8   :  { %v21875_v12 = vpop.eup %21874  ;;  %v8860_v41 = vadd.f32 1.0, %v21873_v17  ;;  %8568 = vmatpush1.bf16.msra.mxu1 %v17703_v58  ;;  %v8884_v11 = vmul.f32 %v8836_v8, %v8692_v63  ;;  %v20455_v58 = vld [vmem:[#allocation8 + $0x1830] ss:$24 sps:$4 sm:$0xff]   ;;  %v451_v8 = vld [vmem:[#allocation5 + $0xb38] sm:$0xff] }
 0x5b9   :  { %v8861_v21 = vadd.f32 1.0, %v21875_v12  ;;  %8569 = vmatprep.subr.bf16.mxu1 %v17728_v7  ;;  %v8885_v28 = vmul.f32 %v8837_v62, %v8693_v5  ;;  %v20460_v7 = vld [vmem:[#allocation8 + $0x1864] ss:$24 sps:$4 sm:$0xff]   ;;  %v17824_v17 = vcombine.high %v439_v48, %v451_v8  ;;  %v20463_v62 = vld [vmem:[#allocation8 + $0x1894] ss:$24 sps:$4 sm:$0xff]  }
 0x5ba   :  { %v8908_v55 = vmul.f32 %v8860_v41, %v8716_v22  ;;  %v463_v12 = vld [vmem:[#allocation5 + $0xb98] sm:$0xff]  ;;  %v17823_v22 = vcombine.low %v439_v48, %v451_v8  ;;  %v20461_v41 = vld [vmem:[#allocation8 + $0x1890] ss:$24 sps:$4 sm:$0xff]  }
 0x5bb   :  { %v8909_v29 = vmul.f32 %v8861_v21, %v8717_v37  ;;  %v475_v63 = vld [vmem:[#allocation5 + $0xbf8] sm:$0xff] }
 0x5bc   :  { %v22462_v47 = vpack.c.bf16 %v8908_v55, %v8884_v11  ;;  %8570 = vmatpush1.bf16.msra.mxu1 %v17727_v52  ;;  %v17848_v52 = vcombine.high %v463_v12, %v475_v63  ;;  %v20466_v5 = vld [vmem:[#allocation8 + $0x18c4] ss:$24 sps:$4 sm:$0xff]   ;;  %v20464_v11 = vld [vmem:[#allocation8 + $0x18c0] ss:$24 sps:$4 sm:$0xff]  }
 0x5bd   :  { %8571 = vmatprep.subr.bf16.mxu1 %v17752_v54  ;;  %v22464_v14 = vpack.c.bf16 %v8909_v29, %v8885_v28  ;;  %v487_v37 = vld [vmem:[#allocation5 + $0xc58] sm:$0xff]  ;;  %v17847_v54 = vcombine.low %v463_v12, %v475_v63  ;;  %v20469_v28 = vld [vmem:[#allocation8 + $0x18f4] ss:$24 sps:$4 sm:$0xff]  }
 0x5be   :  { %v499_v21 = vld [vmem:[#allocation5 + $0xcb8] sm:$0xff] }
 0x5bf   :  { %16219 = vmatprep.mubr.bf16.mxu0 %v22464_v14  ;;  %v17872_v55 = vcombine.high %v487_v37, %v499_v21  ;;  %v511_v29 = vld [vmem:[#allocation5 + $0xd18] sm:$0xff]  ;;  %v17871_v40 = vcombine.low %v487_v37, %v499_v21  ;;  %v20479_v37 = vld [vmem:[#allocation8 + $0x19b0] ss:$24 sps:$4 sm:$0xff]  }
 0x5c0   :  { %8572 = vmatpush1.bf16.msra.mxu1 %v17751_v32  ;;  %16220 = vmatmul.mubr.bf16.vlgmr.msra.gmra.mrb[16].mxu0 %v22462_v47  ;;  %v20467_v32 = vld [vmem:[#allocation8 + $0x18f0] ss:$24 sps:$4 sm:$0xff]   ;;  %v17895_v20 = vcombine.low %v511_v29, %v523_v35  ;;  %v571_v48 = vld [vmem:[#allocation5 + $0xef8] sm:$0xff] }
 0x5c1   :  { %16231 = vmatpush1.bf16.msra.mxu0 %v20452_v34  ;;  %16262 = vmatprep.mubr.bf16.mxu0 %v22365_v27  ;;  %v17896_v34 = vcombine.high %v511_v29, %v523_v35  ;;  %v20476_v12 = vld [vmem:[#allocation8 + $0x1980] ss:$24 sps:$4 sm:$0xff]  }
 0x5c2   :  { %8573 = vmatprep.subr.bf16.mxu1 %v17776_v56  ;;  %16232 = vmatprep.subr.bf16.mxu0 %v20457_v57  ;;  %v20472_v56 = vld [vmem:[#allocation8 + $0x1924] ss:$24 sps:$4 sm:$0xff]   ;;  %v20482_v29 = vld [vmem:[#allocation8 + $0x19e0] ss:$24 sps:$4 sm:$0xff]  }
 0x5c3   :  { %v535_v57 = vld [vmem:[#allocation5 + $0xdd8] sm:$0xff] }
 0x5c4   :  { %8574 = vmatpush1.bf16.msra.mxu1 %v17775_v6  ;;  %v20470_v6 = vld [vmem:[#allocation8 + $0x1920] ss:$24 sps:$4 sm:$0xff]   ;;  %v17919_v8 = vcombine.low %v535_v57, %v547_v33 }
 0x5c5   :  { %16233 = vmatpush1.bf16.msra.mxu0 %v20455_v58  ;;  %8575 = vmatprep.subr.bf16.mxu1 %v17800_v49  ;;  %v17920_v58 = vcombine.high %v535_v57, %v547_v33  ;;  %v20475_v49 = vld [vmem:[#allocation8 + $0x1954] ss:$24 sps:$4 sm:$0xff]   ;;  %v20485_v57 = vld [vmem:[#allocation8 + $0x1a10] ss:$24 sps:$4 sm:$0xff]  }
 0x5c6   :  { %16234 = vmatprep.subr.bf16.mxu0 %v20460_v7  ;;  %v559_v7 = vld [vmem:[#allocation5 + $0xe98] sm:$0xff] }
 0x5c8   :  { %8576 = vmatpush1.bf16.msra.mxu1 %v17799_v23  ;;  %v20473_v23 = vld [vmem:[#allocation8 + $0x1950] ss:$24 sps:$4 sm:$0xff]  }
 0x5c9   :  { %16235 = vmatpush1.bf16.msra.mxu0 %v20458_v31  ;;  %8577 = vmatprep.subr.bf16.mxu1 %v17824_v17  ;;  %v17944_v31 = vcombine.high %v559_v7, %v571_v48  ;;  %v583_v17 = vld [vmem:[#allocation5 + $0xf58] sm:$0xff] }
 0x5ca   :  { %16236 = vmatprep.subr.bf16.mxu0 %v20463_v62  ;;  %v595_v62 = vld [vmem:[#allocation5 + $0xfb8] sm:$0xff] }
 0x5cb   :  { %v17968_v63 = vcombine.high %v583_v17, %v595_v62 }
 0x5cc   :  { %8578 = vmatpush1.bf16.msra.mxu1 %v17823_v22  ;;  %v20481_v22 = vld [vmem:[#allocation8 + $0x19b4] ss:$24 sps:$4 sm:$0xff]  }
 0x5cd   :  { %16237 = vmatpush1.bf16.msra.mxu0 %v20461_v41  ;;  %8579 = vmatprep.subr.bf16.mxu1 %v17848_v52  ;;  %v607_v41 = vld [vmem:[#allocation5 + $0x1018] sm:$0xff] }
 0x5ce   :  { %16238 = vmatprep.subr.bf16.mxu0 %v20466_v5  ;;  %v619_v52 = vld [vmem:[#allocation5 + $0x1078] sm:$0xff]  ;;  %v17967_v5 = vcombine.low %v583_v17, %v595_v62  ;;  %v20491_v17 = vld [vmem:[#allocation8 + $0x1a70] ss:$24 sps:$4 sm:$0xff]  }
 0x5cf   :  { %v17992_v21 = vcombine.high %v607_v41, %v619_v52 }
 0x5d0   :  { %8580 = vmatpush1.bf16.msra.mxu1 %v17847_v54  ;;  %v20484_v54 = vld [vmem:[#allocation8 + $0x19e4] ss:$24 sps:$4 sm:$0xff]  }
 0x5d1   :  { %16239 = vmatpush1.bf16.msra.mxu0 %v20464_v11  ;;  %8592 = vmatprep.subr.bf16.mxu1 %v17872_v55  ;;  %v631_v11 = vld [vmem:[#allocation5 + $0x10d8] sm:$0xff] }
 0x5d2   :  { %16240 = vmatprep.subr.bf16.mxu0 %v20469_v28  ;;  %v643_v55 = vld [vmem:[#allocation5 + $0x1138] sm:$0xff]  ;;  %v17991_v28 = vcombine.low %v607_v41, %v619_v52 }
 0x5d3   :  { %8582 = vmatmul.mubr.bf16.vlgmr.msra.gmra.mrb[28].mxu1 %v22121_v15  ;;  %v20478_v15 = vld [vmem:[#allocation8 + $0x1984] ss:$24 sps:$4 sm:$0xff]   ;;  %v18016_v35 = vcombine.high %v631_v11, %v643_v55  ;;  %v20494_v41 = vld [vmem:[#allocation8 + $0x1aa0] ss:$24 sps:$4 sm:$0xff]  }
 0x5d4   :  { %8593 = vmatpush1.bf16.msra.mxu1 %v17871_v40  ;;  %8624 = vmatprep.mubr.bf16.mxu1 %v22123_v25  ;;  %v17943_v25 = vcombine.low %v559_v7, %v571_v48  ;;  %v20487_v40 = vld [vmem:[#allocation8 + $0x1a14] ss:$24 sps:$4 sm:$0xff]   ;;  %v20488_v7 = vld [vmem:[#allocation8 + $0x1a40] ss:$24 sps:$4 sm:$0xff]  }
 0x5d5   :  { %16241 = vmatpush1.bf16.msra.mxu0 %v20467_v32  ;;  %8594 = vmatprep.subr.bf16.mxu1 %v17896_v34  ;;  %v655_v32 = vld [vmem:[#allocation5 + $0x1198] sm:$0xff] }
 0x5d6   :  { %16242 = vmatprep.subr.bf16.mxu0 %v20472_v56  ;;  %v667_v34 = vld [vmem:[#allocation5 + $0x11f8] sm:$0xff]  ;;  %v18015_v56 = vcombine.low %v631_v11, %v643_v55  ;;  %v20497_v11 = vld [vmem:[#allocation8 + $0x1ad0] ss:$24 sps:$4 sm:$0xff]  }
 0x5d7   :  { %v18040_v33 = vcombine.high %v655_v32, %v667_v34 }
 0x5d8   :  { %8595 = vmatpush1.bf16.msra.mxu1 %v17895_v20  ;;  %v20490_v20 = vld [vmem:[#allocation8 + $0x1a44] ss:$24 sps:$4 sm:$0xff]  }
 0x5d9   :  { %16243 = vmatpush1.bf16.msra.mxu0 %v20470_v6  ;;  %8596 = vmatprep.subr.bf16.mxu1 %v17920_v58  ;;  %v679_v6 = vld [vmem:[#allocation5 + $0x1258] sm:$0xff] }
 0x5da   :  { %16244 = vmatprep.subr.bf16.mxu0 %v20475_v49  ;;  %v691_v58 = vld [vmem:[#allocation5 + $0x12b8] sm:$0xff]  ;;  %v18039_v49 = vcombine.low %v655_v32, %v667_v34 }
 0x5db   :  { %v18064_v48 = vcombine.high %v679_v6, %v691_v58  ;;  %v20500_v34 = vld [vmem:[#allocation8 + $0x1b00] ss:$24 sps:$4 sm:$0xff]  }
 0x5dc   :  { %8597 = vmatpush1.bf16.msra.mxu1 %v17919_v8  ;;  %v20493_v8 = vld [vmem:[#allocation8 + $0x1a74] ss:$24 sps:$4 sm:$0xff]  }
 0x5dd   :  { %16245 = vmatpush1.bf16.msra.mxu0 %v20473_v23  ;;  %8598 = vmatprep.subr.bf16.mxu1 %v17944_v31  ;;  %v703_v23 = vld [vmem:[#allocation5 + $0x1318] sm:$0xff] }
 0x5de   :  { %16246 = vmatprep.subr.bf16.mxu0 %v20478_v15  ;;  %v715_v31 = vld [vmem:[#allocation5 + $0x1378] sm:$0xff]  ;;  %v18063_v15 = vcombine.low %v679_v6, %v691_v58  ;;  %v20503_v58 = vld [vmem:[#allocation8 + $0x1b30] ss:$24 sps:$4 sm:$0xff]  }
 0x5df   :  { %v18088_v62 = vcombine.high %v703_v23, %v715_v31 }
 0x5e0   :  { %8599 = vmatpush1.bf16.msra.mxu1 %v17943_v25  ;;  %v20496_v25 = vld [vmem:[#allocation8 + $0x1aa4] ss:$24 sps:$4 sm:$0xff]  }
 0x5e1   :  { %16247 = vmatpush1.bf16.msra.mxu0 %v20476_v12  ;;  %8600 = vmatprep.subr.bf16.mxu1 %v17968_v63  ;;  %v727_v12 = vld [vmem:[#allocation5 + $0x13d8] sm:$0xff] }
 0x5e2   :  { %16248 = vmatprep.subr.bf16.mxu0 %v20481_v22  ;;  %v739_v63 = vld [vmem:[#allocation5 + $0x1438] sm:$0xff]  ;;  %v18087_v22 = vcombine.low %v703_v23, %v715_v31 }
 0x5e3   :  { %v18112_v52 = vcombine.high %v727_v12, %v739_v63  ;;  %v20506_v31 = vld [vmem:[#allocation8 + $0x1b60] ss:$24 sps:$4 sm:$0xff]  }
 0x5e4   :  { %8601 = vmatpush1.bf16.msra.mxu1 %v17967_v5  ;;  %v20499_v5 = vld [vmem:[#allocation8 + $0x1ad4] ss:$24 sps:$4 sm:$0xff]  }
 0x5e5   :  { %16249 = vmatpush1.bf16.msra.mxu0 %v20479_v37  ;;  %8602 = vmatprep.subr.bf16.mxu1 %v17992_v21  ;;  %v751_v37 = vld [vmem:[#allocation5 + $0x1498] sm:$0xff] }
 0x5e6   :  { %16250 = vmatprep.subr.bf16.mxu0 %v20484_v54  ;;  %v763_v21 = vld [vmem:[#allocation5 + $0x14f8] sm:$0xff]  ;;  %v18111_v54 = vcombine.low %v727_v12, %v739_v63  ;;  %v20509_v63 = vld [vmem:[#allocation8 + $0x1b90] ss:$24 sps:$4 sm:$0xff]  }
 0x5e7   :  { %v18136_v55 = vcombine.high %v751_v37, %v763_v21 }
 0x5e8   :  { %8603 = vmatpush1.bf16.msra.mxu1 %v17991_v28  ;;  %v775_v28 = vld [vmem:[#allocation5 + $0x1558] sm:$0xff] }
 0x5e9   :  { %16251 = vmatpush1.bf16.msra.mxu0 %v20482_v29  ;;  %8604 = vmatprep.subr.bf16.mxu1 %v18016_v35  ;;  %v787_v29 = vld [vmem:[#allocation5 + $0x15b8] sm:$0xff] }
 0x5ea   :  { %16252 = vmatprep.subr.bf16.mxu0 %v20487_v40  ;;  %v20502_v35 = vld [vmem:[#allocation8 + $0x1b04] ss:$24 sps:$4 sm:$0xff]   ;;  %v18135_v40 = vcombine.low %v751_v37, %v763_v21  ;;  %v18160_v32 = vcombine.high %v775_v28, %v787_v29  ;;  %v20512_v21 = vld [vmem:[#allocation8 + $0x1bc0] ss:$24 sps:$4 sm:$0xff]  }
 0x5ec   :  { %8605 = vmatpush1.bf16.msra.mxu1 %v18015_v56  ;;  %v799_v56 = vld [vmem:[#allocation5 + $0x1618] sm:$0xff] }
 0x5ed   :  { %16253 = vmatpush1.bf16.msra.mxu0 %v20485_v57  ;;  %8606 = vmatprep.subr.bf16.mxu1 %v18040_v33  ;;  %v811_v57 = vld [vmem:[#allocation5 + $0x1678] sm:$0xff]  ;;  %v20505_v33 = vld [vmem:[#allocation8 + $0x1b34] ss:$24 sps:$4 sm:$0xff]  }
 0x5ee   :  { %16254 = vmatprep.subr.bf16.mxu0 %v20490_v20  ;;  %v18159_v20 = vcombine.low %v775_v28, %v787_v29  ;;  %v18184_v6 = vcombine.high %v799_v56, %v811_v57 }
 0x5f0   :  { %8607 = vmatpush1.bf16.msra.mxu1 %v18039_v49  ;;  %v823_v49 = vld [vmem:[#allocation5 + $0x16d8] sm:$0xff] }
 0x5f1   :  { %16255 = vmatpush1.bf16.msra.mxu0 %v20488_v7  ;;  %8608 = vmatprep.subr.bf16.mxu1 %v18064_v48  ;;  %v835_v7 = vld [vmem:[#allocation5 + $0x1738] sm:$0xff] }
 0x5f2   :  { %16256 = vmatprep.subr.bf16.mxu0 %v20493_v8  ;;  %v20508_v48 = vld [vmem:[#allocation8 + $0x1b64] ss:$24 sps:$4 sm:$0xff]   ;;  %v18183_v8 = vcombine.low %v799_v56, %v811_v57  ;;  %v18208_v23 = vcombine.high %v823_v49, %v835_v7 }
 0x5f4   :  { %8609 = vmatpush1.bf16.msra.mxu1 %v18063_v15  ;;  %v847_v15 = vld [vmem:[#allocation5 + $0x1798] sm:$0xff] }
 0x5f5   :  { %16257 = vmatpush1.bf16.msra.mxu0 %v20491_v17  ;;  %8610 = vmatprep.subr.bf16.mxu1 %v18088_v62  ;;  %v859_v17 = vld [vmem:[#allocation5 + $0x17f8] sm:$0xff]  ;;  %v20511_v62 = vld [vmem:[#allocation8 + $0x1b94] ss:$24 sps:$4 sm:$0xff]  }
 0x5f6   :  { %16258 = vmatprep.subr.bf16.mxu0 %v20496_v25  ;;  %v18207_v25 = vcombine.low %v823_v49, %v835_v7  ;;  %v18232_v12 = vcombine.high %v847_v15, %v859_v17 }
 0x5f8   :  { %8611 = vmatpush1.bf16.msra.mxu1 %v18087_v22  ;;  %v871_v22 = vld [vmem:[#allocation5 + $0x1858] sm:$0xff] }
 0x5f9   :  { %16259 = vmatpush1.bf16.msra.mxu0 %v20494_v41  ;;  %8612 = vmatprep.subr.bf16.mxu1 %v18112_v52  ;;  %v883_v41 = vld [vmem:[#allocation5 + $0x18b8] sm:$0xff] }
 0x5fa   :  { %16260 = vmatprep.subr.bf16.mxu0 %v20499_v5  ;;  %v20514_v52 = vld [vmem:[#allocation8 + $0x1bc4] ss:$24 sps:$4 sm:$0xff]   ;;  %v18231_v5 = vcombine.low %v847_v15, %v859_v17  ;;  %v18256_v37 = vcombine.high %v871_v22, %v883_v41  ;;  %v18255_v28 = vcombine.low %v871_v22, %v883_v41  ;;  %v20533_v15 = vld [vmem:[#allocation8 + $0x1c80] ss:$24 sps:$4 sm:$0xff]   ;;  %v20539_v22 = vld [vmem:[#allocation8 + $0x1cb0] ss:$24 sps:$4 sm:$0xff]  }
 0x5fb   :  { %v991_v17 = vld [vmem:[#allocation5 + $0x1c18] sm:$0xff] }
 0x5fc   :  { %8613 = vmatpush1.bf16.msra.mxu1 %v18111_v54  ;;  %v895_v54 = vld [vmem:[#allocation5 + $0x1918] sm:$0xff] }
 0x5fd   :  { %16261 = vmatpush1.bf16.msra.mxu0 %v20497_v11  ;;  %8614 = vmatprep.subr.bf16.mxu1 %v18136_v55  ;;  %v907_v11 = vld [vmem:[#allocation5 + $0x1978] sm:$0xff]  ;;  %v20517_v55 = vld [vmem:[#allocation8 + $0x1bf4] ss:$24 sps:$4 sm:$0xff]  }
 0x5fe   :  { %16273 = vmatprep.subr.bf16.mxu0 %v20502_v35  ;;  %v18280_v29 = vcombine.high %v895_v54, %v907_v11  ;;  %v20515_v35 = vld [vmem:[#allocation8 + $0x1bf0] ss:$24 sps:$4 sm:$0xff]   ;;  %v18279_v56 = vcombine.low %v895_v54, %v907_v11  ;;  %v1015_v41 = vld [vmem:[#allocation5 + $0x1cd8] sm:$0xff] }
 0x5ff   :  { %v20545_v54 = vld [vmem:[#allocation8 + $0x1ce0] ss:$24 sps:$4 sm:$0xff]  }
 0x600   :  { %16263 = vmatmul.mubr.bf16.vlgmr.msra.gmra.mrb[16].mxu0 %v22363_v53  ;;  %8615 = vmatpush1.bf16.msra.mxu1 %v18135_v40  ;;  %v919_v40 = vld [vmem:[#allocation5 + $0x19d8] sm:$0xff] }
 0x601   :  { %8616 = vmatprep.subr.bf16.mxu1 %v18160_v32  ;;  %16274 = vmatpush1.bf16.msra.mxu0 %v20500_v34  ;;  %v931_v32 = vld [vmem:[#allocation5 + $0x1a38] sm:$0xff] }
 0x602   :  { %16275 = vmatprep.subr.bf16.mxu0 %v20505_v33  ;;  %v20523_v34 = vld [vmem:[#allocation8 + $0x1c24] ss:$24 sps:$4 sm:$0xff]   ;;  %v18304_v57 = vcombine.high %v919_v40, %v931_v32  ;;  %v20521_v33 = vld [vmem:[#allocation8 + $0x1c20] ss:$24 sps:$4 sm:$0xff]   ;;  %v18303_v49 = vcombine.low %v919_v40, %v931_v32  ;;  %v20551_v40 = vld [vmem:[#allocation8 + $0x1d10] ss:$24 sps:$4 sm:$0xff]  }
 0x603   :  { %v1039_v11 = vld [vmem:[#allocation5 + $0x1d98] sm:$0xff] }
 0x604   :  { %8617 = vmatpush1.bf16.msra.mxu1 %v18159_v20  ;;  %v943_v20 = vld [vmem:[#allocation5 + $0x1a98] sm:$0xff] }
 0x605   :  { %8618 = vmatprep.subr.bf16.mxu1 %v18184_v6  ;;  %16276 = vmatpush1.bf16.msra.mxu0 %v20503_v58  ;;  %v955_v6 = vld [vmem:[#allocation5 + $0x1af8] sm:$0xff]  ;;  %v20529_v58 = vld [vmem:[#allocation8 + $0x1c54] ss:$24 sps:$4 sm:$0xff]  }
 0x606   :  { %16277 = vmatprep.subr.bf16.mxu0 %v20508_v48  ;;  %v18328_v7 = vcombine.high %v943_v20, %v955_v6  ;;  %v20527_v48 = vld [vmem:[#allocation8 + $0x1c50] ss:$24 sps:$4 sm:$0xff]   ;;  %v1063_v32 = vld [vmem:[#allocation5 + $0x1e58] sm:$0xff] }
 0x608   :  { %8619 = vmatpush1.bf16.msra.mxu1 %v18183_v8  ;;  %v967_v8 = vld [vmem:[#allocation5 + $0x1b58] sm:$0xff] }
 0x609   :  { %8620 = vmatprep.subr.bf16.mxu1 %v18208_v23  ;;  %16278 = vmatpush1.bf16.msra.mxu0 %v20506_v31  ;;  %v20535_v23 = vld [vmem:[#allocation8 + $0x1c84] ss:$24 sps:$4 sm:$0xff]  }
 0x60a   :  { %16279 = vmatprep.subr.bf16.mxu0 %v20511_v62  ;;  %v1003_v62 = vld [vmem:[#allocation5 + $0x1c78] sm:$0xff] }
 0x60c   :  { %8621 = vmatpush1.bf16.msra.mxu1 %v18207_v25  ;;  %v20541_v25 = vld [vmem:[#allocation8 + $0x1cb4] ss:$24 sps:$4 sm:$0xff]  }
 0x60d   :  { %8622 = vmatprep.subr.bf16.mxu1 %v18232_v12  ;;  %16280 = vmatpush1.bf16.msra.mxu0 %v20509_v63  ;;  %v18376_v63 = vcombine.high %v991_v17, %v1003_v62 }
 0x60e   :  { %16281 = vmatprep.subr.bf16.mxu0 %v20514_v52  ;;  %v1027_v52 = vld [vmem:[#allocation5 + $0x1d38] sm:$0xff] }
 0x610   :  { %8623 = vmatpush1.bf16.msra.mxu1 %v18231_v5  ;;  %v20547_v5 = vld [vmem:[#allocation8 + $0x1ce4] ss:$24 sps:$4 sm:$0xff]  }
 0x611   :  { %8635 = vmatprep.subr.bf16.mxu1 %v18256_v37  ;;  %16282 = vmatpush1.bf16.msra.mxu0 %v20512_v21  ;;  %v18375_v37 = vcombine.low %v991_v17, %v1003_v62  ;;  %v18400_v21 = vcombine.high %v1015_v41, %v1027_v52  ;;  %v20569_v17 = vld [vmem:[#allocation8 + $0x1da0] ss:$24 sps:$4 sm:$0xff]  }
 0x612   :  { %16283 = vmatprep.subr.bf16.mxu0 %v20517_v55  ;;  %v1051_v55 = vld [vmem:[#allocation5 + $0x1df8] sm:$0xff] }
 0x613   :  { %8625 = vmatmul.mubr.bf16.vlgmr.msra.gmra.mrb[28].mxu1 %v22129_v30  ;;  %v979_v30 = vld [vmem:[#allocation5 + $0x1bb8] sm:$0xff] }
 0x614   :  { %8636 = vmatpush1.bf16.msra.mxu1 %v18255_v28  ;;  %8667 = vmatprep.mubr.bf16.mxu1 %v22131_v39  ;;  %v18327_v39 = vcombine.low %v943_v20, %v955_v6  ;;  %v18352_v31 = vcombine.high %v967_v8, %v979_v30  ;;  %v18351_v12 = vcombine.low %v967_v8, %v979_v30  ;;  %v20553_v28 = vld [vmem:[#allocation8 + $0x1d14] ss:$24 sps:$4 sm:$0xff]   ;;  %v20557_v20 = vld [vmem:[#allocation8 + $0x1d40] ss:$24 sps:$4 sm:$0xff]   ;;  %v20563_v8 = vld [vmem:[#allocation8 + $0x1d70] ss:$24 sps:$4 sm:$0xff]  }
 0x615   :  { %8637 = vmatprep.subr.bf16.mxu1 %v18280_v29  ;;  %16284 = vmatpush1.bf16.msra.mxu0 %v20515_v35  ;;  %v18399_v29 = vcombine.low %v1015_v41, %v1027_v52  ;;  %v18424_v35 = vcombine.high %v1039_v11, %v1051_v55  ;;  %v1087_v6 = vld [vmem:[#allocation5 + $0x1f18] sm:$0xff]  ;;  %v20575_v41 = vld [vmem:[#allocation8 + $0x1dd0] ss:$24 sps:$4 sm:$0xff]  }
 0x616   :  { %16285 = vmatprep.subr.bf16.mxu0 %v20523_v34  ;;  %v1075_v34 = vld [vmem:[#allocation5 + $0x1eb8] sm:$0xff] }
 0x617   :  { %v1111_v30 = vld [vmem:[#allocation5 + $0x1fd8] sm:$0xff] }
 0x618   :  { %8638 = vmatpush1.bf16.msra.mxu1 %v18279_v56  ;;  %v20559_v56 = vld [vmem:[#allocation8 + $0x1d44] ss:$24 sps:$4 sm:$0xff]  }
 0x619   :  { %8639 = vmatprep.subr.bf16.mxu1 %v18304_v57  ;;  %16286 = vmatpush1.bf16.msra.mxu0 %v20521_v33  ;;  %v18423_v57 = vcombine.low %v1039_v11, %v1051_v55  ;;  %v18448_v33 = vcombine.high %v1063_v32, %v1075_v34  ;;  %v1135_v62 = vld [vmem:[#allocation5 + $0x2098] sm:$0xff] }
 0x61a   :  { %16287 = vmatprep.subr.bf16.mxu0 %v20529_v58  ;;  %v1099_v58 = vld [vmem:[#allocation5 + $0x1f78] sm:$0xff] }
 0x61b   :  { %v1159_v52 = vld [vmem:[#allocation5 + $0x2158] sm:$0xff] }
 0x61c   :  { %8640 = vmatpush1.bf16.msra.mxu1 %v18303_v49  ;;  %v20565_v49 = vld [vmem:[#allocation8 + $0x1d74] ss:$24 sps:$4 sm:$0xff]   ;;  %v1183_v11 = vld [vmem:[#allocation5 + $0x2218] sm:$0xff] }
 0x61d   :  { %8641 = vmatprep.subr.bf16.mxu1 %v18328_v7  ;;  %16288 = vmatpush1.bf16.msra.mxu0 %v20527_v48  ;;  %v18447_v7 = vcombine.low %v1063_v32, %v1075_v34  ;;  %v18472_v48 = vcombine.high %v1087_v6, %v1099_v58  ;;  %v1195_v55 = vld [vmem:[#allocation5 + $0x2278] sm:$0xff] }
 0x61e   :  { %16289 = vmatprep.subr.bf16.mxu0 %v20535_v23  ;;  %v1123_v23 = vld [vmem:[#allocation5 + $0x2038] sm:$0xff]  ;;  %v18567_v32 = vcombine.low %v1183_v11, %v1195_v55 }
 0x620   :  { %8642 = vmatpush1.bf16.msra.mxu1 %v18327_v39  ;;  %v20571_v39 = vld [vmem:[#allocation8 + $0x1da4] ss:$24 sps:$4 sm:$0xff]  }
 0x621   :  { %8643 = vmatprep.subr.bf16.mxu1 %v18352_v31  ;;  %16290 = vmatpush1.bf16.msra.mxu0 %v20533_v15  ;;  %v18471_v31 = vcombine.low %v1087_v6, %v1099_v58  ;;  %v18496_v15 = vcombine.high %v1111_v30, %v1123_v23  ;;  %v20520_v58 = vld [vmem:[#allocation8 + $0xc] ss:$24 sps:$4 sm:$0xff]  }
 0x622   :  { %16291 = vmatprep.subr.bf16.mxu0 %v20541_v25  ;;  %v1147_v25 = vld [vmem:[#allocation5 + $0x20f8] sm:$0xff] }
 0x624   :  { %8644 = vmatpush1.bf16.msra.mxu1 %v18351_v12  ;;  %v20577_v12 = vld [vmem:[#allocation8 + $0x1dd4] ss:$24 sps:$4 sm:$0xff]  }
 0x625   :  { %8645 = vmatprep.subr.bf16.mxu1 %v18376_v63  ;;  %16292 = vmatpush1.bf16.msra.mxu0 %v20539_v22  ;;  %v18495_v63 = vcombine.low %v1111_v30, %v1123_v23  ;;  %v18520_v22 = vcombine.high %v1135_v62, %v1147_v25  ;;  %v20530_v30 = vld [vmem:[#allocation8 + $0x68] ss:$24 sps:$4 sm:$0xff]   ;;  %v20538_v23 = vld [vmem:[#allocation8 + $0x9c] ss:$24 sps:$4 sm:$0xff]  }
 0x626   :  { %16293 = vmatprep.subr.bf16.mxu0 %v20547_v5  ;;  %v1171_v5 = vld [vmem:[#allocation5 + $0x21b8] sm:$0xff] }
 0x628   :  { %8646 = vmatpush1.bf16.msra.mxu1 %v18375_v37  ;;  %v20583_v37 = vld [vmem:[#allocation8 + $0x1e04] ss:$24 sps:$4 sm:$0xff]  }
 0x629   :  { %8647 = vmatprep.subr.bf16.mxu1 %v18400_v21  ;;  %16294 = vmatpush1.bf16.msra.mxu0 %v20545_v54  ;;  %v18519_v21 = vcombine.low %v1135_v62, %v1147_v25  ;;  %v18544_v54 = vcombine.high %v1159_v52, %v1171_v5  ;;  %v22476_v62 = vld [vmem:[#allocation7 + $0x10] sm:$0xff] }
 0x62a   :  { %16295 = vmatprep.subr.bf16.mxu0 %v20553_v28  ;;  %v18543_v28 = vcombine.low %v1159_v52, %v1171_v5  ;;  %v1329_v25 = vrot.slane %v22476_v62, %v22243_v42 }
 0x62c   :  { %8648 = vmatpush1.bf16.msra.mxu1 %v18399_v29  ;;  %v18568_v29 = vcombine.high %v1183_v11, %v1195_v55 }
 0x62d   :  { %8649 = vmatprep.subr.bf16.mxu1 %v18424_v35  ;;  %16296 = vmatpush1.bf16.msra.mxu0 %v20551_v40  ;;  %v1207_v35 = vld [vmem:[#allocation5 + $0x22d8] sm:$0xff] }
 0x62e   :  { %16297 = vmatprep.subr.bf16.mxu0 %v20559_v56  ;;  %v1219_v40 = vld [vmem:[#allocation5 + $0x2338] sm:$0xff] }
 0x62f   :  { %v18592_v34 = vcombine.high %v1207_v35, %v1219_v40  ;;  %v1231_v56 = vld [vmem:[#allocation5 + $0x2398] sm:$0xff] }
 0x630   :  { %8650 = vmatpush1.bf16.msra.mxu1 %v18423_v57  ;;  %v1243_v57 = vld [vmem:[#allocation5 + $0x23f8] sm:$0xff] }
 0x631   :  { %8651 = vmatprep.subr.bf16.mxu1 %v18448_v33  ;;  %16298 = vmatpush1.bf16.msra.mxu0 %v20557_v20  ;;  %v18591_v33 = vcombine.low %v1207_v35, %v1219_v40  ;;  %v18616_v20 = vcombine.high %v1231_v56, %v1243_v57  ;;  %v18615_v6 = vcombine.low %v1231_v56, %v1243_v57  ;;  %v20568_v56 = vld [vmem:[#allocation8 + $0x18c] ss:$24 sps:$4 sm:$0xff]   ;;  %v20566_v57 = vld [vmem:[#allocation8 + $0x188] ss:$24 sps:$4 sm:$0xff]  }
 0x632   :  { %16299 = vmatprep.subr.bf16.mxu0 %v20565_v49  ;;  %v20518_v49 = vld [vmem:[#allocation8 + $0x8] ss:$24 sps:$4 sm:$0xff]  }
 0x634   :  { %8652 = vmatpush1.bf16.msra.mxu1 %v18447_v7  ;;  %v20526_v7 = vld [vmem:[#allocation8 + $0x3c] ss:$24 sps:$4 sm:$0xff]  }
 0x635   :  { %8653 = vmatprep.subr.bf16.mxu1 %v18472_v48  ;;  %16300 = vmatpush1.bf16.msra.mxu0 %v20563_v8  ;;  %v20524_v48 = vld [vmem:[#allocation8 + $0x38] ss:$24 sps:$4 sm:$0xff]   ;;  %v20532_v8 = vld [vmem:[#allocation8 + $0x6c] ss:$24 sps:$4 sm:$0xff]  }
 0x636   :  { %16301 = vmatprep.subr.bf16.mxu0 %v20571_v39  ;;  %v20536_v39 = vld [vmem:[#allocation8 + $0x98] ss:$24 sps:$4 sm:$0xff]  }
 0x638   :  { %8654 = vmatpush1.bf16.msra.mxu1 %v18471_v31  ;;  %v20544_v31 = vld [vmem:[#allocation8 + $0xcc] ss:$24 sps:$4 sm:$0xff]  }
 0x639   :  { %8655 = vmatprep.subr.bf16.mxu1 %v18496_v15  ;;  %16302 = vmatpush1.bf16.msra.mxu0 %v20569_v17  ;;  %v20542_v15 = vld [vmem:[#allocation8 + $0xc8] ss:$24 sps:$4 sm:$0xff]   ;;  %v20550_v17 = vld [vmem:[#allocation8 + $0xfc] ss:$24 sps:$4 sm:$0xff]  }
 0x63a   :  { %16303 = vmatprep.subr.bf16.mxu0 %v20577_v12  ;;  %v20548_v12 = vld [vmem:[#allocation8 + $0xf8] ss:$24 sps:$4 sm:$0xff]  }
 0x63c   :  { %8656 = vmatpush1.bf16.msra.mxu1 %v18495_v63  ;;  %v20556_v63 = vld [vmem:[#allocation8 + $0x12c] ss:$24 sps:$4 sm:$0xff]  }
 0x63d   :  { %8657 = vmatprep.subr.bf16.mxu1 %v18520_v22  ;;  %16304 = vmatpush1.bf16.msra.mxu0 %v20575_v41 }
 0x63e   :  { %16316 = vmatprep.subr.bf16.mxu0 %v20583_v37 }
 0x640   :  { %8658 = vmatpush1.bf16.msra.mxu1 %v18519_v21  ;;  %v20554_v21 = vld [vmem:[#allocation8 + $0x128] ss:$24 sps:$4 sm:$0xff]  }
 0x641   :  { %8659 = vmatprep.subr.bf16.mxu1 %v18544_v54 }
 0x644   :  { %8660 = vmatpush1.bf16.msra.mxu1 %v18543_v28  ;;  %v20562_v28 = vld [vmem:[#allocation8 + $0x15c] ss:$24 sps:$4 sm:$0xff]  }
 0x645   :  { %8661 = vmatprep.subr.bf16.mxu1 %v18568_v29 }
 0x648   :  { %8662 = vmatpush1.bf16.msra.mxu1 %v18567_v32 }
 0x649   :  { %8663 = vmatprep.subr.bf16.mxu1 %v18592_v34  ;;  %v20560_v34 = vld [vmem:[#allocation8 + $0x158] ss:$24 sps:$4 sm:$0xff]  }
 0x64c   :  { %8664 = vmatpush1.bf16.msra.mxu1 %v18591_v33  ;;  %v20574_v33 = vld [vmem:[#allocation8 + $0x1bc] ss:$24 sps:$4 sm:$0xff]  }
 0x64d   :  { %8665 = vmatprep.subr.bf16.mxu1 %v18616_v20  ;;  %v20572_v20 = vld [vmem:[#allocation8 + $0x1b8] ss:$24 sps:$4 sm:$0xff]  }
 0x650   :  { %8666 = vmatpush1.bf16.msra.mxu1 %v18615_v6 }
 0x651   :  { %16402 = vmatprep.subr.bf16.mxu1 %v20520_v58  ;;  %v20580_v58 = vld [vmem:[#allocation8 + $0x1ec] ss:$24 sps:$4 sm:$0xff]  }
 0x653   :  { %8668 = vmatmul.mubr.bf16.vlgmr.msra.gmra.mrb[28].mxu1 %v22137_v44  ;;  %v1325_v44 = vrot.slane %v22476_v62, %v22240_v38 }
 0x654   :  { %16403 = vmatpush1.bf16.msra.mxu1 %v20518_v49  ;;  %16434 = vmatprep.mubr.bf16.mxu1 %v22221_v10 }
 0x655   :  { %16404 = vmatprep.subr.bf16.mxu1 %v20526_v7 }
 0x658   :  { %16405 = vmatpush1.bf16.msra.mxu1 %v20524_v48 }
 0x659   :  { %16406 = vmatprep.subr.bf16.mxu1 %v20532_v8 }
 0x65c   :  { %16407 = vmatpush1.bf16.msra.mxu1 %v20530_v30 }
 0x65d   :  { %16408 = vmatprep.subr.bf16.mxu1 %v20538_v23 }
 0x660   :  { %16409 = vmatpush1.bf16.msra.mxu1 %v20536_v39 }
 0x661   :  { %16410 = vmatprep.subr.bf16.mxu1 %v20544_v31 }
 0x664   :  { %16411 = vmatpush1.bf16.msra.mxu1 %v20542_v15  ;;  %v20578_v15 = vld [vmem:[#allocation8 + $0x1e8] ss:$24 sps:$4 sm:$0xff]  }
 0x665   :  { %16412 = vmatprep.subr.bf16.mxu1 %v20550_v17 }
 0x666   :  { %v8411_v22 = vpop.f32.mrb[24].mxu1 }
 0x667   :  { %v19805_v41 = vadd.f32 %v8411_v22, %v1325_v44  ;;  %v8413_v52 = vpop.f32.mrb[25].mxu1 }
 0x668   :  { %v19806_v5 = vadd.f32 %v8413_v52, %v1329_v25  ;;  %v8415_v37 = vpop.f32.mrb[26].mxu1  ;;  %16413 = vmatpush1.bf16.msra.mxu1 %v20548_v12  ;;  %v20586_v12 = vld [vmem:[#allocation8 + $0x21c] ss:$24 sps:$4 sm:$0xff]  }
 0x669   :  { %v8744_v54 = vmul.f32 0.70710677, %v19805_v41  ;;  %v19807_v11 = vadd.f32 %v8415_v37, %v1325_v44  ;;  %v8417_v55 = vpop.f32.mrb[27].mxu1  ;;  %16414 = vmatprep.subr.bf16.mxu1 %v20556_v63  ;;  %v8696_v23 = vmul.f32 0.5, %v19805_v41  ;;  %v20581_v41 = vld [vmem:[#allocation8 + $0x1e00] ss:$24 sps:$4 sm:$0xff]  }
 0x66a   :  { %v8745_v29 = vmul.f32 0.70710677, %v19806_v5  ;;  %v19808_v35 = vadd.f32 %v8417_v55, %v1329_v25  ;;  %v8697_v17 = vmul.f32 0.5, %v19806_v5  ;;  %v20590_v5 = vld [vmem:[#allocation8 + $0x248] ss:$24 sps:$4 sm:$0xff]  }
 0x66b   :  { %21876 = verf.f32 %v8744_v54  ;;  %v8768_v40 = vmul.f32 0.70710677, %v19807_v11  ;;  %v8720_v39 = vmul.f32 0.5, %v19807_v11  ;;  %v20584_v54 = vld [vmem:[#allocation8 + $0x218] ss:$24 sps:$4 sm:$0xff]  }
 0x66c   :  { %21878 = verf.f32 %v8745_v29  ;;  %v8769_v32 = vmul.f32 0.70710677, %v19808_v35  ;;  %16415 = vmatpush1.bf16.msra.mxu1 %v20554_v21  ;;  %v8721_v44 = vmul.f32 0.5, %v19808_v35  ;;  %v20589_v11 = vld [vmem:[#allocation8 + $0x1e34] ss:$24 sps:$4 sm:$0xff]  }
 0x66d   :  { %21880 = verf.f32 %v8768_v40  ;;  %16416 = vmatprep.subr.bf16.mxu1 %v20562_v28  ;;  %v20592_v28 = vld [vmem:[#allocation8 + $0x24c] ss:$24 sps:$4 sm:$0xff]   ;;  %v20587_v29 = vld [vmem:[#allocation8 + $0x1e30] ss:$24 sps:$4 sm:$0xff]   ;;  %v20598_v35 = vld [vmem:[#allocation8 + $0x27c] ss:$24 sps:$4 sm:$0xff]  }
 0x66e   :  { %21882 = verf.f32 %v8769_v32  ;;  %v20595_v40 = vld [vmem:[#allocation8 + $0x1e64] ss:$24 sps:$4 sm:$0xff]   ;;  %v20596_v32 = vld [vmem:[#allocation8 + $0x278] ss:$24 sps:$4 sm:$0xff]  }
 0x670   :  { %16417 = vmatpush1.bf16.msra.mxu1 %v20560_v34  ;;  %v20593_v34 = vld [vmem:[#allocation8 + $0x1e60] ss:$24 sps:$4 sm:$0xff]  }
 0x671   :  { %16418 = vmatprep.subr.bf16.mxu1 %v20568_v56  ;;  %v20604_v56 = vld [vmem:[#allocation8 + $0x2ac] ss:$24 sps:$4 sm:$0xff]  }
 0x674   :  { %16419 = vmatpush1.bf16.msra.mxu1 %v20566_v57  ;;  %v20601_v57 = vld [vmem:[#allocation8 + $0x1e94] ss:$24 sps:$4 sm:$0xff]  }
 0x675   :  { %v21877_v6 = vpop.eup %21876  ;;  %16420 = vmatprep.subr.bf16.mxu1 %v20574_v33  ;;  %v20602_v33 = vld [vmem:[#allocation8 + $0x2a8] ss:$24 sps:$4 sm:$0xff]  }
 0x676   :  { %v21879_v49 = vpop.eup %21878  ;;  %v8840_v7 = vadd.f32 1.0, %v21877_v6  ;;  %v20610_v6 = vld [vmem:[#allocation8 + $0x2dc] ss:$24 sps:$4 sm:$0xff]  }
 0x677   :  { %v21881_v48 = vpop.eup %21880  ;;  %v8841_v8 = vadd.f32 1.0, %v21879_v49  ;;  %v20608_v49 = vld [vmem:[#allocation8 + $0x2d8] ss:$24 sps:$4 sm:$0xff]  }
 0x678   :  { %v21883_v30 = vpop.eup %21882  ;;  %v8864_v31 = vadd.f32 1.0, %v21881_v48  ;;  %16421 = vmatpush1.bf16.msra.mxu1 %v20572_v20  ;;  %v8888_v63 = vmul.f32 %v8840_v7, %v8696_v23  ;;  %v20599_v20 = vld [vmem:[#allocation8 + $0x1e90] ss:$24 sps:$4 sm:$0xff]   ;;  %v20605_v7 = vld [vmem:[#allocation8 + $0x1ec0] ss:$24 sps:$4 sm:$0xff]  }
 0x679   :  { %v8865_v25 = vadd.f32 1.0, %v21883_v30  ;;  %16422 = vmatprep.subr.bf16.mxu1 %v20580_v58  ;;  %v8889_v52 = vmul.f32 %v8841_v8, %v8697_v17  ;;  %v20607_v58 = vld [vmem:[#allocation8 + $0x1ec4] ss:$24 sps:$4 sm:$0xff]   ;;  %v20613_v8 = vld [vmem:[#allocation8 + $0x1ef4] ss:$24 sps:$4 sm:$0xff]  }
 0x67a   :  { %v8912_v22 = vmul.f32 %v8864_v31, %v8720_v39  ;;  %v20616_v48 = vld [vmem:[#allocation8 + $0x30c] ss:$24 sps:$4 sm:$0xff]   ;;  %v20614_v30 = vld [vmem:[#allocation8 + $0x308] ss:$24 sps:$4 sm:$0xff]   ;;  %v20622_v39 = vld [vmem:[#allocation8 + $0x33c] ss:$24 sps:$4 sm:$0xff]  }
 0x67b   :  { %v8913_v37 = vmul.f32 %v8865_v25, %v8721_v44  ;;  %v20611_v23 = vld [vmem:[#allocation8 + $0x1ef0] ss:$24 sps:$4 sm:$0xff]   ;;  %v20619_v31 = vld [vmem:[#allocation8 + $0x1f24] ss:$24 sps:$4 sm:$0xff]   ;;  %v20617_v17 = vld [vmem:[#allocation8 + $0x1f20] ss:$24 sps:$4 sm:$0xff]  }
 0x67c   :  { %v22482_v21 = vpack.c.bf16 %v8912_v22, %v8888_v63  ;;  %16423 = vmatpush1.bf16.msra.mxu1 %v20578_v15  ;;  %v20620_v15 = vld [vmem:[#allocation8 + $0x338] ss:$24 sps:$4 sm:$0xff]   ;;  %v20628_v44 = vld [vmem:[#allocation8 + $0x36c] ss:$24 sps:$4 sm:$0xff]   ;;  %v20634_v22 = vld [vmem:[#allocation8 + $0x39c] ss:$24 sps:$4 sm:$0xff]  }
 0x67d   :  { %v22484_v55 = vpack.c.bf16 %v8913_v37, %v8889_v52  ;;  %16424 = vmatprep.subr.bf16.mxu1 %v20586_v12  ;;  %v20625_v25 = vld [vmem:[#allocation8 + $0x1f54] ss:$24 sps:$4 sm:$0xff]   ;;  %v20626_v12 = vld [vmem:[#allocation8 + $0x368] ss:$24 sps:$4 sm:$0xff]   ;;  %v20631_v52 = vld [vmem:[#allocation8 + $0x1f84] ss:$24 sps:$4 sm:$0xff]  }
 0x67e   :  { %v20623_v63 = vld [vmem:[#allocation8 + $0x1f50] ss:$24 sps:$4 sm:$0xff]  }
 0x67f   :  { %16305 = vmatprep.mubr.bf16.mxu0 %v22484_v55  ;;  %v20632_v37 = vld [vmem:[#allocation8 + $0x398] ss:$24 sps:$4 sm:$0xff]  }
 0x680   :  { %16306 = vmatmul.mubr.bf16.vlgmr.msra.gmra.mrb[16].mxu0 %v22482_v21  ;;  %16425 = vmatpush1.bf16.msra.mxu1 %v20584_v54  ;;  %v20629_v54 = vld [vmem:[#allocation8 + $0x1f80] ss:$24 sps:$4 sm:$0xff]  }
 0x681   :  { %16317 = vmatpush1.bf16.msra.mxu0 %v20581_v41  ;;  %16348 = vmatprep.mubr.bf16.mxu0 %v22427_v60  ;;  %v20640_v41 = vld [vmem:[#allocation8 + $0x3cc] ss:$24 sps:$4 sm:$0xff]  }
 0x682   :  { %16318 = vmatprep.subr.bf16.mxu0 %v20589_v11  ;;  %16426 = vmatprep.subr.bf16.mxu1 %v20592_v28  ;;  %v20637_v11 = vld [vmem:[#allocation8 + $0x1fb4] ss:$24 sps:$4 sm:$0xff]   ;;  %v20638_v28 = vld [vmem:[#allocation8 + $0x3c8] ss:$24 sps:$4 sm:$0xff]  }
 0x684   :  { %16427 = vmatpush1.bf16.msra.mxu1 %v20590_v5  ;;  %v20635_v5 = vld [vmem:[#allocation8 + $0x1fb0] ss:$24 sps:$4 sm:$0xff]  }
 0x685   :  { %16319 = vmatpush1.bf16.msra.mxu0 %v20587_v29  ;;  %16428 = vmatprep.subr.bf16.mxu1 %v20598_v35  ;;  %v20646_v29 = vld [vmem:[#allocation8 + $0x3fc] ss:$24 sps:$4 sm:$0xff]  }
 0x686   :  { %16320 = vmatprep.subr.bf16.mxu0 %v20595_v40  ;;  %v20643_v35 = vld [vmem:[#allocation8 + $0x1fe4] ss:$24 sps:$4 sm:$0xff]   ;;  %v20644_v40 = vld [vmem:[#allocation8 + $0x3f8] ss:$24 sps:$4 sm:$0xff]  }
 0x688   :  { %16429 = vmatpush1.bf16.msra.mxu1 %v20596_v32  ;;  %v20641_v32 = vld [vmem:[#allocation8 + $0x1fe0] ss:$24 sps:$4 sm:$0xff]  }
 0x689   :  { %16321 = vmatpush1.bf16.msra.mxu0 %v20593_v34  ;;  %16430 = vmatprep.subr.bf16.mxu1 %v20604_v56  ;;  %v20652_v34 = vld [vmem:[#allocation8 + $0x42c] ss:$24 sps:$4 sm:$0xff]  }
 0x68a   :  { %16322 = vmatprep.subr.bf16.mxu0 %v20601_v57  ;;  %v20649_v56 = vld [vmem:[#allocation8 + $0x2014] ss:$24 sps:$4 sm:$0xff]   ;;  %v20650_v57 = vld [vmem:[#allocation8 + $0x428] ss:$24 sps:$4 sm:$0xff]  }
 0x68c   :  { %16431 = vmatpush1.bf16.msra.mxu1 %v20602_v33  ;;  %v20647_v33 = vld [vmem:[#allocation8 + $0x2010] ss:$24 sps:$4 sm:$0xff]  }
 0x68d   :  { %16323 = vmatpush1.bf16.msra.mxu0 %v20599_v20  ;;  %16432 = vmatprep.subr.bf16.mxu1 %v20610_v6  ;;  %v20658_v20 = vld [vmem:[#allocation8 + $0x45c] ss:$24 sps:$4 sm:$0xff]  }
 0x68e   :  { %16324 = vmatprep.subr.bf16.mxu0 %v20607_v58  ;;  %v20655_v6 = vld [vmem:[#allocation8 + $0x2044] ss:$24 sps:$4 sm:$0xff]   ;;  %v20656_v58 = vld [vmem:[#allocation8 + $0x458] ss:$24 sps:$4 sm:$0xff]  }
 0x690   :  { %16433 = vmatpush1.bf16.msra.mxu1 %v20608_v49  ;;  %v20653_v49 = vld [vmem:[#allocation8 + $0x2040] ss:$24 sps:$4 sm:$0xff]  }
 0x691   :  { %16325 = vmatpush1.bf16.msra.mxu0 %v20605_v7  ;;  %16445 = vmatprep.subr.bf16.mxu1 %v20616_v48  ;;  %v20664_v7 = vld [vmem:[#allocation8 + $0x48c] ss:$24 sps:$4 sm:$0xff]  }
 0x692   :  { %16326 = vmatprep.subr.bf16.mxu0 %v20613_v8  ;;  %v20661_v48 = vld [vmem:[#allocation8 + $0x2074] ss:$24 sps:$4 sm:$0xff]   ;;  %v20662_v8 = vld [vmem:[#allocation8 + $0x488] ss:$24 sps:$4 sm:$0xff]  }
 0x693   :  { %16435 = vmatmul.mubr.bf16.vlgmr.msra.gmra.mrb[32].mxu1 %v22217_v2 }
 0x694   :  { %16446 = vmatpush1.bf16.msra.mxu1 %v20614_v30  ;;  %16477 = vmatprep.mubr.bf16.mxu1 %v22309_v19  ;;  %v20659_v30 = vld [vmem:[#allocation8 + $0x2070] ss:$24 sps:$4 sm:$0xff]  }
 0x695   :  { %16327 = vmatpush1.bf16.msra.mxu0 %v20611_v23  ;;  %16447 = vmatprep.subr.bf16.mxu1 %v20622_v39  ;;  %v20670_v23 = vld [vmem:[#allocation8 + $0x4bc] ss:$24 sps:$4 sm:$0xff]  }
 0x696   :  { %16328 = vmatprep.subr.bf16.mxu0 %v20619_v31  ;;  %v20667_v39 = vld [vmem:[#allocation8 + $0x20a4] ss:$24 sps:$4 sm:$0xff]   ;;  %v20668_v31 = vld [vmem:[#allocation8 + $0x4b8] ss:$24 sps:$4 sm:$0xff]  }
 0x698   :  { %16448 = vmatpush1.bf16.msra.mxu1 %v20620_v15  ;;  %v20665_v15 = vld [vmem:[#allocation8 + $0x20a0] ss:$24 sps:$4 sm:$0xff]  }
 0x699   :  { %16329 = vmatpush1.bf16.msra.mxu0 %v20617_v17  ;;  %16449 = vmatprep.subr.bf16.mxu1 %v20628_v44  ;;  %v20676_v17 = vld [vmem:[#allocation8 + $0x4ec] ss:$24 sps:$4 sm:$0xff]  }
 0x69a   :  { %16330 = vmatprep.subr.bf16.mxu0 %v20625_v25  ;;  %v20673_v44 = vld [vmem:[#allocation8 + $0x20d4] ss:$24 sps:$4 sm:$0xff]   ;;  %v20674_v25 = vld [vmem:[#allocation8 + $0x4e8] ss:$24 sps:$4 sm:$0xff]  }
 0x69c   :  { %16450 = vmatpush1.bf16.msra.mxu1 %v20626_v12  ;;  %v20671_v12 = vld [vmem:[#allocation8 + $0x20d0] ss:$24 sps:$4 sm:$0xff]  }
 0x69d   :  { %16331 = vmatpush1.bf16.msra.mxu0 %v20623_v63  ;;  %16451 = vmatprep.subr.bf16.mxu1 %v20634_v22  ;;  %v20679_v63 = vld [vmem:[#allocation8 + $0x51c] ss:$24 sps:$4 sm:$0xff]  }
 0x69e   :  { %16332 = vmatprep.subr.bf16.mxu0 %v20631_v52  ;;  %v20727_v22 = vld [vmem:[#allocation8 + $0x2104] ss:$24 sps:$4 sm:$0xff]   ;;  %v20677_v52 = vld [vmem:[#allocation8 + $0x518] ss:$24 sps:$4 sm:$0xff]  }
 0x6a0   :  { %16452 = vmatpush1.bf16.msra.mxu1 %v20632_v37  ;;  %v20682_v37 = vld [vmem:[#allocation8 + $0x54c] ss:$24 sps:$4 sm:$0xff]  }
 0x6a1   :  { %16333 = vmatpush1.bf16.msra.mxu0 %v20629_v54  ;;  %16453 = vmatprep.subr.bf16.mxu1 %v20640_v41  ;;  %v20725_v54 = vld [vmem:[#allocation8 + $0x2100] ss:$24 sps:$4 sm:$0xff]   ;;  %v20733_v41 = vld [vmem:[#allocation8 + $0x2134] ss:$24 sps:$4 sm:$0xff]  }
 0x6a2   :  { %16334 = vmatprep.subr.bf16.mxu0 %v20637_v11  ;;  %v20680_v11 = vld [vmem:[#allocation8 + $0x548] ss:$24 sps:$4 sm:$0xff]  }
 0x6a4   :  { %16454 = vmatpush1.bf16.msra.mxu1 %v20638_v28  ;;  %v20685_v28 = vld [vmem:[#allocation8 + $0x57c] ss:$24 sps:$4 sm:$0xff]  }
 0x6a5   :  { %16335 = vmatpush1.bf16.msra.mxu0 %v20635_v5  ;;  %16455 = vmatprep.subr.bf16.mxu1 %v20646_v29  ;;  %v20731_v5 = vld [vmem:[#allocation8 + $0x2130] ss:$24 sps:$4 sm:$0xff]   ;;  %v20739_v29 = vld [vmem:[#allocation8 + $0x2164] ss:$24 sps:$4 sm:$0xff]  }
 0x6a6   :  { %16336 = vmatprep.subr.bf16.mxu0 %v20643_v35  ;;  %v20683_v35 = vld [vmem:[#allocation8 + $0x578] ss:$24 sps:$4 sm:$0xff]  }
 0x6a8   :  { %16456 = vmatpush1.bf16.msra.mxu1 %v20644_v40  ;;  %v20688_v40 = vld [vmem:[#allocation8 + $0x5ac] ss:$24 sps:$4 sm:$0xff]  }
 0x6a9   :  { %16337 = vmatpush1.bf16.msra.mxu0 %v20641_v32  ;;  %16457 = vmatprep.subr.bf16.mxu1 %v20652_v34  ;;  %v20737_v32 = vld [vmem:[#allocation8 + $0x2160] ss:$24 sps:$4 sm:$0xff]   ;;  %v20745_v34 = vld [vmem:[#allocation8 + $0x2194] ss:$24 sps:$4 sm:$0xff]  }
 0x6aa   :  { %16338 = vmatprep.subr.bf16.mxu0 %v20649_v56  ;;  %v20686_v56 = vld [vmem:[#allocation8 + $0x5a8] ss:$24 sps:$4 sm:$0xff]  }
 0x6ac   :  { %16458 = vmatpush1.bf16.msra.mxu1 %v20650_v57  ;;  %v20691_v57 = vld [vmem:[#allocation8 + $0x5dc] ss:$24 sps:$4 sm:$0xff]  }
 0x6ad   :  { %16339 = vmatpush1.bf16.msra.mxu0 %v20647_v33  ;;  %16459 = vmatprep.subr.bf16.mxu1 %v20658_v20  ;;  %v20743_v33 = vld [vmem:[#allocation8 + $0x2190] ss:$24 sps:$4 sm:$0xff]   ;;  %v20751_v20 = vld [vmem:[#allocation8 + $0x21c4] ss:$24 sps:$4 sm:$0xff]  }
 0x6ae   :  { %16340 = vmatprep.subr.bf16.mxu0 %v20655_v6  ;;  %v20689_v6 = vld [vmem:[#allocation8 + $0x5d8] ss:$24 sps:$4 sm:$0xff]  }
 0x6b0   :  { %16460 = vmatpush1.bf16.msra.mxu1 %v20656_v58  ;;  %v20694_v58 = vld [vmem:[#allocation8 + $0x60c] ss:$24 sps:$4 sm:$0xff]  }
 0x6b1   :  { %16341 = vmatpush1.bf16.msra.mxu0 %v20653_v49  ;;  %16461 = vmatprep.subr.bf16.mxu1 %v20664_v7  ;;  %v20749_v49 = vld [vmem:[#allocation8 + $0x21c0] ss:$24 sps:$4 sm:$0xff]   ;;  %v20757_v7 = vld [vmem:[#allocation8 + $0x21f4] ss:$24 sps:$4 sm:$0xff]  }
 0x6b2   :  { %16342 = vmatprep.subr.bf16.mxu0 %v20661_v48  ;;  %v20692_v48 = vld [vmem:[#allocation8 + $0x608] ss:$24 sps:$4 sm:$0xff]  }
 0x6b4   :  { %16462 = vmatpush1.bf16.msra.mxu1 %v20662_v8  ;;  %v20697_v8 = vld [vmem:[#allocation8 + $0x63c] ss:$24 sps:$4 sm:$0xff]  }
 0x6b5   :  { %16343 = vmatpush1.bf16.msra.mxu0 %v20659_v30  ;;  %16463 = vmatprep.subr.bf16.mxu1 %v20670_v23  ;;  %v20755_v30 = vld [vmem:[#allocation8 + $0x21f0] ss:$24 sps:$4 sm:$0xff]   ;;  %v20763_v23 = vld [vmem:[#allocation8 + $0x2224] ss:$24 sps:$4 sm:$0xff]  }
 0x6b6   :  { %16344 = vmatprep.subr.bf16.mxu0 %v20667_v39  ;;  %v20695_v39 = vld [vmem:[#allocation8 + $0x638] ss:$24 sps:$4 sm:$0xff]  }
 0x6b8   :  { %16464 = vmatpush1.bf16.msra.mxu1 %v20668_v31  ;;  %v20700_v31 = vld [vmem:[#allocation8 + $0x66c] ss:$24 sps:$4 sm:$0xff]  }
 0x6b9   :  { %16345 = vmatpush1.bf16.msra.mxu0 %v20665_v15  ;;  %16465 = vmatprep.subr.bf16.mxu1 %v20676_v17  ;;  %v20761_v15 = vld [vmem:[#allocation8 + $0x2220] ss:$24 sps:$4 sm:$0xff]   ;;  %v20769_v17 = vld [vmem:[#allocation8 + $0x2254] ss:$24 sps:$4 sm:$0xff]  }
 0x6ba   :  { %16346 = vmatprep.subr.bf16.mxu0 %v20673_v44  ;;  %v20698_v44 = vld [vmem:[#allocation8 + $0x668] ss:$24 sps:$4 sm:$0xff]  }
 0x6bc   :  { %16466 = vmatpush1.bf16.msra.mxu1 %v20674_v25  ;;  %v20703_v25 = vld [vmem:[#allocation8 + $0x69c] ss:$24 sps:$4 sm:$0xff]  }
 0x6bd   :  { %16347 = vmatpush1.bf16.msra.mxu0 %v20671_v12  ;;  %16467 = vmatprep.subr.bf16.mxu1 %v20679_v63  ;;  %v20767_v12 = vld [vmem:[#allocation8 + $0x2250] ss:$24 sps:$4 sm:$0xff]   ;;  %v20775_v63 = vld [vmem:[#allocation8 + $0x2284] ss:$24 sps:$4 sm:$0xff]  }
 0x6be   :  { %16359 = vmatprep.subr.bf16.mxu0 %v20727_v22  ;;  %v20701_v22 = vld [vmem:[#allocation8 + $0x698] ss:$24 sps:$4 sm:$0xff]  }
 0x6c0   :  { %16349 = vmatmul.mubr.bf16.vlgmr.msra.gmra.mrb[16].mxu0 %v22425_v9  ;;  %16468 = vmatpush1.bf16.msra.mxu1 %v20677_v52  ;;  %v20706_v52 = vld [vmem:[#allocation8 + $0x6cc] ss:$24 sps:$4 sm:$0xff]  }
 0x6c1   :  { %16469 = vmatprep.subr.bf16.mxu1 %v20682_v37  ;;  %16360 = vmatpush1.bf16.msra.mxu0 %v20725_v54  ;;  %v20773_v37 = vld [vmem:[#allocation8 + $0x2280] ss:$24 sps:$4 sm:$0xff]   ;;  %v20781_v54 = vld [vmem:[#allocation8 + $0x22b4] ss:$24 sps:$4 sm:$0xff]  }
 0x6c2   :  { %16361 = vmatprep.subr.bf16.mxu0 %v20733_v41  ;;  %v20704_v41 = vld [vmem:[#allocation8 + $0x6c8] ss:$24 sps:$4 sm:$0xff]  }
 0x6c4   :  { %16470 = vmatpush1.bf16.msra.mxu1 %v20680_v11  ;;  %v20709_v11 = vld [vmem:[#allocation8 + $0x6fc] ss:$24 sps:$4 sm:$0xff]  }
 0x6c5   :  { %16471 = vmatprep.subr.bf16.mxu1 %v20685_v28  ;;  %16362 = vmatpush1.bf16.msra.mxu0 %v20731_v5  ;;  %v20779_v28 = vld [vmem:[#allocation8 + $0x22b0] ss:$24 sps:$4 sm:$0xff]   ;;  %v20787_v5 = vld [vmem:[#allocation8 + $0x22e4] ss:$24 sps:$4 sm:$0xff]  }
 0x6c6   :  { %16363 = vmatprep.subr.bf16.mxu0 %v20739_v29  ;;  %v20707_v29 = vld [vmem:[#allocation8 + $0x6f8] ss:$24 sps:$4 sm:$0xff]  }
 0x6c8   :  { %16472 = vmatpush1.bf16.msra.mxu1 %v20683_v35  ;;  %v20712_v35 = vld [vmem:[#allocation8 + $0x72c] ss:$24 sps:$4 sm:$0xff]  }
 0x6c9   :  { %16473 = vmatprep.subr.bf16.mxu1 %v20688_v40  ;;  %16364 = vmatpush1.bf16.msra.mxu0 %v20737_v32  ;;  %v20785_v40 = vld [vmem:[#allocation8 + $0x22e0] ss:$24 sps:$4 sm:$0xff]   ;;  %v20793_v32 = vld [vmem:[#allocation8 + $0x2314] ss:$24 sps:$4 sm:$0xff]  }
 0x6ca   :  { %16365 = vmatprep.subr.bf16.mxu0 %v20745_v34  ;;  %v20710_v34 = vld [vmem:[#allocation8 + $0x728] ss:$24 sps:$4 sm:$0xff]  }
 0x6cc   :  { %16474 = vmatpush1.bf16.msra.mxu1 %v20686_v56  ;;  %v20715_v56 = vld [vmem:[#allocation8 + $0x75c] ss:$24 sps:$4 sm:$0xff]  }
 0x6cd   :  { %16475 = vmatprep.subr.bf16.mxu1 %v20691_v57  ;;  %16366 = vmatpush1.bf16.msra.mxu0 %v20743_v33  ;;  %v20791_v57 = vld [vmem:[#allocation8 + $0x2310] ss:$24 sps:$4 sm:$0xff]   ;;  %v20799_v33 = vld [vmem:[#allocation8 + $0x2344] ss:$24 sps:$4 sm:$0xff]  }
 0x6ce   :  { %16367 = vmatprep.subr.bf16.mxu0 %v20751_v20  ;;  %v20713_v20 = vld [vmem:[#allocation8 + $0x758] ss:$24 sps:$4 sm:$0xff]  }
 0x6d0   :  { %16476 = vmatpush1.bf16.msra.mxu1 %v20689_v6  ;;  %v20718_v6 = vld [vmem:[#allocation8 + $0x78c] ss:$24 sps:$4 sm:$0xff]  }
 0x6d1   :  { %16488 = vmatprep.subr.bf16.mxu1 %v20694_v58  ;;  %16368 = vmatpush1.bf16.msra.mxu0 %v20749_v49  ;;  %v20797_v58 = vld [vmem:[#allocation8 + $0x2340] ss:$24 sps:$4 sm:$0xff]   ;;  %v20805_v49 = vld [vmem:[#allocation8 + $0x2374] ss:$24 sps:$4 sm:$0xff]  }
 0x6d2   :  { %16369 = vmatprep.subr.bf16.mxu0 %v20757_v7  ;;  %v20716_v7 = vld [vmem:[#allocation8 + $0x788] ss:$24 sps:$4 sm:$0xff]  }
 0x6d3   :  { %16478 = vmatmul.mubr.bf16.vlgmr.msra.gmra.mrb[32].mxu1 %v22305_v4 }
 0x6d4   :  { %16489 = vmatpush1.bf16.msra.mxu1 %v20692_v48  ;;  %16520 = vmatprep.mubr.bf16.mxu1 %v22361_v51  ;;  %v20721_v48 = vld [vmem:[#allocation8 + $0x7bc] ss:$24 sps:$4 sm:$0xff]  }
 0x6d5   :  { %16490 = vmatprep.subr.bf16.mxu1 %v20697_v8  ;;  %16370 = vmatpush1.bf16.msra.mxu0 %v20755_v30  ;;  %v20803_v8 = vld [vmem:[#allocation8 + $0x2370] ss:$24 sps:$4 sm:$0xff]   ;;  %v20811_v30 = vld [vmem:[#allocation8 + $0x23a4] ss:$24 sps:$4 sm:$0xff]  }
 0x6d6   :  { %16371 = vmatprep.subr.bf16.mxu0 %v20763_v23  ;;  %v20719_v23 = vld [vmem:[#allocation8 + $0x7b8] ss:$24 sps:$4 sm:$0xff]  }
 0x6d8   :  { %16491 = vmatpush1.bf16.msra.mxu1 %v20695_v39  ;;  %v20724_v39 = vld [vmem:[#allocation8 + $0x7ec] ss:$24 sps:$4 sm:$0xff]  }
 0x6d9   :  { %16492 = vmatprep.subr.bf16.mxu1 %v20700_v31  ;;  %16372 = vmatpush1.bf16.msra.mxu0 %v20761_v15  ;;  %v20809_v31 = vld [vmem:[#allocation8 + $0x23a0] ss:$24 sps:$4 sm:$0xff]   ;;  %v20817_v15 = vld [vmem:[#allocation8 + $0x23d4] ss:$24 sps:$4 sm:$0xff]  }
 0x6da   :  { %16373 = vmatprep.subr.bf16.mxu0 %v20769_v17  ;;  %v20722_v17 = vld [vmem:[#allocation8 + $0x7e8] ss:$24 sps:$4 sm:$0xff]  }
 0x6dc   :  { %16493 = vmatpush1.bf16.msra.mxu1 %v20698_v44  ;;  %v20730_v44 = vld [vmem:[#allocation8 + $0x81c] ss:$24 sps:$4 sm:$0xff]  }
 0x6dd   :  { %16494 = vmatprep.subr.bf16.mxu1 %v20703_v25  ;;  %16374 = vmatpush1.bf16.msra.mxu0 %v20767_v12  ;;  %v20815_v25 = vld [vmem:[#allocation8 + $0x23d0] ss:$24 sps:$4 sm:$0xff]   ;;  %v20826_v12 = vld [vmem:[#allocation8 + $0x14] ss:$24 sps:$4 sm:$0xff]  }
 0x6de   :  { %16375 = vmatprep.subr.bf16.mxu0 %v20775_v63  ;;  %v20728_v63 = vld [vmem:[#allocation8 + $0x818] ss:$24 sps:$4 sm:$0xff]  }
 0x6e0   :  { %16495 = vmatpush1.bf16.msra.mxu1 %v20701_v22  ;;  %v20736_v22 = vld [vmem:[#allocation8 + $0x84c] ss:$24 sps:$4 sm:$0xff]  }
 0x6e1   :  { %16496 = vmatprep.subr.bf16.mxu1 %v20706_v52  ;;  %16376 = vmatpush1.bf16.msra.mxu0 %v20773_v37  ;;  %v20734_v52 = vld [vmem:[#allocation8 + $0x848] ss:$24 sps:$4 sm:$0xff]   ;;  %v20742_v37 = vld [vmem:[#allocation8 + $0x87c] ss:$24 sps:$4 sm:$0xff]  }
 0x6e2   :  { %16377 = vmatprep.subr.bf16.mxu0 %v20781_v54  ;;  %v20740_v54 = vld [vmem:[#allocation8 + $0x878] ss:$24 sps:$4 sm:$0xff]  }
 0x6e4   :  { %16497 = vmatpush1.bf16.msra.mxu1 %v20704_v41  ;;  %v20748_v41 = vld [vmem:[#allocation8 + $0x8ac] ss:$24 sps:$4 sm:$0xff]  }
 0x6e5   :  { %16498 = vmatprep.subr.bf16.mxu1 %v20709_v11  ;;  %16378 = vmatpush1.bf16.msra.mxu0 %v20779_v28  ;;  %v20746_v11 = vld [vmem:[#allocation8 + $0x8a8] ss:$24 sps:$4 sm:$0xff]   ;;  %v20754_v28 = vld [vmem:[#allocation8 + $0x8dc] ss:$24 sps:$4 sm:$0xff]  }
 0x6e6   :  { %16379 = vmatprep.subr.bf16.mxu0 %v20787_v5  ;;  %v20752_v5 = vld [vmem:[#allocation8 + $0x8d8] ss:$24 sps:$4 sm:$0xff]  }
 0x6e8   :  { %16499 = vmatpush1.bf16.msra.mxu1 %v20707_v29  ;;  %v20760_v29 = vld [vmem:[#allocation8 + $0x90c] ss:$24 sps:$4 sm:$0xff]  }
 0x6e9   :  { %16500 = vmatprep.subr.bf16.mxu1 %v20712_v35  ;;  %16380 = vmatpush1.bf16.msra.mxu0 %v20785_v40  ;;  %v20758_v35 = vld [vmem:[#allocation8 + $0x908] ss:$24 sps:$4 sm:$0xff]   ;;  %v20766_v40 = vld [vmem:[#allocation8 + $0x93c] ss:$24 sps:$4 sm:$0xff]  }
 0x6ea   :  { %16381 = vmatprep.subr.bf16.mxu0 %v20793_v32  ;;  %v20764_v32 = vld [vmem:[#allocation8 + $0x938] ss:$24 sps:$4 sm:$0xff]  }
 0x6ec   :  { %16501 = vmatpush1.bf16.msra.mxu1 %v20710_v34  ;;  %v20772_v34 = vld [vmem:[#allocation8 + $0x96c] ss:$24 sps:$4 sm:$0xff]  }
 0x6ed   :  { %16502 = vmatprep.subr.bf16.mxu1 %v20715_v56  ;;  %16382 = vmatpush1.bf16.msra.mxu0 %v20791_v57  ;;  %v20770_v56 = vld [vmem:[#allocation8 + $0x968] ss:$24 sps:$4 sm:$0xff]   ;;  %v20778_v57 = vld [vmem:[#allocation8 + $0x99c] ss:$24 sps:$4 sm:$0xff]  }
 0x6ee   :  { %16383 = vmatprep.subr.bf16.mxu0 %v20799_v33  ;;  %v20776_v33 = vld [vmem:[#allocation8 + $0x998] ss:$24 sps:$4 sm:$0xff]  }
 0x6f0   :  { %16503 = vmatpush1.bf16.msra.mxu1 %v20713_v20  ;;  %v20784_v20 = vld [vmem:[#allocation8 + $0x9cc] ss:$24 sps:$4 sm:$0xff]  }
 0x6f1   :  { %16504 = vmatprep.subr.bf16.mxu1 %v20718_v6  ;;  %16384 = vmatpush1.bf16.msra.mxu0 %v20797_v58  ;;  %v20782_v6 = vld [vmem:[#allocation8 + $0x9c8] ss:$24 sps:$4 sm:$0xff]   ;;  %v20790_v58 = vld [vmem:[#allocation8 + $0x9fc] ss:$24 sps:$4 sm:$0xff]  }
 0x6f2   :  { %16385 = vmatprep.subr.bf16.mxu0 %v20805_v49  ;;  %v1341_v49 = vrot.slane %v22476_v62, %v22379_v36 }
 0x6f4   :  { %16505 = vmatpush1.bf16.msra.mxu1 %v20716_v7  ;;  %v1345_v7 = vrot.slane %v22476_v62, %v22382_v46  ;;  %v20800_v62 = vld [vmem:[#allocation8 + $0xa58] ss:$24 sps:$4 sm:$0xff]  }
 0x6f5   :  { %16506 = vmatprep.subr.bf16.mxu1 %v20721_v48  ;;  %16386 = vmatpush1.bf16.msra.mxu0 %v20803_v8  ;;  %v20788_v48 = vld [vmem:[#allocation8 + $0x9f8] ss:$24 sps:$4 sm:$0xff]   ;;  %v20796_v8 = vld [vmem:[#allocation8 + $0xa2c] ss:$24 sps:$4 sm:$0xff]  }
 0x6f6   :  { %16387 = vmatprep.subr.bf16.mxu0 %v20811_v30 }
 0x6f8   :  { %16507 = vmatpush1.bf16.msra.mxu1 %v20719_v23 }
 0x6f9   :  { %16508 = vmatprep.subr.bf16.mxu1 %v20724_v39  ;;  %16388 = vmatpush1.bf16.msra.mxu0 %v20809_v31 }
 0x6fa   :  { %16389 = vmatprep.subr.bf16.mxu0 %v20817_v15 }
 0x6fc   :  { %16509 = vmatpush1.bf16.msra.mxu1 %v20722_v17  ;;  %v20794_v17 = vld [vmem:[#allocation8 + $0xa28] ss:$24 sps:$4 sm:$0xff]  }
 0x6fd   :  { %16510 = vmatprep.subr.bf16.mxu1 %v20730_v44  ;;  %16390 = vmatpush1.bf16.msra.mxu0 %v20815_v25 }
 0x6fe   :  { %16918 = vmatprep.subr.bf16.mxu0 %v20826_v12 }
 0x700   :  { %16511 = vmatpush1.bf16.msra.mxu1 %v20728_v63  ;;  %v20802_v63 = vld [vmem:[#allocation8 + $0xa5c] ss:$24 sps:$4 sm:$0xff]  }
 0x701   :  { %16512 = vmatprep.subr.bf16.mxu1 %v20736_v22 }
 0x704   :  { %16513 = vmatpush1.bf16.msra.mxu1 %v20734_v52 }
 0x705   :  { %16514 = vmatprep.subr.bf16.mxu1 %v20742_v37  ;;  %v20808_v37 = vld [vmem:[#allocation8 + $0xa8c] ss:$24 sps:$4 sm:$0xff]  }
 0x708   :  { %16515 = vmatpush1.bf16.msra.mxu1 %v20740_v54  ;;  %v20806_v54 = vld [vmem:[#allocation8 + $0xa88] ss:$24 sps:$4 sm:$0xff]  }
 0x709   :  { %16516 = vmatprep.subr.bf16.mxu1 %v20748_v41  ;;  %v20814_v41 = vld [vmem:[#allocation8 + $0xabc] ss:$24 sps:$4 sm:$0xff]  }
 0x70c   :  { %16517 = vmatpush1.bf16.msra.mxu1 %v20746_v11  ;;  %v20812_v11 = vld [vmem:[#allocation8 + $0xab8] ss:$24 sps:$4 sm:$0xff]  }
 0x70d   :  { %16518 = vmatprep.subr.bf16.mxu1 %v20754_v28 }
 0x710   :  { %16519 = vmatpush1.bf16.msra.mxu1 %v20752_v5  ;;  %v20820_v5 = vld [vmem:[#allocation8 + $0xaec] ss:$24 sps:$4 sm:$0xff]  }
 0x711   :  { %16531 = vmatprep.subr.bf16.mxu1 %v20760_v29 }
 0x713   :  { %16521 = vmatmul.mubr.bf16.vlgmr.msra.gmra.mrb[32].mxu1 %v22359_v0 }
 0x714   :  { %16532 = vmatpush1.bf16.msra.mxu1 %v20758_v35  ;;  %16563 = vmatprep.mubr.bf16.mxu1 %v22422_v26 }
 0x715   :  { %16533 = vmatprep.subr.bf16.mxu1 %v20766_v40 }
 0x718   :  { %16534 = vmatpush1.bf16.msra.mxu1 %v20764_v32 }
 0x719   :  { %16535 = vmatprep.subr.bf16.mxu1 %v20772_v34 }
 0x71c   :  { %16536 = vmatpush1.bf16.msra.mxu1 %v20770_v56 }
 0x71d   :  { %16537 = vmatprep.subr.bf16.mxu1 %v20778_v57 }
 0x720   :  { %16538 = vmatpush1.bf16.msra.mxu1 %v20776_v33 }
 0x721   :  { %16539 = vmatprep.subr.bf16.mxu1 %v20784_v20  ;;  %v20818_v20 = vld [vmem:[#allocation8 + $0xae8] ss:$24 sps:$4 sm:$0xff]  }
 0x724   :  { %16540 = vmatpush1.bf16.msra.mxu1 %v20782_v6 }
 0x725   :  { %16541 = vmatprep.subr.bf16.mxu1 %v20790_v58 }
 0x726   :  { %v8669_v30 = vpop.f32.mrb[28].mxu1 }
 0x727   :  { %v19813_v23 = vadd.f32 %v8669_v30, %v1341_v49  ;;  %v8671_v39 = vpop.f32.mrb[29].mxu1 }
 0x728   :  { %v19814_v31 = vadd.f32 %v8671_v39, %v1345_v7  ;;  %v8673_v15 = vpop.f32.mrb[30].mxu1  ;;  %16542 = vmatpush1.bf16.msra.mxu1 %v20788_v48 }
 0x729   :  { %v8748_v44 = vmul.f32 0.70710677, %v19813_v23  ;;  %v19815_v25 = vadd.f32 %v8673_v15, %v1341_v49  ;;  %v8675_v12 = vpop.f32.mrb[31].mxu1  ;;  %16543 = vmatprep.subr.bf16.mxu1 %v20796_v8  ;;  %v8700_v56 = vmul.f32 0.5, %v19813_v23  ;;  %v20824_v23 = vld [vmem:[#allocation8 + $0x10] ss:$24 sps:$4 sm:$0xff]  }
 0x72a   :  { %v8749_v36 = vmul.f32 0.70710677, %v19814_v31  ;;  %v19816_v22 = vadd.f32 %v8675_v12, %v1345_v7  ;;  %v8701_v6 = vmul.f32 0.5, %v19814_v31  ;;  %v20823_v7 = vld [vmem:[#allocation8 + $0xb1c] ss:$24 sps:$4 sm:$0xff]  }
 0x72b   :  { %21884 = verf.f32 %v8748_v44  ;;  %v8772_v52 = vmul.f32 0.70710677, %v19815_v25  ;;  %v8724_v57 = vmul.f32 0.5, %v19815_v25  ;;  %v20829_v25 = vld [vmem:[#allocation8 + $0xb4c] ss:$24 sps:$4 sm:$0xff]  }
 0x72c   :  { %21886 = verf.f32 %v8749_v36  ;;  %v8773_v46 = vmul.f32 0.70710677, %v19816_v22  ;;  %16544 = vmatpush1.bf16.msra.mxu1 %v20794_v17  ;;  %v8725_v58 = vmul.f32 0.5, %v19816_v22  ;;  %v20821_v17 = vld [vmem:[#allocation8 + $0xb18] ss:$24 sps:$4 sm:$0xff]  }
 0x72d   :  { %21888 = verf.f32 %v8772_v52  ;;  %16545 = vmatprep.subr.bf16.mxu1 %v20802_v63  ;;  %v20832_v12 = vld [vmem:[#allocation8 + $0x44] ss:$24 sps:$4 sm:$0xff]   ;;  %v20827_v31 = vld [vmem:[#allocation8 + $0xb48] ss:$24 sps:$4 sm:$0xff]   ;;  %v20838_v22 = vld [vmem:[#allocation8 + $0x74] ss:$24 sps:$4 sm:$0xff]  }
 0x72e   :  { %21890 = verf.f32 %v8773_v46  ;;  %v20830_v63 = vld [vmem:[#allocation8 + $0x40] ss:$24 sps:$4 sm:$0xff]   ;;  %v20835_v36 = vld [vmem:[#allocation8 + $0xb7c] ss:$24 sps:$4 sm:$0xff]   ;;  %v20836_v46 = vld [vmem:[#allocation8 + $0x70] ss:$24 sps:$4 sm:$0xff]  }
 0x72f   :  { %v20833_v52 = vld [vmem:[#allocation8 + $0xb78] ss:$24 sps:$4 sm:$0xff]  }
 0x730   :  { %16546 = vmatpush1.bf16.msra.mxu1 %v20800_v62  ;;  %v20841_v62 = vld [vmem:[#allocation8 + $0xbac] ss:$24 sps:$4 sm:$0xff]  }
 0x731   :  { %16547 = vmatprep.subr.bf16.mxu1 %v20808_v37  ;;  %v20844_v37 = vld [vmem:[#allocation8 + $0xa4] ss:$24 sps:$4 sm:$0xff]  }
 0x734   :  { %16548 = vmatpush1.bf16.msra.mxu1 %v20806_v54  ;;  %v20839_v54 = vld [vmem:[#allocation8 + $0xba8] ss:$24 sps:$4 sm:$0xff]  }
 0x735   :  { %v21885_v28 = vpop.eup %21884  ;;  %16549 = vmatprep.subr.bf16.mxu1 %v20814_v41  ;;  %v20842_v41 = vld [vmem:[#allocation8 + $0xa0] ss:$24 sps:$4 sm:$0xff]  }
 0x736   :  { %v21887_v29 = vpop.eup %21886  ;;  %v8844_v35 = vadd.f32 1.0, %v21885_v28  ;;  %v20845_v28 = vld [vmem:[#allocation8 + $0xbd8] ss:$24 sps:$4 sm:$0xff]  }
 0x737   :  { %v21889_v40 = vpop.eup %21888  ;;  %v8845_v32 = vadd.f32 1.0, %v21887_v29  ;;  %v20853_v29 = vld [vmem:[#allocation8 + $0xc0c] ss:$24 sps:$4 sm:$0xff]  }
 0x738   :  { %v21891_v34 = vpop.eup %21890  ;;  %v8868_v33 = vadd.f32 1.0, %v21889_v40  ;;  %16550 = vmatpush1.bf16.msra.mxu1 %v20812_v11  ;;  %v8892_v48 = vmul.f32 %v8844_v35, %v8700_v56  ;;  %v20847_v11 = vld [vmem:[#allocation8 + $0xbdc] ss:$24 sps:$4 sm:$0xff]   ;;  %v20851_v40 = vld [vmem:[#allocation8 + $0xc08] ss:$24 sps:$4 sm:$0xff]  }
 0x739   :  { %v8869_v49 = vadd.f32 1.0, %v21891_v34  ;;  %16551 = vmatprep.subr.bf16.mxu1 %v20820_v5  ;;  %v8893_v30 = vmul.f32 %v8845_v32, %v8701_v6  ;;  %v20848_v5 = vld [vmem:[#allocation8 + $0xd0] ss:$24 sps:$4 sm:$0xff]   ;;  %v20856_v35 = vld [vmem:[#allocation8 + $0x104] ss:$24 sps:$4 sm:$0xff]  }
 0x73a   :  { %v8916_v8 = vmul.f32 %v8868_v33, %v8724_v57  ;;  %v20854_v32 = vld [vmem:[#allocation8 + $0x100] ss:$24 sps:$4 sm:$0xff]   ;;  %v20859_v34 = vld [vmem:[#allocation8 + $0xc3c] ss:$24 sps:$4 sm:$0xff]   ;;  %v20860_v33 = vld [vmem:[#allocation8 + $0x130] ss:$24 sps:$4 sm:$0xff]  }
 0x73b   :  { %v8917_v39 = vmul.f32 %v8869_v49, %v8725_v58  ;;  %v20862_v56 = vld [vmem:[#allocation8 + $0x134] ss:$24 sps:$4 sm:$0xff]   ;;  %v20857_v57 = vld [vmem:[#allocation8 + $0xc38] ss:$24 sps:$4 sm:$0xff]   ;;  %v20868_v6 = vld [vmem:[#allocation8 + $0x164] ss:$24 sps:$4 sm:$0xff]  }
 0x73c   :  { %v22500_v15 = vpack.c.bf16 %v8916_v8, %v8892_v48  ;;  %16552 = vmatpush1.bf16.msra.mxu1 %v20818_v20  ;;  %v20865_v20 = vld [vmem:[#allocation8 + $0xc6c] ss:$24 sps:$4 sm:$0xff]   ;;  %v20863_v58 = vld [vmem:[#allocation8 + $0xc68] ss:$24 sps:$4 sm:$0xff]   ;;  %v20869_v8 = vld [vmem:[#allocation8 + $0xc98] ss:$24 sps:$4 sm:$0xff]  }
 0x73d   :  { %v22502_v44 = vpack.c.bf16 %v8917_v39, %v8893_v30  ;;  %16553 = vmatprep.subr.bf16.mxu1 %v20823_v7  ;;  %v20866_v49 = vld [vmem:[#allocation8 + $0x160] ss:$24 sps:$4 sm:$0xff]   ;;  %v20871_v7 = vld [vmem:[#allocation8 + $0xc9c] ss:$24 sps:$4 sm:$0xff]   ;;  %v20872_v30 = vld [vmem:[#allocation8 + $0x190] ss:$24 sps:$4 sm:$0xff]  }
 0x73e   :  { %v20874_v48 = vld [vmem:[#allocation8 + $0x194] ss:$24 sps:$4 sm:$0xff]  }
 0x73f   :  { %16391 = vmatprep.mubr.bf16.mxu0 %v22502_v44  ;;  %v20877_v39 = vld [vmem:[#allocation8 + $0xccc] ss:$24 sps:$4 sm:$0xff]  }
 0x740   :  { %16392 = vmatmul.mubr.bf16.vlgmr.msra.gmra.mrb[16].mxu0 %v22500_v15  ;;  %16554 = vmatpush1.bf16.msra.mxu1 %v20821_v17  ;;  %v20880_v17 = vld [vmem:[#allocation8 + $0x1c4] ss:$24 sps:$4 sm:$0xff]  }
 0x741   :  { %16919 = vmatpush1.bf16.msra.mxu0 %v20824_v23  ;;  %16950 = vmatprep.mubr.bf16.mxu0 %v22221_v10  ;;  %v20850_v10 = vld [vmem:[#allocation8 + $0xd4] ss:$24 sps:$4 sm:$0xff]   ;;  %v20875_v23 = vld [vmem:[#allocation8 + $0xcc8] ss:$24 sps:$4 sm:$0xff]  }
 0x742   :  { %16555 = vmatprep.subr.bf16.mxu1 %v20829_v25  ;;  %16920 = vmatprep.subr.bf16.mxu0 %v20832_v12  ;;  %v20878_v25 = vld [vmem:[#allocation8 + $0x1c0] ss:$24 sps:$4 sm:$0xff]   ;;  %v20883_v12 = vld [vmem:[#allocation8 + $0xcfc] ss:$24 sps:$4 sm:$0xff]  }
 0x744   :  { %16556 = vmatpush1.bf16.msra.mxu1 %v20827_v31  ;;  %v20886_v31 = vld [vmem:[#allocation8 + $0x1f4] ss:$24 sps:$4 sm:$0xff]  }
 0x745   :  { %16921 = vmatpush1.bf16.msra.mxu0 %v20830_v63  ;;  %16557 = vmatprep.subr.bf16.mxu1 %v20835_v36  ;;  %v20881_v63 = vld [vmem:[#allocation8 + $0xcf8] ss:$24 sps:$4 sm:$0xff]  }
 0x746   :  { %16922 = vmatprep.subr.bf16.mxu0 %v20838_v22  ;;  %v20884_v36 = vld [vmem:[#allocation8 + $0x1f0] ss:$24 sps:$4 sm:$0xff]   ;;  %v20889_v22 = vld [vmem:[#allocation8 + $0xd2c] ss:$24 sps:$4 sm:$0xff]  }
 0x748   :  { %16558 = vmatpush1.bf16.msra.mxu1 %v20833_v52  ;;  %v20892_v52 = vld [vmem:[#allocation8 + $0x224] ss:$24 sps:$4 sm:$0xff]  }
 0x749   :  { %16923 = vmatpush1.bf16.msra.mxu0 %v20836_v46  ;;  %16559 = vmatprep.subr.bf16.mxu1 %v20841_v62  ;;  %v20887_v46 = vld [vmem:[#allocation8 + $0xd28] ss:$24 sps:$4 sm:$0xff]  }
 0x74a   :  { %16924 = vmatprep.subr.bf16.mxu0 %v20844_v37  ;;  %v20890_v62 = vld [vmem:[#allocation8 + $0x220] ss:$24 sps:$4 sm:$0xff]   ;;  %v20895_v37 = vld [vmem:[#allocation8 + $0xd5c] ss:$24 sps:$4 sm:$0xff]  }
 0x74c   :  { %16560 = vmatpush1.bf16.msra.mxu1 %v20839_v54  ;;  %v20898_v54 = vld [vmem:[#allocation8 + $0x254] ss:$24 sps:$4 sm:$0xff]  }
 0x74d   :  { %16925 = vmatpush1.bf16.msra.mxu0 %v20842_v41  ;;  %16561 = vmatprep.subr.bf16.mxu1 %v20847_v11  ;;  %v20893_v41 = vld [vmem:[#allocation8 + $0xd58] ss:$24 sps:$4 sm:$0xff]  }
 0x74e   :  { %16926 = vmatprep.subr.bf16.mxu0 %v20850_v10  ;;  %v20896_v11 = vld [vmem:[#allocation8 + $0x250] ss:$24 sps:$4 sm:$0xff]   ;;  %v20901_v10 = vld [vmem:[#allocation8 + $0xd8c] ss:$24 sps:$4 sm:$0xff]  }
 0x750   :  { %16562 = vmatpush1.bf16.msra.mxu1 %v20845_v28  ;;  %v20904_v28 = vld [vmem:[#allocation8 + $0x284] ss:$24 sps:$4 sm:$0xff]  }
 0x751   :  { %16927 = vmatpush1.bf16.msra.mxu0 %v20848_v5  ;;  %16574 = vmatprep.subr.bf16.mxu1 %v20853_v29  ;;  %v20899_v5 = vld [vmem:[#allocation8 + $0xd88] ss:$24 sps:$4 sm:$0xff]  }
 0x752   :  { %16928 = vmatprep.subr.bf16.mxu0 %v20856_v35  ;;  %v20902_v29 = vld [vmem:[#allocation8 + $0x280] ss:$24 sps:$4 sm:$0xff]   ;;  %v20907_v35 = vld [vmem:[#allocation8 + $0xdbc] ss:$24 sps:$4 sm:$0xff]  }
 0x753   :  { %16564 = vmatmul.mubr.bf16.vlgmr.msra.gmra.mrb[32].mxu1 %v22419_v18 }
 0x754   :  { %16575 = vmatpush1.bf16.msra.mxu1 %v20851_v40  ;;  %16606 = vmatprep.mubr.bf16.mxu1 %v22225_v24  ;;  %v20910_v40 = vld [vmem:[#allocation8 + $0x2b4] ss:$24 sps:$4 sm:$0xff]  }
 0x755   :  { %16929 = vmatpush1.bf16.msra.mxu0 %v20854_v32  ;;  %16576 = vmatprep.subr.bf16.mxu1 %v20859_v34  ;;  %v20905_v32 = vld [vmem:[#allocation8 + $0xdb8] ss:$24 sps:$4 sm:$0xff]  }
 0x756   :  { %16930 = vmatprep.subr.bf16.mxu0 %v20862_v56  ;;  %v20908_v34 = vld [vmem:[#allocation8 + $0x2b0] ss:$24 sps:$4 sm:$0xff]   ;;  %v20913_v56 = vld [vmem:[#allocation8 + $0xdec] ss:$24 sps:$4 sm:$0xff]  }
 0x758   :  { %16577 = vmatpush1.bf16.msra.mxu1 %v20857_v57  ;;  %v20916_v57 = vld [vmem:[#allocation8 + $0x2e4] ss:$24 sps:$4 sm:$0xff]  }
 0x759   :  { %16931 = vmatpush1.bf16.msra.mxu0 %v20860_v33  ;;  %16578 = vmatprep.subr.bf16.mxu1 %v20865_v20  ;;  %v20911_v33 = vld [vmem:[#allocation8 + $0xde8] ss:$24 sps:$4 sm:$0xff]  }
 0x75a   :  { %16932 = vmatprep.subr.bf16.mxu0 %v20868_v6  ;;  %v20914_v20 = vld [vmem:[#allocation8 + $0x2e0] ss:$24 sps:$4 sm:$0xff]   ;;  %v20919_v6 = vld [vmem:[#allocation8 + $0xe1c] ss:$24 sps:$4 sm:$0xff]  }
 0x75c   :  { %16579 = vmatpush1.bf16.msra.mxu1 %v20863_v58  ;;  %v20922_v58 = vld [vmem:[#allocation8 + $0x314] ss:$24 sps:$4 sm:$0xff]  }
 0x75d   :  { %16933 = vmatpush1.bf16.msra.mxu0 %v20866_v49  ;;  %16580 = vmatprep.subr.bf16.mxu1 %v20871_v7  ;;  %v20917_v49 = vld [vmem:[#allocation8 + $0xe18] ss:$24 sps:$4 sm:$0xff]  }
 0x75e   :  { %16934 = vmatprep.subr.bf16.mxu0 %v20874_v48  ;;  %v20920_v7 = vld [vmem:[#allocation8 + $0x310] ss:$24 sps:$4 sm:$0xff]   ;;  %v20925_v48 = vld [vmem:[#allocation8 + $0xe4c] ss:$24 sps:$4 sm:$0xff]  }
 0x760   :  { %16581 = vmatpush1.bf16.msra.mxu1 %v20869_v8  ;;  %v20928_v8 = vld [vmem:[#allocation8 + $0x344] ss:$24 sps:$4 sm:$0xff]  }
 0x761   :  { %16935 = vmatpush1.bf16.msra.mxu0 %v20872_v30  ;;  %16582 = vmatprep.subr.bf16.mxu1 %v20877_v39  ;;  %v20923_v30 = vld [vmem:[#allocation8 + $0xe48] ss:$24 sps:$4 sm:$0xff]  }
 0x762   :  { %16936 = vmatprep.subr.bf16.mxu0 %v20880_v17  ;;  %v20926_v39 = vld [vmem:[#allocation8 + $0x340] ss:$24 sps:$4 sm:$0xff]   ;;  %v20931_v17 = vld [vmem:[#allocation8 + $0xe7c] ss:$24 sps:$4 sm:$0xff]  }
 0x764   :  { %16583 = vmatpush1.bf16.msra.mxu1 %v20875_v23  ;;  %v20934_v23 = vld [vmem:[#allocation8 + $0x374] ss:$24 sps:$4 sm:$0xff]  }
 0x765   :  { %16937 = vmatpush1.bf16.msra.mxu0 %v20878_v25  ;;  %16584 = vmatprep.subr.bf16.mxu1 %v20883_v12  ;;  %v20929_v25 = vld [vmem:[#allocation8 + $0xe78] ss:$24 sps:$4 sm:$0xff]  }
 0x766   :  { %16938 = vmatprep.subr.bf16.mxu0 %v20886_v31  ;;  %v20932_v12 = vld [vmem:[#allocation8 + $0x370] ss:$24 sps:$4 sm:$0xff]   ;;  %v20937_v31 = vld [vmem:[#allocation8 + $0xeac] ss:$24 sps:$4 sm:$0xff]  }
 0x768   :  { %16585 = vmatpush1.bf16.msra.mxu1 %v20881_v63  ;;  %v20940_v63 = vld [vmem:[#allocation8 + $0x3a4] ss:$24 sps:$4 sm:$0xff]  }
 0x769   :  { %16939 = vmatpush1.bf16.msra.mxu0 %v20884_v36  ;;  %16586 = vmatprep.subr.bf16.mxu1 %v20889_v22  ;;  %v20938_v36 = vld [vmem:[#allocation8 + $0x3a0] ss:$24 sps:$4 sm:$0xff]   ;;  %v20943_v22 = vld [vmem:[#allocation8 + $0xedc] ss:$24 sps:$4 sm:$0xff]  }
 0x76a   :  { %16940 = vmatprep.subr.bf16.mxu0 %v20892_v52  ;;  %v20941_v52 = vld [vmem:[#allocation8 + $0xed8] ss:$24 sps:$4 sm:$0xff]  }
 0x76c   :  { %16587 = vmatpush1.bf16.msra.mxu1 %v20887_v46  ;;  %v20944_v46 = vld [vmem:[#allocation8 + $0x3d0] ss:$24 sps:$4 sm:$0xff]  }
 0x76d   :  { %16941 = vmatpush1.bf16.msra.mxu0 %v20890_v62  ;;  %16588 = vmatprep.subr.bf16.mxu1 %v20895_v37  ;;  %v20949_v62 = vld [vmem:[#allocation8 + $0xf0c] ss:$24 sps:$4 sm:$0xff]  }
 0x76e   :  { %16942 = vmatprep.subr.bf16.mxu0 %v20898_v54  ;;  %v20952_v37 = vld [vmem:[#allocation8 + $0x404] ss:$24 sps:$4 sm:$0xff]   ;;  %v20947_v54 = vld [vmem:[#allocation8 + $0xf08] ss:$24 sps:$4 sm:$0xff]  }
 0x770   :  { %16589 = vmatpush1.bf16.msra.mxu1 %v20893_v41  ;;  %v20950_v41 = vld [vmem:[#allocation8 + $0x400] ss:$24 sps:$4 sm:$0xff]  }
 0x771   :  { %16943 = vmatpush1.bf16.msra.mxu0 %v20896_v11  ;;  %16590 = vmatprep.subr.bf16.mxu1 %v20901_v10  ;;  %v20955_v11 = vld [vmem:[#allocation8 + $0xf3c] ss:$24 sps:$4 sm:$0xff]  }
 0x772   :  { %16944 = vmatprep.subr.bf16.mxu0 %v20904_v28  ;;  %v20958_v10 = vld [vmem:[#allocation8 + $0x434] ss:$24 sps:$4 sm:$0xff]   ;;  %v20953_v28 = vld [vmem:[#allocation8 + $0xf38] ss:$24 sps:$4 sm:$0xff]  }
 0x774   :  { %16591 = vmatpush1.bf16.msra.mxu1 %v20899_v5  ;;  %v20956_v5 = vld [vmem:[#allocation8 + $0x430] ss:$24 sps:$4 sm:$0xff]  }
 0x775   :  { %16945 = vmatpush1.bf16.msra.mxu0 %v20902_v29  ;;  %16592 = vmatprep.subr.bf16.mxu1 %v20907_v35  ;;  %v20961_v29 = vld [vmem:[#allocation8 + $0xf6c] ss:$24 sps:$4 sm:$0xff]  }
 0x776   :  { %16946 = vmatprep.subr.bf16.mxu0 %v20910_v40  ;;  %v20964_v35 = vld [vmem:[#allocation8 + $0x464] ss:$24 sps:$4 sm:$0xff]   ;;  %v20959_v40 = vld [vmem:[#allocation8 + $0xf68] ss:$24 sps:$4 sm:$0xff]  }
 0x778   :  { %16593 = vmatpush1.bf16.msra.mxu1 %v20905_v32  ;;  %v20962_v32 = vld [vmem:[#allocation8 + $0x460] ss:$24 sps:$4 sm:$0xff]  }
 0x779   :  { %16947 = vmatpush1.bf16.msra.mxu0 %v20908_v34  ;;  %16594 = vmatprep.subr.bf16.mxu1 %v20913_v56  ;;  %v20967_v34 = vld [vmem:[#allocation8 + $0xf9c] ss:$24 sps:$4 sm:$0xff]  }
 0x77a   :  { %16948 = vmatprep.subr.bf16.mxu0 %v20916_v57  ;;  %v20970_v56 = vld [vmem:[#allocation8 + $0x494] ss:$24 sps:$4 sm:$0xff]   ;;  %v20965_v57 = vld [vmem:[#allocation8 + $0xf98] ss:$24 sps:$4 sm:$0xff]  }
 0x77c   :  { %16595 = vmatpush1.bf16.msra.mxu1 %v20911_v33  ;;  %v20968_v33 = vld [vmem:[#allocation8 + $0x490] ss:$24 sps:$4 sm:$0xff]  }
 0x77d   :  { %16949 = vmatpush1.bf16.msra.mxu0 %v20914_v20  ;;  %16596 = vmatprep.subr.bf16.mxu1 %v20919_v6  ;;  %v20973_v20 = vld [vmem:[#allocation8 + $0xfcc] ss:$24 sps:$4 sm:$0xff]  }
 0x77e   :  { %16961 = vmatprep.subr.bf16.mxu0 %v20922_v58  ;;  %v20976_v6 = vld [vmem:[#allocation8 + $0x4c4] ss:$24 sps:$4 sm:$0xff]   ;;  %v20971_v58 = vld [vmem:[#allocation8 + $0xfc8] ss:$24 sps:$4 sm:$0xff]  }
 0x780   :  { %16951 = vmatmul.mubr.bf16.vlgmr.msra.gmra.mrb[20].mxu0 %v22217_v2  ;;  %16597 = vmatpush1.bf16.msra.mxu1 %v20917_v49  ;;  %v20935_v2 = vld [vmem:[#allocation8 + $0xea8] ss:$24 sps:$4 sm:$0xff]  }
 0x781   :  { %16962 = vmatpush1.bf16.msra.mxu0 %v20920_v7  ;;  %16993 = vmatprep.mubr.bf16.mxu0 %v22309_v19  ;;  %v20946_v19 = vld [vmem:[#allocation8 + $0x3d4] ss:$24 sps:$4 sm:$0xff]   ;;  %v20974_v49 = vld [vmem:[#allocation8 + $0x4c0] ss:$24 sps:$4 sm:$0xff]  }
 0x782   :  { %16598 = vmatprep.subr.bf16.mxu1 %v20925_v48  ;;  %16963 = vmatprep.subr.bf16.mxu0 %v20928_v8  ;;  %v20979_v7 = vld [vmem:[#allocation8 + $0xffc] ss:$24 sps:$4 sm:$0xff]   ;;  %v20977_v8 = vld [vmem:[#allocation8 + $0xff8] ss:$24 sps:$4 sm:$0xff]  }
 0x783   :  { %v20982_v48 = vld [vmem:[#allocation8 + $0x4f4] ss:$24 sps:$4 sm:$0xff]  }
 0x784   :  { %16599 = vmatpush1.bf16.msra.mxu1 %v20923_v30  ;;  %v20980_v30 = vld [vmem:[#allocation8 + $0x4f0] ss:$24 sps:$4 sm:$0xff]  }
 0x785   :  { %16964 = vmatpush1.bf16.msra.mxu0 %v20926_v39  ;;  %16600 = vmatprep.subr.bf16.mxu1 %v20931_v17  ;;  %v20985_v39 = vld [vmem:[#allocation8 + $0x102c] ss:$24 sps:$4 sm:$0xff]  }
 0x786   :  { %16965 = vmatprep.subr.bf16.mxu0 %v20934_v23  ;;  %v20988_v17 = vld [vmem:[#allocation8 + $0x524] ss:$24 sps:$4 sm:$0xff]   ;;  %v20983_v23 = vld [vmem:[#allocation8 + $0x1028] ss:$24 sps:$4 sm:$0xff]  }
 0x788   :  { %16601 = vmatpush1.bf16.msra.mxu1 %v20929_v25  ;;  %v20986_v25 = vld [vmem:[#allocation8 + $0x520] ss:$24 sps:$4 sm:$0xff]  }
 0x789   :  { %16966 = vmatpush1.bf16.msra.mxu0 %v20932_v12  ;;  %16602 = vmatprep.subr.bf16.mxu1 %v20937_v31  ;;  %v20991_v12 = vld [vmem:[#allocation8 + $0x105c] ss:$24 sps:$4 sm:$0xff]  }
 0x78a   :  { %16967 = vmatprep.subr.bf16.mxu0 %v20940_v63  ;;  %v20994_v31 = vld [vmem:[#allocation8 + $0x554] ss:$24 sps:$4 sm:$0xff]   ;;  %v20989_v63 = vld [vmem:[#allocation8 + $0x1058] ss:$24 sps:$4 sm:$0xff]  }
 0x78c   :  { %16603 = vmatpush1.bf16.msra.mxu1 %v20935_v2  ;;  %v20992_v2 = vld [vmem:[#allocation8 + $0x550] ss:$24 sps:$4 sm:$0xff]  }
 0x78d   :  { %16968 = vmatpush1.bf16.msra.mxu0 %v20938_v36  ;;  %16604 = vmatprep.subr.bf16.mxu1 %v20943_v22  ;;  %v20997_v36 = vld [vmem:[#allocation8 + $0x108c] ss:$24 sps:$4 sm:$0xff]  }
 0x78e   :  { %16969 = vmatprep.subr.bf16.mxu0 %v20946_v19  ;;  %v21000_v22 = vld [vmem:[#allocation8 + $0x584] ss:$24 sps:$4 sm:$0xff]   ;;  %v20995_v19 = vld [vmem:[#allocation8 + $0x1088] ss:$24 sps:$4 sm:$0xff]  }
 0x790   :  { %16605 = vmatpush1.bf16.msra.mxu1 %v20941_v52  ;;  %v20998_v52 = vld [vmem:[#allocation8 + $0x580] ss:$24 sps:$4 sm:$0xff]  }
 0x791   :  { %16970 = vmatpush1.bf16.msra.mxu0 %v20944_v46  ;;  %16617 = vmatprep.subr.bf16.mxu1 %v20949_v62  ;;  %v21003_v46 = vld [vmem:[#allocation8 + $0x10bc] ss:$24 sps:$4 sm:$0xff]  }
 0x792   :  { %16971 = vmatprep.subr.bf16.mxu0 %v20952_v37  ;;  %v21006_v62 = vld [vmem:[#allocation8 + $0x5b4] ss:$24 sps:$4 sm:$0xff]   ;;  %v21001_v37 = vld [vmem:[#allocation8 + $0x10b8] ss:$24 sps:$4 sm:$0xff]  }
 0x793   :  { %16607 = vmatmul.mubr.bf16.vlgmr.msra.gmra.mrb[32].mxu1 %v22223_v16 }
 0x794   :  { %16618 = vmatpush1.bf16.msra.mxu1 %v20947_v54  ;;  %16649 = vmatprep.mubr.bf16.mxu1 %v22446_v3  ;;  %v21004_v54 = vld [vmem:[#allocation8 + $0x5b0] ss:$24 sps:$4 sm:$0xff]  }
 0x795   :  { %16972 = vmatpush1.bf16.msra.mxu0 %v20950_v41  ;;  %16619 = vmatprep.subr.bf16.mxu1 %v20955_v11  ;;  %v21009_v41 = vld [vmem:[#allocation8 + $0x10ec] ss:$24 sps:$4 sm:$0xff]  }
 0x796   :  { %16973 = vmatprep.subr.bf16.mxu0 %v20958_v10  ;;  %v21012_v11 = vld [vmem:[#allocation8 + $0x5e4] ss:$24 sps:$4 sm:$0xff]   ;;  %v21007_v10 = vld [vmem:[#allocation8 + $0x10e8] ss:$24 sps:$4 sm:$0xff]  }
 0x798   :  { %16620 = vmatpush1.bf16.msra.mxu1 %v20953_v28  ;;  %v21010_v28 = vld [vmem:[#allocation8 + $0x5e0] ss:$24 sps:$4 sm:$0xff]  }
 0x799   :  { %16974 = vmatpush1.bf16.msra.mxu0 %v20956_v5  ;;  %16621 = vmatprep.subr.bf16.mxu1 %v20961_v29  ;;  %v21015_v5 = vld [vmem:[#allocation8 + $0x111c] ss:$24 sps:$4 sm:$0xff]  }
 0x79a   :  { %16975 = vmatprep.subr.bf16.mxu0 %v20964_v35  ;;  %v21018_v29 = vld [vmem:[#allocation8 + $0x614] ss:$24 sps:$4 sm:$0xff]   ;;  %v21013_v35 = vld [vmem:[#allocation8 + $0x1118] ss:$24 sps:$4 sm:$0xff]  }
 0x79c   :  { %16622 = vmatpush1.bf16.msra.mxu1 %v20959_v40  ;;  %v21016_v40 = vld [vmem:[#allocation8 + $0x610] ss:$24 sps:$4 sm:$0xff]  }
 0x79d   :  { %16976 = vmatpush1.bf16.msra.mxu0 %v20962_v32  ;;  %16623 = vmatprep.subr.bf16.mxu1 %v20967_v34  ;;  %v21021_v32 = vld [vmem:[#allocation8 + $0x114c] ss:$24 sps:$4 sm:$0xff]  }
 0x79e   :  { %16977 = vmatprep.subr.bf16.mxu0 %v20970_v56  ;;  %v21024_v34 = vld [vmem:[#allocation8 + $0x644] ss:$24 sps:$4 sm:$0xff]   ;;  %v21019_v56 = vld [vmem:[#allocation8 + $0x1148] ss:$24 sps:$4 sm:$0xff]  }
 0x7a0   :  { %16624 = vmatpush1.bf16.msra.mxu1 %v20965_v57  ;;  %v21022_v57 = vld [vmem:[#allocation8 + $0x640] ss:$24 sps:$4 sm:$0xff]  }
 0x7a1   :  { %16978 = vmatpush1.bf16.msra.mxu0 %v20968_v33  ;;  %16625 = vmatprep.subr.bf16.mxu1 %v20973_v20  ;;  %v21027_v33 = vld [vmem:[#allocation8 + $0x117c] ss:$24 sps:$4 sm:$0xff]  }
 0x7a2   :  { %16979 = vmatprep.subr.bf16.mxu0 %v20976_v6  ;;  %v21030_v20 = vld [vmem:[#allocation8 + $0x674] ss:$24 sps:$4 sm:$0xff]   ;;  %v21025_v6 = vld [vmem:[#allocation8 + $0x1178] ss:$24 sps:$4 sm:$0xff]  }
 0x7a4   :  { %16626 = vmatpush1.bf16.msra.mxu1 %v20971_v58  ;;  %v21028_v58 = vld [vmem:[#allocation8 + $0x670] ss:$24 sps:$4 sm:$0xff]  }
 0x7a5   :  { %16980 = vmatpush1.bf16.msra.mxu0 %v20974_v49  ;;  %16627 = vmatprep.subr.bf16.mxu1 %v20979_v7  ;;  %v21033_v49 = vld [vmem:[#allocation8 + $0x11ac] ss:$24 sps:$4 sm:$0xff]  }
 0x7a6   :  { %16981 = vmatprep.subr.bf16.mxu0 %v20982_v48  ;;  %v21036_v7 = vld [vmem:[#allocation8 + $0x6a4] ss:$24 sps:$4 sm:$0xff]   ;;  %v21034_v48 = vld [vmem:[#allocation8 + $0x6a0] ss:$24 sps:$4 sm:$0xff]  }
 0x7a8   :  { %16628 = vmatpush1.bf16.msra.mxu1 %v20977_v8  ;;  %v21039_v8 = vld [vmem:[#allocation8 + $0x11dc] ss:$24 sps:$4 sm:$0xff]  }
 0x7a9   :  { %16982 = vmatpush1.bf16.msra.mxu0 %v20980_v30  ;;  %16629 = vmatprep.subr.bf16.mxu1 %v20985_v39  ;;  %v21037_v30 = vld [vmem:[#allocation8 + $0x11d8] ss:$24 sps:$4 sm:$0xff]  }
 0x7aa   :  { %16983 = vmatprep.subr.bf16.mxu0 %v20988_v17  ;;  %v21040_v39 = vld [vmem:[#allocation8 + $0x6d0] ss:$24 sps:$4 sm:$0xff]   ;;  %v21045_v17 = vld [vmem:[#allocation8 + $0x120c] ss:$24 sps:$4 sm:$0xff]  }
 0x7ac   :  { %16630 = vmatpush1.bf16.msra.mxu1 %v20983_v23  ;;  %v21048_v23 = vld [vmem:[#allocation8 + $0x704] ss:$24 sps:$4 sm:$0xff]  }
 0x7ad   :  { %16984 = vmatpush1.bf16.msra.mxu0 %v20986_v25  ;;  %16631 = vmatprep.subr.bf16.mxu1 %v20991_v12  ;;  %v21043_v25 = vld [vmem:[#allocation8 + $0x1208] ss:$24 sps:$4 sm:$0xff]  }
 0x7ae   :  { %16985 = vmatprep.subr.bf16.mxu0 %v20994_v31  ;;  %v21046_v12 = vld [vmem:[#allocation8 + $0x700] ss:$24 sps:$4 sm:$0xff]   ;;  %v21051_v31 = vld [vmem:[#allocation8 + $0x123c] ss:$24 sps:$4 sm:$0xff]  }
 0x7b0   :  { %16632 = vmatpush1.bf16.msra.mxu1 %v20989_v63  ;;  %v21054_v63 = vld [vmem:[#allocation8 + $0x734] ss:$24 sps:$4 sm:$0xff]  }
 0x7b1   :  { %16986 = vmatpush1.bf16.msra.mxu0 %v20992_v2  ;;  %16633 = vmatprep.subr.bf16.mxu1 %v20997_v36  ;;  %v21049_v2 = vld [vmem:[#allocation8 + $0x1238] ss:$24 sps:$4 sm:$0xff]  }
 0x7b2   :  { %16987 = vmatprep.subr.bf16.mxu0 %v21000_v22  ;;  %v21052_v36 = vld [vmem:[#allocation8 + $0x730] ss:$24 sps:$4 sm:$0xff]   ;;  %v21057_v22 = vld [vmem:[#allocation8 + $0x126c] ss:$24 sps:$4 sm:$0xff]  }
 0x7b4   :  { %16634 = vmatpush1.bf16.msra.mxu1 %v20995_v19  ;;  %v21060_v19 = vld [vmem:[#allocation8 + $0x764] ss:$24 sps:$4 sm:$0xff]  }
 0x7b5   :  { %16988 = vmatpush1.bf16.msra.mxu0 %v20998_v52  ;;  %16635 = vmatprep.subr.bf16.mxu1 %v21003_v46  ;;  %v21055_v52 = vld [vmem:[#allocation8 + $0x1268] ss:$24 sps:$4 sm:$0xff]  }
 0x7b6   :  { %16989 = vmatprep.subr.bf16.mxu0 %v21006_v62  ;;  %v21058_v46 = vld [vmem:[#allocation8 + $0x760] ss:$24 sps:$4 sm:$0xff]   ;;  %v21063_v62 = vld [vmem:[#allocation8 + $0x129c] ss:$24 sps:$4 sm:$0xff]  }
 0x7b8   :  { %16636 = vmatpush1.bf16.msra.mxu1 %v21001_v37  ;;  %v21066_v37 = vld [vmem:[#allocation8 + $0x794] ss:$24 sps:$4 sm:$0xff]  }
 0x7b9   :  { %16990 = vmatpush1.bf16.msra.mxu0 %v21004_v54  ;;  %16637 = vmatprep.subr.bf16.mxu1 %v21009_v41  ;;  %v21061_v54 = vld [vmem:[#allocation8 + $0x1298] ss:$24 sps:$4 sm:$0xff]  }
 0x7ba   :  { %16991 = vmatprep.subr.bf16.mxu0 %v21012_v11  ;;  %v21064_v41 = vld [vmem:[#allocation8 + $0x790] ss:$24 sps:$4 sm:$0xff]   ;;  %v21069_v11 = vld [vmem:[#allocation8 + $0x12cc] ss:$24 sps:$4 sm:$0xff]  }
 0x7bc   :  { %16638 = vmatpush1.bf16.msra.mxu1 %v21007_v10  ;;  %v21072_v10 = vld [vmem:[#allocation8 + $0x7c4] ss:$24 sps:$4 sm:$0xff]  }
 0x7bd   :  { %16992 = vmatpush1.bf16.msra.mxu0 %v21010_v28  ;;  %16639 = vmatprep.subr.bf16.mxu1 %v21015_v5  ;;  %v21067_v28 = vld [vmem:[#allocation8 + $0x12c8] ss:$24 sps:$4 sm:$0xff]  }
 0x7be   :  { %17004 = vmatprep.subr.bf16.mxu0 %v21018_v29  ;;  %v21070_v5 = vld [vmem:[#allocation8 + $0x7c0] ss:$24 sps:$4 sm:$0xff]   ;;  %v21075_v29 = vld [vmem:[#allocation8 + $0x12fc] ss:$24 sps:$4 sm:$0xff]  }
 0x7c0   :  { %16994 = vmatmul.mubr.bf16.vlgmr.msra.gmra.mrb[20].mxu0 %v22305_v4  ;;  %16640 = vmatpush1.bf16.msra.mxu1 %v21013_v35  ;;  %v21031_v4 = vld [vmem:[#allocation8 + $0x11a8] ss:$24 sps:$4 sm:$0xff]   ;;  %v21078_v35 = vld [vmem:[#allocation8 + $0x7f4] ss:$24 sps:$4 sm:$0xff]  }
 0x7c1   :  { %17005 = vmatpush1.bf16.msra.mxu0 %v21016_v40  ;;  %17036 = vmatprep.mubr.bf16.mxu0 %v22361_v51  ;;  %v21042_v51 = vld [vmem:[#allocation8 + $0x6d4] ss:$24 sps:$4 sm:$0xff]   ;;  %v21073_v40 = vld [vmem:[#allocation8 + $0x12f8] ss:$24 sps:$4 sm:$0xff]  }
 0x7c2   :  { %16641 = vmatprep.subr.bf16.mxu1 %v21021_v32  ;;  %17006 = vmatprep.subr.bf16.mxu0 %v21024_v34  ;;  %v21076_v32 = vld [vmem:[#allocation8 + $0x7f0] ss:$24 sps:$4 sm:$0xff]   ;;  %v21081_v34 = vld [vmem:[#allocation8 + $0x132c] ss:$24 sps:$4 sm:$0xff]  }
 0x7c4   :  { %16642 = vmatpush1.bf16.msra.mxu1 %v21019_v56  ;;  %v21084_v56 = vld [vmem:[#allocation8 + $0x824] ss:$24 sps:$4 sm:$0xff]  }
 0x7c5   :  { %17007 = vmatpush1.bf16.msra.mxu0 %v21022_v57  ;;  %16643 = vmatprep.subr.bf16.mxu1 %v21027_v33  ;;  %v21079_v57 = vld [vmem:[#allocation8 + $0x1328] ss:$24 sps:$4 sm:$0xff]  }
 0x7c6   :  { %17008 = vmatprep.subr.bf16.mxu0 %v21030_v20  ;;  %v21082_v33 = vld [vmem:[#allocation8 + $0x820] ss:$24 sps:$4 sm:$0xff]   ;;  %v21087_v20 = vld [vmem:[#allocation8 + $0x135c] ss:$24 sps:$4 sm:$0xff]  }
 0x7c8   :  { %16644 = vmatpush1.bf16.msra.mxu1 %v21025_v6  ;;  %v21090_v6 = vld [vmem:[#allocation8 + $0x854] ss:$24 sps:$4 sm:$0xff]  }
 0x7c9   :  { %17009 = vmatpush1.bf16.msra.mxu0 %v21028_v58  ;;  %16645 = vmatprep.subr.bf16.mxu1 %v21033_v49  ;;  %v21085_v58 = vld [vmem:[#allocation8 + $0x1358] ss:$24 sps:$4 sm:$0xff]  }
 0x7ca   :  { %17010 = vmatprep.subr.bf16.mxu0 %v21036_v7  ;;  %v21088_v49 = vld [vmem:[#allocation8 + $0x850] ss:$24 sps:$4 sm:$0xff]   ;;  %v21093_v7 = vld [vmem:[#allocation8 + $0x138c] ss:$24 sps:$4 sm:$0xff]  }
 0x7cc   :  { %16646 = vmatpush1.bf16.msra.mxu1 %v21031_v4  ;;  %v21096_v4 = vld [vmem:[#allocation8 + $0x884] ss:$24 sps:$4 sm:$0xff]  }
 0x7cd   :  { %17011 = vmatpush1.bf16.msra.mxu0 %v21034_v48  ;;  %16647 = vmatprep.subr.bf16.mxu1 %v21039_v8  ;;  %v21091_v48 = vld [vmem:[#allocation8 + $0x1388] ss:$24 sps:$4 sm:$0xff]  }
 0x7ce   :  { %17012 = vmatprep.subr.bf16.mxu0 %v21042_v51  ;;  %v21094_v8 = vld [vmem:[#allocation8 + $0x880] ss:$24 sps:$4 sm:$0xff]   ;;  %v21099_v51 = vld [vmem:[#allocation8 + $0x13bc] ss:$24 sps:$4 sm:$0xff]  }
 0x7d0   :  { %16648 = vmatpush1.bf16.msra.mxu1 %v21037_v30  ;;  %v21102_v30 = vld [vmem:[#allocation8 + $0x8b4] ss:$24 sps:$4 sm:$0xff]  }
 0x7d1   :  { %17013 = vmatpush1.bf16.msra.mxu0 %v21040_v39  ;;  %16660 = vmatprep.subr.bf16.mxu1 %v21045_v17  ;;  %v21097_v39 = vld [vmem:[#allocation8 + $0x13b8] ss:$24 sps:$4 sm:$0xff]  }
 0x7d2   :  { %17014 = vmatprep.subr.bf16.mxu0 %v21048_v23  ;;  %v21100_v17 = vld [vmem:[#allocation8 + $0x8b0] ss:$24 sps:$4 sm:$0xff]   ;;  %v21105_v23 = vld [vmem:[#allocation8 + $0x13ec] ss:$24 sps:$4 sm:$0xff]  }
 0x7d3   :  { %16650 = vmatmul.mubr.bf16.vlgmr.msra.gmra.mrb[32].mxu1 %v22444_v1 }
 0x7d4   :  { %16661 = vmatpush1.bf16.msra.mxu1 %v21043_v25  ;;  %16692 = vmatprep.mubr.bf16.mxu1 %v22313_v45  ;;  %v21108_v25 = vld [vmem:[#allocation8 + $0x8e4] ss:$24 sps:$4 sm:$0xff]  }
 0x7d5   :  { %17015 = vmatpush1.bf16.msra.mxu0 %v21046_v12  ;;  %16662 = vmatprep.subr.bf16.mxu1 %v21051_v31  ;;  %v21103_v12 = vld [vmem:[#allocation8 + $0x13e8] ss:$24 sps:$4 sm:$0xff]  }
 0x7d6   :  { %17016 = vmatprep.subr.bf16.mxu0 %v21054_v63  ;;  %v21106_v31 = vld [vmem:[#allocation8 + $0x8e0] ss:$24 sps:$4 sm:$0xff]   ;;  %v21111_v63 = vld [vmem:[#allocation8 + $0x141c] ss:$24 sps:$4 sm:$0xff]  }
 0x7d8   :  { %16663 = vmatpush1.bf16.msra.mxu1 %v21049_v2  ;;  %v21114_v2 = vld [vmem:[#allocation8 + $0x914] ss:$24 sps:$4 sm:$0xff]  }
 0x7d9   :  { %17017 = vmatpush1.bf16.msra.mxu0 %v21052_v36  ;;  %16664 = vmatprep.subr.bf16.mxu1 %v21057_v22  ;;  %v21109_v36 = vld [vmem:[#allocation8 + $0x1418] ss:$24 sps:$4 sm:$0xff]  }
 0x7da   :  { %17018 = vmatprep.subr.bf16.mxu0 %v21060_v19  ;;  %v21112_v22 = vld [vmem:[#allocation8 + $0x910] ss:$24 sps:$4 sm:$0xff]   ;;  %v21117_v19 = vld [vmem:[#allocation8 + $0x144c] ss:$24 sps:$4 sm:$0xff]  }
 0x7dc   :  { %16665 = vmatpush1.bf16.msra.mxu1 %v21055_v52  ;;  %v21120_v52 = vld [vmem:[#allocation8 + $0x944] ss:$24 sps:$4 sm:$0xff]  }
 0x7dd   :  { %17019 = vmatpush1.bf16.msra.mxu0 %v21058_v46  ;;  %16666 = vmatprep.subr.bf16.mxu1 %v21063_v62  ;;  %v21115_v46 = vld [vmem:[#allocation8 + $0x1448] ss:$24 sps:$4 sm:$0xff]  }
 0x7de   :  { %17020 = vmatprep.subr.bf16.mxu0 %v21066_v37  ;;  %v21118_v62 = vld [vmem:[#allocation8 + $0x940] ss:$24 sps:$4 sm:$0xff]   ;;  %v21123_v37 = vld [vmem:[#allocation8 + $0x147c] ss:$24 sps:$4 sm:$0xff]  }
 0x7e0   :  { %16667 = vmatpush1.bf16.msra.mxu1 %v21061_v54  ;;  %v21126_v54 = vld [vmem:[#allocation8 + $0x974] ss:$24 sps:$4 sm:$0xff]  }
 0x7e1   :  { %17021 = vmatpush1.bf16.msra.mxu0 %v21064_v41  ;;  %16668 = vmatprep.subr.bf16.mxu1 %v21069_v11  ;;  %v21121_v41 = vld [vmem:[#allocation8 + $0x1478] ss:$24 sps:$4 sm:$0xff]  }
 0x7e2   :  { %17022 = vmatprep.subr.bf16.mxu0 %v21072_v10  ;;  %v21124_v11 = vld [vmem:[#allocation8 + $0x970] ss:$24 sps:$4 sm:$0xff]   ;;  %v21129_v10 = vld [vmem:[#allocation8 + $0x14ac] ss:$24 sps:$4 sm:$0xff]  }
 0x7e4   :  { %16669 = vmatpush1.bf16.msra.mxu1 %v21067_v28  ;;  %v21132_v28 = vld [vmem:[#allocation8 + $0x9a4] ss:$24 sps:$4 sm:$0xff]  }
 0x7e5   :  { %17023 = vmatpush1.bf16.msra.mxu0 %v21070_v5  ;;  %16670 = vmatprep.subr.bf16.mxu1 %v21075_v29  ;;  %v21130_v5 = vld [vmem:[#allocation8 + $0x9a0] ss:$24 sps:$4 sm:$0xff]   ;;  %v21135_v29 = vld [vmem:[#allocation8 + $0x14dc] ss:$24 sps:$4 sm:$0xff]  }
 0x7e6   :  { %17024 = vmatprep.subr.bf16.mxu0 %v21078_v35  ;;  %v21133_v35 = vld [vmem:[#allocation8 + $0x14d8] ss:$24 sps:$4 sm:$0xff]  }
 0x7e8   :  { %16671 = vmatpush1.bf16.msra.mxu1 %v21073_v40  ;;  %v21136_v40 = vld [vmem:[#allocation8 + $0x9d0] ss:$24 sps:$4 sm:$0xff]  }
 0x7e9   :  { %17025 = vmatpush1.bf16.msra.mxu0 %v21076_v32  ;;  %16672 = vmatprep.subr.bf16.mxu1 %v21081_v34  ;;  %v10094_v32 = vld [vmem:[%s22578_s4] sm:$0x3f] }
 0x7ea   :  { %17026 = vmatprep.subr.bf16.mxu0 %v21084_v56  ;;  %v21141_v34 = vld [vmem:[#allocation8 + $0x150c] ss:$24 sps:$4 sm:$0xff]  }
 0x7eb   :  { %v21144_v56 = vld [vmem:[#allocation8 + $0xa04] ss:$24 sps:$4 sm:$0xff]  }
 0x7ec   :  { %16673 = vmatpush1.bf16.msra.mxu1 %v21079_v57  ;;  %v10099_v57 = vrot.slane %v10094_v32, %v22158_v59 }
 0x7ed   :  { %17027 = vmatpush1.bf16.msra.mxu0 %v21082_v33  ;;  %16674 = vmatprep.subr.bf16.mxu1 %v21087_v20  ;;  %v21139_v33 = vld [vmem:[#allocation8 + $0x1508] ss:$24 sps:$4 sm:$0xff]  }
 0x7ee   :  { %17028 = vmatprep.subr.bf16.mxu0 %v21090_v6  ;;  %v21142_v20 = vld [vmem:[#allocation8 + $0xa00] ss:$24 sps:$4 sm:$0xff]   ;;  %v10103_v6 = vrot.slane %v10094_v32, %v22161_v61  ;;  %v21189_v32 = vld [vmem:[#allocation8 + $0x168c] ss:$24 sps:$4 sm:$0xff]  }
 0x7f0   :  { %16675 = vmatpush1.bf16.msra.mxu1 %v21085_v58  ;;  %v21147_v58 = vld [vmem:[#allocation8 + $0x153c] ss:$24 sps:$4 sm:$0xff]  }
 0x7f1   :  { %17029 = vmatpush1.bf16.msra.mxu0 %v21088_v49  ;;  %16676 = vmatprep.subr.bf16.mxu1 %v21093_v7  ;;  %v21150_v49 = vld [vmem:[#allocation8 + $0xa34] ss:$24 sps:$4 sm:$0xff]  }
 0x7f2   :  { %17030 = vmatprep.subr.bf16.mxu0 %v21096_v4 }
 0x7f4   :  { %16677 = vmatpush1.bf16.msra.mxu1 %v21091_v48 }
 0x7f5   :  { %17031 = vmatpush1.bf16.msra.mxu0 %v21094_v8  ;;  %16678 = vmatprep.subr.bf16.mxu1 %v21099_v51  ;;  %v21145_v8 = vld [vmem:[#allocation8 + $0x1538] ss:$24 sps:$4 sm:$0xff]  }
 0x7f6   :  { %17032 = vmatprep.subr.bf16.mxu0 %v21102_v30  ;;  %v21148_v30 = vld [vmem:[#allocation8 + $0xa30] ss:$24 sps:$4 sm:$0xff]  }
 0x7f8   :  { %16679 = vmatpush1.bf16.msra.mxu1 %v21097_v39  ;;  %v21153_v39 = vld [vmem:[#allocation8 + $0x156c] ss:$24 sps:$4 sm:$0xff]  }
 0x7f9   :  { %17033 = vmatpush1.bf16.msra.mxu0 %v21100_v17  ;;  %16680 = vmatprep.subr.bf16.mxu1 %v21105_v23  ;;  %v21156_v23 = vld [vmem:[#allocation8 + $0xa64] ss:$24 sps:$4 sm:$0xff]  }
 0x7fa   :  { %17034 = vmatprep.subr.bf16.mxu0 %v21108_v25 }
 0x7fc   :  { %16681 = vmatpush1.bf16.msra.mxu1 %v21103_v12  ;;  %v21151_v12 = vld [vmem:[#allocation8 + $0x1568] ss:$24 sps:$4 sm:$0xff]  }
 0x7fd   :  { %17035 = vmatpush1.bf16.msra.mxu0 %v21106_v31  ;;  %16682 = vmatprep.subr.bf16.mxu1 %v21111_v63  ;;  %v21154_v31 = vld [vmem:[#allocation8 + $0xa60] ss:$24 sps:$4 sm:$0xff]   ;;  %v21159_v63 = vld [vmem:[#allocation8 + $0x159c] ss:$24 sps:$4 sm:$0xff]  }
 0x7fe   :  { %17047 = vmatprep.subr.bf16.mxu0 %v21114_v2  ;;  %v21162_v2 = vld [vmem:[#allocation8 + $0xa94] ss:$24 sps:$4 sm:$0xff]  }
 0x800   :  { %17037 = vmatmul.mubr.bf16.vlgmr.msra.gmra.mrb[20].mxu0 %v22359_v0  ;;  %16683 = vmatpush1.bf16.msra.mxu1 %v21109_v36  ;;  %v21127_v0 = vld [vmem:[#allocation8 + $0x14a8] ss:$24 sps:$4 sm:$0xff]   ;;  %v21157_v36 = vld [vmem:[#allocation8 + $0x1598] ss:$24 sps:$4 sm:$0xff]  }
 0x801   :  { %17048 = vmatpush1.bf16.msra.mxu0 %v21112_v22  ;;  %17079 = vmatprep.mubr.bf16.mxu0 %v22422_v26  ;;  %v21138_v26 = vld [vmem:[#allocation8 + $0x9d4] ss:$24 sps:$4 sm:$0xff]   ;;  %v21160_v22 = vld [vmem:[#allocation8 + $0xa90] ss:$24 sps:$4 sm:$0xff]  }
 0x802   :  { %16684 = vmatprep.subr.bf16.mxu1 %v21117_v19  ;;  %17049 = vmatprep.subr.bf16.mxu0 %v21120_v52  ;;  %v21165_v19 = vld [vmem:[#allocation8 + $0x15cc] ss:$24 sps:$4 sm:$0xff]  }
 0x803   :  { %v21168_v52 = vld [vmem:[#allocation8 + $0xac4] ss:$24 sps:$4 sm:$0xff]  }
 0x804   :  { %16685 = vmatpush1.bf16.msra.mxu1 %v21115_v46  ;;  %v21163_v46 = vld [vmem:[#allocation8 + $0x15c8] ss:$24 sps:$4 sm:$0xff]  }
 0x805   :  { %17050 = vmatpush1.bf16.msra.mxu0 %v21118_v62  ;;  %16686 = vmatprep.subr.bf16.mxu1 %v21123_v37  ;;  %v21166_v62 = vld [vmem:[#allocation8 + $0xac0] ss:$24 sps:$4 sm:$0xff]   ;;  %v21171_v37 = vld [vmem:[#allocation8 + $0x15fc] ss:$24 sps:$4 sm:$0xff]  }
 0x806   :  { %17051 = vmatprep.subr.bf16.mxu0 %v21126_v54  ;;  %v21174_v54 = vld [vmem:[#allocation8 + $0xaf4] ss:$24 sps:$4 sm:$0xff]  }
 0x808   :  { %16687 = vmatpush1.bf16.msra.mxu1 %v21121_v41  ;;  %v21169_v41 = vld [vmem:[#allocation8 + $0x15f8] ss:$24 sps:$4 sm:$0xff]  }
 0x809   :  { %17052 = vmatpush1.bf16.msra.mxu0 %v21124_v11  ;;  %16688 = vmatprep.subr.bf16.mxu1 %v21129_v10  ;;  %v21172_v11 = vld [vmem:[#allocation8 + $0xaf0] ss:$24 sps:$4 sm:$0xff]   ;;  %v21177_v10 = vld [vmem:[#allocation8 + $0x162c] ss:$24 sps:$4 sm:$0xff]  }
 0x80a   :  { %17053 = vmatprep.subr.bf16.mxu0 %v21132_v28  ;;  %v21180_v28 = vld [vmem:[#allocation8 + $0xb24] ss:$24 sps:$4 sm:$0xff]  }
 0x80c   :  { %16689 = vmatpush1.bf16.msra.mxu1 %v21127_v0  ;;  %v21175_v0 = vld [vmem:[#allocation8 + $0x1628] ss:$24 sps:$4 sm:$0xff]  }
 0x80d   :  { %17054 = vmatpush1.bf16.msra.mxu0 %v21130_v5  ;;  %16690 = vmatprep.subr.bf16.mxu1 %v21135_v29  ;;  %v21178_v5 = vld [vmem:[#allocation8 + $0xb20] ss:$24 sps:$4 sm:$0xff]   ;;  %v21183_v29 = vld [vmem:[#allocation8 + $0x165c] ss:$24 sps:$4 sm:$0xff]  }
 0x80e   :  { %17055 = vmatprep.subr.bf16.mxu0 %v21138_v26  ;;  %v21186_v26 = vld [vmem:[#allocation8 + $0xb54] ss:$24 sps:$4 sm:$0xff]  }
 0x810   :  { %16691 = vmatpush1.bf16.msra.mxu1 %v21133_v35  ;;  %v21181_v35 = vld [vmem:[#allocation8 + $0x1658] ss:$24 sps:$4 sm:$0xff]  }
 0x811   :  { %17056 = vmatpush1.bf16.msra.mxu0 %v21136_v40  ;;  %16703 = vmatprep.subr.bf16.mxu1 %v21141_v34  ;;  %v21184_v40 = vld [vmem:[#allocation8 + $0xb50] ss:$24 sps:$4 sm:$0xff]   ;;  %v21192_v34 = vld [vmem:[#allocation8 + $0xb84] ss:$24 sps:$4 sm:$0xff]  }
 0x812   :  { %17057 = vmatprep.subr.bf16.mxu0 %v21144_v56  ;;  %v21187_v56 = vld [vmem:[#allocation8 + $0x1688] ss:$24 sps:$4 sm:$0xff]  }
 0x813   :  { %v16393_v7 = vpop.f32.mrb[16].mxu0  ;;  %16693 = vmatmul.mubr.bf16.vlgmr.msra.gmra.mrb[32].mxu1 %v22311_v13 }
 0x814   :  { %v19817_v4 = vadd.f32 %v16393_v7, %v10099_v57  ;;  %v16395_v48 = vpop.f32.mrb[17].mxu0  ;;  %16704 = vmatpush1.bf16.msra.mxu1 %v21139_v33  ;;  %16735 = vmatprep.mubr.bf16.mxu1 %v22464_v14  ;;  %v21195_v33 = vld [vmem:[#allocation8 + $0x16bc] ss:$24 sps:$4 sm:$0xff]  }
 0x815   :  { %v19818_v51 = vadd.f32 %v16395_v48, %v10103_v6  ;;  %17058 = vmatpush1.bf16.msra.mxu0 %v21142_v20  ;;  %v16397_v59 = vpop.f32.mrb[18].mxu0  ;;  %16705 = vmatprep.subr.bf16.mxu1 %v21147_v58  ;;  %v21198_v20 = vld [vmem:[#allocation8 + $0xbb4] ss:$24 sps:$4 sm:$0xff]   ;;  %v21196_v58 = vld [vmem:[#allocation8 + $0xbb0] ss:$24 sps:$4 sm:$0xff]  }
 0x816   :  { %17434 = vst [vmem:[#allocation10] sm:$0xff] %v19817_v4  ;;  %v19819_v61 = vadd.f32 %v16397_v59, %v10099_v57  ;;  %v16399_v17 = vpop.f32.mrb[19].mxu0  ;;  %17059 = vmatprep.subr.bf16.mxu0 %v21150_v49  ;;  %v21190_v57 = vld [vmem:[#allocation8 + $0xb80] ss:$24 sps:$4 sm:$0xff]   ;;  %v21201_v49 = vld [vmem:[#allocation8 + $0x16ec] ss:$24 sps:$4 sm:$0xff]  }
 0x817   :  { %17435 = vst [vmem:[#allocation10 + $0x8] sm:$0xff] %v19818_v51  ;;  %v19820_v25 = vadd.f32 %v16399_v17, %v10103_v6  ;;  %v21193_v6 = vld [vmem:[#allocation8 + $0x16b8] ss:$24 sps:$4 sm:$0xff]   ;;  %v21204_v7 = vld [vmem:[#allocation8 + $0xbe4] ss:$24 sps:$4 sm:$0xff]  }
 0x818   :  { %17440 = vst [vmem:[#allocation10 + $0x30] sm:$0xff] %v19819_v61  ;;  %16706 = vmatpush1.bf16.msra.mxu1 %v21145_v8  ;;  %v21199_v4 = vld [vmem:[#allocation8 + $0x16e8] ss:$24 sps:$4 sm:$0xff]   ;;  %v21207_v8 = vld [vmem:[#allocation8 + $0x171c] ss:$24 sps:$4 sm:$0xff]  }
 0x819   :  { %17441 = vst [vmem:[#allocation10 + $0x38] sm:$0xff] %v19820_v25  ;;  %17060 = vmatpush1.bf16.msra.mxu0 %v21148_v30  ;;  %16707 = vmatprep.subr.bf16.mxu1 %v21153_v39  ;;  %v21202_v48 = vld [vmem:[#allocation8 + $0xbe0] ss:$24 sps:$4 sm:$0xff]   ;;  %v21210_v51 = vld [vmem:[#allocation8 + $0xc14] ss:$24 sps:$4 sm:$0xff]  }
 0x81a   :  { %17061 = vmatprep.subr.bf16.mxu0 %v21156_v23  ;;  %v21205_v59 = vld [vmem:[#allocation8 + $0x1718] ss:$24 sps:$4 sm:$0xff]   ;;  %v21213_v39 = vld [vmem:[#allocation8 + $0x174c] ss:$24 sps:$4 sm:$0xff]   ;;  %v21211_v17 = vld [vmem:[#allocation8 + $0x1748] ss:$24 sps:$4 sm:$0xff]  }
 0x81b   :  { %v21208_v30 = vld [vmem:[#allocation8 + $0xc10] ss:$24 sps:$4 sm:$0xff]   ;;  %v21216_v61 = vld [vmem:[#allocation8 + $0xc44] ss:$24 sps:$4 sm:$0xff]   ;;  %v21214_v23 = vld [vmem:[#allocation8 + $0xc40] ss:$24 sps:$4 sm:$0xff]  }
 0x81c   :  { %16708 = vmatpush1.bf16.msra.mxu1 %v21151_v12  ;;  %v21219_v25 = vld [vmem:[#allocation8 + $0x177c] ss:$24 sps:$4 sm:$0xff]  }
 0x81d   :  { %17062 = vmatpush1.bf16.msra.mxu0 %v21154_v31  ;;  %16709 = vmatprep.subr.bf16.mxu1 %v21159_v63  ;;  %v21222_v12 = vld [vmem:[#allocation8 + $0xc74] ss:$24 sps:$4 sm:$0xff]   ;;  %v21217_v31 = vld [vmem:[#allocation8 + $0x1778] ss:$24 sps:$4 sm:$0xff]  }
 0x81e   :  { %17063 = vmatprep.subr.bf16.mxu0 %v21162_v2  ;;  %v21220_v63 = vld [vmem:[#allocation8 + $0xc70] ss:$24 sps:$4 sm:$0xff]   ;;  %v21225_v2 = vld [vmem:[#allocation8 + $0x17ac] ss:$24 sps:$4 sm:$0xff]  }
 0x820   :  { %16710 = vmatpush1.bf16.msra.mxu1 %v21157_v36  ;;  %v21228_v36 = vld [vmem:[#allocation8 + $0xca4] ss:$24 sps:$4 sm:$0xff]  }
 0x821   :  { %17064 = vmatpush1.bf16.msra.mxu0 %v21160_v22  ;;  %16711 = vmatprep.subr.bf16.mxu1 %v21165_v19  ;;  %v21226_v22 = vld [vmem:[#allocation8 + $0xca0] ss:$24 sps:$4 sm:$0xff]   ;;  %v21231_v19 = vld [vmem:[#allocation8 + $0x17dc] ss:$24 sps:$4 sm:$0xff]  }
 0x822   :  { %17065 = vmatprep.subr.bf16.mxu0 %v21168_v52  ;;  %v21229_v52 = vld [vmem:[#allocation8 + $0x17d8] ss:$24 sps:$4 sm:$0xff]  }
 0x824   :  { %16712 = vmatpush1.bf16.msra.mxu1 %v21163_v46  ;;  %v21232_v46 = vld [vmem:[#allocation8 + $0xcd0] ss:$24 sps:$4 sm:$0xff]  }
 0x825   :  { %17066 = vmatpush1.bf16.msra.mxu0 %v21166_v62  ;;  %16713 = vmatprep.subr.bf16.mxu1 %v21171_v37  ;;  %v21237_v62 = vld [vmem:[#allocation8 + $0x180c] ss:$24 sps:$4 sm:$0xff]  }
 0x826   :  { %17067 = vmatprep.subr.bf16.mxu0 %v21174_v54  ;;  %v21240_v37 = vld [vmem:[#allocation8 + $0xd04] ss:$24 sps:$4 sm:$0xff]   ;;  %v21235_v54 = vld [vmem:[#allocation8 + $0x1808] ss:$24 sps:$4 sm:$0xff]  }
 0x828   :  { %16714 = vmatpush1.bf16.msra.mxu1 %v21169_v41  ;;  %v21238_v41 = vld [vmem:[#allocation8 + $0xd00] ss:$24 sps:$4 sm:$0xff]  }
 0x829   :  { %17068 = vmatpush1.bf16.msra.mxu0 %v21172_v11  ;;  %16715 = vmatprep.subr.bf16.mxu1 %v21177_v10  ;;  %v21243_v11 = vld [vmem:[#allocation8 + $0x183c] ss:$24 sps:$4 sm:$0xff]  }
 0x82a   :  { %17069 = vmatprep.subr.bf16.mxu0 %v21180_v28  ;;  %v21246_v10 = vld [vmem:[#allocation8 + $0xd34] ss:$24 sps:$4 sm:$0xff]   ;;  %v21241_v28 = vld [vmem:[#allocation8 + $0x1838] ss:$24 sps:$4 sm:$0xff]  }
 0x82c   :  { %16716 = vmatpush1.bf16.msra.mxu1 %v21175_v0  ;;  %v21244_v0 = vld [vmem:[#allocation8 + $0xd30] ss:$24 sps:$4 sm:$0xff]  }
 0x82d   :  { %17070 = vmatpush1.bf16.msra.mxu0 %v21178_v5  ;;  %16717 = vmatprep.subr.bf16.mxu1 %v21183_v29  ;;  %v21249_v5 = vld [vmem:[#allocation8 + $0x186c] ss:$24 sps:$4 sm:$0xff]  }
 0x82e   :  { %17071 = vmatprep.subr.bf16.mxu0 %v21186_v26  ;;  %v21252_v29 = vld [vmem:[#allocation8 + $0xd64] ss:$24 sps:$4 sm:$0xff]   ;;  %v21247_v26 = vld [vmem:[#allocation8 + $0x1868] ss:$24 sps:$4 sm:$0xff]  }
 0x830   :  { %16718 = vmatpush1.bf16.msra.mxu1 %v21181_v35  ;;  %v21250_v35 = vld [vmem:[#allocation8 + $0xd60] ss:$24 sps:$4 sm:$0xff]  }
 0x831   :  { %17072 = vmatpush1.bf16.msra.mxu0 %v21184_v40  ;;  %16719 = vmatprep.subr.bf16.mxu1 %v21189_v32  ;;  %v21255_v40 = vld [vmem:[#allocation8 + $0x189c] ss:$24 sps:$4 sm:$0xff]  }
 0x832   :  { %17073 = vmatprep.subr.bf16.mxu0 %v21192_v34  ;;  %v21258_v32 = vld [vmem:[#allocation8 + $0xd94] ss:$24 sps:$4 sm:$0xff]   ;;  %v21253_v34 = vld [vmem:[#allocation8 + $0x1898] ss:$24 sps:$4 sm:$0xff]  }
 0x834   :  { %16720 = vmatpush1.bf16.msra.mxu1 %v21187_v56  ;;  %v21256_v56 = vld [vmem:[#allocation8 + $0xd90] ss:$24 sps:$4 sm:$0xff]  }
 0x835   :  { %17074 = vmatpush1.bf16.msra.mxu0 %v21190_v57  ;;  %16721 = vmatprep.subr.bf16.mxu1 %v21195_v33  ;;  %v21261_v57 = vld [vmem:[#allocation8 + $0x18cc] ss:$24 sps:$4 sm:$0xff]  }
 0x836   :  { %17075 = vmatprep.subr.bf16.mxu0 %v21198_v20  ;;  %v21264_v33 = vld [vmem:[#allocation8 + $0xdc4] ss:$24 sps:$4 sm:$0xff]   ;;  %v21259_v20 = vld [vmem:[#allocation8 + $0x18c8] ss:$24 sps:$4 sm:$0xff]  }
 0x838   :  { %16722 = vmatpush1.bf16.msra.mxu1 %v21193_v6  ;;  %v21262_v6 = vld [vmem:[#allocation8 + $0xdc0] ss:$24 sps:$4 sm:$0xff]  }
 0x839   :  { %17076 = vmatpush1.bf16.msra.mxu0 %v21196_v58  ;;  %16723 = vmatprep.subr.bf16.mxu1 %v21201_v49  ;;  %v21267_v58 = vld [vmem:[#allocation8 + $0x18fc] ss:$24 sps:$4 sm:$0xff]  }
 0x83a   :  { %17077 = vmatprep.subr.bf16.mxu0 %v21204_v7  ;;  %v21270_v49 = vld [vmem:[#allocation8 + $0xdf4] ss:$24 sps:$4 sm:$0xff]   ;;  %v21265_v7 = vld [vmem:[#allocation8 + $0x18f8] ss:$24 sps:$4 sm:$0xff]  }
 0x83c   :  { %16724 = vmatpush1.bf16.msra.mxu1 %v21199_v4  ;;  %v21268_v4 = vld [vmem:[#allocation8 + $0xdf0] ss:$24 sps:$4 sm:$0xff]  }
 0x83d   :  { %17078 = vmatpush1.bf16.msra.mxu0 %v21202_v48  ;;  %16725 = vmatprep.subr.bf16.mxu1 %v21207_v8  ;;  %v21273_v48 = vld [vmem:[#allocation8 + $0x192c] ss:$24 sps:$4 sm:$0xff]  }
 0x83e   :  { %17090 = vmatprep.subr.bf16.mxu0 %v21210_v51  ;;  %v21276_v8 = vld [vmem:[#allocation8 + $0xe24] ss:$24 sps:$4 sm:$0xff]   ;;  %v21271_v51 = vld [vmem:[#allocation8 + $0x1928] ss:$24 sps:$4 sm:$0xff]  }
 0x840   :  { %17080 = vmatmul.mubr.bf16.vlgmr.msra.gmra.mrb[20].mxu0 %v22419_v18  ;;  %16726 = vmatpush1.bf16.msra.mxu1 %v21205_v59  ;;  %v21223_v18 = vld [vmem:[#allocation8 + $0x17a8] ss:$24 sps:$4 sm:$0xff]  }
 0x841   :  { %17091 = vmatpush1.bf16.msra.mxu0 %v21208_v30  ;;  %17122 = vmatprep.mubr.bf16.mxu0 %v22225_v24  ;;  %v21234_v24 = vld [vmem:[#allocation8 + $0xcd4] ss:$24 sps:$4 sm:$0xff]   ;;  %v21274_v59 = vld [vmem:[#allocation8 + $0xe20] ss:$24 sps:$4 sm:$0xff]  }
 0x842   :  { %16727 = vmatprep.subr.bf16.mxu1 %v21213_v39  ;;  %17092 = vmatprep.subr.bf16.mxu0 %v21216_v61  ;;  %v21279_v30 = vld [vmem:[#allocation8 + $0x195c] ss:$24 sps:$4 sm:$0xff]   ;;  %v21277_v61 = vld [vmem:[#allocation8 + $0x1958] ss:$24 sps:$4 sm:$0xff]  }
 0x843   :  { %v21282_v39 = vld [vmem:[#allocation8 + $0xe54] ss:$24 sps:$4 sm:$0xff]  }
 0x844   :  { %16728 = vmatpush1.bf16.msra.mxu1 %v21211_v17  ;;  %v21280_v17 = vld [vmem:[#allocation8 + $0xe50] ss:$24 sps:$4 sm:$0xff]  }
 0x845   :  { %17093 = vmatpush1.bf16.msra.mxu0 %v21214_v23  ;;  %16729 = vmatprep.subr.bf16.mxu1 %v21219_v25  ;;  %v21285_v23 = vld [vmem:[#allocation8 + $0x198c] ss:$24 sps:$4 sm:$0xff]  }
 0x846   :  { %17094 = vmatprep.subr.bf16.mxu0 %v21222_v12  ;;  %v21288_v25 = vld [vmem:[#allocation8 + $0xe84] ss:$24 sps:$4 sm:$0xff]   ;;  %v21283_v12 = vld [vmem:[#allocation8 + $0x1988] ss:$24 sps:$4 sm:$0xff]  }
 0x848   :  { %16730 = vmatpush1.bf16.msra.mxu1 %v21217_v31  ;;  %v21286_v31 = vld [vmem:[#allocation8 + $0xe80] ss:$24 sps:$4 sm:$0xff]  }
 0x849   :  { %17095 = vmatpush1.bf16.msra.mxu0 %v21220_v63  ;;  %16731 = vmatprep.subr.bf16.mxu1 %v21225_v2  ;;  %v21291_v63 = vld [vmem:[#allocation8 + $0x19bc] ss:$24 sps:$4 sm:$0xff]  }
 0x84a   :  { %17096 = vmatprep.subr.bf16.mxu0 %v21228_v36  ;;  %v21294_v2 = vld [vmem:[#allocation8 + $0xeb4] ss:$24 sps:$4 sm:$0xff]   ;;  %v21289_v36 = vld [vmem:[#allocation8 + $0x19b8] ss:$24 sps:$4 sm:$0xff]  }
 0x84c   :  { %16732 = vmatpush1.bf16.msra.mxu1 %v21223_v18  ;;  %v21292_v18 = vld [vmem:[#allocation8 + $0xeb0] ss:$24 sps:$4 sm:$0xff]  }
 0x84d   :  { %17097 = vmatpush1.bf16.msra.mxu0 %v21226_v22  ;;  %16733 = vmatprep.subr.bf16.mxu1 %v21231_v19  ;;  %v21297_v22 = vld [vmem:[#allocation8 + $0x19ec] ss:$24 sps:$4 sm:$0xff]  }
 0x84e   :  { %17098 = vmatprep.subr.bf16.mxu0 %v21234_v24  ;;  %v21300_v19 = vld [vmem:[#allocation8 + $0xee4] ss:$24 sps:$4 sm:$0xff]   ;;  %v21295_v24 = vld [vmem:[#allocation8 + $0x19e8] ss:$24 sps:$4 sm:$0xff]  }
 0x850   :  { %16734 = vmatpush1.bf16.msra.mxu1 %v21229_v52  ;;  %v21298_v52 = vld [vmem:[#allocation8 + $0xee0] ss:$24 sps:$4 sm:$0xff]  }
 0x851   :  { %17099 = vmatpush1.bf16.msra.mxu0 %v21232_v46  ;;  %16746 = vmatprep.subr.bf16.mxu1 %v21237_v62  ;;  %v21303_v46 = vld [vmem:[#allocation8 + $0x1a1c] ss:$24 sps:$4 sm:$0xff]  }
 0x852   :  { %17100 = vmatprep.subr.bf16.mxu0 %v21240_v37  ;;  %v21306_v62 = vld [vmem:[#allocation8 + $0xf14] ss:$24 sps:$4 sm:$0xff]   ;;  %v21301_v37 = vld [vmem:[#allocation8 + $0x1a18] ss:$24 sps:$4 sm:$0xff]  }
 0x853   :  { %16736 = vmatmul.mubr.bf16.vlgmr.msra.gmra.mrb[32].mxu1 %v22462_v47 }
 0x854   :  { %16747 = vmatpush1.bf16.msra.mxu1 %v21235_v54  ;;  %16778 = vmatprep.mubr.bf16.mxu1 %v22365_v27  ;;  %v21304_v54 = vld [vmem:[#allocation8 + $0xf10] ss:$24 sps:$4 sm:$0xff]  }
 0x855   :  { %17101 = vmatpush1.bf16.msra.mxu0 %v21238_v41  ;;  %16748 = vmatprep.subr.bf16.mxu1 %v21243_v11  ;;  %v21309_v41 = vld [vmem:[#allocation8 + $0x1a4c] ss:$24 sps:$4 sm:$0xff]  }
 0x856   :  { %17102 = vmatprep.subr.bf16.mxu0 %v21246_v10  ;;  %v21312_v11 = vld [vmem:[#allocation8 + $0xf44] ss:$24 sps:$4 sm:$0xff]   ;;  %v21307_v10 = vld [vmem:[#allocation8 + $0x1a48] ss:$24 sps:$4 sm:$0xff]  }
 0x858   :  { %16749 = vmatpush1.bf16.msra.mxu1 %v21241_v28  ;;  %v21310_v28 = vld [vmem:[#allocation8 + $0xf40] ss:$24 sps:$4 sm:$0xff]  }
 0x859   :  { %17103 = vmatpush1.bf16.msra.mxu0 %v21244_v0  ;;  %16750 = vmatprep.subr.bf16.mxu1 %v21249_v5  ;;  %v21315_v0 = vld [vmem:[#allocation8 + $0x1a7c] ss:$24 sps:$4 sm:$0xff]  }
 0x85a   :  { %17104 = vmatprep.subr.bf16.mxu0 %v21252_v29  ;;  %v21318_v5 = vld [vmem:[#allocation8 + $0xf74] ss:$24 sps:$4 sm:$0xff]   ;;  %v21313_v29 = vld [vmem:[#allocation8 + $0x1a78] ss:$24 sps:$4 sm:$0xff]  }
 0x85c   :  { %16751 = vmatpush1.bf16.msra.mxu1 %v21247_v26  ;;  %v21316_v26 = vld [vmem:[#allocation8 + $0xf70] ss:$24 sps:$4 sm:$0xff]  }
 0x85d   :  { %17105 = vmatpush1.bf16.msra.mxu0 %v21250_v35  ;;  %16752 = vmatprep.subr.bf16.mxu1 %v21255_v40  ;;  %v21321_v35 = vld [vmem:[#allocation8 + $0x1aac] ss:$24 sps:$4 sm:$0xff]  }
 0x85e   :  { %17106 = vmatprep.subr.bf16.mxu0 %v21258_v32  ;;  %v21324_v40 = vld [vmem:[#allocation8 + $0xfa4] ss:$24 sps:$4 sm:$0xff]   ;;  %v21322_v32 = vld [vmem:[#allocation8 + $0xfa0] ss:$24 sps:$4 sm:$0xff]  }
 0x860   :  { %16753 = vmatpush1.bf16.msra.mxu1 %v21253_v34  ;;  %v21327_v34 = vld [vmem:[#allocation8 + $0x1adc] ss:$24 sps:$4 sm:$0xff]  }
 0x861   :  { %17107 = vmatpush1.bf16.msra.mxu0 %v21256_v56  ;;  %16754 = vmatprep.subr.bf16.mxu1 %v21261_v57  ;;  %v21325_v56 = vld [vmem:[#allocation8 + $0x1ad8] ss:$24 sps:$4 sm:$0xff]  }
 0x862   :  { %17108 = vmatprep.subr.bf16.mxu0 %v21264_v33  ;;  %v21328_v57 = vld [vmem:[#allocation8 + $0xfd0] ss:$24 sps:$4 sm:$0xff]   ;;  %v21333_v33 = vld [vmem:[#allocation8 + $0x1b0c] ss:$24 sps:$4 sm:$0xff]  }
 0x864   :  { %16755 = vmatpush1.bf16.msra.mxu1 %v21259_v20  ;;  %v21336_v20 = vld [vmem:[#allocation8 + $0x1004] ss:$24 sps:$4 sm:$0xff]  }
 0x865   :  { %17109 = vmatpush1.bf16.msra.mxu0 %v21262_v6  ;;  %16756 = vmatprep.subr.bf16.mxu1 %v21267_v58  ;;  %v21331_v6 = vld [vmem:[#allocation8 + $0x1b08] ss:$24 sps:$4 sm:$0xff]  }
 0x866   :  { %17110 = vmatprep.subr.bf16.mxu0 %v21270_v49  ;;  %v21334_v58 = vld [vmem:[#allocation8 + $0x1000] ss:$24 sps:$4 sm:$0xff]   ;;  %v21339_v49 = vld [vmem:[#allocation8 + $0x1b3c] ss:$24 sps:$4 sm:$0xff]  }
 0x868   :  { %16757 = vmatpush1.bf16.msra.mxu1 %v21265_v7  ;;  %v21342_v7 = vld [vmem:[#allocation8 + $0x1034] ss:$24 sps:$4 sm:$0xff]  }
 0x869   :  { %17111 = vmatpush1.bf16.msra.mxu0 %v21268_v4  ;;  %16758 = vmatprep.subr.bf16.mxu1 %v21273_v48  ;;  %v21337_v4 = vld [vmem:[#allocation8 + $0x1b38] ss:$24 sps:$4 sm:$0xff]  }
 0x86a   :  { %17112 = vmatprep.subr.bf16.mxu0 %v21276_v8  ;;  %v21340_v48 = vld [vmem:[#allocation8 + $0x1030] ss:$24 sps:$4 sm:$0xff]   ;;  %v21345_v8 = vld [vmem:[#allocation8 + $0x1b6c] ss:$24 sps:$4 sm:$0xff]  }
 0x86c   :  { %16759 = vmatpush1.bf16.msra.mxu1 %v21271_v51  ;;  %v21348_v51 = vld [vmem:[#allocation8 + $0x1064] ss:$24 sps:$4 sm:$0xff]  }
 0x86d   :  { %17113 = vmatpush1.bf16.msra.mxu0 %v21274_v59  ;;  %16760 = vmatprep.subr.bf16.mxu1 %v21279_v30  ;;  %v21343_v59 = vld [vmem:[#allocation8 + $0x1b68] ss:$24 sps:$4 sm:$0xff]  }
 0x86e   :  { %17114 = vmatprep.subr.bf16.mxu0 %v21282_v39  ;;  %v21346_v30 = vld [vmem:[#allocation8 + $0x1060] ss:$24 sps:$4 sm:$0xff]   ;;  %v21351_v39 = vld [vmem:[#allocation8 + $0x1b9c] ss:$24 sps:$4 sm:$0xff]  }
 0x870   :  { %16761 = vmatpush1.bf16.msra.mxu1 %v21277_v61  ;;  %v21354_v61 = vld [vmem:[#allocation8 + $0x1094] ss:$24 sps:$4 sm:$0xff]  }
 0x871   :  { %17115 = vmatpush1.bf16.msra.mxu0 %v21280_v17  ;;  %16762 = vmatprep.subr.bf16.mxu1 %v21285_v23  ;;  %v21349_v17 = vld [vmem:[#allocation8 + $0x1b98] ss:$24 sps:$4 sm:$0xff]  }
 0x872   :  { %17116 = vmatprep.subr.bf16.mxu0 %v21288_v25  ;;  %v21352_v23 = vld [vmem:[#allocation8 + $0x1090] ss:$24 sps:$4 sm:$0xff]   ;;  %v21357_v25 = vld [vmem:[#allocation8 + $0x1bcc] ss:$24 sps:$4 sm:$0xff]  }
 0x874   :  { %16763 = vmatpush1.bf16.msra.mxu1 %v21283_v12  ;;  %v21360_v12 = vld [vmem:[#allocation8 + $0x10c4] ss:$24 sps:$4 sm:$0xff]  }
 0x875   :  { %17117 = vmatpush1.bf16.msra.mxu0 %v21286_v31  ;;  %16764 = vmatprep.subr.bf16.mxu1 %v21291_v63  ;;  %v21355_v31 = vld [vmem:[#allocation8 + $0x1bc8] ss:$24 sps:$4 sm:$0xff]  }
 0x876   :  { %17118 = vmatprep.subr.bf16.mxu0 %v21294_v2  ;;  %v21358_v63 = vld [vmem:[#allocation8 + $0x10c0] ss:$24 sps:$4 sm:$0xff]   ;;  %v21363_v2 = vld [vmem:[#allocation8 + $0x1bfc] ss:$24 sps:$4 sm:$0xff]  }
 0x878   :  { %16765 = vmatpush1.bf16.msra.mxu1 %v21289_v36  ;;  %v21366_v36 = vld [vmem:[#allocation8 + $0x10f4] ss:$24 sps:$4 sm:$0xff]  }
 0x879   :  { %17119 = vmatpush1.bf16.msra.mxu0 %v21292_v18  ;;  %16766 = vmatprep.subr.bf16.mxu1 %v21297_v22  ;;  %v21361_v18 = vld [vmem:[#allocation8 + $0x1bf8] ss:$24 sps:$4 sm:$0xff]  }
 0x87a   :  { %17120 = vmatprep.subr.bf16.mxu0 %v21300_v19  ;;  %v21364_v22 = vld [vmem:[#allocation8 + $0x10f0] ss:$24 sps:$4 sm:$0xff]   ;;  %v21369_v19 = vld [vmem:[#allocation8 + $0x1c2c] ss:$24 sps:$4 sm:$0xff]  }
 0x87c   :  { %16767 = vmatpush1.bf16.msra.mxu1 %v21295_v24  ;;  %v21372_v24 = vld [vmem:[#allocation8 + $0x1124] ss:$24 sps:$4 sm:$0xff]  }
 0x87d   :  { %17121 = vmatpush1.bf16.msra.mxu0 %v21298_v52  ;;  %16768 = vmatprep.subr.bf16.mxu1 %v21303_v46  ;;  %v21367_v52 = vld [vmem:[#allocation8 + $0x1c28] ss:$24 sps:$4 sm:$0xff]  }
 0x87e   :  { %17133 = vmatprep.subr.bf16.mxu0 %v21306_v62  ;;  %v21370_v46 = vld [vmem:[#allocation8 + $0x1120] ss:$24 sps:$4 sm:$0xff]   ;;  %v21375_v62 = vld [vmem:[#allocation8 + $0x1c5c] ss:$24 sps:$4 sm:$0xff]  }
 0x880   :  { %17123 = vmatmul.mubr.bf16.vlgmr.msra.gmra.mrb[20].mxu0 %v22223_v16  ;;  %16769 = vmatpush1.bf16.msra.mxu1 %v21301_v37  ;;  %v21319_v16 = vld [vmem:[#allocation8 + $0x1aa8] ss:$24 sps:$4 sm:$0xff]   ;;  %v21378_v37 = vld [vmem:[#allocation8 + $0x1154] ss:$24 sps:$4 sm:$0xff]  }
 0x881   :  { %17134 = vmatpush1.bf16.msra.mxu0 %v21304_v54  ;;  %17165 = vmatprep.mubr.bf16.mxu0 %v22446_v3  ;;  %v21330_v3 = vld [vmem:[#allocation8 + $0xfd4] ss:$24 sps:$4 sm:$0xff]   ;;  %v21373_v54 = vld [vmem:[#allocation8 + $0x1c58] ss:$24 sps:$4 sm:$0xff]  }
 0x882   :  { %16770 = vmatprep.subr.bf16.mxu1 %v21309_v41  ;;  %17135 = vmatprep.subr.bf16.mxu0 %v21312_v11  ;;  %v21376_v41 = vld [vmem:[#allocation8 + $0x1150] ss:$24 sps:$4 sm:$0xff]   ;;  %v21381_v11 = vld [vmem:[#allocation8 + $0x1c8c] ss:$24 sps:$4 sm:$0xff]  }
 0x884   :  { %16771 = vmatpush1.bf16.msra.mxu1 %v21307_v10  ;;  %v21384_v10 = vld [vmem:[#allocation8 + $0x1184] ss:$24 sps:$4 sm:$0xff]  }
 0x885   :  { %17136 = vmatpush1.bf16.msra.mxu0 %v21310_v28  ;;  %16772 = vmatprep.subr.bf16.mxu1 %v21315_v0  ;;  %v21379_v28 = vld [vmem:[#allocation8 + $0x1c88] ss:$24 sps:$4 sm:$0xff]  }
 0x886   :  { %17137 = vmatprep.subr.bf16.mxu0 %v21318_v5  ;;  %v21382_v0 = vld [vmem:[#allocation8 + $0x1180] ss:$24 sps:$4 sm:$0xff]   ;;  %v21387_v5 = vld [vmem:[#allocation8 + $0x1cbc] ss:$24 sps:$4 sm:$0xff]  }
 0x888   :  { %16773 = vmatpush1.bf16.msra.mxu1 %v21313_v29  ;;  %v21390_v29 = vld [vmem:[#allocation8 + $0x11b4] ss:$24 sps:$4 sm:$0xff]  }
 0x889   :  { %17138 = vmatpush1.bf16.msra.mxu0 %v21316_v26  ;;  %16774 = vmatprep.subr.bf16.mxu1 %v21321_v35  ;;  %v21385_v26 = vld [vmem:[#allocation8 + $0x1cb8] ss:$24 sps:$4 sm:$0xff]  }
 0x88a   :  { %17139 = vmatprep.subr.bf16.mxu0 %v21324_v40  ;;  %v21388_v35 = vld [vmem:[#allocation8 + $0x11b0] ss:$24 sps:$4 sm:$0xff]   ;;  %v21393_v40 = vld [vmem:[#allocation8 + $0x1cec] ss:$24 sps:$4 sm:$0xff]  }
 0x88c   :  { %16775 = vmatpush1.bf16.msra.mxu1 %v21319_v16  ;;  %v21396_v16 = vld [vmem:[#allocation8 + $0x11e4] ss:$24 sps:$4 sm:$0xff]  }
 0x88d   :  { %17140 = vmatpush1.bf16.msra.mxu0 %v21322_v32  ;;  %16776 = vmatprep.subr.bf16.mxu1 %v21327_v34  ;;  %v21391_v32 = vld [vmem:[#allocation8 + $0x1ce8] ss:$24 sps:$4 sm:$0xff]  }
 0x88e   :  { %17141 = vmatprep.subr.bf16.mxu0 %v21330_v3  ;;  %v21394_v34 = vld [vmem:[#allocation8 + $0x11e0] ss:$24 sps:$4 sm:$0xff]   ;;  %v21399_v3 = vld [vmem:[#allocation8 + $0x1d1c] ss:$24 sps:$4 sm:$0xff]  }
 0x890   :  { %16777 = vmatpush1.bf16.msra.mxu1 %v21325_v56  ;;  %v21402_v56 = vld [vmem:[#allocation8 + $0x1214] ss:$24 sps:$4 sm:$0xff]  }
 0x891   :  { %17142 = vmatpush1.bf16.msra.mxu0 %v21328_v57  ;;  %16789 = vmatprep.subr.bf16.mxu1 %v21333_v33  ;;  %v21397_v57 = vld [vmem:[#allocation8 + $0x1d18] ss:$24 sps:$4 sm:$0xff]  }
 0x892   :  { %17143 = vmatprep.subr.bf16.mxu0 %v21336_v20  ;;  %v21400_v33 = vld [vmem:[#allocation8 + $0x1210] ss:$24 sps:$4 sm:$0xff]   ;;  %v21405_v20 = vld [vmem:[#allocation8 + $0x1d4c] ss:$24 sps:$4 sm:$0xff]  }
 0x893   :  { %16779 = vmatmul.mubr.bf16.vlgmr.msra.gmra.mrb[32].mxu1 %v22363_v53 }
 0x894   :  { %16790 = vmatpush1.bf16.msra.mxu1 %v21331_v6  ;;  %16821 = vmatprep.mubr.bf16.mxu1 %v22484_v55  ;;  %v21408_v6 = vld [vmem:[#allocation8 + $0x1244] ss:$24 sps:$4 sm:$0xff]  }
 0x895   :  { %17144 = vmatpush1.bf16.msra.mxu0 %v21334_v58  ;;  %16791 = vmatprep.subr.bf16.mxu1 %v21339_v49  ;;  %v21403_v58 = vld [vmem:[#allocation8 + $0x1d48] ss:$24 sps:$4 sm:$0xff]  }
 0x896   :  { %17145 = vmatprep.subr.bf16.mxu0 %v21342_v7  ;;  %v21406_v49 = vld [vmem:[#allocation8 + $0x1240] ss:$24 sps:$4 sm:$0xff]   ;;  %v21411_v7 = vld [vmem:[#allocation8 + $0x1d7c] ss:$24 sps:$4 sm:$0xff]  }
 0x898   :  { %16792 = vmatpush1.bf16.msra.mxu1 %v21337_v4  ;;  %v21414_v4 = vld [vmem:[#allocation8 + $0x1274] ss:$24 sps:$4 sm:$0xff]  }
 0x899   :  { %17146 = vmatpush1.bf16.msra.mxu0 %v21340_v48  ;;  %16793 = vmatprep.subr.bf16.mxu1 %v21345_v8  ;;  %v21409_v48 = vld [vmem:[#allocation8 + $0x1d78] ss:$24 sps:$4 sm:$0xff]  }
 0x89a   :  { %17147 = vmatprep.subr.bf16.mxu0 %v21348_v51  ;;  %v21412_v8 = vld [vmem:[#allocation8 + $0x1270] ss:$24 sps:$4 sm:$0xff]   ;;  %v21417_v51 = vld [vmem:[#allocation8 + $0x1dac] ss:$24 sps:$4 sm:$0xff]  }
 0x89c   :  { %16794 = vmatpush1.bf16.msra.mxu1 %v21343_v59  ;;  %v21420_v59 = vld [vmem:[#allocation8 + $0x12a4] ss:$24 sps:$4 sm:$0xff]  }
 0x89d   :  { %17148 = vmatpush1.bf16.msra.mxu0 %v21346_v30  ;;  %16795 = vmatprep.subr.bf16.mxu1 %v21351_v39  ;;  %v21418_v30 = vld [vmem:[#allocation8 + $0x12a0] ss:$24 sps:$4 sm:$0xff]   ;;  %v21423_v39 = vld [vmem:[#allocation8 + $0x1ddc] ss:$24 sps:$4 sm:$0xff]  }
 0x89e   :  { %17149 = vmatprep.subr.bf16.mxu0 %v21354_v61  ;;  %v21421_v61 = vld [vmem:[#allocation8 + $0x1dd8] ss:$24 sps:$4 sm:$0xff]  }
 0x8a0   :  { %16796 = vmatpush1.bf16.msra.mxu1 %v21349_v17  ;;  %v21424_v17 = vld [vmem:[#allocation8 + $0x12d0] ss:$24 sps:$4 sm:$0xff]  }
 0x8a1   :  { %17150 = vmatpush1.bf16.msra.mxu0 %v21352_v23  ;;  %16797 = vmatprep.subr.bf16.mxu1 %v21357_v25  ;;  %v21429_v23 = vld [vmem:[#allocation8 + $0x1e0c] ss:$24 sps:$4 sm:$0xff]  }
 0x8a2   :  { %17151 = vmatprep.subr.bf16.mxu0 %v21360_v12  ;;  %v21432_v25 = vld [vmem:[#allocation8 + $0x1304] ss:$24 sps:$4 sm:$0xff]   ;;  %v21427_v12 = vld [vmem:[#allocation8 + $0x1e08] ss:$24 sps:$4 sm:$0xff]  }
 0x8a4   :  { %16798 = vmatpush1.bf16.msra.mxu1 %v21355_v31  ;;  %v21430_v31 = vld [vmem:[#allocation8 + $0x1300] ss:$24 sps:$4 sm:$0xff]  }
 0x8a5   :  { %17152 = vmatpush1.bf16.msra.mxu0 %v21358_v63  ;;  %16799 = vmatprep.subr.bf16.mxu1 %v21363_v2  ;;  %v21435_v63 = vld [vmem:[#allocation8 + $0x1e3c] ss:$24 sps:$4 sm:$0xff]  }
 0x8a6   :  { %17153 = vmatprep.subr.bf16.mxu0 %v21366_v36  ;;  %v21438_v2 = vld [vmem:[#allocation8 + $0x1334] ss:$24 sps:$4 sm:$0xff]   ;;  %v21433_v36 = vld [vmem:[#allocation8 + $0x1e38] ss:$24 sps:$4 sm:$0xff]  }
 0x8a8   :  { %16800 = vmatpush1.bf16.msra.mxu1 %v21361_v18  ;;  %v21436_v18 = vld [vmem:[#allocation8 + $0x1330] ss:$24 sps:$4 sm:$0xff]  }
 0x8a9   :  { %17154 = vmatpush1.bf16.msra.mxu0 %v21364_v22  ;;  %16801 = vmatprep.subr.bf16.mxu1 %v21369_v19  ;;  %v21441_v22 = vld [vmem:[#allocation8 + $0x1e6c] ss:$24 sps:$4 sm:$0xff]  }
 0x8aa   :  { %17155 = vmatprep.subr.bf16.mxu0 %v21372_v24  ;;  %v21444_v19 = vld [vmem:[#allocation8 + $0x1364] ss:$24 sps:$4 sm:$0xff]   ;;  %v21439_v24 = vld [vmem:[#allocation8 + $0x1e68] ss:$24 sps:$4 sm:$0xff]  }
 0x8ac   :  { %16802 = vmatpush1.bf16.msra.mxu1 %v21367_v52  ;;  %v21442_v52 = vld [vmem:[#allocation8 + $0x1360] ss:$24 sps:$4 sm:$0xff]  }
 0x8ad   :  { %17156 = vmatpush1.bf16.msra.mxu0 %v21370_v46  ;;  %16803 = vmatprep.subr.bf16.mxu1 %v21375_v62  ;;  %v21447_v46 = vld [vmem:[#allocation8 + $0x1e9c] ss:$24 sps:$4 sm:$0xff]  }
 0x8ae   :  { %17157 = vmatprep.subr.bf16.mxu0 %v21378_v37  ;;  %v21450_v62 = vld [vmem:[#allocation8 + $0x1394] ss:$24 sps:$4 sm:$0xff]   ;;  %v21445_v37 = vld [vmem:[#allocation8 + $0x1e98] ss:$24 sps:$4 sm:$0xff]  }
 0x8b0   :  { %16804 = vmatpush1.bf16.msra.mxu1 %v21373_v54  ;;  %v21448_v54 = vld [vmem:[#allocation8 + $0x1390] ss:$24 sps:$4 sm:$0xff]  }
 0x8b1   :  { %17158 = vmatpush1.bf16.msra.mxu0 %v21376_v41  ;;  %16805 = vmatprep.subr.bf16.mxu1 %v21381_v11  ;;  %v21453_v41 = vld [vmem:[#allocation8 + $0x1ecc] ss:$24 sps:$4 sm:$0xff]  }
 0x8b2   :  { %17159 = vmatprep.subr.bf16.mxu0 %v21384_v10  ;;  %v21456_v11 = vld [vmem:[#allocation8 + $0x13c4] ss:$24 sps:$4 sm:$0xff]   ;;  %v21451_v10 = vld [vmem:[#allocation8 + $0x1ec8] ss:$24 sps:$4 sm:$0xff]  }
 0x8b4   :  { %16806 = vmatpush1.bf16.msra.mxu1 %v21379_v28  ;;  %v21454_v28 = vld [vmem:[#allocation8 + $0x13c0] ss:$24 sps:$4 sm:$0xff]  }
 0x8b5   :  { %17160 = vmatpush1.bf16.msra.mxu0 %v21382_v0  ;;  %16807 = vmatprep.subr.bf16.mxu1 %v21387_v5  ;;  %v21459_v0 = vld [vmem:[#allocation8 + $0x1efc] ss:$24 sps:$4 sm:$0xff]  }
 0x8b6   :  { %17161 = vmatprep.subr.bf16.mxu0 %v21390_v29  ;;  %v21462_v5 = vld [vmem:[#allocation8 + $0x13f4] ss:$24 sps:$4 sm:$0xff]   ;;  %v21457_v29 = vld [vmem:[#allocation8 + $0x1ef8] ss:$24 sps:$4 sm:$0xff]  }
 0x8b8   :  { %16808 = vmatpush1.bf16.msra.mxu1 %v21385_v26  ;;  %v21460_v26 = vld [vmem:[#allocation8 + $0x13f0] ss:$24 sps:$4 sm:$0xff]  }
 0x8b9   :  { %17162 = vmatpush1.bf16.msra.mxu0 %v21388_v35  ;;  %16809 = vmatprep.subr.bf16.mxu1 %v21393_v40  ;;  %v21465_v35 = vld [vmem:[#allocation8 + $0x1f2c] ss:$24 sps:$4 sm:$0xff]  }
 0x8ba   :  { %17163 = vmatprep.subr.bf16.mxu0 %v21396_v16  ;;  %v21468_v40 = vld [vmem:[#allocation8 + $0x1424] ss:$24 sps:$4 sm:$0xff]   ;;  %v21463_v16 = vld [vmem:[#allocation8 + $0x1f28] ss:$24 sps:$4 sm:$0xff]  }
 0x8bc   :  { %16810 = vmatpush1.bf16.msra.mxu1 %v21391_v32  ;;  %v21466_v32 = vld [vmem:[#allocation8 + $0x1420] ss:$24 sps:$4 sm:$0xff]  }
 0x8bd   :  { %17164 = vmatpush1.bf16.msra.mxu0 %v21394_v34  ;;  %16811 = vmatprep.subr.bf16.mxu1 %v21399_v3  ;;  %v21471_v34 = vld [vmem:[#allocation8 + $0x1f5c] ss:$24 sps:$4 sm:$0xff]  }
 0x8be   :  { %17176 = vmatprep.subr.bf16.mxu0 %v21402_v56  ;;  %v21474_v3 = vld [vmem:[#allocation8 + $0x1454] ss:$24 sps:$4 sm:$0xff]   ;;  %v21469_v56 = vld [vmem:[#allocation8 + $0x1f58] ss:$24 sps:$4 sm:$0xff]  }
 0x8c0   :  { %17166 = vmatmul.mubr.bf16.vlgmr.msra.gmra.mrb[20].mxu0 %v22444_v1  ;;  %16812 = vmatpush1.bf16.msra.mxu1 %v21397_v57  ;;  %v21415_v1 = vld [vmem:[#allocation8 + $0x1da8] ss:$24 sps:$4 sm:$0xff]  }
 0x8c1   :  { %17177 = vmatpush1.bf16.msra.mxu0 %v21400_v33  ;;  %17208 = vmatprep.mubr.bf16.mxu0 %v22313_v45  ;;  %v21426_v45 = vld [vmem:[#allocation8 + $0x12d4] ss:$24 sps:$4 sm:$0xff]   ;;  %v21472_v57 = vld [vmem:[#allocation8 + $0x1450] ss:$24 sps:$4 sm:$0xff]  }
 0x8c2   :  { %16813 = vmatprep.subr.bf16.mxu1 %v21405_v20  ;;  %17178 = vmatprep.subr.bf16.mxu0 %v21408_v6  ;;  %v21477_v33 = vld [vmem:[#allocation8 + $0x1f8c] ss:$24 sps:$4 sm:$0xff]   ;;  %v21475_v6 = vld [vmem:[#allocation8 + $0x1f88] ss:$24 sps:$4 sm:$0xff]  }
 0x8c3   :  { %v21480_v20 = vld [vmem:[#allocation8 + $0x1484] ss:$24 sps:$4 sm:$0xff]  }
 0x8c4   :  { %16814 = vmatpush1.bf16.msra.mxu1 %v21403_v58  ;;  %v21478_v58 = vld [vmem:[#allocation8 + $0x1480] ss:$24 sps:$4 sm:$0xff]  }
 0x8c5   :  { %17179 = vmatpush1.bf16.msra.mxu0 %v21406_v49  ;;  %16815 = vmatprep.subr.bf16.mxu1 %v21411_v7  ;;  %v21483_v49 = vld [vmem:[#allocation8 + $0x1fbc] ss:$24 sps:$4 sm:$0xff]  }
 0x8c6   :  { %17180 = vmatprep.subr.bf16.mxu0 %v21414_v4  ;;  %v21486_v7 = vld [vmem:[#allocation8 + $0x14b4] ss:$24 sps:$4 sm:$0xff]   ;;  %v21481_v4 = vld [vmem:[#allocation8 + $0x1fb8] ss:$24 sps:$4 sm:$0xff]  }
 0x8c8   :  { %16816 = vmatpush1.bf16.msra.mxu1 %v21409_v48  ;;  %v21484_v48 = vld [vmem:[#allocation8 + $0x14b0] ss:$24 sps:$4 sm:$0xff]  }
 0x8c9   :  { %17181 = vmatpush1.bf16.msra.mxu0 %v21412_v8  ;;  %16817 = vmatprep.subr.bf16.mxu1 %v21417_v51  ;;  %v21489_v8 = vld [vmem:[#allocation8 + $0x1fec] ss:$24 sps:$4 sm:$0xff]  }
 0x8ca   :  { %17182 = vmatprep.subr.bf16.mxu0 %v21420_v59  ;;  %v21492_v51 = vld [vmem:[#allocation8 + $0x14e4] ss:$24 sps:$4 sm:$0xff]   ;;  %v21487_v59 = vld [vmem:[#allocation8 + $0x1fe8] ss:$24 sps:$4 sm:$0xff]  }
 0x8cc   :  { %16818 = vmatpush1.bf16.msra.mxu1 %v21415_v1  ;;  %v21490_v1 = vld [vmem:[#allocation8 + $0x14e0] ss:$24 sps:$4 sm:$0xff]  }
 0x8cd   :  { %17183 = vmatpush1.bf16.msra.mxu0 %v21418_v30  ;;  %16819 = vmatprep.subr.bf16.mxu1 %v21423_v39  ;;  %v21495_v30 = vld [vmem:[#allocation8 + $0x201c] ss:$24 sps:$4 sm:$0xff]  }
 0x8ce   :  { %17184 = vmatprep.subr.bf16.mxu0 %v21426_v45  ;;  %v21498_v39 = vld [vmem:[#allocation8 + $0x1514] ss:$24 sps:$4 sm:$0xff]   ;;  %v21493_v45 = vld [vmem:[#allocation8 + $0x2018] ss:$24 sps:$4 sm:$0xff]  }
 0x8d0   :  { %16820 = vmatpush1.bf16.msra.mxu1 %v21421_v61  ;;  %v21496_v61 = vld [vmem:[#allocation8 + $0x1510] ss:$24 sps:$4 sm:$0xff]  }
 0x8d1   :  { %17185 = vmatpush1.bf16.msra.mxu0 %v21424_v17  ;;  %16832 = vmatprep.subr.bf16.mxu1 %v21429_v23  ;;  %v21501_v17 = vld [vmem:[#allocation8 + $0x204c] ss:$24 sps:$4 sm:$0xff]  }
 0x8d2   :  { %17186 = vmatprep.subr.bf16.mxu0 %v21432_v25  ;;  %v21504_v23 = vld [vmem:[#allocation8 + $0x1544] ss:$24 sps:$4 sm:$0xff]   ;;  %v21499_v25 = vld [vmem:[#allocation8 + $0x2048] ss:$24 sps:$4 sm:$0xff]  }
 0x8d3   :  { %16822 = vmatmul.mubr.bf16.vlgmr.msra.gmra.mrb[32].mxu1 %v22482_v21 }
 0x8d4   :  { %16833 = vmatpush1.bf16.msra.mxu1 %v21427_v12  ;;  %16864 = vmatprep.mubr.bf16.mxu1 %v22427_v60  ;;  %v21502_v12 = vld [vmem:[#allocation8 + $0x1540] ss:$24 sps:$4 sm:$0xff]  }
 0x8d5   :  { %17187 = vmatpush1.bf16.msra.mxu0 %v21430_v31  ;;  %16834 = vmatprep.subr.bf16.mxu1 %v21435_v63  ;;  %v21507_v31 = vld [vmem:[#allocation8 + $0x207c] ss:$24 sps:$4 sm:$0xff]  }
 0x8d6   :  { %17188 = vmatprep.subr.bf16.mxu0 %v21438_v2  ;;  %v21510_v63 = vld [vmem:[#allocation8 + $0x1574] ss:$24 sps:$4 sm:$0xff]   ;;  %v21505_v2 = vld [vmem:[#allocation8 + $0x2078] ss:$24 sps:$4 sm:$0xff]  }
 0x8d8   :  { %16835 = vmatpush1.bf16.msra.mxu1 %v21433_v36  ;;  %v21508_v36 = vld [vmem:[#allocation8 + $0x1570] ss:$24 sps:$4 sm:$0xff]  }
 0x8d9   :  { %17189 = vmatpush1.bf16.msra.mxu0 %v21436_v18  ;;  %16836 = vmatprep.subr.bf16.mxu1 %v21441_v22  ;;  %v21513_v18 = vld [vmem:[#allocation8 + $0x20ac] ss:$24 sps:$4 sm:$0xff]  }
 0x8da   :  { %17190 = vmatprep.subr.bf16.mxu0 %v21444_v19  ;;  %v21516_v22 = vld [vmem:[#allocation8 + $0x15a4] ss:$24 sps:$4 sm:$0xff]   ;;  %v21514_v19 = vld [vmem:[#allocation8 + $0x15a0] ss:$24 sps:$4 sm:$0xff]  }
 0x8dc   :  { %16837 = vmatpush1.bf16.msra.mxu1 %v21439_v24  ;;  %v21519_v24 = vld [vmem:[#allocation8 + $0x20dc] ss:$24 sps:$4 sm:$0xff]  }
 0x8dd   :  { %17191 = vmatpush1.bf16.msra.mxu0 %v21442_v52  ;;  %16838 = vmatprep.subr.bf16.mxu1 %v21447_v46  ;;  %v21517_v52 = vld [vmem:[#allocation8 + $0x20d8] ss:$24 sps:$4 sm:$0xff]  }
 0x8de   :  { %17192 = vmatprep.subr.bf16.mxu0 %v21450_v62  ;;  %v21520_v46 = vld [vmem:[#allocation8 + $0x15d0] ss:$24 sps:$4 sm:$0xff]   ;;  %v21525_v62 = vld [vmem:[#allocation8 + $0x210c] ss:$24 sps:$4 sm:$0xff]  }
 0x8e0   :  { %16839 = vmatpush1.bf16.msra.mxu1 %v21445_v37  ;;  %v21528_v37 = vld [vmem:[#allocation8 + $0x1604] ss:$24 sps:$4 sm:$0xff]  }
 0x8e1   :  { %17193 = vmatpush1.bf16.msra.mxu0 %v21448_v54  ;;  %16840 = vmatprep.subr.bf16.mxu1 %v21453_v41  ;;  %v21523_v54 = vld [vmem:[#allocation8 + $0x2108] ss:$24 sps:$4 sm:$0xff]  }
 0x8e2   :  { %17194 = vmatprep.subr.bf16.mxu0 %v21456_v11  ;;  %v21526_v41 = vld [vmem:[#allocation8 + $0x1600] ss:$24 sps:$4 sm:$0xff]   ;;  %v21531_v11 = vld [vmem:[#allocation8 + $0x213c] ss:$24 sps:$4 sm:$0xff]  }
 0x8e4   :  { %16841 = vmatpush1.bf16.msra.mxu1 %v21451_v10  ;;  %v21534_v10 = vld [vmem:[#allocation8 + $0x1634] ss:$24 sps:$4 sm:$0xff]  }
 0x8e5   :  { %17195 = vmatpush1.bf16.msra.mxu0 %v21454_v28  ;;  %16842 = vmatprep.subr.bf16.mxu1 %v21459_v0  ;;  %v21529_v28 = vld [vmem:[#allocation8 + $0x2138] ss:$24 sps:$4 sm:$0xff]  }
 0x8e6   :  { %17196 = vmatprep.subr.bf16.mxu0 %v21462_v5  ;;  %v21532_v0 = vld [vmem:[#allocation8 + $0x1630] ss:$24 sps:$4 sm:$0xff]   ;;  %v21537_v5 = vld [vmem:[#allocation8 + $0x216c] ss:$24 sps:$4 sm:$0xff]  }
 0x8e8   :  { %16843 = vmatpush1.bf16.msra.mxu1 %v21457_v29  ;;  %v21540_v29 = vld [vmem:[#allocation8 + $0x1664] ss:$24 sps:$4 sm:$0xff]  }
 0x8e9   :  { %17197 = vmatpush1.bf16.msra.mxu0 %v21460_v26  ;;  %16844 = vmatprep.subr.bf16.mxu1 %v21465_v35  ;;  %v21535_v26 = vld [vmem:[#allocation8 + $0x2168] ss:$24 sps:$4 sm:$0xff]  }
 0x8ea   :  { %17198 = vmatprep.subr.bf16.mxu0 %v21468_v40  ;;  %v21538_v35 = vld [vmem:[#allocation8 + $0x1660] ss:$24 sps:$4 sm:$0xff]   ;;  %v21543_v40 = vld [vmem:[#allocation8 + $0x219c] ss:$24 sps:$4 sm:$0xff]  }
 0x8ec   :  { %16845 = vmatpush1.bf16.msra.mxu1 %v21463_v16  ;;  %v21546_v16 = vld [vmem:[#allocation8 + $0x1694] ss:$24 sps:$4 sm:$0xff]  }
 0x8ed   :  { %17199 = vmatpush1.bf16.msra.mxu0 %v21466_v32  ;;  %16846 = vmatprep.subr.bf16.mxu1 %v21471_v34  ;;  %v21541_v32 = vld [vmem:[#allocation8 + $0x2198] ss:$24 sps:$4 sm:$0xff]  }
 0x8ee   :  { %17200 = vmatprep.subr.bf16.mxu0 %v21474_v3  ;;  %v21544_v34 = vld [vmem:[#allocation8 + $0x1690] ss:$24 sps:$4 sm:$0xff]   ;;  %v21549_v3 = vld [vmem:[#allocation8 + $0x21cc] ss:$24 sps:$4 sm:$0xff]  }
 0x8f0   :  { %16847 = vmatpush1.bf16.msra.mxu1 %v21469_v56  ;;  %v21552_v56 = vld [vmem:[#allocation8 + $0x16c4] ss:$24 sps:$4 sm:$0xff]  }
 0x8f1   :  { %17201 = vmatpush1.bf16.msra.mxu0 %v21472_v57  ;;  %16848 = vmatprep.subr.bf16.mxu1 %v21477_v33  ;;  %v21547_v57 = vld [vmem:[#allocation8 + $0x21c8] ss:$24 sps:$4 sm:$0xff]  }
 0x8f2   :  { %17202 = vmatprep.subr.bf16.mxu0 %v21480_v20  ;;  %v21550_v33 = vld [vmem:[#allocation8 + $0x16c0] ss:$24 sps:$4 sm:$0xff]   ;;  %v21555_v20 = vld [vmem:[#allocation8 + $0x21fc] ss:$24 sps:$4 sm:$0xff]  }
 0x8f4   :  { %16849 = vmatpush1.bf16.msra.mxu1 %v21475_v6  ;;  %v21558_v6 = vld [vmem:[#allocation8 + $0x16f4] ss:$24 sps:$4 sm:$0xff]  }
 0x8f5   :  { %17203 = vmatpush1.bf16.msra.mxu0 %v21478_v58  ;;  %16850 = vmatprep.subr.bf16.mxu1 %v21483_v49  ;;  %v21553_v58 = vld [vmem:[#allocation8 + $0x21f8] ss:$24 sps:$4 sm:$0xff]  }
 0x8f6   :  { %17204 = vmatprep.subr.bf16.mxu0 %v21486_v7  ;;  %v21556_v49 = vld [vmem:[#allocation8 + $0x16f0] ss:$24 sps:$4 sm:$0xff]   ;;  %v21561_v7 = vld [vmem:[#allocation8 + $0x222c] ss:$24 sps:$4 sm:$0xff]  }
 0x8f8   :  { %16851 = vmatpush1.bf16.msra.mxu1 %v21481_v4  ;;  %v21564_v4 = vld [vmem:[#allocation8 + $0x1724] ss:$24 sps:$4 sm:$0xff]  }
 0x8f9   :  { %17205 = vmatpush1.bf16.msra.mxu0 %v21484_v48  ;;  %16852 = vmatprep.subr.bf16.mxu1 %v21489_v8  ;;  %v21559_v48 = vld [vmem:[#allocation8 + $0x2228] ss:$24 sps:$4 sm:$0xff]  }
 0x8fa   :  { %17206 = vmatprep.subr.bf16.mxu0 %v21492_v51  ;;  %v21562_v8 = vld [vmem:[#allocation8 + $0x1720] ss:$24 sps:$4 sm:$0xff]   ;;  %v21567_v51 = vld [vmem:[#allocation8 + $0x225c] ss:$24 sps:$4 sm:$0xff]  }
 0x8fc   :  { %16853 = vmatpush1.bf16.msra.mxu1 %v21487_v59  ;;  %v21570_v59 = vld [vmem:[#allocation8 + $0x1754] ss:$24 sps:$4 sm:$0xff]  }
 0x8fd   :  { %17207 = vmatpush1.bf16.msra.mxu0 %v21490_v1  ;;  %16854 = vmatprep.subr.bf16.mxu1 %v21495_v30  ;;  %v21565_v1 = vld [vmem:[#allocation8 + $0x2258] ss:$24 sps:$4 sm:$0xff]  }
 0x8fe   :  { %17219 = vmatprep.subr.bf16.mxu0 %v21498_v39  ;;  %v21568_v30 = vld [vmem:[#allocation8 + $0x1750] ss:$24 sps:$4 sm:$0xff]   ;;  %v21573_v39 = vld [vmem:[#allocation8 + $0x228c] ss:$24 sps:$4 sm:$0xff]  }
 0x900   :  { %17209 = vmatmul.mubr.bf16.vlgmr.msra.gmra.mrb[20].mxu0 %v22311_v13  ;;  %16855 = vmatpush1.bf16.msra.mxu1 %v21493_v45  ;;  %v21511_v13 = vld [vmem:[#allocation8 + $0x20a8] ss:$24 sps:$4 sm:$0xff]   ;;  %v21576_v45 = vld [vmem:[#allocation8 + $0x1784] ss:$24 sps:$4 sm:$0xff]  }
 0x901   :  { %17220 = vmatpush1.bf16.msra.mxu0 %v21496_v61  ;;  %17251 = vmatprep.mubr.bf16.mxu0 %v22464_v14  ;;  %v21522_v14 = vld [vmem:[#allocation8 + $0x15d4] ss:$24 sps:$4 sm:$0xff]   ;;  %v21571_v61 = vld [vmem:[#allocation8 + $0x2288] ss:$24 sps:$4 sm:$0xff]  }
 0x902   :  { %16856 = vmatprep.subr.bf16.mxu1 %v21501_v17  ;;  %17221 = vmatprep.subr.bf16.mxu0 %v21504_v23  ;;  %v21574_v17 = vld [vmem:[#allocation8 + $0x1780] ss:$24 sps:$4 sm:$0xff]   ;;  %v21579_v23 = vld [vmem:[#allocation8 + $0x22bc] ss:$24 sps:$4 sm:$0xff]  }
 0x904   :  { %16857 = vmatpush1.bf16.msra.mxu1 %v21499_v25  ;;  %v21582_v25 = vld [vmem:[#allocation8 + $0x17b4] ss:$24 sps:$4 sm:$0xff]  }
 0x905   :  { %17222 = vmatpush1.bf16.msra.mxu0 %v21502_v12  ;;  %16858 = vmatprep.subr.bf16.mxu1 %v21507_v31  ;;  %v21577_v12 = vld [vmem:[#allocation8 + $0x22b8] ss:$24 sps:$4 sm:$0xff]  }
 0x906   :  { %17223 = vmatprep.subr.bf16.mxu0 %v21510_v63  ;;  %v21580_v31 = vld [vmem:[#allocation8 + $0x17b0] ss:$24 sps:$4 sm:$0xff]   ;;  %v21585_v63 = vld [vmem:[#allocation8 + $0x22ec] ss:$24 sps:$4 sm:$0xff]  }
 0x908   :  { %16859 = vmatpush1.bf16.msra.mxu1 %v21505_v2  ;;  %v21588_v2 = vld [vmem:[#allocation8 + $0x17e4] ss:$24 sps:$4 sm:$0xff]  }
 0x909   :  { %17224 = vmatpush1.bf16.msra.mxu0 %v21508_v36  ;;  %16860 = vmatprep.subr.bf16.mxu1 %v21513_v18  ;;  %v21583_v36 = vld [vmem:[#allocation8 + $0x22e8] ss:$24 sps:$4 sm:$0xff]  }
 0x90a   :  { %17225 = vmatprep.subr.bf16.mxu0 %v21516_v22  ;;  %v21586_v18 = vld [vmem:[#allocation8 + $0x17e0] ss:$24 sps:$4 sm:$0xff]   ;;  %v21591_v22 = vld [vmem:[#allocation8 + $0x231c] ss:$24 sps:$4 sm:$0xff]  }
 0x90c   :  { %16861 = vmatpush1.bf16.msra.mxu1 %v21511_v13  ;;  %v21594_v13 = vld [vmem:[#allocation8 + $0x1814] ss:$24 sps:$4 sm:$0xff]  }
 0x90d   :  { %17226 = vmatpush1.bf16.msra.mxu0 %v21514_v19  ;;  %16862 = vmatprep.subr.bf16.mxu1 %v21519_v24  ;;  %v21589_v19 = vld [vmem:[#allocation8 + $0x2318] ss:$24 sps:$4 sm:$0xff]  }
 0x90e   :  { %17227 = vmatprep.subr.bf16.mxu0 %v21522_v14  ;;  %v21592_v24 = vld [vmem:[#allocation8 + $0x1810] ss:$24 sps:$4 sm:$0xff]   ;;  %v21597_v14 = vld [vmem:[#allocation8 + $0x234c] ss:$24 sps:$4 sm:$0xff]  }
 0x910   :  { %16863 = vmatpush1.bf16.msra.mxu1 %v21517_v52  ;;  %v21600_v52 = vld [vmem:[#allocation8 + $0x1844] ss:$24 sps:$4 sm:$0xff]  }
 0x911   :  { %17228 = vmatpush1.bf16.msra.mxu0 %v21520_v46  ;;  %16875 = vmatprep.subr.bf16.mxu1 %v21525_v62  ;;  %v21595_v46 = vld [vmem:[#allocation8 + $0x2348] ss:$24 sps:$4 sm:$0xff]  }
 0x912   :  { %17229 = vmatprep.subr.bf16.mxu0 %v21528_v37  ;;  %v21598_v62 = vld [vmem:[#allocation8 + $0x1840] ss:$24 sps:$4 sm:$0xff]   ;;  %v21603_v37 = vld [vmem:[#allocation8 + $0x237c] ss:$24 sps:$4 sm:$0xff]  }
 0x913   :  { %16865 = vmatmul.mubr.bf16.vlgmr.msra.gmra.mrb[32].mxu1 %v22425_v9 }
 0x914   :  { %16876 = vmatpush1.bf16.msra.mxu1 %v21523_v54  ;;  %16907 = vmatprep.mubr.bf16.mxu1 %v22502_v44  ;;  %v21606_v54 = vld [vmem:[#allocation8 + $0x1874] ss:$24 sps:$4 sm:$0xff]  }
 0x915   :  { %17230 = vmatpush1.bf16.msra.mxu0 %v21526_v41  ;;  %16877 = vmatprep.subr.bf16.mxu1 %v21531_v11  ;;  %v21601_v41 = vld [vmem:[#allocation8 + $0x2378] ss:$24 sps:$4 sm:$0xff]  }
 0x916   :  { %17231 = vmatprep.subr.bf16.mxu0 %v21534_v10  ;;  %v21604_v11 = vld [vmem:[#allocation8 + $0x1870] ss:$24 sps:$4 sm:$0xff]   ;;  %v21609_v10 = vld [vmem:[#allocation8 + $0x23ac] ss:$24 sps:$4 sm:$0xff]  }
 0x918   :  { %16878 = vmatpush1.bf16.msra.mxu1 %v21529_v28  ;;  %v21612_v28 = vld [vmem:[#allocation8 + $0x18a4] ss:$24 sps:$4 sm:$0xff]  }
 0x919   :  { %17232 = vmatpush1.bf16.msra.mxu0 %v21532_v0  ;;  %16879 = vmatprep.subr.bf16.mxu1 %v21537_v5  ;;  %v21610_v0 = vld [vmem:[#allocation8 + $0x18a0] ss:$24 sps:$4 sm:$0xff]   ;;  %v21615_v5 = vld [vmem:[#allocation8 + $0x23dc] ss:$24 sps:$4 sm:$0xff]  }
 0x91a   :  { %17233 = vmatprep.subr.bf16.mxu0 %v21540_v29  ;;  %v21613_v29 = vld [vmem:[#allocation8 + $0x23d8] ss:$24 sps:$4 sm:$0xff]  }
 0x91c   :  { %16880 = vmatpush1.bf16.msra.mxu1 %v21535_v26  ;;  %v21616_v26 = vld [vmem:[#allocation8 + $0x18d0] ss:$24 sps:$4 sm:$0xff]  }
 0x91d   :  { %17234 = vmatpush1.bf16.msra.mxu0 %v21538_v35  ;;  %16881 = vmatprep.subr.bf16.mxu1 %v21543_v40  ;;  %v21621_v35 = vld [vmem:[#allocation8 + $0x1904] ss:$24 sps:$4 sm:$0xff]   ;;  %v21619_v40 = vld [vmem:[#allocation8 + $0x1900] ss:$24 sps:$4 sm:$0xff]  }
 0x91e   :  { %17235 = vmatprep.subr.bf16.mxu0 %v21546_v16  ;;  %v21624_v16 = vld [vmem:[#allocation8 + $0x1934] ss:$24 sps:$4 sm:$0xff]  }
 0x920   :  { %16882 = vmatpush1.bf16.msra.mxu1 %v21541_v32  ;;  %v21622_v32 = vld [vmem:[#allocation8 + $0x1930] ss:$24 sps:$4 sm:$0xff]  }
 0x921   :  { %17236 = vmatpush1.bf16.msra.mxu0 %v21544_v34  ;;  %16883 = vmatprep.subr.bf16.mxu1 %v21549_v3  ;;  %v21627_v34 = vld [vmem:[#allocation8 + $0x1964] ss:$24 sps:$4 sm:$0xff]   ;;  %v21625_v3 = vld [vmem:[#allocation8 + $0x1960] ss:$24 sps:$4 sm:$0xff]  }
 0x922   :  { %17237 = vmatprep.subr.bf16.mxu0 %v21552_v56  ;;  %v21630_v56 = vld [vmem:[#allocation8 + $0x1994] ss:$24 sps:$4 sm:$0xff]  }
 0x924   :  { %16884 = vmatpush1.bf16.msra.mxu1 %v21547_v57  ;;  %v21628_v57 = vld [vmem:[#allocation8 + $0x1990] ss:$24 sps:$4 sm:$0xff]  }
 0x925   :  { %17238 = vmatpush1.bf16.msra.mxu0 %v21550_v33  ;;  %16885 = vmatprep.subr.bf16.mxu1 %v21555_v20  ;;  %v21633_v33 = vld [vmem:[#allocation8 + $0x19c4] ss:$24 sps:$4 sm:$0xff]   ;;  %v21631_v20 = vld [vmem:[#allocation8 + $0x19c0] ss:$24 sps:$4 sm:$0xff]  }
 0x926   :  { %17239 = vmatprep.subr.bf16.mxu0 %v21558_v6  ;;  %v21636_v6 = vld [vmem:[#allocation8 + $0x19f4] ss:$24 sps:$4 sm:$0xff]  }
 0x928   :  { %16886 = vmatpush1.bf16.msra.mxu1 %v21553_v58  ;;  %v21634_v58 = vld [vmem:[#allocation8 + $0x19f0] ss:$24 sps:$4 sm:$0xff]  }
 0x929   :  { %17240 = vmatpush1.bf16.msra.mxu0 %v21556_v49  ;;  %16887 = vmatprep.subr.bf16.mxu1 %v21561_v7  ;;  %v21639_v49 = vld [vmem:[#allocation8 + $0x1a24] ss:$24 sps:$4 sm:$0xff]   ;;  %v21637_v7 = vld [vmem:[#allocation8 + $0x1a20] ss:$24 sps:$4 sm:$0xff]  }
 0x92a   :  { %17241 = vmatprep.subr.bf16.mxu0 %v21564_v4  ;;  %v21642_v4 = vld [vmem:[#allocation8 + $0x1a54] ss:$24 sps:$4 sm:$0xff]  }
 0x92c   :  { %16888 = vmatpush1.bf16.msra.mxu1 %v21559_v48  ;;  %v21640_v48 = vld [vmem:[#allocation8 + $0x1a50] ss:$24 sps:$4 sm:$0xff]  }
 0x92d   :  { %17242 = vmatpush1.bf16.msra.mxu0 %v21562_v8  ;;  %16889 = vmatprep.subr.bf16.mxu1 %v21567_v51  ;;  %v21645_v8 = vld [vmem:[#allocation8 + $0x1a84] ss:$24 sps:$4 sm:$0xff]   ;;  %v21643_v51 = vld [vmem:[#allocation8 + $0x1a80] ss:$24 sps:$4 sm:$0xff]  }
 0x92e   :  { %17243 = vmatprep.subr.bf16.mxu0 %v21570_v59  ;;  %v21648_v59 = vld [vmem:[#allocation8 + $0x1ab4] ss:$24 sps:$4 sm:$0xff]  }
 0x930   :  { %16890 = vmatpush1.bf16.msra.mxu1 %v21565_v1  ;;  %v21646_v1 = vld [vmem:[#allocation8 + $0x1ab0] ss:$24 sps:$4 sm:$0xff]  }
 0x931   :  { %17244 = vmatpush1.bf16.msra.mxu0 %v21568_v30  ;;  %16891 = vmatprep.subr.bf16.mxu1 %v21573_v39  ;;  %v21651_v30 = vld [vmem:[#allocation8 + $0x1ae4] ss:$24 sps:$4 sm:$0xff]   ;;  %v21649_v39 = vld [vmem:[#allocation8 + $0x1ae0] ss:$24 sps:$4 sm:$0xff]  }
 0x932   :  { %17245 = vmatprep.subr.bf16.mxu0 %v21576_v45  ;;  %v21654_v45 = vld [vmem:[#allocation8 + $0x1b14] ss:$24 sps:$4 sm:$0xff]  }
 0x934   :  { %16892 = vmatpush1.bf16.msra.mxu1 %v21571_v61  ;;  %v21652_v61 = vld [vmem:[#allocation8 + $0x1b10] ss:$24 sps:$4 sm:$0xff]  }
 0x935   :  { %17246 = vmatpush1.bf16.msra.mxu0 %v21574_v17  ;;  %16893 = vmatprep.subr.bf16.mxu1 %v21579_v23  ;;  %v21657_v17 = vld [vmem:[#allocation8 + $0x1b44] ss:$24 sps:$4 sm:$0xff]   ;;  %v21655_v23 = vld [vmem:[#allocation8 + $0x1b40] ss:$24 sps:$4 sm:$0xff]  }
 0x936   :  { %17247 = vmatprep.subr.bf16.mxu0 %v21582_v25  ;;  %v21660_v25 = vld [vmem:[#allocation8 + $0x1b74] ss:$24 sps:$4 sm:$0xff]  }
 0x938   :  { %16894 = vmatpush1.bf16.msra.mxu1 %v21577_v12  ;;  %v21658_v12 = vld [vmem:[#allocation8 + $0x1b70] ss:$24 sps:$4 sm:$0xff]  }
 0x939   :  { %17248 = vmatpush1.bf16.msra.mxu0 %v21580_v31  ;;  %16895 = vmatprep.subr.bf16.mxu1 %v21585_v63  ;;  %v21663_v31 = vld [vmem:[#allocation8 + $0x1ba4] ss:$24 sps:$4 sm:$0xff]   ;;  %v21661_v63 = vld [vmem:[#allocation8 + $0x1ba0] ss:$24 sps:$4 sm:$0xff]  }
 0x93a   :  { %17249 = vmatprep.subr.bf16.mxu0 %v21588_v2  ;;  %v21666_v2 = vld [vmem:[#allocation8 + $0x1bd4] ss:$24 sps:$4 sm:$0xff]  }
 0x93c   :  { %16896 = vmatpush1.bf16.msra.mxu1 %v21583_v36  ;;  %v21664_v36 = vld [vmem:[#allocation8 + $0x1bd0] ss:$24 sps:$4 sm:$0xff]  }
 0x93d   :  { %17250 = vmatpush1.bf16.msra.mxu0 %v21586_v18  ;;  %16897 = vmatprep.subr.bf16.mxu1 %v21591_v22  ;;  %v21669_v18 = vld [vmem:[#allocation8 + $0x1c04] ss:$24 sps:$4 sm:$0xff]   ;;  %v21672_v22 = vld [vmem:[#allocation8 + $0x1c34] ss:$24 sps:$4 sm:$0xff]  }
 0x93e   :  { %17262 = vmatprep.subr.bf16.mxu0 %v21594_v13  ;;  %v21675_v13 = vld [vmem:[#allocation8 + $0x1c64] ss:$24 sps:$4 sm:$0xff]  }
 0x940   :  { %17252 = vmatmul.mubr.bf16.vlgmr.msra.gmra.mrb[20].mxu0 %v22462_v47  ;;  %16898 = vmatpush1.bf16.msra.mxu1 %v21589_v19  ;;  %v21607_v47 = vld [vmem:[#allocation8 + $0x23a8] ss:$24 sps:$4 sm:$0xff]  }
 0x941   :  { %17263 = vmatpush1.bf16.msra.mxu0 %v21592_v24  ;;  %17294 = vmatprep.mubr.bf16.mxu0 %v22365_v27  ;;  %v21618_v27 = vld [vmem:[#allocation8 + $0x18d4] ss:$24 sps:$4 sm:$0xff]   ;;  %v21673_v19 = vld [vmem:[#allocation8 + $0x1c60] ss:$24 sps:$4 sm:$0xff]  }
 0x942   :  { %16899 = vmatprep.subr.bf16.mxu1 %v21597_v14  ;;  %17264 = vmatprep.subr.bf16.mxu0 %v21600_v52  ;;  %v21678_v24 = vld [vmem:[#allocation8 + $0x1c94] ss:$24 sps:$4 sm:$0xff]   ;;  %v21676_v14 = vld [vmem:[#allocation8 + $0x1c90] ss:$24 sps:$4 sm:$0xff]   ;;  %v21681_v52 = vld [vmem:[#allocation8 + $0x1cc4] ss:$24 sps:$4 sm:$0xff]  }
 0x944   :  { %16900 = vmatpush1.bf16.msra.mxu1 %v21595_v46  ;;  %v21679_v46 = vld [vmem:[#allocation8 + $0x1cc0] ss:$24 sps:$4 sm:$0xff]  }
 0x945   :  { %17265 = vmatpush1.bf16.msra.mxu0 %v21598_v62  ;;  %16901 = vmatprep.subr.bf16.mxu1 %v21603_v37  ;;  %v21684_v62 = vld [vmem:[#allocation8 + $0x1cf4] ss:$24 sps:$4 sm:$0xff]   ;;  %v21682_v37 = vld [vmem:[#allocation8 + $0x1cf0] ss:$24 sps:$4 sm:$0xff]  }
 0x946   :  { %17266 = vmatprep.subr.bf16.mxu0 %v21606_v54  ;;  %v21687_v54 = vld [vmem:[#allocation8 + $0x1d24] ss:$24 sps:$4 sm:$0xff]  }
 0x948   :  { %16902 = vmatpush1.bf16.msra.mxu1 %v21601_v41  ;;  %v21685_v41 = vld [vmem:[#allocation8 + $0x1d20] ss:$24 sps:$4 sm:$0xff]  }
 0x949   :  { %17267 = vmatpush1.bf16.msra.mxu0 %v21604_v11  ;;  %16903 = vmatprep.subr.bf16.mxu1 %v21609_v10  ;;  %v21690_v11 = vld [vmem:[#allocation8 + $0x1d54] ss:$24 sps:$4 sm:$0xff]   ;;  %v21688_v10 = vld [vmem:[#allocation8 + $0x1d50] ss:$24 sps:$4 sm:$0xff]  }
 0x94a   :  { %17268 = vmatprep.subr.bf16.mxu0 %v21612_v28  ;;  %v21693_v28 = vld [vmem:[#allocation8 + $0x1d84] ss:$24 sps:$4 sm:$0xff]  }
 0x94c   :  { %16904 = vmatpush1.bf16.msra.mxu1 %v21607_v47  ;;  %v21691_v47 = vld [vmem:[#allocation8 + $0x1d80] ss:$24 sps:$4 sm:$0xff]  }
 0x94d   :  { %17269 = vmatpush1.bf16.msra.mxu0 %v21610_v0  ;;  %16905 = vmatprep.subr.bf16.mxu1 %v21615_v5  ;;  %v21696_v0 = vld [vmem:[#allocation8 + $0x1db4] ss:$24 sps:$4 sm:$0xff]   ;;  %v21694_v5 = vld [vmem:[#allocation8 + $0x1db0] ss:$24 sps:$4 sm:$0xff]  }
 0x94e   :  { %17270 = vmatprep.subr.bf16.mxu0 %v21618_v27  ;;  %v21699_v27 = vld [vmem:[#allocation8 + $0x1de4] ss:$24 sps:$4 sm:$0xff]  }
 0x950   :  { %16906 = vmatpush1.bf16.msra.mxu1 %v21613_v29  ;;  %v21697_v29 = vld [vmem:[#allocation8 + $0x1de0] ss:$24 sps:$4 sm:$0xff]  }
 0x951   :  { %17271 = vmatpush1.bf16.msra.mxu0 %v21616_v26  ;;  %v21702_v26 = vld [vmem:[#allocation8 + $0x1e14] ss:$24 sps:$4 sm:$0xff]  }
 0x952   :  { %17272 = vmatprep.subr.bf16.mxu0 %v21621_v35  ;;  %v21700_v35 = vld [vmem:[#allocation8 + $0x1e10] ss:$24 sps:$4 sm:$0xff]  }
 0x953   :  { %16908 = vmatmul.mubr.bf16.vlgmr.msra.gmra.mrb[32].mxu1 %v22500_v15 }
 0x955   :  { %17273 = vmatpush1.bf16.msra.mxu0 %v21619_v40  ;;  %v21705_v40 = vld [vmem:[#allocation8 + $0x1e44] ss:$24 sps:$4 sm:$0xff]  }
 0x956   :  { %17274 = vmatprep.subr.bf16.mxu0 %v21624_v16  ;;  %v21703_v16 = vld [vmem:[#allocation8 + $0x1e40] ss:$24 sps:$4 sm:$0xff]  }
 0x959   :  { %17275 = vmatpush1.bf16.msra.mxu0 %v21622_v32  ;;  %v21708_v32 = vld [vmem:[#allocation8 + $0x1e74] ss:$24 sps:$4 sm:$0xff]  }
 0x95a   :  { %17276 = vmatprep.subr.bf16.mxu0 %v21627_v34  ;;  %v21706_v34 = vld [vmem:[#allocation8 + $0x1e70] ss:$24 sps:$4 sm:$0xff]  }
 0x95d   :  { %17277 = vmatpush1.bf16.msra.mxu0 %v21625_v3  ;;  %v21711_v3 = vld [vmem:[#allocation8 + $0x1ea4] ss:$24 sps:$4 sm:$0xff]  }
 0x95e   :  { %17278 = vmatprep.subr.bf16.mxu0 %v21630_v56  ;;  %v21709_v56 = vld [vmem:[#allocation8 + $0x1ea0] ss:$24 sps:$4 sm:$0xff]  }
 0x961   :  { %17279 = vmatpush1.bf16.msra.mxu0 %v21628_v57  ;;  %v21714_v57 = vld [vmem:[#allocation8 + $0x1ed4] ss:$24 sps:$4 sm:$0xff]  }
 0x962   :  { %17280 = vmatprep.subr.bf16.mxu0 %v21633_v33  ;;  %v21712_v33 = vld [vmem:[#allocation8 + $0x1ed0] ss:$24 sps:$4 sm:$0xff]  }
 0x965   :  { %17281 = vmatpush1.bf16.msra.mxu0 %v21631_v20  ;;  %v21717_v20 = vld [vmem:[#allocation8 + $0x1f04] ss:$24 sps:$4 sm:$0xff]  }
 0x966   :  { %17282 = vmatprep.subr.bf16.mxu0 %v21636_v6  ;;  %v21720_v6 = vld [vmem:[#allocation8 + $0x1f34] ss:$24 sps:$4 sm:$0xff]  }
 0x969   :  { %17283 = vmatpush1.bf16.msra.mxu0 %v21634_v58  ;;  %v21723_v58 = vld [vmem:[#allocation8 + $0x1f64] ss:$24 sps:$4 sm:$0xff]  }
 0x96a   :  { %17284 = vmatprep.subr.bf16.mxu0 %v21639_v49  ;;  %v21721_v49 = vld [vmem:[#allocation8 + $0x1f60] ss:$24 sps:$4 sm:$0xff]  }
 0x96d   :  { %17285 = vmatpush1.bf16.msra.mxu0 %v21637_v7  ;;  %v21726_v7 = vld [vmem:[#allocation8 + $0x1f94] ss:$24 sps:$4 sm:$0xff]  }
 0x96e   :  { %17286 = vmatprep.subr.bf16.mxu0 %v21642_v4  ;;  %v21724_v4 = vld [vmem:[#allocation8 + $0x1f90] ss:$24 sps:$4 sm:$0xff]  }
 0x971   :  { %17287 = vmatpush1.bf16.msra.mxu0 %v21640_v48  ;;  %v21729_v48 = vld [vmem:[#allocation8 + $0x1fc4] ss:$24 sps:$4 sm:$0xff]  }
 0x972   :  { %17288 = vmatprep.subr.bf16.mxu0 %v21645_v8  ;;  %v21727_v8 = vld [vmem:[#allocation8 + $0x1fc0] ss:$24 sps:$4 sm:$0xff]  }
 0x975   :  { %17289 = vmatpush1.bf16.msra.mxu0 %v21643_v51  ;;  %v21732_v51 = vld [vmem:[#allocation8 + $0x1ff4] ss:$24 sps:$4 sm:$0xff]  }
 0x976   :  { %17290 = vmatprep.subr.bf16.mxu0 %v21648_v59  ;;  %v21730_v59 = vld [vmem:[#allocation8 + $0x1ff0] ss:$24 sps:$4 sm:$0xff]  }
 0x979   :  { %17291 = vmatpush1.bf16.msra.mxu0 %v21646_v1  ;;  %v21735_v1 = vld [vmem:[#allocation8 + $0x2024] ss:$24 sps:$4 sm:$0xff]  }
 0x97a   :  { %17292 = vmatprep.subr.bf16.mxu0 %v21651_v30  ;;  %v21733_v30 = vld [vmem:[#allocation8 + $0x2020] ss:$24 sps:$4 sm:$0xff]  }
 0x97d   :  { %17293 = vmatpush1.bf16.msra.mxu0 %v21649_v39  ;;  %v21738_v39 = vld [vmem:[#allocation8 + $0x2054] ss:$24 sps:$4 sm:$0xff]  }
 0x97e   :  { %17305 = vmatprep.subr.bf16.mxu0 %v21654_v45  ;;  %v21736_v45 = vld [vmem:[#allocation8 + $0x2050] ss:$24 sps:$4 sm:$0xff]  }
 0x980   :  { %17295 = vmatmul.mubr.bf16.vlgmr.msra.gmra.mrb[20].mxu0 %v22363_v53  ;;  %v21667_v53 = vld [vmem:[#allocation8 + $0x1c00] ss:$24 sps:$4 sm:$0xff]  }
 0x981   :  { %17306 = vmatpush1.bf16.msra.mxu0 %v21652_v61  ;;  %17337 = vmatprep.mubr.bf16.mxu0 %v22484_v55  ;;  %v21670_v55 = vld [vmem:[#allocation8 + $0x1c30] ss:$24 sps:$4 sm:$0xff]   ;;  %v21741_v61 = vld [vmem:[#allocation8 + $0x2084] ss:$24 sps:$4 sm:$0xff]  }
 0x982   :  { %17307 = vmatprep.subr.bf16.mxu0 %v21657_v17  ;;  %v21739_v17 = vld [vmem:[#allocation8 + $0x2080] ss:$24 sps:$4 sm:$0xff]  }
 0x985   :  { %17308 = vmatpush1.bf16.msra.mxu0 %v21655_v23  ;;  %v21744_v23 = vld [vmem:[#allocation8 + $0x20b4] ss:$24 sps:$4 sm:$0xff]  }
 0x986   :  { %17309 = vmatprep.subr.bf16.mxu0 %v21660_v25  ;;  %v21742_v25 = vld [vmem:[#allocation8 + $0x20b0] ss:$24 sps:$4 sm:$0xff]  }
 0x989   :  { %17310 = vmatpush1.bf16.msra.mxu0 %v21658_v12  ;;  %v21747_v12 = vld [vmem:[#allocation8 + $0x20e4] ss:$24 sps:$4 sm:$0xff]  }
 0x98a   :  { %17311 = vmatprep.subr.bf16.mxu0 %v21663_v31  ;;  %v21745_v31 = vld [vmem:[#allocation8 + $0x20e0] ss:$24 sps:$4 sm:$0xff]  }
 0x98d   :  { %17312 = vmatpush1.bf16.msra.mxu0 %v21661_v63  ;;  %v21750_v63 = vld [vmem:[#allocation8 + $0x2114] ss:$24 sps:$4 sm:$0xff]  }
 0x98e   :  { %17313 = vmatprep.subr.bf16.mxu0 %v21666_v2  ;;  %v21748_v2 = vld [vmem:[#allocation8 + $0x2110] ss:$24 sps:$4 sm:$0xff]  }
 0x991   :  { %17314 = vmatpush1.bf16.msra.mxu0 %v21664_v36  ;;  %v21753_v36 = vld [vmem:[#allocation8 + $0x2144] ss:$24 sps:$4 sm:$0xff]  }
 0x992   :  { %17315 = vmatprep.subr.bf16.mxu0 %v21669_v18  ;;  %v21751_v18 = vld [vmem:[#allocation8 + $0x2140] ss:$24 sps:$4 sm:$0xff]  }
 0x995   :  { %17316 = vmatpush1.bf16.msra.mxu0 %v21667_v53  ;;  %v21756_v53 = vld [vmem:[#allocation8 + $0x2174] ss:$24 sps:$4 sm:$0xff]  }
 0x996   :  { %17317 = vmatprep.subr.bf16.mxu0 %v21672_v22  ;;  %v21754_v22 = vld [vmem:[#allocation8 + $0x2170] ss:$24 sps:$4 sm:$0xff]  }
 0x999   :  { %17318 = vmatpush1.bf16.msra.mxu0 %v21670_v55  ;;  %v21759_v55 = vld [vmem:[#allocation8 + $0x21a4] ss:$24 sps:$4 sm:$0xff]  }
 0x99a   :  { %17319 = vmatprep.subr.bf16.mxu0 %v21675_v13  ;;  %v21757_v13 = vld [vmem:[#allocation8 + $0x21a0] ss:$24 sps:$4 sm:$0xff]  }
 0x99d   :  { %17320 = vmatpush1.bf16.msra.mxu0 %v21673_v19  ;;  %v21762_v19 = vld [vmem:[#allocation8 + $0x21d4] ss:$24 sps:$4 sm:$0xff]  }
 0x99e   :  { %17321 = vmatprep.subr.bf16.mxu0 %v21678_v24  ;;  %v21760_v24 = vld [vmem:[#allocation8 + $0x21d0] ss:$24 sps:$4 sm:$0xff]  }
 0x9a1   :  { %17322 = vmatpush1.bf16.msra.mxu0 %v21676_v14  ;;  %v21765_v14 = vld [vmem:[#allocation8 + $0x2204] ss:$24 sps:$4 sm:$0xff]  }
 0x9a2   :  { %17323 = vmatprep.subr.bf16.mxu0 %v21681_v52  ;;  %v21768_v52 = vld [vmem:[#allocation8 + $0x2234] ss:$24 sps:$4 sm:$0xff]  }
 0x9a5   :  { %17324 = vmatpush1.bf16.msra.mxu0 %v21679_v46  ;;  %v21771_v46 = vld [vmem:[#allocation8 + $0x2264] ss:$24 sps:$4 sm:$0xff]  }
 0x9a6   :  { %17325 = vmatprep.subr.bf16.mxu0 %v21684_v62  ;;  %v21769_v62 = vld [vmem:[#allocation8 + $0x2260] ss:$24 sps:$4 sm:$0xff]  }
 0x9a9   :  { %17326 = vmatpush1.bf16.msra.mxu0 %v21682_v37  ;;  %v21774_v37 = vld [vmem:[#allocation8 + $0x2294] ss:$24 sps:$4 sm:$0xff]  }
 0x9aa   :  { %17327 = vmatprep.subr.bf16.mxu0 %v21687_v54  ;;  %v21772_v54 = vld [vmem:[#allocation8 + $0x2290] ss:$24 sps:$4 sm:$0xff]  }
 0x9ad   :  { %17328 = vmatpush1.bf16.msra.mxu0 %v21685_v41  ;;  %v21777_v41 = vld [vmem:[#allocation8 + $0x22c4] ss:$24 sps:$4 sm:$0xff]  }
 0x9ae   :  { %17329 = vmatprep.subr.bf16.mxu0 %v21690_v11  ;;  %v21775_v11 = vld [vmem:[#allocation8 + $0x22c0] ss:$24 sps:$4 sm:$0xff]  }
 0x9b1   :  { %17330 = vmatpush1.bf16.msra.mxu0 %v21688_v10  ;;  %v21780_v10 = vld [vmem:[#allocation8 + $0x22f4] ss:$24 sps:$4 sm:$0xff]  }
 0x9b2   :  { %17331 = vmatprep.subr.bf16.mxu0 %v21693_v28  ;;  %v21899_v28 = vld [vmem:[%s22578_s4] sm:$0x3f]  ;;  %s22028_s4 = smov [#allocation10]  }
 0x9b3   :  { %s17451_s23 = sshll.u32 %s22028_s4, 4  ;;  %s17452_s23 = int_to_ptr.vmem [resolvable:$true] %s17451_s23 }
 0x9b4   :  { %s21988_s24 = scalar_lea.vmem %s17452_s23, 1536  ;;  %p21993_p5 = scmp.lt.s32.totalorder %s17452_s23, %s17452_s23 }
 0x9b5   :  { %17332 = vmatpush1.bf16.msra.mxu0 %v21691_v47  ;;  %v10107_v47 = vrot.slane %v21899_v28, %v22240_v38  ;;  %v21786_v38 = vld [vmem:[#allocation8 + $0x2354] ss:$24 sps:$4 sm:$0xff]   ;;  %p21989_p4 = scmp.ne.s32.totalorder %s17452_s23, %s21988_s24  ;;  %p21994_p6 = scmp.lt.s32.totalorder %s21988_s24, %s21988_s24 }
 0x9b6   :  { %17333 = vmatprep.subr.bf16.mxu0 %v21696_v0  ;;  %v10111_v0 = vrot.slane %v21899_v28, %v22243_v42  ;;  %v21784_v42 = vld [vmem:[#allocation8 + $0x2350] ss:$24 sps:$4 sm:$0xff]  }
 0x9b7   :  { %p21995_p7 = por %p21994_p6, %p21993_p5 }
 0x9b9   :  { %17334 = vmatpush1.bf16.msra.mxu0 %v21694_v5  ;;  %v21778_v5 = vld [vmem:[#allocation8 + $0x22f0] ss:$24 sps:$4 sm:$0xff]   ;;  %p21996_p8 = pnand %p21995_p7, %p21989_p4 }
 0x9ba   :  { %17335 = vmatprep.subr.bf16.mxu0 %v21699_v27 }
 0x9bd   :  { %17336 = vmatpush1.bf16.msra.mxu0 %v21697_v29  ;;  %v21783_v29 = vld [vmem:[#allocation8 + $0x2324] ss:$24 sps:$4 sm:$0xff]  }
 0x9be   :  { %17348 = vmatprep.subr.bf16.mxu0 %v21702_v26 }
 0x9c0   :  { %17338 = vmatmul.mubr.bf16.vlgmr.msra.gmra.mrb[20].mxu0 %v22482_v21  ;;  %v21715_v21 = vld [vmem:[#allocation8 + $0x1f00] ss:$24 sps:$4 sm:$0xff]  }
 0x9c1   :  { %17349 = vmatpush1.bf16.msra.mxu0 %v21700_v35  ;;  %17380 = vmatprep.mubr.bf16.mxu0 %v22427_v60  ;;  %v21718_v60 = vld [vmem:[#allocation8 + $0x1f30] ss:$24 sps:$4 sm:$0xff]  }
 0x9c2   :  { %17350 = vmatprep.subr.bf16.mxu0 %v21705_v40 }
 0x9c5   :  { %17351 = vmatpush1.bf16.msra.mxu0 %v21703_v16 }
 0x9c6   :  { %17352 = vmatprep.subr.bf16.mxu0 %v21708_v32 }
 0x9c9   :  { %17353 = vmatpush1.bf16.msra.mxu0 %v21706_v34 }
 0x9ca   :  { %17354 = vmatprep.subr.bf16.mxu0 %v21711_v3  ;;  %v21781_v3 = vld [vmem:[#allocation8 + $0x2320] ss:$24 sps:$4 sm:$0xff]  }
 0x9cd   :  { %17355 = vmatpush1.bf16.msra.mxu0 %v21709_v56 }
 0x9ce   :  { %17356 = vmatprep.subr.bf16.mxu0 %v21714_v57  ;;  %v21789_v57 = vld [vmem:[#allocation8 + $0x2384] ss:$24 sps:$4 sm:$0xff]  }
 0x9d1   :  { %17357 = vmatpush1.bf16.msra.mxu0 %v21712_v33  ;;  %v21787_v33 = vld [vmem:[#allocation8 + $0x2380] ss:$24 sps:$4 sm:$0xff]  }
 0x9d2   :  { %17358 = vmatprep.subr.bf16.mxu0 %v21717_v20  ;;  %v21792_v20 = vld [vmem:[#allocation8 + $0x23b4] ss:$24 sps:$4 sm:$0xff]  }
 0x9d5   :  { %17359 = vmatpush1.bf16.msra.mxu0 %v21715_v21  ;;  %v21790_v21 = vld [vmem:[#allocation8 + $0x23b0] ss:$24 sps:$4 sm:$0xff]  }
 0x9d6   :  { %17360 = vmatprep.subr.bf16.mxu0 %v21720_v6  ;;  %v21795_v6 = vld [vmem:[#allocation8 + $0x23e4] ss:$24 sps:$4 sm:$0xff]  }
 0x9d9   :  { %17361 = vmatpush1.bf16.msra.mxu0 %v21718_v60  ;;  %v21793_v60 = vld [vmem:[#allocation8 + $0x23e0] ss:$24 sps:$4 sm:$0xff]  }
 0x9da   :  { %17362 = vmatprep.subr.bf16.mxu0 %v21723_v58  ;;  %v10115_v58 = vrot.slane %v21899_v28, %v22246_v43 }
 0x9dd   :  { %17363 = vmatpush1.bf16.msra.mxu0 %v21721_v49  ;;  %v10119_v49 = vrot.slane %v21899_v28, %v22249_v50 }
 0x9de   :  { %17364 = vmatprep.subr.bf16.mxu0 %v21726_v7 }
 0x9e1   :  { %17365 = vmatpush1.bf16.msra.mxu0 %v21724_v4 }
 0x9e2   :  { %17366 = vmatprep.subr.bf16.mxu0 %v21729_v48 }
 0x9e5   :  { %17367 = vmatpush1.bf16.msra.mxu0 %v21727_v8 }
 0x9e6   :  { %17368 = vmatprep.subr.bf16.mxu0 %v21732_v51 }
 0x9e9   :  { %17369 = vmatpush1.bf16.msra.mxu0 %v21730_v59 }
 0x9ea   :  { %17370 = vmatprep.subr.bf16.mxu0 %v21735_v1 }
 0x9ed   :  { %17371 = vmatpush1.bf16.msra.mxu0 %v21733_v30 }
 0x9ee   :  { %17372 = vmatprep.subr.bf16.mxu0 %v21738_v39 }
 0x9f1   :  { %17373 = vmatpush1.bf16.msra.mxu0 %v21736_v45 }
 0x9f2   :  { %17374 = vmatprep.subr.bf16.mxu0 %v21741_v61 }
 0x9f5   :  { %17375 = vmatpush1.bf16.msra.mxu0 %v21739_v17 }
 0x9f6   :  { %17376 = vmatprep.subr.bf16.mxu0 %v21744_v23 }
 0x9f9   :  { %17377 = vmatpush1.bf16.msra.mxu0 %v21742_v25 }
 0x9fa   :  { %17378 = vmatprep.subr.bf16.mxu0 %v21747_v12 }
 0x9fd   :  { %17379 = vmatpush1.bf16.msra.mxu0 %v21745_v31 }
 0x9fe   :  { %17391 = vmatprep.subr.bf16.mxu0 %v21750_v63 }
 0xa00   :  { %17381 = vmatmul.mubr.bf16.vlgmr.msra.gmra.mrb[20].mxu0 %v22425_v9  ;;  %v21763_v9 = vld [vmem:[#allocation8 + $0x2200] ss:$24 sps:$4 sm:$0xff]  }
 0xa01   :  { %17392 = vmatpush1.bf16.msra.mxu0 %v21748_v2  ;;  %17423 = vmatprep.mubr.bf16.mxu0 %v22502_v44  ;;  %v21766_v44 = vld [vmem:[#allocation8 + $0x2230] ss:$24 sps:$4 sm:$0xff]  }
 0xa02   :  { %17393 = vmatprep.subr.bf16.mxu0 %v21753_v36 }
 0xa05   :  { %17394 = vmatpush1.bf16.msra.mxu0 %v21751_v18 }
 0xa06   :  { %17395 = vmatprep.subr.bf16.mxu0 %v21756_v53 }
 0xa09   :  { %17396 = vmatpush1.bf16.msra.mxu0 %v21754_v22 }
 0xa0a   :  { %17397 = vmatprep.subr.bf16.mxu0 %v21759_v55 }
 0xa0d   :  { %17398 = vmatpush1.bf16.msra.mxu0 %v21757_v13 }
 0xa0e   :  { %17399 = vmatprep.subr.bf16.mxu0 %v21762_v19 }
 0xa11   :  { %17400 = vmatpush1.bf16.msra.mxu0 %v21760_v24 }
 0xa12   :  { %17401 = vmatprep.subr.bf16.mxu0 %v21765_v14 }
 0xa15   :  { %17402 = vmatpush1.bf16.msra.mxu0 %v21763_v9 }
 0xa16   :  { %17403 = vmatprep.subr.bf16.mxu0 %v21768_v52 }
 0xa19   :  { %17404 = vmatpush1.bf16.msra.mxu0 %v21766_v44 }
 0xa1a   :  { %17405 = vmatprep.subr.bf16.mxu0 %v21771_v46 }
 0xa1d   :  { %17406 = vmatpush1.bf16.msra.mxu0 %v21769_v62 }
 0xa1e   :  { %17407 = vmatprep.subr.bf16.mxu0 %v21774_v37 }
 0xa21   :  { %17408 = vmatpush1.bf16.msra.mxu0 %v21772_v54 }
 0xa22   :  { %17409 = vmatprep.subr.bf16.mxu0 %v21777_v41 }
 0xa25   :  { %17410 = vmatpush1.bf16.msra.mxu0 %v21775_v11 }
 0xa26   :  { %v16909_v27 = vpop.f32.mrb[32].mxu1  ;;  %17411 = vmatprep.subr.bf16.mxu0 %v21780_v10 }
 0xa27   :  { %v19821_v26 = vadd.f32 %v16909_v27, %v10107_v47  ;;  %v16911_v35 = vpop.f32.mrb[33].mxu1 }
 0xa28   :  { %v19822_v40 = vadd.f32 %v16911_v35, %v10111_v0  ;;  %v16913_v16 = vpop.f32.mrb[34].mxu1 }
 0xa29   :  { %17436 = vst [vmem:[#allocation10 + $0x10] sm:$0xff] %v19821_v26  ;;  %v19823_v32 = vadd.f32 %v16913_v16, %v10107_v47  ;;  %17412 = vmatpush1.bf16.msra.mxu0 %v21778_v5  ;;  %v16915_v34 = vpop.f32.mrb[35].mxu1 }
 0xa2a   :  { %17437 = vst [vmem:[#allocation10 + $0x18] sm:$0xff] %v19822_v40  ;;  %v19824_v56 = vadd.f32 %v16915_v34, %v10111_v0  ;;  %17413 = vmatprep.subr.bf16.mxu0 %v21783_v29 }
 0xa2b   :  { %17442 = vst [vmem:[#allocation10 + $0x40] sm:$0xff] %v19823_v32 }
 0xa2c   :  { %17443 = vst [vmem:[#allocation10 + $0x48] sm:$0xff] %v19824_v56 }
 0xa2d   :  { %17414 = vmatpush1.bf16.msra.mxu0 %v21781_v3 }
 0xa2e   :  { %17415 = vmatprep.subr.bf16.mxu0 %v21786_v38 }
 0xa31   :  { %17416 = vmatpush1.bf16.msra.mxu0 %v21784_v42 }
 0xa32   :  { %17417 = vmatprep.subr.bf16.mxu0 %v21789_v57 }
 0xa35   :  { %17418 = vmatpush1.bf16.msra.mxu0 %v21787_v33 }
 0xa36   :  { %17419 = vmatprep.subr.bf16.mxu0 %v21792_v20 }
 0xa39   :  { %17420 = vmatpush1.bf16.msra.mxu0 %v21790_v21 }
 0xa3a   :  { %17421 = vmatprep.subr.bf16.mxu0 %v21795_v6 }
 0xa3d   :  { %17422 = vmatpush1.bf16.msra.mxu0 %v21793_v60 }
 0xa40   :  { %17424 = vmatmul.mubr.bf16.vlgmr.msra.gmra.mrb[20].mxu0 %v22500_v15 }
 0xb13   :  { %v17425_v7 = vpop.f32.mrb[20].mxu0 }
 0xb14   :  { %v19825_v4 = vadd.f32 %v17425_v7, %v10115_v58  ;;  %v17427_v48 = vpop.f32.mrb[21].mxu0 }
 0xb15   :  { %v19826_v8 = vadd.f32 %v17427_v48, %v10119_v49  ;;  %v17429_v51 = vpop.f32.mrb[22].mxu0 }
 0xb16   :  { %17438 = vst [vmem:[#allocation10 + $0x20] sm:$0xff] %v19825_v4  ;;  %v19827_v59 = vadd.f32 %v17429_v51, %v10115_v58  ;;  %v17431_v1 = vpop.f32.mrb[23].mxu0 }
 0xb17   :  { %17439 = vst [vmem:[#allocation10 + $0x28] sm:$0xff] %v19826_v8  ;;  %v19828_v30 = vadd.f32 %v17431_v1, %v10119_v49 }
 0xb18   :  { %17444 = vst [vmem:[#allocation10 + $0x50] sm:$0xff] %v19827_v59 }
 0xb19   :  { %17445 = vst [vmem:[#allocation10 + $0x58] sm:$0xff] %v19828_v30 }
 0xb1a   :  { %21999 = shalt.err (!%p21996_p8)
}
 0xb1b   :  { %s22000_s27 = scalar_lea.hbm %s22579_s5, 1536 }
 0xb1c   :  { %p22001_p9 = scmp.ne.s32.totalorder %s22579_s5, %s22000_s27  ;;  %p22004_p10 = scmp.lt.u32.totalorder %s22000_s27, %s22579_s5 }
 0xb1e   :  { %p22006_p11 = pnand %p22004_p10, %p22001_p9 }
 0xb20   :  { %22009 = shalt.err (!%p22006_p11)
}
 0xb21   :  { %17457 = dma.vmem_to_hbm [thread:$0]  %s17452_s23, 1536, %s22579_s5, [#allocation4], %s22022_s1, %s22022_s1, %s22023_s17  }
 0xb22   :  { %22016 = dma.done.wait [#allocation4], 1536  }
 0xb23   :  { %22017 = vsyncadd [#allocation4], 4294965760 }
 0xb24   :  { %17461 = vsyncpa [#allocation3], 1 }
 0xb25   :  { %17462 = vsyncpa [#allocation6], 1 }
 0xb26   :  { %17463 = vsyncpa [#allocation9], 1 }
 0xb27   :  { %17464 = vsyncpa [#allocation4], 1 }

</bundles_post_ra>
